<compile_context>
chip_gen: v7x
topology: tpu7x:2x2x1
jax: 0.10.0
libtpu: 0.0.40
codegen_flags: <defaults>
</compile_context>

<pallas_src>
import functools

import jax
import jax.numpy as jnp
from jax import lax
from jax.experimental import pallas as pl
from jax.experimental.pallas import tpu as pltpu

H_KERN = (8, 8, 8, 8, 8, 32)
H_STRD = (4, 4, 4, 4, 4, 1)
H_PADD = (2, 2, 2, 2, 2, 0)
BN_EPS = 1e-5


def _pick_tile_l(l_out):
    """Output rows per grid step.  Tiny layers: one step (v5e/v6e have no use
    for splitting them); large layers: >=4 steps, tile <= 1024, so output-DMA
    pipelining is deep enough and v7x megacore gets >=2 steps per core."""
    if l_out <= 256:
        return l_out
    t = 8
    cap = min(1024, l_out // 4)
    while t * 2 <= cap and l_out % (t * 2) == 0:
        t *= 2
    return t


# ------------------------------ Pallas kernels ------------------------------
def _conv_tap_kernel(hb_ref, wt_ref, wb_ref, b_ref, o_ref, *, tile_l, relu):
    """Fused Conv1d(K=8, stride=4, pad=2) + folded BN(eval) + ReLU.

    hb_ref : (L_out + 8, 4*Cin) bf16  padded input grouped 4 rows/group,
             resident in VMEM for the whole batch element.
    wt_ref : (4*Cin, Cout) bf16   taps 0..3 (BN scale folded in)
    wb_ref : (4*Cin, Cout) bf16   taps 4..7
    b_ref  : (1, Cout)     f32    conv bias + BN shift
    o_ref  : (tile_l, Cout)       layer output tile

    out[t] = relu(hb[t] @ Wt + hb[t+1] @ Wb + bias)
    """
    i = pl.program_id(1)
    start = pl.multiple_of(i * tile_l, tile_l)
    # One aligned slab covers both taps; the +1 group shift is applied to the
    # f32 partial product via an XLU sublane roll (no unaligned bf16 loads).
    a = hb_ref[pl.ds(start, tile_l + 8), :]
    z0 = jnp.dot(a, wt_ref[...], preferred_element_type=jnp.float32)
    z1 = jnp.dot(a, wb_ref[...], preferred_element_type=jnp.float32)
    z1 = pltpu.roll(z1, shift=tile_l + 7, axis=0)     # z1[j] <- z1[j + 1]
    y = z0[:tile_l] + z1[:tile_l] + b_ref[...]
    if relu:
        y = jnp.maximum(y, 0.0)
    o_ref[...] = y.astype(o_ref.dtype)


def _matmul_bias_kernel(a_ref, w_ref, b_ref, o_ref):
    acc = jnp.dot(a_ref[...], w_ref[...], preferred_element_type=jnp.float32)
    o_ref[...] = (acc + b_ref[...]).astype(o_ref.dtype)


# -------------------------------- wrappers -----------------------------------
def conv_bn_relu_layer(h, w_top, w_bot, bias, *, relu=True):
    """(B, L, Cin) bf16 -> (B, L/4, Cout) bf16, Conv1d(8,4,2)+BN(eval)+ReLU."""
    B, L, C = h.shape
    L_out = L // 4
    cout = w_top.shape[1]
    # pad=2 on the left; right pad extended to 30 so the per-tile slab read
    # (tile_l + 8 groups) never runs past the end.  The extra rows are zeros
    # and only feed partial products that are discarded.
    hb = jnp.pad(h, ((0, 0), (2, 30), (0, 0))).reshape(B, L_out + 8, 4 * C)
    tile_l = _pick_tile_l(L_out)
    grid = (B, L_out // tile_l)
    return pl.pallas_call(
        functools.partial(_conv_tap_kernel, tile_l=tile_l, relu=relu),
        out_shape=jax.ShapeDtypeStruct((B, L_out, cout), jnp.bfloat16),
        grid=grid,
        in_specs=[
            # full per-batch grouped activation, fetched once per batch index
            pl.BlockSpec((None, L_out + 8, 4 * C), lambda b, i: (b, 0, 0)),
            pl.BlockSpec((4 * C, cout), lambda b, i: (0, 0)),
            pl.BlockSpec((4 * C, cout), lambda b, i: (0, 0)),
            pl.BlockSpec((1, cout), lambda b, i: (0, 0)),
        ],
        out_specs=pl.BlockSpec((None, tile_l, cout), lambda b, i: (b, i, 0)),
        compiler_params=pltpu.CompilerParams(
            dimension_semantics=("parallel", "parallel")),
    )(hb, w_top, w_bot, bias)


def final_matmul(a, w_mat, bias):
    """Layer 5: Conv1d(K=32, s=1, p=0) over the length-32 window == matmul."""
    M, Kd = a.shape
    N = w_mat.shape[1]
    return pl.pallas_call(
        _matmul_bias_kernel,
        out_shape=jax.ShapeDtypeStruct((M, N), jnp.float32),
        grid=(1,),
        in_specs=[
            pl.BlockSpec((M, Kd), lambda i: (0, 0)),
            pl.BlockSpec((Kd, N), lambda i: (0, 0)),
            pl.BlockSpec((1, N), lambda i: (0, 0)),
        ],
        out_specs=pl.BlockSpec((M, N), lambda i: (0, 0)),
    )(a, w_mat, bias)


def encoder_forward(x, layers):
    """x: (B, nc, L) NCW float32 -> (B, nz, 1), matching Encoder.forward."""
    B = x.shape[0]
    h = jnp.transpose(x, (0, 2, 1)).astype(jnp.bfloat16)   # NCW -> NLC, once
    for k in range(5):
        p = layers[k]
        h = conv_bn_relu_layer(h, p["w_top"], p["w_bot"], p["bias"], relu=True)
    p = layers[5]
    a = h.reshape(B, h.shape[1] * h.shape[2])               # (B, 32*C5), free
    y = final_matmul(a, p["w_mat"], p["bias"])              # (B, nz) f32
    return y[:, :, None]                                    # (B, nz, 1)


# ------------------------------- references ----------------------------------
def encoder_forward_ref(x, layers):
    """Identical bf16/f32 math via plain XLA dots (tight check)."""
    B = x.shape[0]
    h = jnp.transpose(x, (0, 2, 1)).astype(jnp.bfloat16)
    for k in range(5):
        p = layers[k]
        _, L, C = h.shape
        L_out = L // 4
        hb = jnp.pad(h, ((0, 0), (2, 2), (0, 0))).reshape(B, L_out + 1, 4 * C)
        a0 = hb[:, :L_out, :]
        a1 = hb[:, 1:L_out + 1, :]
        y = (jnp.einsum("glc,cn->gln", a0, p["w_top"],
                        preferred_element_type=jnp.float32)
             + jnp.einsum("glc,cn->gln", a1, p["w_bot"],
                          preferred_element_type=jnp.float32)
             + p["bias"][None])
        h = jnp.maximum(y, 0.0).astype(jnp.bfloat16)
    p = layers[5]
    a = h.reshape(B, h.shape[1] * h.shape[2])
    y = jnp.dot(a, p["w_mat"], preferred_element_type=jnp.float32) + p["bias"]
    return y[:, :, None]


def encoder_forward_conv_ref(x, raw):
    """Independent pure-f32 reference: Conv1d + BatchNorm1d(eval) + ReLU."""
    h = x
    for k in range(6):
        p = raw[k]
        h = lax.conv_general_dilated(
            h, p["w"], window_strides=(H_STRD[k],),
            padding=[(H_PADD[k], H_PADD[k])],
            dimension_numbers=("NCH", "OIH", "NCH"))
        h = h + p["b"][None, :, None]
        if k < 5:
            inv = p["gamma"] / jnp.sqrt(p["rvar"] + BN_EPS)
            h = (h - p["rmean"][None, :, None]) * inv[None, :, None] \
                + p["beta"][None, :, None]
            h = jnp.maximum(h, 0.0)
    return h


# ------------------------------ parameter init -------------------------------
def init_raw_params(key, nc, ngf, nz):
    h_chan = (nc, ngf, 2 * ngf, 4 * ngf, 8 * ngf, 16 * ngf, nz)
    raw = []
    for k in range(6):
        cin, cout, K = h_chan[k], h_chan[k + 1], H_KERN[k]
        key, kw, kb, kg, kbt, km, kv = jax.random.split(key, 7)
        fan_in = cin * K
        w = jax.random.normal(kw, (cout, cin, K), jnp.float32) / jnp.sqrt(fan_in)
        b = 0.01 * jax.random.normal(kb, (cout,), jnp.float32)
        if k < 5:   # batch_norm layers (eval-mode running stats)
            gamma = 1.0 + 0.1 * jax.random.normal(kg, (cout,), jnp.float32)
            beta = 0.1 * jax.random.normal(kbt, (cout,), jnp.float32)
            rmean = 0.05 * jax.random.normal(km, (cout,), jnp.float32)
            rvar = 1.0 + 0.1 * jax.random.uniform(kv, (cout,), jnp.float32)
        else:       # last layer: bias only, no norm, no activation
            gamma = beta = rmean = rvar = None
        raw.append(dict(w=w, b=b, gamma=gamma, beta=beta, rmean=rmean, rvar=rvar))
    return raw


def prepare_layers(raw):
    """One-time transform: fold BN scale into W, conv bias + BN shift into
    bias_eff, lay W out as (K*Cin, Cout) with k-major / channel-minor rows,
    split into the tap-0..3 / tap-4..7 halves, cast to bf16.  No padding."""
    layers = []
    for k in range(6):
        p = raw[k]
        cout, cin, K = p["w"].shape
        if k < 5:
            scale = p["gamma"] / jnp.sqrt(p["rvar"] + BN_EPS)
            shift = p["beta"] - p["rmean"] * scale
        else:
            scale = jnp.ones((cout,), jnp.float32)
            shift = jnp.zeros((cout,), jnp.float32)
        bias_eff = (p["b"] * scale + shift).reshape(1, cout).astype(jnp.float32)
        w_fold = p["w"] * scale[:, None, None]
        w_mat = jnp.transpose(w_fold, (2, 1, 0)).reshape(K * cin, cout)
        w_mat = w_mat.astype(jnp.bfloat16)
        if k < 5:
            layers.append(dict(w_top=w_mat[:4 * cin],
                               w_bot=w_mat[4 * cin:],
                               bias=bias_eff))
        else:
            layers.append(dict(w_mat=w_mat, bias=bias_eff))
    return layers


# ----------------------------------- main ------------------------------------
if __name__ == "__main__":
    # The architecture requires L = 32768 so the final kernel-32 conv sees a
    # length-32 input; keep the channel widths small instead of the sequence.
    nc, ngf, nz = 1, 8, 8
    B, L = 2, 32768

    key = jax.random.PRNGKey(0)
    kx, kp = jax.random.split(key)
    x = jax.random.normal(kx, (B, nc, L), jnp.float32)
    raw = init_raw_params(kp, nc, ngf, nz)
    layers = prepare_layers(raw)

    y = jax.block_until_ready(jax.jit(encoder_forward)(x, layers))
    assert y.shape == (B, nz, 1), y.shape

    # 1) Pallas vs identical bf16/f32 math via XLA dots (tight check).
    y_ref = jax.block_until_ready(jax.jit(encoder_forward_ref)(x, layers))
    scale1 = float(jnp.max(jnp.abs(y_ref)))
    err1 = float(jnp.max(jnp.abs(y - y_ref)))
    assert err1 <= 2e-2 * max(1.0, scale1), f"pallas vs matched ref: {err1}"

    # 2) Pallas vs independent f32 Conv1d + BN(eval) + ReLU reference
    #    (looser tolerance: bf16 quantization through 6 layers).
    y_conv = jax.block_until_ready(jax.jit(encoder_forward_conv_ref)(x, raw))
    scale2 = float(jnp.max(jnp.abs(y_conv)))
    err2 = float(jnp.max(jnp.abs(y - y_conv)))
    assert err2 <= 1e-1 * max(1.0, scale2), f"pallas vs f32 conv ref: {err2}"

    print("KERNEL_OK")
</pallas_src>

<mosaic_0001>
module attributes {stable_mosaic.version = 11 : i64} {
  func.func @_conv_tap_kernel(%arg0: i32, %arg1: i32, %arg2: memref<1x8200x4xbf16, #tpu.memory_space<vmem>>, %arg3: memref<4x8xbf16, #tpu.memory_space<vmem>>, %arg4: memref<4x8xbf16, #tpu.memory_space<vmem>>, %arg5: memref<1x8xf32, #tpu.memory_space<vmem>>, %arg6: memref<1x1024x8xbf16, #tpu.memory_space<vmem>>) attributes {dimension_semantics = [#tpu.dimension_semantics<parallel>, #tpu.dimension_semantics<parallel>], iteration_bounds = array<i64: 2, 8>, scalar_prefetch = 0 : i64, scratch_operands = 0 : i64, tpu.core_type = #tpu.core_type<tc>, window_params = [{transform_indices = @transform_0, window_bounds = array<i64: 1, 8200, 4>}, {pipeline_mode = #tpu.pipeline_mode<synchronous>, transform_indices = @transform_1, window_bounds = array<i64: 4, 8>}, {pipeline_mode = #tpu.pipeline_mode<synchronous>, transform_indices = @transform_2, window_bounds = array<i64: 4, 8>}, {pipeline_mode = #tpu.pipeline_mode<synchronous>, transform_indices = @transform_3, window_bounds = array<i64: 1, 8>}, {transform_indices = @transform_4, window_bounds = array<i64: 1, 1024, 8>}]} {
    %c1024_i32 = arith.constant 1024 : i32
    %0 = arith.muli %arg1, %c1024_i32 : i32
    %1 = tpu.assume_multiple %0, 1024 : i32
    %c0 = arith.constant 0 : index
    %2 = arith.index_cast %1 : i32 to index
    %c0_0 = arith.constant 0 : index
    %3 = vector.load %arg2[%c0, %2, %c0_0] : memref<1x8200x4xbf16, #tpu.memory_space<vmem>>, vector<1x1032x4xbf16>
    %4 = vector.shape_cast %3 : vector<1x1032x4xbf16> to vector<1032x4xbf16>
    %c0_1 = arith.constant 0 : index
    %c0_2 = arith.constant 0 : index
    %5 = vector.load %arg3[%c0_1, %c0_2] : memref<4x8xbf16, #tpu.memory_space<vmem>>, vector<4x8xbf16>
    %cst = arith.constant dense<0.000000e+00> : vector<1032x8xf32>
    %6 = tpu.matmul %4, %5, %cst {dimension_numbers = #tpu.dot_dimension_numbers<[1], [0], [0], [1], [0, 0, 1, 1], [], []>} : vector<1032x4xbf16>, vector<4x8xbf16>, vector<1032x8xf32> -> vector<1032x8xf32>
    %c0_3 = arith.constant 0 : index
    %c0_4 = arith.constant 0 : index
    %7 = vector.load %arg4[%c0_3, %c0_4] : memref<4x8xbf16, #tpu.memory_space<vmem>>, vector<4x8xbf16>
    %cst_5 = arith.constant dense<0.000000e+00> : vector<1032x8xf32>
    %8 = tpu.matmul %4, %7, %cst_5 {dimension_numbers = #tpu.dot_dimension_numbers<[1], [0], [0], [1], [0, 0, 1, 1], [], []>} : vector<1032x4xbf16>, vector<4x8xbf16>, vector<1032x8xf32> -> vector<1032x8xf32>
    %c1031_i32 = arith.constant 1031 : i32
    %9 = tpu.dynamic_rotate %8 by %c1031_i32 dim 0 : vector<1032x8xf32>, i32 -> vector<1032x8xf32>
    %10 = vector.extract_strided_slice %6 {offsets = [0, 0], sizes = [1024, 8], strides = [1, 1]} : vector<1032x8xf32> to vector<1024x8xf32>
    %11 = vector.extract_strided_slice %9 {offsets = [0, 0], sizes = [1024, 8], strides = [1, 1]} : vector<1032x8xf32> to vector<1024x8xf32>
    %12 = arith.addf %10, %11 : vector<1024x8xf32>
    %c0_6 = arith.constant 0 : index
    %c0_7 = arith.constant 0 : index
    %13 = vector.load %arg5[%c0_6, %c0_7] : memref<1x8xf32, #tpu.memory_space<vmem>>, vector<1x8xf32>
    %14 = vector.broadcast %13 : vector<1x8xf32> to vector<1024x8xf32>
    %15 = arith.addf %12, %14 : vector<1024x8xf32>
    %cst_8 = arith.constant 0.000000e+00 : f32
    %16 = vector.broadcast %cst_8 : f32 to vector<1024x8xf32>
    %17 = arith.maximumf %15, %16 : vector<1024x8xf32>
    %18 = arith.truncf %17 : vector<1024x8xf32> to vector<1024x8xbf16>
    %c0_9 = arith.constant 0 : index
    %c0_10 = arith.constant 0 : index
    %c0_11 = arith.constant 0 : index
    %19 = vector.load %arg6[%c0_9, %c0_10, %c0_11] : memref<1x1024x8xbf16, #tpu.memory_space<vmem>>, vector<1x1024x8xbf16>
    %20 = vector.shape_cast %19 : vector<1x1024x8xbf16> to vector<1024x8xbf16>
    %21 = vector.shape_cast %18 : vector<1024x8xbf16> to vector<1x1024x8xbf16>
    tpu.vector_store %arg6[%c0_9, %c0_10, %c0_11], %21 {strides = array<i32>} : memref<1x1024x8xbf16, #tpu.memory_space<vmem>>, vector<1x1024x8xbf16>,
    return
  }
  func.func @transform_0(%arg0: i32, %arg1: i32) -> (i32, i32, i32) {
    %c0_i32 = arith.constant 0 : i32
    %c0_i32_0 = arith.constant 0 : i32
    %c0_i32_1 = arith.constant 0 : i32
    return %arg0, %c0_i32, %c0_i32_0 : i32, i32, i32
  }
  func.func @transform_1(%arg0: i32, %arg1: i32) -> (i32, i32) {
    %c0_i32 = arith.constant 0 : i32
    %c0_i32_0 = arith.constant 0 : i32
    %c0_i32_1 = arith.constant 0 : i32
    return %c0_i32, %c0_i32_0 : i32, i32
  }
  func.func @transform_2(%arg0: i32, %arg1: i32) -> (i32, i32) {
    %c0_i32 = arith.constant 0 : i32
    %c0_i32_0 = arith.constant 0 : i32
    %c0_i32_1 = arith.constant 0 : i32
    return %c0_i32, %c0_i32_0 : i32, i32
  }
  func.func @transform_3(%arg0: i32, %arg1: i32) -> (i32, i32) {
    %c0_i32 = arith.constant 0 : i32
    %c0_i32_0 = arith.constant 0 : i32
    %c0_i32_1 = arith.constant 0 : i32
    return %c0_i32, %c0_i32_0 : i32, i32
  }
  func.func @transform_4(%arg0: i32, %arg1: i32) -> (i32, i32, i32) {
    %c0_i32 = arith.constant 0 : i32
    %c0_i32_0 = arith.constant 0 : i32
    return %arg0, %arg1, %c0_i32 : i32, i32, i32
  }
}

module attributes {stable_mosaic.version = 11 : i64} {
  func.func @_conv_tap_kernel(%arg0: i32, %arg1: i32, %arg2: memref<1x2056x32xbf16, #tpu.memory_space<vmem>>, %arg3: memref<32x16xbf16, #tpu.memory_space<vmem>>, %arg4: memref<32x16xbf16, #tpu.memory_space<vmem>>, %arg5: memref<1x16xf32, #tpu.memory_space<vmem>>, %arg6: memref<1x512x16xbf16, #tpu.memory_space<vmem>>) attributes {dimension_semantics = [#tpu.dimension_semantics<parallel>, #tpu.dimension_semantics<parallel>], iteration_bounds = array<i64: 2, 4>, scalar_prefetch = 0 : i64, scratch_operands = 0 : i64, tpu.core_type = #tpu.core_type<tc>, window_params = [{transform_indices = @transform_0, window_bounds = array<i64: 1, 2056, 32>}, {pipeline_mode = #tpu.pipeline_mode<synchronous>, transform_indices = @transform_1, window_bounds = array<i64: 32, 16>}, {pipeline_mode = #tpu.pipeline_mode<synchronous>, transform_indices = @transform_2, window_bounds = array<i64: 32, 16>}, {pipeline_mode = #tpu.pipeline_mode<synchronous>, transform_indices = @transform_3, window_bounds = array<i64: 1, 16>}, {transform_indices = @transform_4, window_bounds = array<i64: 1, 512, 16>}]} {
    %c512_i32 = arith.constant 512 : i32
    %0 = arith.muli %arg1, %c512_i32 : i32
    %1 = tpu.assume_multiple %0, 512 : i32
    %c0 = arith.constant 0 : index
    %2 = arith.index_cast %1 : i32 to index
    %c0_0 = arith.constant 0 : index
    %3 = vector.load %arg2[%c0, %2, %c0_0] : memref<1x2056x32xbf16, #tpu.memory_space<vmem>>, vector<1x520x32xbf16>
    %4 = vector.shape_cast %3 : vector<1x520x32xbf16> to vector<520x32xbf16>
    %c0_1 = arith.constant 0 : index
    %c0_2 = arith.constant 0 : index
    %5 = vector.load %arg3[%c0_1, %c0_2] : memref<32x16xbf16, #tpu.memory_space<vmem>>, vector<32x16xbf16>
    %cst = arith.constant dense<0.000000e+00> : vector<520x16xf32>
    %6 = tpu.matmul %4, %5, %cst {dimension_numbers = #tpu.dot_dimension_numbers<[1], [0], [0], [1], [0, 0, 1, 1], [], []>} : vector<520x32xbf16>, vector<32x16xbf16>, vector<520x16xf32> -> vector<520x16xf32>
    %c0_3 = arith.constant 0 : index
    %c0_4 = arith.constant 0 : index
    %7 = vector.load %arg4[%c0_3, %c0_4] : memref<32x16xbf16, #tpu.memory_space<vmem>>, vector<32x16xbf16>
    %cst_5 = arith.constant dense<0.000000e+00> : vector<520x16xf32>
    %8 = tpu.matmul %4, %7, %cst_5 {dimension_numbers = #tpu.dot_dimension_numbers<[1], [0], [0], [1], [0, 0, 1, 1], [], []>} : vector<520x32xbf16>, vector<32x16xbf16>, vector<520x16xf32> -> vector<520x16xf32>
    %c519_i32 = arith.constant 519 : i32
    %9 = tpu.dynamic_rotate %8 by %c519_i32 dim 0 : vector<520x16xf32>, i32 -> vector<520x16xf32>
    %10 = vector.extract_strided_slice %6 {offsets = [0, 0], sizes = [512, 16], strides = [1, 1]} : vector<520x16xf32> to vector<512x16xf32>
    %11 = vector.extract_strided_slice %9 {offsets = [0, 0], sizes = [512, 16], strides = [1, 1]} : vector<520x16xf32> to vector<512x16xf32>
    %12 = arith.addf %10, %11 : vector<512x16xf32>
    %c0_6 = arith.constant 0 : index
    %c0_7 = arith.constant 0 : index
    %13 = vector.load %arg5[%c0_6, %c0_7] : memref<1x16xf32, #tpu.memory_space<vmem>>, vector<1x16xf32>
    %14 = vector.broadcast %13 : vector<1x16xf32> to vector<512x16xf32>
    %15 = arith.addf %12, %14 : vector<512x16xf32>
    %cst_8 = arith.constant 0.000000e+00 : f32
    %16 = vector.broadcast %cst_8 : f32 to vector<512x16xf32>
    %17 = arith.maximumf %15, %16 : vector<512x16xf32>
    %18 = arith.truncf %17 : vector<512x16xf32> to vector<512x16xbf16>
    %c0_9 = arith.constant 0 : index
    %c0_10 = arith.constant 0 : index
    %c0_11 = arith.constant 0 : index
    %19 = vector.load %arg6[%c0_9, %c0_10, %c0_11] : memref<1x512x16xbf16, #tpu.memory_space<vmem>>, vector<1x512x16xbf16>
    %20 = vector.shape_cast %19 : vector<1x512x16xbf16> to vector<512x16xbf16>
    %21 = vector.shape_cast %18 : vector<512x16xbf16> to vector<1x512x16xbf16>
    tpu.vector_store %arg6[%c0_9, %c0_10, %c0_11], %21 {strides = array<i32>} : memref<1x512x16xbf16, #tpu.memory_space<vmem>>, vector<1x512x16xbf16>,
    return
  }
  func.func @transform_0(%arg0: i32, %arg1: i32) -> (i32, i32, i32) {
    %c0_i32 = arith.constant 0 : i32
    %c0_i32_0 = arith.constant 0 : i32
    %c0_i32_1 = arith.constant 0 : i32
    return %arg0, %c0_i32, %c0_i32_0 : i32, i32, i32
  }
  func.func @transform_1(%arg0: i32, %arg1: i32) -> (i32, i32) {
    %c0_i32 = arith.constant 0 : i32
    %c0_i32_0 = arith.constant 0 : i32
    %c0_i32_1 = arith.constant 0 : i32
    return %c0_i32, %c0_i32_0 : i32, i32
  }
  func.func @transform_2(%arg0: i32, %arg1: i32) -> (i32, i32) {
    %c0_i32 = arith.constant 0 : i32
    %c0_i32_0 = arith.constant 0 : i32
    %c0_i32_1 = arith.constant 0 : i32
    return %c0_i32, %c0_i32_0 : i32, i32
  }
  func.func @transform_3(%arg0: i32, %arg1: i32) -> (i32, i32) {
    %c0_i32 = arith.constant 0 : i32
    %c0_i32_0 = arith.constant 0 : i32
    %c0_i32_1 = arith.constant 0 : i32
    return %c0_i32, %c0_i32_0 : i32, i32
  }
  func.func @transform_4(%arg0: i32, %arg1: i32) -> (i32, i32, i32) {
    %c0_i32 = arith.constant 0 : i32
    %c0_i32_0 = arith.constant 0 : i32
    return %arg0, %arg1, %c0_i32 : i32, i32, i32
  }
}

module attributes {stable_mosaic.version = 11 : i64} {
  func.func @_conv_tap_kernel(%arg0: i32, %arg1: i32, %arg2: memref<1x520x64xbf16, #tpu.memory_space<vmem>>, %arg3: memref<64x32xbf16, #tpu.memory_space<vmem>>, %arg4: memref<64x32xbf16, #tpu.memory_space<vmem>>, %arg5: memref<1x32xf32, #tpu.memory_space<vmem>>, %arg6: memref<1x128x32xbf16, #tpu.memory_space<vmem>>) attributes {dimension_semantics = [#tpu.dimension_semantics<parallel>, #tpu.dimension_semantics<parallel>], iteration_bounds = array<i64: 2, 4>, scalar_prefetch = 0 : i64, scratch_operands = 0 : i64, tpu.core_type = #tpu.core_type<tc>, window_params = [{transform_indices = @transform_0, window_bounds = array<i64: 1, 520, 64>}, {pipeline_mode = #tpu.pipeline_mode<synchronous>, transform_indices = @transform_1, window_bounds = array<i64: 64, 32>}, {pipeline_mode = #tpu.pipeline_mode<synchronous>, transform_indices = @transform_2, window_bounds = array<i64: 64, 32>}, {pipeline_mode = #tpu.pipeline_mode<synchronous>, transform_indices = @transform_3, window_bounds = array<i64: 1, 32>}, {transform_indices = @transform_4, window_bounds = array<i64: 1, 128, 32>}]} {
    %c128_i32 = arith.constant 128 : i32
    %0 = arith.muli %arg1, %c128_i32 : i32
    %1 = tpu.assume_multiple %0, 128 : i32
    %c0 = arith.constant 0 : index
    %2 = arith.index_cast %1 : i32 to index
    %c0_0 = arith.constant 0 : index
    %3 = vector.load %arg2[%c0, %2, %c0_0] : memref<1x520x64xbf16, #tpu.memory_space<vmem>>, vector<1x136x64xbf16>
    %4 = vector.shape_cast %3 : vector<1x136x64xbf16> to vector<136x64xbf16>
    %c0_1 = arith.constant 0 : index
    %c0_2 = arith.constant 0 : index
    %5 = vector.load %arg3[%c0_1, %c0_2] : memref<64x32xbf16, #tpu.memory_space<vmem>>, vector<64x32xbf16>
    %cst = arith.constant dense<0.000000e+00> : vector<136x32xf32>
    %6 = tpu.matmul %4, %5, %cst {dimension_numbers = #tpu.dot_dimension_numbers<[1], [0], [0], [1], [0, 0, 1, 1], [], []>} : vector<136x64xbf16>, vector<64x32xbf16>, vector<136x32xf32> -> vector<136x32xf32>
    %c0_3 = arith.constant 0 : index
    %c0_4 = arith.constant 0 : index
    %7 = vector.load %arg4[%c0_3, %c0_4] : memref<64x32xbf16, #tpu.memory_space<vmem>>, vector<64x32xbf16>
    %cst_5 = arith.constant dense<0.000000e+00> : vector<136x32xf32>
    %8 = tpu.matmul %4, %7, %cst_5 {dimension_numbers = #tpu.dot_dimension_numbers<[1], [0], [0], [1], [0, 0, 1, 1], [], []>} : vector<136x64xbf16>, vector<64x32xbf16>, vector<136x32xf32> -> vector<136x32xf32>
    %c135_i32 = arith.constant 135 : i32
    %9 = tpu.dynamic_rotate %8 by %c135_i32 dim 0 : vector<136x32xf32>, i32 -> vector<136x32xf32>
    %10 = vector.extract_strided_slice %6 {offsets = [0, 0], sizes = [128, 32], strides = [1, 1]} : vector<136x32xf32> to vector<128x32xf32>
    %11 = vector.extract_strided_slice %9 {offsets = [0, 0], sizes = [128, 32], strides = [1, 1]} : vector<136x32xf32> to vector<128x32xf32>
    %12 = arith.addf %10, %11 : vector<128x32xf32>
    %c0_6 = arith.constant 0 : index
    %c0_7 = arith.constant 0 : index
    %13 = vector.load %arg5[%c0_6, %c0_7] : memref<1x32xf32, #tpu.memory_space<vmem>>, vector<1x32xf32>
    %14 = vector.broadcast %13 : vector<1x32xf32> to vector<128x32xf32>
    %15 = arith.addf %12, %14 : vector<128x32xf32>
    %cst_8 = arith.constant 0.000000e+00 : f32
    %16 = vector.broadcast %cst_8 : f32 to vector<128x32xf32>
    %17 = arith.maximumf %15, %16 : vector<128x32xf32>
    %18 = arith.truncf %17 : vector<128x32xf32> to vector<128x32xbf16>
    %c0_9 = arith.constant 0 : index
    %c0_10 = arith.constant 0 : index
    %c0_11 = arith.constant 0 : index
    %19 = vector.load %arg6[%c0_9, %c0_10, %c0_11] : memref<1x128x32xbf16, #tpu.memory_space<vmem>>, vector<1x128x32xbf16>
    %20 = vector.shape_cast %19 : vector<1x128x32xbf16> to vector<128x32xbf16>
    %21 = vector.shape_cast %18 : vector<128x32xbf16> to vector<1x128x32xbf16>
    tpu.vector_store %arg6[%c0_9, %c0_10, %c0_11], %21 {strides = array<i32>} : memref<1x128x32xbf16, #tpu.memory_space<vmem>>, vector<1x128x32xbf16>,
    return
  }
  func.func @transform_0(%arg0: i32, %arg1: i32) -> (i32, i32, i32) {
    %c0_i32 = arith.constant 0 : i32
    %c0_i32_0 = arith.constant 0 : i32
    %c0_i32_1 = arith.constant 0 : i32
    return %arg0, %c0_i32, %c0_i32_0 : i32, i32, i32
  }
  func.func @transform_1(%arg0: i32, %arg1: i32) -> (i32, i32) {
    %c0_i32 = arith.constant 0 : i32
    %c0_i32_0 = arith.constant 0 : i32
    %c0_i32_1 = arith.constant 0 : i32
    return %c0_i32, %c0_i32_0 : i32, i32
  }
  func.func @transform_2(%arg0: i32, %arg1: i32) -> (i32, i32) {
    %c0_i32 = arith.constant 0 : i32
    %c0_i32_0 = arith.constant 0 : i32
    %c0_i32_1 = arith.constant 0 : i32
    return %c0_i32, %c0_i32_0 : i32, i32
  }
  func.func @transform_3(%arg0: i32, %arg1: i32) -> (i32, i32) {
    %c0_i32 = arith.constant 0 : i32
    %c0_i32_0 = arith.constant 0 : i32
    %c0_i32_1 = arith.constant 0 : i32
    return %c0_i32, %c0_i32_0 : i32, i32
  }
  func.func @transform_4(%arg0: i32, %arg1: i32) -> (i32, i32, i32) {
    %c0_i32 = arith.constant 0 : i32
    %c0_i32_0 = arith.constant 0 : i32
    return %arg0, %arg1, %c0_i32 : i32, i32, i32
  }
}

module attributes {stable_mosaic.version = 11 : i64} {
  func.func @_conv_tap_kernel(%arg0: i32, %arg1: i32, %arg2: memref<1x136x128xbf16, #tpu.memory_space<vmem>>, %arg3: memref<128x64xbf16, #tpu.memory_space<vmem>>, %arg4: memref<128x64xbf16, #tpu.memory_space<vmem>>, %arg5: memref<1x64xf32, #tpu.memory_space<vmem>>, %arg6: memref<1x128x64xbf16, #tpu.memory_space<vmem>>) attributes {dimension_semantics = [#tpu.dimension_semantics<parallel>, #tpu.dimension_semantics<parallel>], iteration_bounds = array<i64: 2, 1>, scalar_prefetch = 0 : i64, scratch_operands = 0 : i64, tpu.core_type = #tpu.core_type<tc>, window_params = [{transform_indices = @transform_0, window_bounds = array<i64: 1, 136, 128>}, {pipeline_mode = #tpu.pipeline_mode<synchronous>, transform_indices = @transform_1, window_bounds = array<i64: 128, 64>}, {pipeline_mode = #tpu.pipeline_mode<synchronous>, transform_indices = @transform_2, window_bounds = array<i64: 128, 64>}, {pipeline_mode = #tpu.pipeline_mode<synchronous>, transform_indices = @transform_3, window_bounds = array<i64: 1, 64>}, {transform_indices = @transform_4, window_bounds = array<i64: 1, 128, 64>}]} {
    %c128_i32 = arith.constant 128 : i32
    %0 = arith.muli %arg1, %c128_i32 : i32
    %1 = tpu.assume_multiple %0, 128 : i32
    %c0 = arith.constant 0 : index
    %2 = arith.index_cast %1 : i32 to index
    %c0_0 = arith.constant 0 : index
    %3 = vector.load %arg2[%c0, %2, %c0_0] : memref<1x136x128xbf16, #tpu.memory_space<vmem>>, vector<1x136x128xbf16>
    %4 = vector.shape_cast %3 : vector<1x136x128xbf16> to vector<136x128xbf16>
    %c0_1 = arith.constant 0 : index
    %c0_2 = arith.constant 0 : index
    %5 = vector.load %arg3[%c0_1, %c0_2] : memref<128x64xbf16, #tpu.memory_space<vmem>>, vector<128x64xbf16>
    %cst = arith.constant dense<0.000000e+00> : vector<136x64xf32>
    %6 = tpu.matmul %4, %5, %cst {dimension_numbers = #tpu.dot_dimension_numbers<[1], [0], [0], [1], [0, 0, 1, 1], [], []>} : vector<136x128xbf16>, vector<128x64xbf16>, vector<136x64xf32> -> vector<136x64xf32>
    %c0_3 = arith.constant 0 : index
    %c0_4 = arith.constant 0 : index
    %7 = vector.load %arg4[%c0_3, %c0_4] : memref<128x64xbf16, #tpu.memory_space<vmem>>, vector<128x64xbf16>
    %cst_5 = arith.constant dense<0.000000e+00> : vector<136x64xf32>
    %8 = tpu.matmul %4, %7, %cst_5 {dimension_numbers = #tpu.dot_dimension_numbers<[1], [0], [0], [1], [0, 0, 1, 1], [], []>} : vector<136x128xbf16>, vector<128x64xbf16>, vector<136x64xf32> -> vector<136x64xf32>
    %c135_i32 = arith.constant 135 : i32
    %9 = tpu.dynamic_rotate %8 by %c135_i32 dim 0 : vector<136x64xf32>, i32 -> vector<136x64xf32>
    %10 = vector.extract_strided_slice %6 {offsets = [0, 0], sizes = [128, 64], strides = [1, 1]} : vector<136x64xf32> to vector<128x64xf32>
    %11 = vector.extract_strided_slice %9 {offsets = [0, 0], sizes = [128, 64], strides = [1, 1]} : vector<136x64xf32> to vector<128x64xf32>
    %12 = arith.addf %10, %11 : vector<128x64xf32>
    %c0_6 = arith.constant 0 : index
    %c0_7 = arith.constant 0 : index
    %13 = vector.load %arg5[%c0_6, %c0_7] : memref<1x64xf32, #tpu.memory_space<vmem>>, vector<1x64xf32>
    %14 = vector.broadcast %13 : vector<1x64xf32> to vector<128x64xf32>
    %15 = arith.addf %12, %14 : vector<128x64xf32>
    %cst_8 = arith.constant 0.000000e+00 : f32
    %16 = vector.broadcast %cst_8 : f32 to vector<128x64xf32>
    %17 = arith.maximumf %15, %16 : vector<128x64xf32>
    %18 = arith.truncf %17 : vector<128x64xf32> to vector<128x64xbf16>
    %c0_9 = arith.constant 0 : index
    %c0_10 = arith.constant 0 : index
    %c0_11 = arith.constant 0 : index
    %19 = vector.load %arg6[%c0_9, %c0_10, %c0_11] : memref<1x128x64xbf16, #tpu.memory_space<vmem>>, vector<1x128x64xbf16>
    %20 = vector.shape_cast %19 : vector<1x128x64xbf16> to vector<128x64xbf16>
    %21 = vector.shape_cast %18 : vector<128x64xbf16> to vector<1x128x64xbf16>
    tpu.vector_store %arg6[%c0_9, %c0_10, %c0_11], %21 {strides = array<i32>} : memref<1x128x64xbf16, #tpu.memory_space<vmem>>, vector<1x128x64xbf16>,
    return
  }
  func.func @transform_0(%arg0: i32, %arg1: i32) -> (i32, i32, i32) {
    %c0_i32 = arith.constant 0 : i32
    %c0_i32_0 = arith.constant 0 : i32
    %c0_i32_1 = arith.constant 0 : i32
    return %arg0, %c0_i32, %c0_i32_0 : i32, i32, i32
  }
  func.func @transform_1(%arg0: i32, %arg1: i32) -> (i32, i32) {
    %c0_i32 = arith.constant 0 : i32
    %c0_i32_0 = arith.constant 0 : i32
    %c0_i32_1 = arith.constant 0 : i32
    return %c0_i32, %c0_i32_0 : i32, i32
  }
  func.func @transform_2(%arg0: i32, %arg1: i32) -> (i32, i32) {
    %c0_i32 = arith.constant 0 : i32
    %c0_i32_0 = arith.constant 0 : i32
    %c0_i32_1 = arith.constant 0 : i32
    return %c0_i32, %c0_i32_0 : i32, i32
  }
  func.func @transform_3(%arg0: i32, %arg1: i32) -> (i32, i32) {
    %c0_i32 = arith.constant 0 : i32
    %c0_i32_0 = arith.constant 0 : i32
    %c0_i32_1 = arith.constant 0 : i32
    return %c0_i32, %c0_i32_0 : i32, i32
  }
  func.func @transform_4(%arg0: i32, %arg1: i32) -> (i32, i32, i32) {
    %c0_i32 = arith.constant 0 : i32
    %c0_i32_0 = arith.constant 0 : i32
    return %arg0, %arg1, %c0_i32 : i32, i32, i32
  }
}

module attributes {stable_mosaic.version = 11 : i64} {
  func.func @_conv_tap_kernel(%arg0: i32, %arg1: i32, %arg2: memref<1x40x256xbf16, #tpu.memory_space<vmem>>, %arg3: memref<256x128xbf16, #tpu.memory_space<vmem>>, %arg4: memref<256x128xbf16, #tpu.memory_space<vmem>>, %arg5: memref<1x128xf32, #tpu.memory_space<vmem>>, %arg6: memref<1x32x128xbf16, #tpu.memory_space<vmem>>) attributes {dimension_semantics = [#tpu.dimension_semantics<parallel>, #tpu.dimension_semantics<parallel>], iteration_bounds = array<i64: 2, 1>, scalar_prefetch = 0 : i64, scratch_operands = 0 : i64, tpu.core_type = #tpu.core_type<tc>, window_params = [{transform_indices = @transform_0, window_bounds = array<i64: 1, 40, 256>}, {pipeline_mode = #tpu.pipeline_mode<synchronous>, transform_indices = @transform_1, window_bounds = array<i64: 256, 128>}, {pipeline_mode = #tpu.pipeline_mode<synchronous>, transform_indices = @transform_2, window_bounds = array<i64: 256, 128>}, {pipeline_mode = #tpu.pipeline_mode<synchronous>, transform_indices = @transform_3, window_bounds = array<i64: 1, 128>}, {transform_indices = @transform_4, window_bounds = array<i64: 1, 32, 128>}]} {
    %c32_i32 = arith.constant 32 : i32
    %0 = arith.muli %arg1, %c32_i32 : i32
    %1 = tpu.assume_multiple %0, 32 : i32
    %c0 = arith.constant 0 : index
    %2 = arith.index_cast %1 : i32 to index
    %c0_0 = arith.constant 0 : index
    %3 = vector.load %arg2[%c0, %2, %c0_0] : memref<1x40x256xbf16, #tpu.memory_space<vmem>>, vector<1x40x256xbf16>
    %4 = vector.shape_cast %3 : vector<1x40x256xbf16> to vector<40x256xbf16>
    %c0_1 = arith.constant 0 : index
    %c0_2 = arith.constant 0 : index
    %5 = vector.load %arg3[%c0_1, %c0_2] : memref<256x128xbf16, #tpu.memory_space<vmem>>, vector<256x128xbf16>
    %cst = arith.constant dense<0.000000e+00> : vector<40x128xf32>
    %6 = tpu.matmul %4, %5, %cst {dimension_numbers = #tpu.dot_dimension_numbers<[1], [0], [0], [1], [0, 0, 1, 1], [], []>} : vector<40x256xbf16>, vector<256x128xbf16>, vector<40x128xf32> -> vector<40x128xf32>
    %c0_3 = arith.constant 0 : index
    %c0_4 = arith.constant 0 : index
    %7 = vector.load %arg4[%c0_3, %c0_4] : memref<256x128xbf16, #tpu.memory_space<vmem>>, vector<256x128xbf16>
    %cst_5 = arith.constant dense<0.000000e+00> : vector<40x128xf32>
    %8 = tpu.matmul %4, %7, %cst_5 {dimension_numbers = #tpu.dot_dimension_numbers<[1], [0], [0], [1], [0, 0, 1, 1], [], []>} : vector<40x256xbf16>, vector<256x128xbf16>, vector<40x128xf32> -> vector<40x128xf32>
    %c39_i32 = arith.constant 39 : i32
    %9 = tpu.dynamic_rotate %8 by %c39_i32 dim 0 : vector<40x128xf32>, i32 -> vector<40x128xf32>
    %10 = vector.extract_strided_slice %6 {offsets = [0, 0], sizes = [32, 128], strides = [1, 1]} : vector<40x128xf32> to vector<32x128xf32>
    %11 = vector.extract_strided_slice %9 {offsets = [0, 0], sizes = [32, 128], strides = [1, 1]} : vector<40x128xf32> to vector<32x128xf32>
    %12 = arith.addf %10, %11 : vector<32x128xf32>
    %c0_6 = arith.constant 0 : index
    %c0_7 = arith.constant 0 : index
    %13 = vector.load %arg5[%c0_6, %c0_7] : memref<1x128xf32, #tpu.memory_space<vmem>>, vector<1x128xf32>
    %14 = vector.broadcast %13 : vector<1x128xf32> to vector<32x128xf32>
    %15 = arith.addf %12, %14 : vector<32x128xf32>
    %cst_8 = arith.constant 0.000000e+00 : f32
    %16 = vector.broadcast %cst_8 : f32 to vector<32x128xf32>
    %17 = arith.maximumf %15, %16 : vector<32x128xf32>
    %18 = arith.truncf %17 : vector<32x128xf32> to vector<32x128xbf16>
    %c0_9 = arith.constant 0 : index
    %c0_10 = arith.constant 0 : index
    %c0_11 = arith.constant 0 : index
    %19 = vector.load %arg6[%c0_9, %c0_10, %c0_11] : memref<1x32x128xbf16, #tpu.memory_space<vmem>>, vector<1x32x128xbf16>
    %20 = vector.shape_cast %19 : vector<1x32x128xbf16> to vector<32x128xbf16>
    %21 = vector.shape_cast %18 : vector<32x128xbf16> to vector<1x32x128xbf16>
    tpu.vector_store %arg6[%c0_9, %c0_10, %c0_11], %21 {strides = array<i32>} : memref<1x32x128xbf16, #tpu.memory_space<vmem>>, vector<1x32x128xbf16>,
    return
  }
  func.func @transform_0(%arg0: i32, %arg1: i32) -> (i32, i32, i32) {
    %c0_i32 = arith.constant 0 : i32
    %c0_i32_0 = arith.constant 0 : i32
    %c0_i32_1 = arith.constant 0 : i32
    return %arg0, %c0_i32, %c0_i32_0 : i32, i32, i32
  }
  func.func @transform_1(%arg0: i32, %arg1: i32) -> (i32, i32) {
    %c0_i32 = arith.constant 0 : i32
    %c0_i32_0 = arith.constant 0 : i32
    %c0_i32_1 = arith.constant 0 : i32
    return %c0_i32, %c0_i32_0 : i32, i32
  }
  func.func @transform_2(%arg0: i32, %arg1: i32) -> (i32, i32) {
    %c0_i32 = arith.constant 0 : i32
    %c0_i32_0 = arith.constant 0 : i32
    %c0_i32_1 = arith.constant 0 : i32
    return %c0_i32, %c0_i32_0 : i32, i32
  }
  func.func @transform_3(%arg0: i32, %arg1: i32) -> (i32, i32) {
    %c0_i32 = arith.constant 0 : i32
    %c0_i32_0 = arith.constant 0 : i32
    %c0_i32_1 = arith.constant 0 : i32
    return %c0_i32, %c0_i32_0 : i32, i32
  }
  func.func @transform_4(%arg0: i32, %arg1: i32) -> (i32, i32, i32) {
    %c0_i32 = arith.constant 0 : i32
    %c0_i32_0 = arith.constant 0 : i32
    return %arg0, %arg1, %c0_i32 : i32, i32, i32
  }
}

module attributes {stable_mosaic.version = 11 : i64} {
  func.func @_matmul_bias_kernel(%arg0: i32, %arg1: memref<2x4096xbf16, #tpu.memory_space<vmem>>, %arg2: memref<4096x8xbf16, #tpu.memory_space<vmem>>, %arg3: memref<1x8xf32, #tpu.memory_space<vmem>>, %arg4: memref<2x8xf32, #tpu.memory_space<vmem>>) attributes {dimension_semantics = [#tpu.dimension_semantics<arbitrary>], iteration_bounds = array<i64: 1>, scalar_prefetch = 0 : i64, scratch_operands = 0 : i64, tpu.core_type = #tpu.core_type<tc>, window_params = [{pipeline_mode = #tpu.pipeline_mode<synchronous>, transform_indices = @transform_0, window_bounds = array<i64: 2, 4096>}, {pipeline_mode = #tpu.pipeline_mode<synchronous>, transform_indices = @transform_1, window_bounds = array<i64: 4096, 8>}, {pipeline_mode = #tpu.pipeline_mode<synchronous>, transform_indices = @transform_2, window_bounds = array<i64: 1, 8>}, {pipeline_mode = #tpu.pipeline_mode<synchronous>, transform_indices = @transform_3, window_bounds = array<i64: 2, 8>}]} {
    %c0 = arith.constant 0 : index
    %c0_0 = arith.constant 0 : index
    %0 = vector.load %arg1[%c0, %c0_0] : memref<2x4096xbf16, #tpu.memory_space<vmem>>, vector<2x4096xbf16>
    %c0_1 = arith.constant 0 : index
    %c0_2 = arith.constant 0 : index
    %1 = vector.load %arg2[%c0_1, %c0_2] : memref<4096x8xbf16, #tpu.memory_space<vmem>>, vector<4096x8xbf16>
    %cst = arith.constant dense<0.000000e+00> : vector<2x8xf32>
    %2 = tpu.matmul %0, %1, %cst {dimension_numbers = #tpu.dot_dimension_numbers<[1], [0], [0], [1], [0, 0, 1, 1], [], []>} : vector<2x4096xbf16>, vector<4096x8xbf16>, vector<2x8xf32> -> vector<2x8xf32>
    %c0_3 = arith.constant 0 : index
    %c0_4 = arith.constant 0 : index
    %3 = vector.load %arg3[%c0_3, %c0_4] : memref<1x8xf32, #tpu.memory_space<vmem>>, vector<1x8xf32>
    %4 = vector.broadcast %3 : vector<1x8xf32> to vector<2x8xf32>
    %5 = arith.addf %2, %4 : vector<2x8xf32>
    %c0_5 = arith.constant 0 : index
    %c0_6 = arith.constant 0 : index
    %6 = vector.load %arg4[%c0_5, %c0_6] : memref<2x8xf32, #tpu.memory_space<vmem>>, vector<2x8xf32>
    tpu.vector_store %arg4[%c0_5, %c0_6], %5 {strides = array<i32>} : memref<2x8xf32, #tpu.memory_space<vmem>>, vector<2x8xf32>,
    return
  }
  func.func @transform_0(%arg0: i32) -> (i32, i32) {
    %c0_i32 = arith.constant 0 : i32
    %c0_i32_0 = arith.constant 0 : i32
    %c0_i32_1 = arith.constant 0 : i32
    return %c0_i32, %c0_i32_0 : i32, i32
  }
  func.func @transform_1(%arg0: i32) -> (i32, i32) {
    %c0_i32 = arith.constant 0 : i32
    %c0_i32_0 = arith.constant 0 : i32
    %c0_i32_1 = arith.constant 0 : i32
    return %c0_i32, %c0_i32_0 : i32, i32
  }
  func.func @transform_2(%arg0: i32) -> (i32, i32) {
    %c0_i32 = arith.constant 0 : i32
    %c0_i32_0 = arith.constant 0 : i32
    %c0_i32_1 = arith.constant 0 : i32
    return %c0_i32, %c0_i32_0 : i32, i32
  }
  func.func @transform_3(%arg0: i32) -> (i32, i32) {
    %c0_i32 = arith.constant 0 : i32
    %c0_i32_0 = arith.constant 0 : i32
    %c0_i32_1 = arith.constant 0 : i32
    return %c0_i32, %c0_i32_0 : i32, i32
  }
}

</mosaic_0001>

<bundles_post_ra>
// kernel: encoder_forward.6
= control target key start
LH: loop header
LB: loop body
LE: loop exit
PB: predicated region body
PF: predicated region fallthrough
CT: control target
= control target key end

     0   :  { %s4664_s15 = smov 0   ;;  %s4666_s16 = smov 0   ;;  %s5848_s0 = inlined_call_operand.vmem [shape: bf16[2,8200,4], index: 0, kind: input, shape index: {}]   ;;  %s5849_s1 = inlined_call_operand.vmem [shape: bf16[4,8], index: 1, kind: input, shape index: {}]   ;;  %s5850_s2 = inlined_call_operand.vmem [shape: bf16[4,8], index: 2, kind: input, shape index: {}]   ;;  %s5851_s3 = inlined_call_operand.vmem [shape: f32[1,8], index: 3, kind: input, shape index: {}]   ;;  %s5852_s4 = inlined_call_operand.vmem [shape: bf16[2,8192,8], index: 4, kind: output, shape index: {}]  }
   0x1   :  { %s4668_s17 = smov 0   ;;  %s4670_s18 = smov 0  }
   0x2   :  { %s4672_s19 = smov 0  }
   0x3 LB: > { %s23_s20 = sadd.s32 1, %s4627_s17  ;;  %s26_s21 = sadd.s32 1, %s4631_s18  ;;  %s4635_s19 = sphi %s4672_s19, %s14_s19   ;;  %s4631_s18 = sphi %s4670_s18, %s5856_s18   ;;  %s4627_s17 = sphi %s4668_s17, %s5855_s17   ;;  %s4623_s16 = sphi %s4666_s16, %s5854_s16   ;;  %s4619_s15 = sphi %s4664_s15, %s5853_s15  }
   0x4   : > { %p24_p0 = scmp.ge.s32.totalorder %s23_s20, 8  ;;  %p3369_p1 = scmp.ge.s32.totalorder %s4635_s19, 1 }
   0x5   : > { %p176_p2 = scmp.lt.s32.totalorder %s4635_s19, 17 }
   0x6   : > { %s5858_s20 = smov (%p24_p0, %s23_s20), 0  ;;  %s5860_s21 = smov (!%p24_p0, %s26_s21), %s4631_s18 }
   0x7   : > { %p177_p3 = pnand %p3369_p1, %p176_p2  ;;  %p28_p4 = scmp.ge.s32.totalorder %s5860_s21, 2 }
   0x8   : > { %vm876_vm0 = vcmask (!%p177_p3), 1041408   ;;  %v1431_v0 = vld [vmem:[%s5850_s2] sm:$0x3] (!%p177_p3)  ;;  %p206_p5 = scmp.lt.s32.totalorder (!%p177_p3), %s4623_s16, 1  ;;  %v4637_v1 = vmov (!%p177_p3), 0.0   ;;  %vm4638_vm1 = vmmov (!%p177_p3), 0   ;;  %v2116_v32 = vlaneseq (!%p177_p3) }
   0x9   : > { %s5862_s21 = smov (%p28_p4, %s5860_s21), 0  ;;  %180 = sbr.rel (%p177_p3) target bundleno = 758 (0x2f6), region = 36 }
   0xa   : > { %4224 = vmatprep.subr.bf16.mxu1 (!%p177_p3), %v4637_v1  ;;  %v1433_v2 = vsel (!%p177_p3), %vm876_vm0, %v1431_v0, 0  ;;  %4226 = vmatprep.mubr.msk.bf16.mxu1 (!%p177_p3), %vm4638_vm1, %v4637_v1  ;;  %s3374_s24 = sshll.u32 (!%p177_p3), %s4619_s15, 10  ;;  %v356_v3 = vld [vmem:[%s5849_s1] sm:$0x3] (!%p177_p3)  ;;  %vm680_vm2 = vcmask (!%p177_p3), 31744   ;;  %s3371_s8 = sshll.u32 (!%p177_p3), %s4619_s15, 7 }
   0xb   : > { %4225 = vmatpush3.bf16.msra.mxu1 (!%p177_p3), %v1433_v2  ;;  %3962 = vmatprep.subr.bf16.mxu0 (!%p177_p3), %v4637_v1  ;;  %v878_v4 = vsel (!%p177_p3), %vm876_vm0, %v356_v3, 0  ;;  %s223_s27 = sshra.s32 (!%p177_p3), %s3374_s24, 3  ;;  %p214_p6 = scmp.lt.s32.totalorder (!%p177_p3), %s3371_s8, 1023  ;;  %v4905_v33 = vshrl.u32 (!%p177_p3), %v2116_v32, 7  ;;  %v4917_v46 = vld [vmem:[%s5851_s3] ss:$0 sm:$0xff] (!%p177_p3) }
   0xc   : > { %3963 = vmatpush3.bf16.msra.mxu0 (!%p177_p3), %v878_v4  ;;  %3964 = vmatprep.mubr.msk.bf16.mxu0 (!%p177_p3), %vm4638_vm1, %v4637_v1  ;;  %s3375_s29 = sshll.u32 (!%p177_p3), %s223_s27, 2  ;;  %vm3150_vm4 = vcmask (!%p177_p3), 60416  }
   0xd   : > { %vm2118_vm3 = vcmp.lt.s32.totalorder (!%p177_p3), %v4905_v33, 7 }
  0x10   : > { %s5864_s16 = smov (!%p206_p5, %s4623_s16), 1  ;;  %s5866_s8 = smov (!%p214_p6, %s3371_s8), 1023 }
  0x11   : > { %s4486_s28 = smul.u32 4100, %s5864_s16  ;;  %s3372_s9 = sshll.u32 %s5864_s16, 10 }
  0x12   : > { %s217_s10 = sadd.s32 %s3372_s9, %s5866_s8 }
  0x13   : > { %s210_s6 = scalar_lea.vmem %s5848_s0, %s4486_s28  ;;  %s3373_s13 = sshll.u32 %s217_s10, 2 }
  0x14   : > { %s4715_s7 = scalar_lea.vmem %s210_s6, %s3375_s29  ;;  %s4930_s16 = scalar_lea.vmem %s5852_s4, %s3373_s13 }
  0x15   : > { %v4529_v5 = vld [vmem:[%s4715_s7] sm:$0xff]   ;;  %v4530_v6 = vld [vmem:[%s4715_s7 + $0x8] sm:$0xff]   ;;  %v4531_v7 = vld [vmem:[%s4715_s7 + $0x10] sm:$0xff]  }
  0x16   : > { %4227 = vmatmul.mubr.msk.bf16.vlgmr.msra.gmra.mrb[0].mxu1 %vm680_vm2, %v4529_v5  ;;  %3965 = vmatmul.mubr.msk.bf16.vlgmr.msra.gmra.mrb[0].mxu0 %vm680_vm2, %v4529_v5  ;;  %v4532_v8 = vld [vmem:[%s4715_s7 + $0x18] sm:$0xff]   ;;  %v4533_v9 = vld [vmem:[%s4715_s7 + $0x20] sm:$0xff]   ;;  %v4534_v10 = vld [vmem:[%s4715_s7 + $0x28] sm:$0xff]  }
  0x17   : > { %4230 = vmatprep.mubr.msk.bf16.mxu1 %vm4638_vm1, %v4637_v1  ;;  %3968 = vmatprep.mubr.msk.bf16.mxu0 %vm4638_vm1, %v4637_v1  ;;  %v4535_v11 = vld [vmem:[%s4715_s7 + $0x30] sm:$0xff]   ;;  %v4536_v12 = vld [vmem:[%s4715_s7 + $0x38] sm:$0xff]   ;;  %v4537_v13 = vld [vmem:[%s4715_s7 + $0x40] sm:$0xff]  }
  0x18   : > { %v4538_v14 = vld [vmem:[%s4715_s7 + $0x48] sm:$0xff]   ;;  %v4539_v15 = vld [vmem:[%s4715_s7 + $0x50] sm:$0xff]   ;;  %v4540_v16 = vld [vmem:[%s4715_s7 + $0x58] sm:$0xff]  }
  0x19   : > { %v4541_v17 = vld [vmem:[%s4715_s7 + $0x60] sm:$0xff]   ;;  %v4542_v18 = vld [vmem:[%s4715_s7 + $0x68] sm:$0xff]   ;;  %v4543_v19 = vld [vmem:[%s4715_s7 + $0x70] sm:$0xff]  }
  0x1a   : > { %v4544_v20 = vld [vmem:[%s4715_s7 + $0x78] sm:$0xff]   ;;  %v4545_v21 = vld [vmem:[%s4715_s7 + $0x80] sm:$0xff]   ;;  %v4546_v22 = vld [vmem:[%s4715_s7 + $0x88] sm:$0xff]  }
  0x1b   : > { %v4547_v23 = vld [vmem:[%s4715_s7 + $0x90] sm:$0xff]   ;;  %v4548_v24 = vld [vmem:[%s4715_s7 + $0x98] sm:$0xff]   ;;  %v4549_v25 = vld [vmem:[%s4715_s7 + $0xa0] sm:$0xff]  }
  0x1c   : > { %v4550_v26 = vld [vmem:[%s4715_s7 + $0xa8] sm:$0xff]   ;;  %v4551_v27 = vld [vmem:[%s4715_s7 + $0xb0] sm:$0xff]   ;;  %v4552_v28 = vld [vmem:[%s4715_s7 + $0xb8] sm:$0xff]  }
  0x1d   : > { %v4553_v29 = vld [vmem:[%s4715_s7 + $0xc0] sm:$0xff]   ;;  %v4554_v30 = vld [vmem:[%s4715_s7 + $0xc8] sm:$0xff]   ;;  %v4555_v31 = vld [vmem:[%s4715_s7 + $0xd0] sm:$0xff]  }
  0x1e   : > { %4231 = vmatmul.mubr.msk.bf16.gmra.mrb[4].mxu1 %vm680_vm2, %v4530_v6  ;;  %3969 = vmatmul.mubr.msk.bf16.gmra.mrb[4].mxu0 %vm680_vm2, %v4530_v6  ;;  %v4556_v37 = vld [vmem:[%s4715_s7 + $0xd8] sm:$0xff]   ;;  %v4557_v53 = vld [vmem:[%s4715_s7 + $0xe0] sm:$0xff]  }
  0x1f   : > { %4234 = vmatprep.mubr.msk.bf16.mxu1 %vm4638_vm1, %v4637_v1  ;;  %3972 = vmatprep.mubr.msk.bf16.mxu0 %vm4638_vm1, %v4637_v1 }
  0x26   : > { %4235 = vmatmul.mubr.msk.bf16.gmra.mrb[8].mxu1 %vm680_vm2, %v4531_v7  ;;  %3973 = vmatmul.mubr.msk.bf16.gmra.mrb[8].mxu0 %vm680_vm2, %v4531_v7 }
  0x27   : > { %4238 = vmatprep.mubr.msk.bf16.mxu1 %vm4638_vm1, %v4637_v1  ;;  %3976 = vmatprep.mubr.msk.bf16.mxu0 %vm4638_vm1, %v4637_v1 }
  0x2e   : > { %4239 = vmatmul.mubr.msk.bf16.gmra.mrb[12].mxu1 %vm680_vm2, %v4532_v8  ;;  %3977 = vmatmul.mubr.msk.bf16.gmra.mrb[12].mxu0 %vm680_vm2, %v4532_v8 }
  0x2f   : > { %4242 = vmatprep.mubr.msk.bf16.mxu1 %vm4638_vm1, %v4637_v1  ;;  %3980 = vmatprep.mubr.msk.bf16.mxu0 %vm4638_vm1, %v4637_v1 }
  0x36   : > { %4243 = vmatmul.mubr.msk.bf16.gmra.mrb[16].mxu1 %vm680_vm2, %v4533_v9  ;;  %3981 = vmatmul.mubr.msk.bf16.gmra.mrb[16].mxu0 %vm680_vm2, %v4533_v9 }
  0x37   : > { %4246 = vmatprep.mubr.msk.bf16.mxu1 %vm4638_vm1, %v4637_v1  ;;  %3984 = vmatprep.mubr.msk.bf16.mxu0 %vm4638_vm1, %v4637_v1 }
  0x3e   : > { %4247 = vmatmul.mubr.msk.bf16.gmra.mrb[20].mxu1 %vm680_vm2, %v4534_v10  ;;  %3985 = vmatmul.mubr.msk.bf16.gmra.mrb[20].mxu0 %vm680_vm2, %v4534_v10  ;;  %v4558_v10 = vld [vmem:[%s4715_s7 + $0xe8] sm:$0xff]  }
  0x3f   : > { %4250 = vmatprep.mubr.msk.bf16.mxu1 %vm4638_vm1, %v4637_v1  ;;  %3988 = vmatprep.mubr.msk.bf16.mxu0 %vm4638_vm1, %v4637_v1 }
  0x46   : > { %4251 = vmatmul.mubr.msk.bf16.gmra.mrb[24].mxu1 %vm680_vm2, %v4535_v11  ;;  %3989 = vmatmul.mubr.msk.bf16.gmra.mrb[24].mxu0 %vm680_vm2, %v4535_v11 }
  0x47   : > { %4254 = vmatprep.mubr.msk.bf16.mxu1 %vm4638_vm1, %v4637_v1  ;;  %3992 = vmatprep.mubr.msk.bf16.mxu0 %vm4638_vm1, %v4637_v1 }
  0x4e   : > { %4255 = vmatmul.mubr.msk.bf16.gmra.mrb[28].mxu1 %vm680_vm2, %v4536_v12  ;;  %3993 = vmatmul.mubr.msk.bf16.gmra.mrb[28].mxu0 %vm680_vm2, %v4536_v12 }
  0x4f   : > { %4258 = vmatprep.mubr.msk.bf16.mxu1 %vm4638_vm1, %v4637_v1  ;;  %3996 = vmatprep.mubr.msk.bf16.mxu0 %vm4638_vm1, %v4637_v1 }
  0x56   : > { %4259 = vmatmul.mubr.msk.bf16.gmra.mrb[32].mxu1 %vm680_vm2, %v4537_v13  ;;  %3997 = vmatmul.mubr.msk.bf16.gmra.mrb[32].mxu0 %vm680_vm2, %v4537_v13 }
  0x57   : > { %4262 = vmatprep.mubr.msk.bf16.mxu1 %vm4638_vm1, %v4637_v1  ;;  %4000 = vmatprep.mubr.msk.bf16.mxu0 %vm4638_vm1, %v4637_v1 }
  0x5e   : > { %4263 = vmatmul.mubr.msk.bf16.gmra.mrb[36].mxu1 %vm680_vm2, %v4538_v14  ;;  %4001 = vmatmul.mubr.msk.bf16.gmra.mrb[36].mxu0 %vm680_vm2, %v4538_v14 }
  0x5f   : > { %4266 = vmatprep.mubr.msk.bf16.mxu1 %vm4638_vm1, %v4637_v1  ;;  %4004 = vmatprep.mubr.msk.bf16.mxu0 %vm4638_vm1, %v4637_v1 }
  0x66   : > { %4267 = vmatmul.mubr.msk.bf16.gmra.mrb[40].mxu1 %vm680_vm2, %v4539_v15  ;;  %4005 = vmatmul.mubr.msk.bf16.gmra.mrb[40].mxu0 %vm680_vm2, %v4539_v15 }
  0x67   : > { %4270 = vmatprep.mubr.msk.bf16.mxu1 %vm4638_vm1, %v4637_v1  ;;  %4008 = vmatprep.mubr.msk.bf16.mxu0 %vm4638_vm1, %v4637_v1 }
  0x6e   : > { %4271 = vmatmul.mubr.msk.bf16.gmra.mrb[44].mxu1 %vm680_vm2, %v4540_v16  ;;  %4009 = vmatmul.mubr.msk.bf16.gmra.mrb[44].mxu0 %vm680_vm2, %v4540_v16 }
  0x6f   : > { %4274 = vmatprep.mubr.msk.bf16.mxu1 %vm4638_vm1, %v4637_v1  ;;  %4012 = vmatprep.mubr.msk.bf16.mxu0 %vm4638_vm1, %v4637_v1 }
  0x76   : > { %4275 = vmatmul.mubr.msk.bf16.gmra.mrb[48].mxu1 %vm680_vm2, %v4541_v17  ;;  %4013 = vmatmul.mubr.msk.bf16.gmra.mrb[48].mxu0 %vm680_vm2, %v4541_v17 }
  0x77   : > { %4278 = vmatprep.mubr.msk.bf16.mxu1 %vm4638_vm1, %v4637_v1  ;;  %4016 = vmatprep.mubr.msk.bf16.mxu0 %vm4638_vm1, %v4637_v1 }
  0x7e   : > { %4279 = vmatmul.mubr.msk.bf16.gmra.mrb[52].mxu1 %vm680_vm2, %v4542_v18  ;;  %4017 = vmatmul.mubr.msk.bf16.gmra.mrb[52].mxu0 %vm680_vm2, %v4542_v18 }
  0x7f   : > { %4282 = vmatprep.mubr.msk.bf16.mxu1 %vm4638_vm1, %v4637_v1  ;;  %4020 = vmatprep.mubr.msk.bf16.mxu0 %vm4638_vm1, %v4637_v1 }
  0x86   : > { %4283 = vmatmul.mubr.msk.bf16.gmra.mrb[56].mxu1 %vm680_vm2, %v4543_v19  ;;  %4021 = vmatmul.mubr.msk.bf16.gmra.mrb[56].mxu0 %vm680_vm2, %v4543_v19 }
  0x87   : > { %4286 = vmatprep.mubr.msk.bf16.mxu1 %vm4638_vm1, %v4637_v1  ;;  %4024 = vmatprep.mubr.msk.bf16.mxu0 %vm4638_vm1, %v4637_v1 }
  0x8e   : > { %4287 = vmatmul.mubr.msk.bf16.gmra.mrb[60].mxu1 %vm680_vm2, %v4544_v20  ;;  %4025 = vmatmul.mubr.msk.bf16.gmra.mrb[60].mxu0 %vm680_vm2, %v4544_v20 }
  0x8f   : > { %4290 = vmatprep.mubr.msk.bf16.mxu1 %vm4638_vm1, %v4637_v1  ;;  %4028 = vmatprep.mubr.msk.bf16.mxu0 %vm4638_vm1, %v4637_v1 }
  0x96   : > { %4291 = vmatmul.mubr.msk.bf16.gmra.mrb[64].mxu1 %vm680_vm2, %v4545_v21  ;;  %4029 = vmatmul.mubr.msk.bf16.gmra.mrb[64].mxu0 %vm680_vm2, %v4545_v21 }
  0x97   : > { %4294 = vmatprep.mubr.msk.bf16.mxu1 %vm4638_vm1, %v4637_v1  ;;  %4032 = vmatprep.mubr.msk.bf16.mxu0 %vm4638_vm1, %v4637_v1 }
  0x9e   : > { %4295 = vmatmul.mubr.msk.bf16.gmra.mrb[68].mxu1 %vm680_vm2, %v4546_v22  ;;  %4033 = vmatmul.mubr.msk.bf16.gmra.mrb[68].mxu0 %vm680_vm2, %v4546_v22 }
  0x9f   : > { %4298 = vmatprep.mubr.msk.bf16.mxu1 %vm4638_vm1, %v4637_v1  ;;  %4036 = vmatprep.mubr.msk.bf16.mxu0 %vm4638_vm1, %v4637_v1 }
  0xa6   : > { %4299 = vmatmul.mubr.msk.bf16.gmra.mrb[72].mxu1 %vm680_vm2, %v4547_v23  ;;  %4037 = vmatmul.mubr.msk.bf16.gmra.mrb[72].mxu0 %vm680_vm2, %v4547_v23 }
  0xa7   : > { %4302 = vmatprep.mubr.msk.bf16.mxu1 %vm4638_vm1, %v4637_v1  ;;  %4040 = vmatprep.mubr.msk.bf16.mxu0 %vm4638_vm1, %v4637_v1 }
  0xae   : > { %4303 = vmatmul.mubr.msk.bf16.gmra.mrb[76].mxu1 %vm680_vm2, %v4548_v24  ;;  %4041 = vmatmul.mubr.msk.bf16.gmra.mrb[76].mxu0 %vm680_vm2, %v4548_v24 }
  0xaf   : > { %4306 = vmatprep.mubr.msk.bf16.mxu1 %vm4638_vm1, %v4637_v1  ;;  %4044 = vmatprep.mubr.msk.bf16.mxu0 %vm4638_vm1, %v4637_v1 }
  0xb6   : > { %4307 = vmatmul.mubr.msk.bf16.gmra.mrb[80].mxu1 %vm680_vm2, %v4549_v25  ;;  %4045 = vmatmul.mubr.msk.bf16.gmra.mrb[80].mxu0 %vm680_vm2, %v4549_v25 }
  0xb7   : > { %4310 = vmatprep.mubr.msk.bf16.mxu1 %vm4638_vm1, %v4637_v1  ;;  %4048 = vmatprep.mubr.msk.bf16.mxu0 %vm4638_vm1, %v4637_v1 }
  0xbe   : > { %4311 = vmatmul.mubr.msk.bf16.gmra.mrb[84].mxu1 %vm680_vm2, %v4550_v26  ;;  %4049 = vmatmul.mubr.msk.bf16.gmra.mrb[84].mxu0 %vm680_vm2, %v4550_v26 }
  0xbf   : > { %4314 = vmatprep.mubr.msk.bf16.mxu1 %vm4638_vm1, %v4637_v1  ;;  %4052 = vmatprep.mubr.msk.bf16.mxu0 %vm4638_vm1, %v4637_v1 }
  0xc6   : > { %4315 = vmatmul.mubr.msk.bf16.gmra.mrb[88].mxu1 %vm680_vm2, %v4551_v27  ;;  %4053 = vmatmul.mubr.msk.bf16.gmra.mrb[88].mxu0 %vm680_vm2, %v4551_v27 }
  0xc7   : > { %4318 = vmatprep.mubr.msk.bf16.mxu1 %vm4638_vm1, %v4637_v1  ;;  %4056 = vmatprep.mubr.msk.bf16.mxu0 %vm4638_vm1, %v4637_v1 }
  0xce   : > { %4319 = vmatmul.mubr.msk.bf16.gmra.mrb[92].mxu1 %vm680_vm2, %v4552_v28  ;;  %4057 = vmatmul.mubr.msk.bf16.gmra.mrb[92].mxu0 %vm680_vm2, %v4552_v28 }
  0xcf   : > { %4322 = vmatprep.mubr.msk.bf16.mxu1 %vm4638_vm1, %v4637_v1  ;;  %4060 = vmatprep.mubr.msk.bf16.mxu0 %vm4638_vm1, %v4637_v1 }
  0xd6   : > { %4323 = vmatmul.mubr.msk.bf16.gmra.mrb[96].mxu1 %vm680_vm2, %v4553_v29  ;;  %4061 = vmatmul.mubr.msk.bf16.gmra.mrb[96].mxu0 %vm680_vm2, %v4553_v29 }
  0xd7   : > { %4326 = vmatprep.mubr.msk.bf16.mxu1 %vm4638_vm1, %v4637_v1  ;;  %4064 = vmatprep.mubr.msk.bf16.mxu0 %vm4638_vm1, %v4637_v1 }
  0xde   : > { %4327 = vmatmul.mubr.msk.bf16.gmra.mrb[100].mxu1 %vm680_vm2, %v4554_v30  ;;  %4065 = vmatmul.mubr.msk.bf16.gmra.mrb[100].mxu0 %vm680_vm2, %v4554_v30 }
  0xdf   : > { %4330 = vmatprep.mubr.msk.bf16.mxu1 %vm4638_vm1, %v4637_v1  ;;  %4068 = vmatprep.mubr.msk.bf16.mxu0 %vm4638_vm1, %v4637_v1 }
  0xe6   : > { %4331 = vmatmul.mubr.msk.bf16.gmra.mrb[104].mxu1 %vm680_vm2, %v4555_v31  ;;  %4069 = vmatmul.mubr.msk.bf16.gmra.mrb[104].mxu0 %vm680_vm2, %v4555_v31  ;;  %v4559_v31 = vld [vmem:[%s4715_s7 + $0xf0] sm:$0xff]  }
  0xe7   : > { %4334 = vmatprep.mubr.msk.bf16.mxu1 %vm4638_vm1, %v4637_v1  ;;  %4072 = vmatprep.mubr.msk.bf16.mxu0 %vm4638_vm1, %v4637_v1 }
  0xe9   : > { %v1469_v34 = vpop.f32.mrb[0].mxu1  ;;  %v914_v35 = vpop.f32.mrb[0].mxu0 }
  0xea   : > { %v4228_v36 = vpop.f32.mrb[1].mxu1  ;;  %v3966_v38 = vpop.f32.mrb[1].mxu0  ;;  %v1987_v41 = vrot.slane %v1469_v34, 1 }
  0xeb   : > { %v1472_v39 = vpop.f32.mrb[2].mxu1  ;;  %v917_v40 = vpop.f32.mrb[2].mxu0 }
  0xec   : > { %v1988_v42 = vrot.slane %v1472_v39, 1  ;;  %v4229_v43 = vpop.f32.mrb[3].mxu1  ;;  %v3967_v44 = vpop.f32.mrb[3].mxu0 }
  0xee   : > { %v2246_v45 = vsel %vm2118_vm3, %v1987_v41, %v1988_v42  ;;  %4335 = vmatmul.mubr.msk.bf16.gmra.mrb[108].mxu1 %vm680_vm2, %v4556_v37  ;;  %4073 = vmatmul.mubr.msk.bf16.gmra.mrb[108].mxu0 %vm680_vm2, %v4556_v37 }
  0xef   : > { %v2247_v47 = vadd.f32 %v2246_v45, %v914_v35  ;;  %4338 = vmatprep.mubr.msk.bf16.mxu1 %vm4638_vm1, %v4637_v1  ;;  %4076 = vmatprep.mubr.msk.bf16.mxu0 %vm4638_vm1, %v4637_v1 }
  0xf1   : > { %v2382_v48 = vadd.f32 %v4917_v46, %v2247_v47  ;;  %v1477_v49 = vpop.f32.mrb[4].mxu1  ;;  %v922_v50 = vpop.f32.mrb[4].mxu0 }
  0xf2   : > { %v1989_v51 = vrot.slane %v1477_v49, 1  ;;  %v4232_v52 = vpop.f32.mrb[5].mxu1  ;;  %v3970_v54 = vpop.f32.mrb[5].mxu0 }
  0xf3   : > { %v2510_v55 = vmax.f32 %v2382_v48, 0.0  ;;  %v1480_v56 = vpop.f32.mrb[6].mxu1  ;;  %v925_v57 = vpop.f32.mrb[6].mxu0  ;;  %v4560_v54 = vld [vmem:[%s4715_s7 + $0xf8] sm:$0xff]  }
  0xf4   : > { %v2245_v58 = vsel %vm2118_vm3, %v1988_v42, %v1989_v51  ;;  %v1990_v59 = vrot.slane %v1480_v56, 1  ;;  %v4233_v60 = vpop.f32.mrb[7].mxu1  ;;  %v3971_v61 = vpop.f32.mrb[7].mxu0 }
  0xf5   : > { %v3702_v62 = vpack.c.bf16 %v2510_v55, %v2510_v55  ;;  %v2248_v63 = vadd.f32 %v2245_v58, %v917_v40 }
  0xf6   : > { %v2244_v0 = vsel %vm2118_vm3, %v1989_v51, %v1990_v59  ;;  %4339 = vmatmul.mubr.msk.bf16.gmra.mrb[112].mxu1 %vm680_vm2, %v4557_v53  ;;  %4077 = vmatmul.mubr.msk.bf16.gmra.mrb[112].mxu0 %vm680_vm2, %v4557_v53 }
  0xf7   : > { %3151 = vst.msk [vmem:[%s4930_s16] sm:$0xf] %vm3150_vm4, %v3702_v62  ;;  %v2383_v2 = vadd.f32 %v4917_v46, %v2248_v63  ;;  %v2249_v3 = vadd.f32 %v2244_v0, %v922_v50  ;;  %4342 = vmatprep.mubr.msk.bf16.mxu1 %vm4638_vm1, %v4637_v1  ;;  %4080 = vmatprep.mubr.msk.bf16.mxu0 %vm4638_vm1, %v4637_v1 }
  0xf9   : > { %v2511_v4 = vmax.f32 %v2383_v2, 0.0  ;;  %v2384_v5 = vadd.f32 %v4917_v46, %v2249_v3  ;;  %v1485_v6 = vpop.f32.mrb[8].mxu1  ;;  %v930_v7 = vpop.f32.mrb[8].mxu0 }
  0xfa   : > { %v1991_v8 = vrot.slane %v1485_v6, 1  ;;  %v4236_v9 = vpop.f32.mrb[9].mxu1  ;;  %v3974_v11 = vpop.f32.mrb[9].mxu0 }
  0xfb   : > { %v3703_v12 = vpack.c.bf16 %v2511_v4, %v2511_v4  ;;  %v2512_v13 = vmax.f32 %v2384_v5, 0.0  ;;  %v1488_v14 = vpop.f32.mrb[10].mxu1  ;;  %v933_v15 = vpop.f32.mrb[10].mxu0 }
  0xfc   : > { %v2243_v16 = vsel %vm2118_vm3, %v1990_v59, %v1991_v8  ;;  %v1992_v17 = vrot.slane %v1488_v14, 1  ;;  %v4237_v18 = vpop.f32.mrb[11].mxu1  ;;  %v3975_v19 = vpop.f32.mrb[11].mxu0 }
  0xfd   : > { %3152 = vst.msk [vmem:[%s4930_s16 + $0x4] sm:$0xf] %vm3150_vm4, %v3703_v12  ;;  %v3704_v20 = vpack.c.bf16 %v2512_v13, %v2512_v13  ;;  %v2250_v21 = vadd.f32 %v2243_v16, %v925_v57  ;;  %v4561_v12 = vld [vmem:[%s4715_s7 + $0x100] sm:$0xff]  }
  0xfe   : > { %v2242_v22 = vsel %vm2118_vm3, %v1991_v8, %v1992_v17  ;;  %4343 = vmatmul.mubr.msk.bf16.gmra.mrb[116].mxu1 %vm680_vm2, %v4558_v10  ;;  %4081 = vmatmul.mubr.msk.bf16.gmra.mrb[116].mxu0 %vm680_vm2, %v4558_v10 }
  0xff   : > { %3153 = vst.msk [vmem:[%s4930_s16 + $0x8] sm:$0xf] %vm3150_vm4, %v3704_v20  ;;  %v2385_v23 = vadd.f32 %v4917_v46, %v2250_v21  ;;  %v2251_v24 = vadd.f32 %v2242_v22, %v930_v7  ;;  %4346 = vmatprep.mubr.msk.bf16.mxu1 %vm4638_vm1, %v4637_v1  ;;  %4084 = vmatprep.mubr.msk.bf16.mxu0 %vm4638_vm1, %v4637_v1 }
 0x101   : > { %v2513_v25 = vmax.f32 %v2385_v23, 0.0  ;;  %v2386_v26 = vadd.f32 %v4917_v46, %v2251_v24  ;;  %v1493_v27 = vpop.f32.mrb[12].mxu1  ;;  %v938_v28 = vpop.f32.mrb[12].mxu0 }
 0x102   : > { %v1993_v29 = vrot.slane %v1493_v27, 1  ;;  %v4240_v30 = vpop.f32.mrb[13].mxu1  ;;  %v3978_v32 = vpop.f32.mrb[13].mxu0 }
 0x103   : > { %v3705_v34 = vpack.c.bf16 %v2513_v25, %v2513_v25  ;;  %v2514_v35 = vmax.f32 %v2386_v26, 0.0  ;;  %v1496_v36 = vpop.f32.mrb[14].mxu1  ;;  %v941_v37 = vpop.f32.mrb[14].mxu0 }
 0x104   : > { %v2241_v38 = vsel %vm2118_vm3, %v1992_v17, %v1993_v29  ;;  %v1994_v39 = vrot.slane %v1496_v36, 1  ;;  %v4241_v40 = vpop.f32.mrb[15].mxu1  ;;  %v3979_v41 = vpop.f32.mrb[15].mxu0 }
 0x105   : > { %3154 = vst.msk [vmem:[%s4930_s16 + $0xc] sm:$0xf] %vm3150_vm4, %v3705_v34  ;;  %v3706_v42 = vpack.c.bf16 %v2514_v35, %v2514_v35  ;;  %v2252_v43 = vadd.f32 %v2241_v38, %v933_v15  ;;  %v4562_v34 = vld [vmem:[%s4715_s7 + $0x108] sm:$0xff]  }
 0x106   : > { %v2240_v44 = vsel %vm2118_vm3, %v1993_v29, %v1994_v39  ;;  %4347 = vmatmul.mubr.msk.bf16.gmra.mrb[120].mxu1 %vm680_vm2, %v4559_v31  ;;  %4085 = vmatmul.mubr.msk.bf16.gmra.mrb[120].mxu0 %vm680_vm2, %v4559_v31 }
 0x107   : > { %3155 = vst.msk [vmem:[%s4930_s16 + $0x10] sm:$0xf] %vm3150_vm4, %v3706_v42  ;;  %v2387_v45 = vadd.f32 %v4917_v46, %v2252_v43  ;;  %v2253_v47 = vadd.f32 %v2240_v44, %v938_v28  ;;  %4350 = vmatprep.mubr.msk.bf16.mxu1 %vm4638_vm1, %v4637_v1  ;;  %4088 = vmatprep.mubr.msk.bf16.mxu0 %vm4638_vm1, %v4637_v1 }
 0x109   : > { %v2515_v48 = vmax.f32 %v2387_v45, 0.0  ;;  %v2388_v49 = vadd.f32 %v4917_v46, %v2253_v47  ;;  %v1501_v50 = vpop.f32.mrb[16].mxu1  ;;  %v946_v51 = vpop.f32.mrb[16].mxu0 }
 0x10a   : > { %v1995_v52 = vrot.slane %v1501_v50, 1  ;;  %v4244_v53 = vpop.f32.mrb[17].mxu1  ;;  %v3982_v55 = vpop.f32.mrb[17].mxu0 }
 0x10b   : > { %v3707_v56 = vpack.c.bf16 %v2515_v48, %v2515_v48  ;;  %v2516_v57 = vmax.f32 %v2388_v49, 0.0  ;;  %v1504_v58 = vpop.f32.mrb[18].mxu1  ;;  %v949_v59 = vpop.f32.mrb[18].mxu0 }
 0x10c   : > { %v2239_v60 = vsel %vm2118_vm3, %v1994_v39, %v1995_v52  ;;  %v1996_v61 = vrot.slane %v1504_v58, 1  ;;  %v4245_v62 = vpop.f32.mrb[19].mxu1  ;;  %v3983_v63 = vpop.f32.mrb[19].mxu0 }
 0x10d   : > { %3156 = vst.msk [vmem:[%s4930_s16 + $0x14] sm:$0xf] %vm3150_vm4, %v3707_v56  ;;  %v3708_v0 = vpack.c.bf16 %v2516_v57, %v2516_v57  ;;  %v2254_v2 = vadd.f32 %v2239_v60, %v941_v37  ;;  %v4563_v56 = vld [vmem:[%s4715_s7 + $0x110] sm:$0xff]  }
 0x10e   : > { %v2238_v3 = vsel %vm2118_vm3, %v1995_v52, %v1996_v61  ;;  %4351 = vmatmul.mubr.msk.bf16.gmra.mrb[124].mxu1 %vm680_vm2, %v4560_v54  ;;  %4089 = vmatmul.mubr.msk.bf16.gmra.mrb[124].mxu0 %vm680_vm2, %v4560_v54 }
 0x10f   : > { %3157 = vst.msk [vmem:[%s4930_s16 + $0x18] sm:$0xf] %vm3150_vm4, %v3708_v0  ;;  %v2389_v4 = vadd.f32 %v4917_v46, %v2254_v2  ;;  %v2255_v5 = vadd.f32 %v2238_v3, %v946_v51  ;;  %4354 = vmatprep.mubr.msk.bf16.mxu1 %vm4638_vm1, %v4637_v1  ;;  %4092 = vmatprep.mubr.msk.bf16.mxu0 %vm4638_vm1, %v4637_v1 }
 0x111   : > { %v2517_v6 = vmax.f32 %v2389_v4, 0.0  ;;  %v2390_v7 = vadd.f32 %v4917_v46, %v2255_v5  ;;  %v1509_v8 = vpop.f32.mrb[20].mxu1  ;;  %v954_v9 = vpop.f32.mrb[20].mxu0 }
 0x112   : > { %v1997_v10 = vrot.slane %v1509_v8, 1  ;;  %v4248_v11 = vpop.f32.mrb[21].mxu1  ;;  %v3986_v13 = vpop.f32.mrb[21].mxu0 }
 0x113   : > { %v3709_v14 = vpack.c.bf16 %v2517_v6, %v2517_v6  ;;  %v2518_v15 = vmax.f32 %v2390_v7, 0.0  ;;  %v1512_v16 = vpop.f32.mrb[22].mxu1  ;;  %v957_v17 = vpop.f32.mrb[22].mxu0 }
 0x114   : > { %v2237_v18 = vsel %vm2118_vm3, %v1996_v61, %v1997_v10  ;;  %v1998_v19 = vrot.slane %v1512_v16, 1  ;;  %v4249_v20 = vpop.f32.mrb[23].mxu1  ;;  %v3987_v21 = vpop.f32.mrb[23].mxu0 }
 0x115   : > { %3158 = vst.msk [vmem:[%s4930_s16 + $0x1c] sm:$0xf] %vm3150_vm4, %v3709_v14  ;;  %v3710_v22 = vpack.c.bf16 %v2518_v15, %v2518_v15  ;;  %v2256_v23 = vadd.f32 %v2237_v18, %v949_v59  ;;  %v4564_v14 = vld [vmem:[%s4715_s7 + $0x118] sm:$0xff]  }
 0x116   : > { %v2236_v24 = vsel %vm2118_vm3, %v1997_v10, %v1998_v19  ;;  %4355 = vmatmul.mubr.msk.bf16.gmra.mrb[128].mxu1 %vm680_vm2, %v4561_v12  ;;  %4093 = vmatmul.mubr.msk.bf16.gmra.mrb[128].mxu0 %vm680_vm2, %v4561_v12 }
 0x117   : > { %3159 = vst.msk [vmem:[%s4930_s16 + $0x20] sm:$0xf] %vm3150_vm4, %v3710_v22  ;;  %v2391_v25 = vadd.f32 %v4917_v46, %v2256_v23  ;;  %v2257_v26 = vadd.f32 %v2236_v24, %v954_v9  ;;  %4358 = vmatprep.mubr.msk.bf16.mxu1 %vm4638_vm1, %v4637_v1  ;;  %4096 = vmatprep.mubr.msk.bf16.mxu0 %vm4638_vm1, %v4637_v1 }
 0x119   : > { %v2519_v27 = vmax.f32 %v2391_v25, 0.0  ;;  %v2392_v28 = vadd.f32 %v4917_v46, %v2257_v26  ;;  %v1517_v29 = vpop.f32.mrb[24].mxu1  ;;  %v962_v30 = vpop.f32.mrb[24].mxu0 }
 0x11a   : > { %v1999_v31 = vrot.slane %v1517_v29, 1  ;;  %v4252_v32 = vpop.f32.mrb[25].mxu1  ;;  %v3990_v35 = vpop.f32.mrb[25].mxu0 }
 0x11b   : > { %v3711_v36 = vpack.c.bf16 %v2519_v27, %v2519_v27  ;;  %v2520_v37 = vmax.f32 %v2392_v28, 0.0  ;;  %v1520_v38 = vpop.f32.mrb[26].mxu1  ;;  %v965_v39 = vpop.f32.mrb[26].mxu0 }
 0x11c   : > { %v2235_v40 = vsel %vm2118_vm3, %v1998_v19, %v1999_v31  ;;  %v2000_v41 = vrot.slane %v1520_v38, 1  ;;  %v4253_v42 = vpop.f32.mrb[27].mxu1  ;;  %v3991_v43 = vpop.f32.mrb[27].mxu0 }
 0x11d   : > { %3160 = vst.msk [vmem:[%s4930_s16 + $0x24] sm:$0xf] %vm3150_vm4, %v3711_v36  ;;  %v3712_v44 = vpack.c.bf16 %v2520_v37, %v2520_v37  ;;  %v2258_v45 = vadd.f32 %v2235_v40, %v957_v17  ;;  %v4565_v36 = vld [vmem:[%s4715_s7 + $0x120] sm:$0xff]  }
 0x11e   : > { %v2234_v47 = vsel %vm2118_vm3, %v1999_v31, %v2000_v41  ;;  %4359 = vmatmul.mubr.msk.bf16.gmra.mrb[132].mxu1 %vm680_vm2, %v4562_v34  ;;  %4097 = vmatmul.mubr.msk.bf16.gmra.mrb[132].mxu0 %vm680_vm2, %v4562_v34 }
 0x11f   : > { %3161 = vst.msk [vmem:[%s4930_s16 + $0x28] sm:$0xf] %vm3150_vm4, %v3712_v44  ;;  %v2393_v48 = vadd.f32 %v4917_v46, %v2258_v45  ;;  %v2259_v49 = vadd.f32 %v2234_v47, %v962_v30  ;;  %4362 = vmatprep.mubr.msk.bf16.mxu1 %vm4638_vm1, %v4637_v1  ;;  %4100 = vmatprep.mubr.msk.bf16.mxu0 %vm4638_vm1, %v4637_v1 }
 0x121   : > { %v2521_v50 = vmax.f32 %v2393_v48, 0.0  ;;  %v2394_v51 = vadd.f32 %v4917_v46, %v2259_v49  ;;  %v1525_v52 = vpop.f32.mrb[28].mxu1  ;;  %v970_v53 = vpop.f32.mrb[28].mxu0 }
 0x122   : > { %v2001_v54 = vrot.slane %v1525_v52, 1  ;;  %v4256_v55 = vpop.f32.mrb[29].mxu1  ;;  %v3994_v57 = vpop.f32.mrb[29].mxu0 }
 0x123   : > { %v3713_v58 = vpack.c.bf16 %v2521_v50, %v2521_v50  ;;  %v2522_v59 = vmax.f32 %v2394_v51, 0.0  ;;  %v1528_v60 = vpop.f32.mrb[30].mxu1  ;;  %v973_v61 = vpop.f32.mrb[30].mxu0 }
 0x124   : > { %v2233_v62 = vsel %vm2118_vm3, %v2000_v41, %v2001_v54  ;;  %v2002_v63 = vrot.slane %v1528_v60, 1  ;;  %v4257_v0 = vpop.f32.mrb[31].mxu1  ;;  %v3995_v2 = vpop.f32.mrb[31].mxu0 }
 0x125   : > { %3162 = vst.msk [vmem:[%s4930_s16 + $0x2c] sm:$0xf] %vm3150_vm4, %v3713_v58  ;;  %v3714_v3 = vpack.c.bf16 %v2522_v59, %v2522_v59  ;;  %v2260_v4 = vadd.f32 %v2233_v62, %v965_v39  ;;  %v4566_v58 = vld [vmem:[%s4715_s7 + $0x128] sm:$0xff]  }
 0x126   : > { %v2232_v5 = vsel %vm2118_vm3, %v2001_v54, %v2002_v63  ;;  %4363 = vmatmul.mubr.msk.bf16.gmra.mrb[136].mxu1 %vm680_vm2, %v4563_v56  ;;  %4101 = vmatmul.mubr.msk.bf16.gmra.mrb[136].mxu0 %vm680_vm2, %v4563_v56 }
 0x127   : > { %3163 = vst.msk [vmem:[%s4930_s16 + $0x30] sm:$0xf] %vm3150_vm4, %v3714_v3  ;;  %v2395_v6 = vadd.f32 %v4917_v46, %v2260_v4  ;;  %v2261_v7 = vadd.f32 %v2232_v5, %v970_v53  ;;  %4366 = vmatprep.mubr.msk.bf16.mxu1 %vm4638_vm1, %v4637_v1  ;;  %4104 = vmatprep.mubr.msk.bf16.mxu0 %vm4638_vm1, %v4637_v1 }
 0x129   : > { %v2523_v8 = vmax.f32 %v2395_v6, 0.0  ;;  %v2396_v9 = vadd.f32 %v4917_v46, %v2261_v7  ;;  %v1533_v10 = vpop.f32.mrb[32].mxu1  ;;  %v978_v11 = vpop.f32.mrb[32].mxu0 }
 0x12a   : > { %v2003_v12 = vrot.slane %v1533_v10, 1  ;;  %v4260_v13 = vpop.f32.mrb[33].mxu1  ;;  %v3998_v15 = vpop.f32.mrb[33].mxu0 }
 0x12b   : > { %v3715_v16 = vpack.c.bf16 %v2523_v8, %v2523_v8  ;;  %v2524_v17 = vmax.f32 %v2396_v9, 0.0  ;;  %v1536_v18 = vpop.f32.mrb[34].mxu1  ;;  %v981_v19 = vpop.f32.mrb[34].mxu0 }
 0x12c   : > { %v2231_v20 = vsel %vm2118_vm3, %v2002_v63, %v2003_v12  ;;  %v2004_v21 = vrot.slane %v1536_v18, 1  ;;  %v4261_v22 = vpop.f32.mrb[35].mxu1  ;;  %v3999_v23 = vpop.f32.mrb[35].mxu0 }
 0x12d   : > { %3164 = vst.msk [vmem:[%s4930_s16 + $0x34] sm:$0xf] %vm3150_vm4, %v3715_v16  ;;  %v3716_v24 = vpack.c.bf16 %v2524_v17, %v2524_v17  ;;  %v2262_v25 = vadd.f32 %v2231_v20, %v973_v61  ;;  %v4567_v16 = vld [vmem:[%s4715_s7 + $0x130] sm:$0xff]  }
 0x12e   : > { %v2230_v26 = vsel %vm2118_vm3, %v2003_v12, %v2004_v21  ;;  %4367 = vmatmul.mubr.msk.bf16.gmra.mrb[140].mxu1 %vm680_vm2, %v4564_v14  ;;  %4105 = vmatmul.mubr.msk.bf16.gmra.mrb[140].mxu0 %vm680_vm2, %v4564_v14 }
 0x12f   : > { %3165 = vst.msk [vmem:[%s4930_s16 + $0x38] sm:$0xf] %vm3150_vm4, %v3716_v24  ;;  %v2397_v27 = vadd.f32 %v4917_v46, %v2262_v25  ;;  %v2263_v28 = vadd.f32 %v2230_v26, %v978_v11  ;;  %4370 = vmatprep.mubr.msk.bf16.mxu1 %vm4638_vm1, %v4637_v1  ;;  %4108 = vmatprep.mubr.msk.bf16.mxu0 %vm4638_vm1, %v4637_v1 }
 0x131   : > { %v2525_v29 = vmax.f32 %v2397_v27, 0.0  ;;  %v2398_v30 = vadd.f32 %v4917_v46, %v2263_v28  ;;  %v1541_v31 = vpop.f32.mrb[36].mxu1  ;;  %v986_v32 = vpop.f32.mrb[36].mxu0 }
 0x132   : > { %v2005_v34 = vrot.slane %v1541_v31, 1  ;;  %v4264_v35 = vpop.f32.mrb[37].mxu1  ;;  %v4002_v37 = vpop.f32.mrb[37].mxu0 }
 0x133   : > { %v3717_v38 = vpack.c.bf16 %v2525_v29, %v2525_v29  ;;  %v2526_v39 = vmax.f32 %v2398_v30, 0.0  ;;  %v1544_v40 = vpop.f32.mrb[38].mxu1  ;;  %v989_v41 = vpop.f32.mrb[38].mxu0 }
 0x134   : > { %v2229_v42 = vsel %vm2118_vm3, %v2004_v21, %v2005_v34  ;;  %v2006_v43 = vrot.slane %v1544_v40, 1  ;;  %v4265_v44 = vpop.f32.mrb[39].mxu1  ;;  %v4003_v45 = vpop.f32.mrb[39].mxu0 }
 0x135   : > { %3166 = vst.msk [vmem:[%s4930_s16 + $0x3c] sm:$0xf] %vm3150_vm4, %v3717_v38  ;;  %v3718_v47 = vpack.c.bf16 %v2526_v39, %v2526_v39  ;;  %v2264_v48 = vadd.f32 %v2229_v42, %v981_v19  ;;  %v4568_v38 = vld [vmem:[%s4715_s7 + $0x138] sm:$0xff]  }
 0x136   : > { %v2228_v49 = vsel %vm2118_vm3, %v2005_v34, %v2006_v43  ;;  %4371 = vmatmul.mubr.msk.bf16.gmra.mrb[144].mxu1 %vm680_vm2, %v4565_v36  ;;  %4109 = vmatmul.mubr.msk.bf16.gmra.mrb[144].mxu0 %vm680_vm2, %v4565_v36 }
 0x137   : > { %3167 = vst.msk [vmem:[%s4930_s16 + $0x40] sm:$0xf] %vm3150_vm4, %v3718_v47  ;;  %v2399_v50 = vadd.f32 %v4917_v46, %v2264_v48  ;;  %v2265_v51 = vadd.f32 %v2228_v49, %v986_v32  ;;  %4374 = vmatprep.mubr.msk.bf16.mxu1 %vm4638_vm1, %v4637_v1  ;;  %4112 = vmatprep.mubr.msk.bf16.mxu0 %vm4638_vm1, %v4637_v1 }
 0x139   : > { %v2527_v52 = vmax.f32 %v2399_v50, 0.0  ;;  %v2400_v53 = vadd.f32 %v4917_v46, %v2265_v51  ;;  %v1549_v54 = vpop.f32.mrb[40].mxu1  ;;  %v994_v55 = vpop.f32.mrb[40].mxu0 }
 0x13a   : > { %v2007_v56 = vrot.slane %v1549_v54, 1  ;;  %v4268_v57 = vpop.f32.mrb[41].mxu1  ;;  %v4006_v59 = vpop.f32.mrb[41].mxu0 }
 0x13b   : > { %v3719_v60 = vpack.c.bf16 %v2527_v52, %v2527_v52  ;;  %v2528_v61 = vmax.f32 %v2400_v53, 0.0  ;;  %v1552_v62 = vpop.f32.mrb[42].mxu1  ;;  %v997_v63 = vpop.f32.mrb[42].mxu0 }
 0x13c   : > { %v2227_v0 = vsel %vm2118_vm3, %v2006_v43, %v2007_v56  ;;  %v2008_v2 = vrot.slane %v1552_v62, 1  ;;  %v4269_v3 = vpop.f32.mrb[43].mxu1  ;;  %v4007_v4 = vpop.f32.mrb[43].mxu0 }
 0x13d   : > { %3168 = vst.msk [vmem:[%s4930_s16 + $0x44] sm:$0xf] %vm3150_vm4, %v3719_v60  ;;  %v3720_v5 = vpack.c.bf16 %v2528_v61, %v2528_v61  ;;  %v2266_v6 = vadd.f32 %v2227_v0, %v989_v41  ;;  %v4569_v60 = vld [vmem:[%s4715_s7 + $0x140] sm:$0xff]  }
 0x13e   : > { %v2226_v7 = vsel %vm2118_vm3, %v2007_v56, %v2008_v2  ;;  %4375 = vmatmul.mubr.msk.bf16.gmra.mrb[148].mxu1 %vm680_vm2, %v4566_v58  ;;  %4113 = vmatmul.mubr.msk.bf16.gmra.mrb[148].mxu0 %vm680_vm2, %v4566_v58 }
 0x13f   : > { %3169 = vst.msk [vmem:[%s4930_s16 + $0x48] sm:$0xf] %vm3150_vm4, %v3720_v5  ;;  %v2401_v8 = vadd.f32 %v4917_v46, %v2266_v6  ;;  %v2267_v9 = vadd.f32 %v2226_v7, %v994_v55  ;;  %4378 = vmatprep.mubr.msk.bf16.mxu1 %vm4638_vm1, %v4637_v1  ;;  %4116 = vmatprep.mubr.msk.bf16.mxu0 %vm4638_vm1, %v4637_v1 }
 0x141   : > { %v2529_v10 = vmax.f32 %v2401_v8, 0.0  ;;  %v2402_v11 = vadd.f32 %v4917_v46, %v2267_v9  ;;  %v1557_v12 = vpop.f32.mrb[44].mxu1  ;;  %v1002_v13 = vpop.f32.mrb[44].mxu0 }
 0x142   : > { %v2009_v14 = vrot.slane %v1557_v12, 1  ;;  %v4272_v15 = vpop.f32.mrb[45].mxu1  ;;  %v4010_v17 = vpop.f32.mrb[45].mxu0 }
 0x143   : > { %v3721_v18 = vpack.c.bf16 %v2529_v10, %v2529_v10  ;;  %v2530_v19 = vmax.f32 %v2402_v11, 0.0  ;;  %v1560_v20 = vpop.f32.mrb[46].mxu1  ;;  %v1005_v21 = vpop.f32.mrb[46].mxu0 }
 0x144   : > { %v2225_v22 = vsel %vm2118_vm3, %v2008_v2, %v2009_v14  ;;  %v2010_v23 = vrot.slane %v1560_v20, 1  ;;  %v4273_v24 = vpop.f32.mrb[47].mxu1  ;;  %v4011_v25 = vpop.f32.mrb[47].mxu0 }
 0x145   : > { %3170 = vst.msk [vmem:[%s4930_s16 + $0x4c] sm:$0xf] %vm3150_vm4, %v3721_v18  ;;  %v3722_v26 = vpack.c.bf16 %v2530_v19, %v2530_v19  ;;  %v2268_v27 = vadd.f32 %v2225_v22, %v997_v63  ;;  %v4570_v18 = vld [vmem:[%s4715_s7 + $0x148] sm:$0xff]  }
 0x146   : > { %v2224_v28 = vsel %vm2118_vm3, %v2009_v14, %v2010_v23  ;;  %4379 = vmatmul.mubr.msk.bf16.gmra.mrb[152].mxu1 %vm680_vm2, %v4567_v16  ;;  %4117 = vmatmul.mubr.msk.bf16.gmra.mrb[152].mxu0 %vm680_vm2, %v4567_v16 }
 0x147   : > { %3171 = vst.msk [vmem:[%s4930_s16 + $0x50] sm:$0xf] %vm3150_vm4, %v3722_v26  ;;  %v2403_v29 = vadd.f32 %v4917_v46, %v2268_v27  ;;  %v2269_v30 = vadd.f32 %v2224_v28, %v1002_v13  ;;  %4382 = vmatprep.mubr.msk.bf16.mxu1 %vm4638_vm1, %v4637_v1  ;;  %4120 = vmatprep.mubr.msk.bf16.mxu0 %vm4638_vm1, %v4637_v1 }
 0x149   : > { %v2531_v31 = vmax.f32 %v2403_v29, 0.0  ;;  %v2404_v32 = vadd.f32 %v4917_v46, %v2269_v30  ;;  %v1565_v34 = vpop.f32.mrb[48].mxu1  ;;  %v1010_v35 = vpop.f32.mrb[48].mxu0 }
 0x14a   : > { %v2011_v36 = vrot.slane %v1565_v34, 1  ;;  %v4276_v37 = vpop.f32.mrb[49].mxu1  ;;  %v4014_v39 = vpop.f32.mrb[49].mxu0 }
 0x14b   : > { %v3723_v40 = vpack.c.bf16 %v2531_v31, %v2531_v31  ;;  %v2532_v41 = vmax.f32 %v2404_v32, 0.0  ;;  %v1568_v42 = vpop.f32.mrb[50].mxu1  ;;  %v1013_v43 = vpop.f32.mrb[50].mxu0 }
 0x14c   : > { %v2223_v44 = vsel %vm2118_vm3, %v2010_v23, %v2011_v36  ;;  %v2012_v45 = vrot.slane %v1568_v42, 1  ;;  %v4277_v47 = vpop.f32.mrb[51].mxu1  ;;  %v4015_v48 = vpop.f32.mrb[51].mxu0 }
 0x14d   : > { %3172 = vst.msk [vmem:[%s4930_s16 + $0x54] sm:$0xf] %vm3150_vm4, %v3723_v40  ;;  %v3724_v49 = vpack.c.bf16 %v2532_v41, %v2532_v41  ;;  %v2270_v50 = vadd.f32 %v2223_v44, %v1005_v21  ;;  %v4571_v40 = vld [vmem:[%s4715_s7 + $0x150] sm:$0xff]  }
 0x14e   : > { %v2222_v51 = vsel %vm2118_vm3, %v2011_v36, %v2012_v45  ;;  %4383 = vmatmul.mubr.msk.bf16.gmra.mrb[156].mxu1 %vm680_vm2, %v4568_v38  ;;  %4121 = vmatmul.mubr.msk.bf16.gmra.mrb[156].mxu0 %vm680_vm2, %v4568_v38 }
 0x14f   : > { %3173 = vst.msk [vmem:[%s4930_s16 + $0x58] sm:$0xf] %vm3150_vm4, %v3724_v49  ;;  %v2405_v52 = vadd.f32 %v4917_v46, %v2270_v50  ;;  %v2271_v53 = vadd.f32 %v2222_v51, %v1010_v35  ;;  %4386 = vmatprep.mubr.msk.bf16.mxu1 %vm4638_vm1, %v4637_v1  ;;  %4124 = vmatprep.mubr.msk.bf16.mxu0 %vm4638_vm1, %v4637_v1 }
 0x151   : > { %v2533_v54 = vmax.f32 %v2405_v52, 0.0  ;;  %v2406_v55 = vadd.f32 %v4917_v46, %v2271_v53  ;;  %v1573_v56 = vpop.f32.mrb[52].mxu1  ;;  %v1018_v57 = vpop.f32.mrb[52].mxu0 }
 0x152   : > { %v2013_v58 = vrot.slane %v1573_v56, 1  ;;  %v4280_v59 = vpop.f32.mrb[53].mxu1  ;;  %v4018_v61 = vpop.f32.mrb[53].mxu0 }
 0x153   : > { %v3725_v62 = vpack.c.bf16 %v2533_v54, %v2533_v54  ;;  %v2534_v63 = vmax.f32 %v2406_v55, 0.0  ;;  %v1576_v0 = vpop.f32.mrb[54].mxu1  ;;  %v1021_v2 = vpop.f32.mrb[54].mxu0 }
 0x154   : > { %v2221_v3 = vsel %vm2118_vm3, %v2012_v45, %v2013_v58  ;;  %v2014_v4 = vrot.slane %v1576_v0, 1  ;;  %v4281_v5 = vpop.f32.mrb[55].mxu1  ;;  %v4019_v6 = vpop.f32.mrb[55].mxu0 }
 0x155   : > { %3174 = vst.msk [vmem:[%s4930_s16 + $0x5c] sm:$0xf] %vm3150_vm4, %v3725_v62  ;;  %v3726_v7 = vpack.c.bf16 %v2534_v63, %v2534_v63  ;;  %v2272_v8 = vadd.f32 %v2221_v3, %v1013_v43  ;;  %v4572_v62 = vld [vmem:[%s4715_s7 + $0x158] sm:$0xff]  }
 0x156   : > { %v2220_v9 = vsel %vm2118_vm3, %v2013_v58, %v2014_v4  ;;  %4387 = vmatmul.mubr.msk.bf16.gmra.mrb[160].mxu1 %vm680_vm2, %v4569_v60  ;;  %4125 = vmatmul.mubr.msk.bf16.gmra.mrb[160].mxu0 %vm680_vm2, %v4569_v60 }
 0x157   : > { %3175 = vst.msk [vmem:[%s4930_s16 + $0x60] sm:$0xf] %vm3150_vm4, %v3726_v7  ;;  %v2407_v10 = vadd.f32 %v4917_v46, %v2272_v8  ;;  %v2273_v11 = vadd.f32 %v2220_v9, %v1018_v57  ;;  %4390 = vmatprep.mubr.msk.bf16.mxu1 %vm4638_vm1, %v4637_v1  ;;  %4128 = vmatprep.mubr.msk.bf16.mxu0 %vm4638_vm1, %v4637_v1 }
 0x159   : > { %v2535_v12 = vmax.f32 %v2407_v10, 0.0  ;;  %v2408_v13 = vadd.f32 %v4917_v46, %v2273_v11  ;;  %v1581_v14 = vpop.f32.mrb[56].mxu1  ;;  %v1026_v15 = vpop.f32.mrb[56].mxu0 }
 0x15a   : > { %v2015_v16 = vrot.slane %v1581_v14, 1  ;;  %v4284_v17 = vpop.f32.mrb[57].mxu1  ;;  %v4022_v19 = vpop.f32.mrb[57].mxu0 }
 0x15b   : > { %v3727_v20 = vpack.c.bf16 %v2535_v12, %v2535_v12  ;;  %v2536_v21 = vmax.f32 %v2408_v13, 0.0  ;;  %v1584_v22 = vpop.f32.mrb[58].mxu1  ;;  %v1029_v23 = vpop.f32.mrb[58].mxu0 }
 0x15c   : > { %v2219_v24 = vsel %vm2118_vm3, %v2014_v4, %v2015_v16  ;;  %v2016_v25 = vrot.slane %v1584_v22, 1  ;;  %v4285_v26 = vpop.f32.mrb[59].mxu1  ;;  %v4023_v27 = vpop.f32.mrb[59].mxu0 }
 0x15d   : > { %3176 = vst.msk [vmem:[%s4930_s16 + $0x64] sm:$0xf] %vm3150_vm4, %v3727_v20  ;;  %v3728_v28 = vpack.c.bf16 %v2536_v21, %v2536_v21  ;;  %v2274_v29 = vadd.f32 %v2219_v24, %v1021_v2  ;;  %v4573_v20 = vld [vmem:[%s4715_s7 + $0x160] sm:$0xff]  }
 0x15e   : > { %v2218_v30 = vsel %vm2118_vm3, %v2015_v16, %v2016_v25  ;;  %4391 = vmatmul.mubr.msk.bf16.gmra.mrb[164].mxu1 %vm680_vm2, %v4570_v18  ;;  %4129 = vmatmul.mubr.msk.bf16.gmra.mrb[164].mxu0 %vm680_vm2, %v4570_v18 }
 0x15f   : > { %3177 = vst.msk [vmem:[%s4930_s16 + $0x68] sm:$0xf] %vm3150_vm4, %v3728_v28  ;;  %v2409_v31 = vadd.f32 %v4917_v46, %v2274_v29  ;;  %v2275_v32 = vadd.f32 %v2218_v30, %v1026_v15  ;;  %4394 = vmatprep.mubr.msk.bf16.mxu1 %vm4638_vm1, %v4637_v1  ;;  %4132 = vmatprep.mubr.msk.bf16.mxu0 %vm4638_vm1, %v4637_v1 }
 0x161   : > { %v2537_v34 = vmax.f32 %v2409_v31, 0.0  ;;  %v2410_v35 = vadd.f32 %v4917_v46, %v2275_v32  ;;  %v1589_v36 = vpop.f32.mrb[60].mxu1  ;;  %v1034_v37 = vpop.f32.mrb[60].mxu0 }
 0x162   : > { %v2017_v38 = vrot.slane %v1589_v36, 1  ;;  %v4288_v39 = vpop.f32.mrb[61].mxu1  ;;  %v4026_v41 = vpop.f32.mrb[61].mxu0 }
 0x163   : > { %v3729_v42 = vpack.c.bf16 %v2537_v34, %v2537_v34  ;;  %v2538_v43 = vmax.f32 %v2410_v35, 0.0  ;;  %v1592_v44 = vpop.f32.mrb[62].mxu1  ;;  %v1037_v45 = vpop.f32.mrb[62].mxu0 }
 0x164   : > { %v2217_v47 = vsel %vm2118_vm3, %v2016_v25, %v2017_v38  ;;  %v2018_v48 = vrot.slane %v1592_v44, 1  ;;  %v4289_v49 = vpop.f32.mrb[63].mxu1  ;;  %v4027_v50 = vpop.f32.mrb[63].mxu0 }
 0x165   : > { %3178 = vst.msk [vmem:[%s4930_s16 + $0x6c] sm:$0xf] %vm3150_vm4, %v3729_v42  ;;  %v3730_v51 = vpack.c.bf16 %v2538_v43, %v2538_v43  ;;  %v2276_v52 = vadd.f32 %v2217_v47, %v1029_v23  ;;  %v4574_v42 = vld [vmem:[%s4715_s7 + $0x168] sm:$0xff]  }
 0x166   : > { %v2216_v53 = vsel %vm2118_vm3, %v2017_v38, %v2018_v48  ;;  %4395 = vmatmul.mubr.msk.bf16.gmra.mrb[168].mxu1 %vm680_vm2, %v4571_v40  ;;  %4133 = vmatmul.mubr.msk.bf16.gmra.mrb[168].mxu0 %vm680_vm2, %v4571_v40 }
 0x167   : > { %3179 = vst.msk [vmem:[%s4930_s16 + $0x70] sm:$0xf] %vm3150_vm4, %v3730_v51  ;;  %v2411_v54 = vadd.f32 %v4917_v46, %v2276_v52  ;;  %v2277_v55 = vadd.f32 %v2216_v53, %v1034_v37  ;;  %4398 = vmatprep.mubr.msk.bf16.mxu1 %vm4638_vm1, %v4637_v1  ;;  %4136 = vmatprep.mubr.msk.bf16.mxu0 %vm4638_vm1, %v4637_v1 }
 0x169   : > { %v2539_v56 = vmax.f32 %v2411_v54, 0.0  ;;  %v2412_v57 = vadd.f32 %v4917_v46, %v2277_v55  ;;  %v1597_v58 = vpop.f32.mrb[64].mxu1  ;;  %v1042_v59 = vpop.f32.mrb[64].mxu0 }
 0x16a   : > { %v2019_v60 = vrot.slane %v1597_v58, 1  ;;  %v4292_v61 = vpop.f32.mrb[65].mxu1  ;;  %v4030_v63 = vpop.f32.mrb[65].mxu0 }
 0x16b   : > { %v3731_v0 = vpack.c.bf16 %v2539_v56, %v2539_v56  ;;  %v2540_v2 = vmax.f32 %v2412_v57, 0.0  ;;  %v1600_v3 = vpop.f32.mrb[66].mxu1  ;;  %v1045_v4 = vpop.f32.mrb[66].mxu0 }
 0x16c   : > { %v2215_v5 = vsel %vm2118_vm3, %v2018_v48, %v2019_v60  ;;  %v2020_v6 = vrot.slane %v1600_v3, 1  ;;  %v4293_v7 = vpop.f32.mrb[67].mxu1  ;;  %v4031_v8 = vpop.f32.mrb[67].mxu0 }
 0x16d   : > { %3180 = vst.msk [vmem:[%s4930_s16 + $0x74] sm:$0xf] %vm3150_vm4, %v3731_v0  ;;  %v3732_v9 = vpack.c.bf16 %v2540_v2, %v2540_v2  ;;  %v2278_v10 = vadd.f32 %v2215_v5, %v1037_v45  ;;  %v4575_v0 = vld [vmem:[%s4715_s7 + $0x170] sm:$0xff]  }
 0x16e   : > { %v2214_v11 = vsel %vm2118_vm3, %v2019_v60, %v2020_v6  ;;  %4399 = vmatmul.mubr.msk.bf16.gmra.mrb[172].mxu1 %vm680_vm2, %v4572_v62  ;;  %4137 = vmatmul.mubr.msk.bf16.gmra.mrb[172].mxu0 %vm680_vm2, %v4572_v62 }
 0x16f   : > { %3181 = vst.msk [vmem:[%s4930_s16 + $0x78] sm:$0xf] %vm3150_vm4, %v3732_v9  ;;  %v2413_v12 = vadd.f32 %v4917_v46, %v2278_v10  ;;  %v2279_v13 = vadd.f32 %v2214_v11, %v1042_v59  ;;  %4402 = vmatprep.mubr.msk.bf16.mxu1 %vm4638_vm1, %v4637_v1  ;;  %4140 = vmatprep.mubr.msk.bf16.mxu0 %vm4638_vm1, %v4637_v1 }
 0x171   : > { %v2541_v14 = vmax.f32 %v2413_v12, 0.0  ;;  %v2414_v15 = vadd.f32 %v4917_v46, %v2279_v13  ;;  %v1605_v16 = vpop.f32.mrb[68].mxu1  ;;  %v1050_v17 = vpop.f32.mrb[68].mxu0  ;;  %v5249_v13 = vld [vmem:[%s5851_s3] ss:$0 sm:$0xff] }
 0x172   : > { %v2021_v18 = vrot.slane %v1605_v16, 1  ;;  %v4296_v19 = vpop.f32.mrb[69].mxu1  ;;  %v4034_v21 = vpop.f32.mrb[69].mxu0 }
 0x173   : > { %v3733_v22 = vpack.c.bf16 %v2541_v14, %v2541_v14  ;;  %v2542_v23 = vmax.f32 %v2414_v15, 0.0  ;;  %v1608_v24 = vpop.f32.mrb[70].mxu1  ;;  %v1053_v25 = vpop.f32.mrb[70].mxu0 }
 0x174   : > { %v2213_v26 = vsel %vm2118_vm3, %v2020_v6, %v2021_v18  ;;  %v2022_v27 = vrot.slane %v1608_v24, 1  ;;  %v4297_v28 = vpop.f32.mrb[71].mxu1  ;;  %v4035_v29 = vpop.f32.mrb[71].mxu0 }
 0x175   : > { %3182 = vst.msk [vmem:[%s4930_s16 + $0x7c] sm:$0xf] %vm3150_vm4, %v3733_v22  ;;  %v3734_v30 = vpack.c.bf16 %v2542_v23, %v2542_v23  ;;  %v2280_v31 = vadd.f32 %v2213_v26, %v1045_v4  ;;  %v4576_v22 = vld [vmem:[%s4715_s7 + $0x178] sm:$0xff]  }
 0x176   : > { %v2212_v32 = vsel %vm2118_vm3, %v2021_v18, %v2022_v27  ;;  %4403 = vmatmul.mubr.msk.bf16.gmra.mrb[176].mxu1 %vm680_vm2, %v4573_v20  ;;  %4141 = vmatmul.mubr.msk.bf16.gmra.mrb[176].mxu0 %vm680_vm2, %v4573_v20 }
 0x177   : > { %3183 = vst.msk [vmem:[%s4930_s16 + $0x80] sm:$0xf] %vm3150_vm4, %v3734_v30  ;;  %v2415_v34 = vadd.f32 %v4917_v46, %v2280_v31  ;;  %v2281_v35 = vadd.f32 %v2212_v32, %v1050_v17  ;;  %4406 = vmatprep.mubr.msk.bf16.mxu1 %vm4638_vm1, %v4637_v1  ;;  %4144 = vmatprep.mubr.msk.bf16.mxu0 %vm4638_vm1, %v4637_v1 }
 0x179   : > { %v2543_v36 = vmax.f32 %v2415_v34, 0.0  ;;  %v2416_v37 = vadd.f32 %v4917_v46, %v2281_v35  ;;  %v1613_v38 = vpop.f32.mrb[72].mxu1  ;;  %v1058_v39 = vpop.f32.mrb[72].mxu0 }
 0x17a   : > { %v2023_v40 = vrot.slane %v1613_v38, 1  ;;  %v4300_v41 = vpop.f32.mrb[73].mxu1  ;;  %v4038_v43 = vpop.f32.mrb[73].mxu0 }
 0x17b   : > { %v3735_v44 = vpack.c.bf16 %v2543_v36, %v2543_v36  ;;  %v2544_v45 = vmax.f32 %v2416_v37, 0.0  ;;  %v1616_v47 = vpop.f32.mrb[74].mxu1  ;;  %v1061_v48 = vpop.f32.mrb[74].mxu0 }
 0x17c   : > { %v2211_v49 = vsel %vm2118_vm3, %v2022_v27, %v2023_v40  ;;  %v2024_v50 = vrot.slane %v1616_v47, 1  ;;  %v4301_v51 = vpop.f32.mrb[75].mxu1  ;;  %v4039_v52 = vpop.f32.mrb[75].mxu0 }
 0x17d   : > { %3184 = vst.msk [vmem:[%s4930_s16 + $0x84] sm:$0xf] %vm3150_vm4, %v3735_v44  ;;  %v3736_v53 = vpack.c.bf16 %v2544_v45, %v2544_v45  ;;  %v2282_v54 = vadd.f32 %v2211_v49, %v1053_v25  ;;  %v4577_v44 = vld [vmem:[%s4715_s7 + $0x180] sm:$0xff]  }
 0x17e   : > { %v2210_v55 = vsel %vm2118_vm3, %v2023_v40, %v2024_v50  ;;  %4407 = vmatmul.mubr.msk.bf16.gmra.mrb[180].mxu1 %vm680_vm2, %v4574_v42  ;;  %4145 = vmatmul.mubr.msk.bf16.gmra.mrb[180].mxu0 %vm680_vm2, %v4574_v42 }
 0x17f   : > { %3185 = vst.msk [vmem:[%s4930_s16 + $0x88] sm:$0xf] %vm3150_vm4, %v3736_v53  ;;  %v2417_v56 = vadd.f32 %v4917_v46, %v2282_v54  ;;  %v2283_v57 = vadd.f32 %v2210_v55, %v1058_v39  ;;  %4410 = vmatprep.mubr.msk.bf16.mxu1 %vm4638_vm1, %v4637_v1  ;;  %4148 = vmatprep.mubr.msk.bf16.mxu0 %vm4638_vm1, %v4637_v1 }
 0x181   : > { %v2545_v58 = vmax.f32 %v2417_v56, 0.0  ;;  %v2418_v59 = vadd.f32 %v4917_v46, %v2283_v57  ;;  %v1621_v60 = vpop.f32.mrb[76].mxu1  ;;  %v1066_v61 = vpop.f32.mrb[76].mxu0 }
 0x182   : > { %v2025_v62 = vrot.slane %v1621_v60, 1  ;;  %v4304_v63 = vpop.f32.mrb[77].mxu1  ;;  %v4042_v2 = vpop.f32.mrb[77].mxu0 }
 0x183   : > { %v3737_v3 = vpack.c.bf16 %v2545_v58, %v2545_v58  ;;  %v2546_v4 = vmax.f32 %v2418_v59, 0.0  ;;  %v1624_v5 = vpop.f32.mrb[78].mxu1  ;;  %v1069_v6 = vpop.f32.mrb[78].mxu0 }
 0x184   : > { %v2209_v7 = vsel %vm2118_vm3, %v2024_v50, %v2025_v62  ;;  %v2026_v8 = vrot.slane %v1624_v5, 1  ;;  %v4305_v9 = vpop.f32.mrb[79].mxu1  ;;  %v4043_v10 = vpop.f32.mrb[79].mxu0 }
 0x185   : > { %3186 = vst.msk [vmem:[%s4930_s16 + $0x8c] sm:$0xf] %vm3150_vm4, %v3737_v3  ;;  %v3738_v46 = vpack.c.bf16 %v2546_v4, %v2546_v4  ;;  %v2284_v11 = vadd.f32 %v2209_v7, %v1061_v48  ;;  %v4578_v3 = vld [vmem:[%s4715_s7 + $0x188] sm:$0xff]  }
 0x186   : > { %v2208_v12 = vsel %vm2118_vm3, %v2025_v62, %v2026_v8  ;;  %4411 = vmatmul.mubr.msk.bf16.gmra.mrb[184].mxu1 %vm680_vm2, %v4575_v0  ;;  %4149 = vmatmul.mubr.msk.bf16.gmra.mrb[184].mxu0 %vm680_vm2, %v4575_v0 }
 0x187   : > { %3187 = vst.msk [vmem:[%s4930_s16 + $0x90] sm:$0xf] %vm3150_vm4, %v3738_v46  ;;  %v2419_v14 = vadd.f32 %v5249_v13, %v2284_v11  ;;  %v2285_v15 = vadd.f32 %v2208_v12, %v1066_v61  ;;  %4414 = vmatprep.mubr.msk.bf16.mxu1 %vm4638_vm1, %v4637_v1  ;;  %4152 = vmatprep.mubr.msk.bf16.mxu0 %vm4638_vm1, %v4637_v1 }
 0x189   : > { %v2547_v16 = vmax.f32 %v2419_v14, 0.0  ;;  %v2420_v17 = vadd.f32 %v5249_v13, %v2285_v15  ;;  %v1629_v18 = vpop.f32.mrb[80].mxu1  ;;  %v1074_v19 = vpop.f32.mrb[80].mxu0 }
 0x18a   : > { %v2027_v20 = vrot.slane %v1629_v18, 1  ;;  %v4308_v21 = vpop.f32.mrb[81].mxu1  ;;  %v4046_v23 = vpop.f32.mrb[81].mxu0 }
 0x18b   : > { %v3739_v24 = vpack.c.bf16 %v2547_v16, %v2547_v16  ;;  %v2548_v25 = vmax.f32 %v2420_v17, 0.0  ;;  %v1632_v26 = vpop.f32.mrb[82].mxu1  ;;  %v1077_v27 = vpop.f32.mrb[82].mxu0 }
 0x18c   : > { %v2207_v28 = vsel %vm2118_vm3, %v2026_v8, %v2027_v20  ;;  %v2028_v29 = vrot.slane %v1632_v26, 1  ;;  %v4309_v30 = vpop.f32.mrb[83].mxu1  ;;  %v4047_v31 = vpop.f32.mrb[83].mxu0 }
 0x18d   : > { %3188 = vst.msk [vmem:[%s4930_s16 + $0x94] sm:$0xf] %vm3150_vm4, %v3739_v24  ;;  %v3740_v32 = vpack.c.bf16 %v2548_v25, %v2548_v25  ;;  %v2286_v34 = vadd.f32 %v2207_v28, %v1069_v6  ;;  %v4579_v24 = vld [vmem:[%s4715_s7 + $0x190] sm:$0xff]  }
 0x18e   : > { %v2206_v35 = vsel %vm2118_vm3, %v2027_v20, %v2028_v29  ;;  %4415 = vmatmul.mubr.msk.bf16.gmra.mrb[188].mxu1 %vm680_vm2, %v4576_v22  ;;  %4153 = vmatmul.mubr.msk.bf16.gmra.mrb[188].mxu0 %vm680_vm2, %v4576_v22 }
 0x18f   : > { %3189 = vst.msk [vmem:[%s4930_s16 + $0x98] sm:$0xf] %vm3150_vm4, %v3740_v32  ;;  %v2421_v36 = vadd.f32 %v5249_v13, %v2286_v34  ;;  %v2287_v37 = vadd.f32 %v2206_v35, %v1074_v19  ;;  %4418 = vmatprep.mubr.msk.bf16.mxu1 %vm4638_vm1, %v4637_v1  ;;  %4156 = vmatprep.mubr.msk.bf16.mxu0 %vm4638_vm1, %v4637_v1 }
 0x191   : > { %v2549_v38 = vmax.f32 %v2421_v36, 0.0  ;;  %v2422_v39 = vadd.f32 %v5249_v13, %v2287_v37  ;;  %v1637_v40 = vpop.f32.mrb[84].mxu1  ;;  %v1082_v41 = vpop.f32.mrb[84].mxu0 }
 0x192   : > { %v2029_v42 = vrot.slane %v1637_v40, 1  ;;  %v4312_v43 = vpop.f32.mrb[85].mxu1  ;;  %v4050_v45 = vpop.f32.mrb[85].mxu0 }
 0x193   : > { %v3741_v47 = vpack.c.bf16 %v2549_v38, %v2549_v38  ;;  %v2550_v48 = vmax.f32 %v2422_v39, 0.0  ;;  %v1640_v49 = vpop.f32.mrb[86].mxu1  ;;  %v1085_v50 = vpop.f32.mrb[86].mxu0 }
 0x194   : > { %v2205_v51 = vsel %vm2118_vm3, %v2028_v29, %v2029_v42  ;;  %v2030_v52 = vrot.slane %v1640_v49, 1  ;;  %v4313_v53 = vpop.f32.mrb[87].mxu1  ;;  %v4051_v54 = vpop.f32.mrb[87].mxu0 }
 0x195   : > { %3190 = vst.msk [vmem:[%s4930_s16 + $0x9c] sm:$0xf] %vm3150_vm4, %v3741_v47  ;;  %v3742_v55 = vpack.c.bf16 %v2550_v48, %v2550_v48  ;;  %v2288_v56 = vadd.f32 %v2205_v51, %v1077_v27  ;;  %v4580_v47 = vld [vmem:[%s4715_s7 + $0x198] sm:$0xff]  }
 0x196   : > { %v2204_v57 = vsel %vm2118_vm3, %v2029_v42, %v2030_v52  ;;  %4419 = vmatmul.mubr.msk.bf16.gmra.mrb[192].mxu1 %vm680_vm2, %v4577_v44  ;;  %4157 = vmatmul.mubr.msk.bf16.gmra.mrb[192].mxu0 %vm680_vm2, %v4577_v44 }
 0x197   : > { %3191 = vst.msk [vmem:[%s4930_s16 + $0xa0] sm:$0xf] %vm3150_vm4, %v3742_v55  ;;  %v2423_v58 = vadd.f32 %v5249_v13, %v2288_v56  ;;  %v2289_v59 = vadd.f32 %v2204_v57, %v1082_v41  ;;  %4422 = vmatprep.mubr.msk.bf16.mxu1 %vm4638_vm1, %v4637_v1  ;;  %4160 = vmatprep.mubr.msk.bf16.mxu0 %vm4638_vm1, %v4637_v1 }
 0x199   : > { %v2551_v60 = vmax.f32 %v2423_v58, 0.0  ;;  %v2424_v61 = vadd.f32 %v5249_v13, %v2289_v59  ;;  %v1645_v62 = vpop.f32.mrb[88].mxu1  ;;  %v1090_v63 = vpop.f32.mrb[88].mxu0 }
 0x19a   : > { %v2031_v0 = vrot.slane %v1645_v62, 1  ;;  %v4316_v2 = vpop.f32.mrb[89].mxu1  ;;  %v4054_v4 = vpop.f32.mrb[89].mxu0 }
 0x19b   : > { %v3743_v5 = vpack.c.bf16 %v2551_v60, %v2551_v60  ;;  %v2552_v6 = vmax.f32 %v2424_v61, 0.0  ;;  %v1648_v7 = vpop.f32.mrb[90].mxu1  ;;  %v1093_v8 = vpop.f32.mrb[90].mxu0 }
 0x19c   : > { %v2203_v9 = vsel %vm2118_vm3, %v2030_v52, %v2031_v0  ;;  %v2032_v10 = vrot.slane %v1648_v7, 1  ;;  %v4317_v46 = vpop.f32.mrb[91].mxu1  ;;  %v4055_v11 = vpop.f32.mrb[91].mxu0 }
 0x19d   : > { %3192 = vst.msk [vmem:[%s4930_s16 + $0xa4] sm:$0xf] %vm3150_vm4, %v3743_v5  ;;  %v3744_v12 = vpack.c.bf16 %v2552_v6, %v2552_v6  ;;  %v2290_v14 = vadd.f32 %v2203_v9, %v1085_v50  ;;  %v4581_v5 = vld [vmem:[%s4715_s7 + $0x1a0] sm:$0xff]  }
 0x19e   : > { %v2202_v15 = vsel %vm2118_vm3, %v2031_v0, %v2032_v10  ;;  %4423 = vmatmul.mubr.msk.bf16.gmra.mrb[196].mxu1 %vm680_vm2, %v4578_v3  ;;  %4161 = vmatmul.mubr.msk.bf16.gmra.mrb[196].mxu0 %vm680_vm2, %v4578_v3 }
 0x19f   : > { %3193 = vst.msk [vmem:[%s4930_s16 + $0xa8] sm:$0xf] %vm3150_vm4, %v3744_v12  ;;  %v2425_v16 = vadd.f32 %v5249_v13, %v2290_v14  ;;  %v2291_v17 = vadd.f32 %v2202_v15, %v1090_v63  ;;  %4426 = vmatprep.mubr.msk.bf16.mxu1 %vm4638_vm1, %v4637_v1  ;;  %4164 = vmatprep.mubr.msk.bf16.mxu0 %vm4638_vm1, %v4637_v1 }
 0x1a1   : > { %v2553_v18 = vmax.f32 %v2425_v16, 0.0  ;;  %v2426_v19 = vadd.f32 %v5249_v13, %v2291_v17  ;;  %v1653_v20 = vpop.f32.mrb[92].mxu1  ;;  %v1098_v21 = vpop.f32.mrb[92].mxu0 }
 0x1a2   : > { %v2033_v22 = vrot.slane %v1653_v20, 1  ;;  %v4320_v23 = vpop.f32.mrb[93].mxu1  ;;  %v4058_v25 = vpop.f32.mrb[93].mxu0 }
 0x1a3   : > { %v3745_v26 = vpack.c.bf16 %v2553_v18, %v2553_v18  ;;  %v2554_v27 = vmax.f32 %v2426_v19, 0.0  ;;  %v1656_v28 = vpop.f32.mrb[94].mxu1  ;;  %v1101_v29 = vpop.f32.mrb[94].mxu0 }
 0x1a4   : > { %v2201_v30 = vsel %vm2118_vm3, %v2032_v10, %v2033_v22  ;;  %v2034_v31 = vrot.slane %v1656_v28, 1  ;;  %v4321_v32 = vpop.f32.mrb[95].mxu1  ;;  %v4059_v34 = vpop.f32.mrb[95].mxu0 }
 0x1a5   : > { %3194 = vst.msk [vmem:[%s4930_s16 + $0xac] sm:$0xf] %vm3150_vm4, %v3745_v26  ;;  %v3746_v35 = vpack.c.bf16 %v2554_v27, %v2554_v27  ;;  %v2292_v36 = vadd.f32 %v2201_v30, %v1093_v8  ;;  %v4582_v26 = vld [vmem:[%s4715_s7 + $0x1a8] sm:$0xff]  }
 0x1a6   : > { %v2200_v37 = vsel %vm2118_vm3, %v2033_v22, %v2034_v31  ;;  %4427 = vmatmul.mubr.msk.bf16.gmra.mrb[200].mxu1 %vm680_vm2, %v4579_v24  ;;  %4165 = vmatmul.mubr.msk.bf16.gmra.mrb[200].mxu0 %vm680_vm2, %v4579_v24 }
 0x1a7   : > { %3195 = vst.msk [vmem:[%s4930_s16 + $0xb0] sm:$0xf] %vm3150_vm4, %v3746_v35  ;;  %v2427_v38 = vadd.f32 %v5249_v13, %v2292_v36  ;;  %v2293_v39 = vadd.f32 %v2200_v37, %v1098_v21  ;;  %4430 = vmatprep.mubr.msk.bf16.mxu1 %vm4638_vm1, %v4637_v1  ;;  %4168 = vmatprep.mubr.msk.bf16.mxu0 %vm4638_vm1, %v4637_v1 }
 0x1a9   : > { %v2555_v40 = vmax.f32 %v2427_v38, 0.0  ;;  %v2428_v41 = vadd.f32 %v5249_v13, %v2293_v39  ;;  %v1661_v42 = vpop.f32.mrb[96].mxu1  ;;  %v1106_v43 = vpop.f32.mrb[96].mxu0 }
 0x1aa   : > { %v2035_v44 = vrot.slane %v1661_v42, 1  ;;  %v4324_v45 = vpop.f32.mrb[97].mxu1  ;;  %v4062_v48 = vpop.f32.mrb[97].mxu0 }
 0x1ab   : > { %v3747_v49 = vpack.c.bf16 %v2555_v40, %v2555_v40  ;;  %v2556_v50 = vmax.f32 %v2428_v41, 0.0  ;;  %v1664_v51 = vpop.f32.mrb[98].mxu1  ;;  %v1109_v52 = vpop.f32.mrb[98].mxu0 }
 0x1ac   : > { %v2199_v53 = vsel %vm2118_vm3, %v2034_v31, %v2035_v44  ;;  %v2036_v54 = vrot.slane %v1664_v51, 1  ;;  %v4325_v55 = vpop.f32.mrb[99].mxu1  ;;  %v4063_v56 = vpop.f32.mrb[99].mxu0 }
 0x1ad   : > { %3196 = vst.msk [vmem:[%s4930_s16 + $0xb4] sm:$0xf] %vm3150_vm4, %v3747_v49  ;;  %v3748_v57 = vpack.c.bf16 %v2556_v50, %v2556_v50  ;;  %v2294_v58 = vadd.f32 %v2199_v53, %v1101_v29  ;;  %v4583_v49 = vld [vmem:[%s4715_s7 + $0x1b0] sm:$0xff]  }
 0x1ae   : > { %v2198_v59 = vsel %vm2118_vm3, %v2035_v44, %v2036_v54  ;;  %4431 = vmatmul.mubr.msk.bf16.gmra.mrb[204].mxu1 %vm680_vm2, %v4580_v47  ;;  %4169 = vmatmul.mubr.msk.bf16.gmra.mrb[204].mxu0 %vm680_vm2, %v4580_v47 }
 0x1af   : > { %3197 = vst.msk [vmem:[%s4930_s16 + $0xb8] sm:$0xf] %vm3150_vm4, %v3748_v57  ;;  %v2429_v60 = vadd.f32 %v5249_v13, %v2294_v58  ;;  %v2295_v61 = vadd.f32 %v2198_v59, %v1106_v43  ;;  %4434 = vmatprep.mubr.msk.bf16.mxu1 %vm4638_vm1, %v4637_v1  ;;  %4172 = vmatprep.mubr.msk.bf16.mxu0 %vm4638_vm1, %v4637_v1 }
 0x1b1   : > { %v2557_v62 = vmax.f32 %v2429_v60, 0.0  ;;  %v2430_v63 = vadd.f32 %v5249_v13, %v2295_v61  ;;  %v1669_v0 = vpop.f32.mrb[100].mxu1  ;;  %v1114_v2 = vpop.f32.mrb[100].mxu0 }
 0x1b2   : > { %v2037_v3 = vrot.slane %v1669_v0, 1  ;;  %v4328_v4 = vpop.f32.mrb[101].mxu1  ;;  %v4066_v6 = vpop.f32.mrb[101].mxu0 }
 0x1b3   : > { %v3749_v7 = vpack.c.bf16 %v2557_v62, %v2557_v62  ;;  %v2558_v8 = vmax.f32 %v2430_v63, 0.0  ;;  %v1672_v9 = vpop.f32.mrb[102].mxu1  ;;  %v1117_v10 = vpop.f32.mrb[102].mxu0 }
 0x1b4   : > { %v2197_v46 = vsel %vm2118_vm3, %v2036_v54, %v2037_v3  ;;  %v2038_v11 = vrot.slane %v1672_v9, 1  ;;  %v4329_v12 = vpop.f32.mrb[103].mxu1  ;;  %v4067_v14 = vpop.f32.mrb[103].mxu0 }
 0x1b5   : > { %3198 = vst.msk [vmem:[%s4930_s16 + $0xbc] sm:$0xf] %vm3150_vm4, %v3749_v7  ;;  %v3750_v15 = vpack.c.bf16 %v2558_v8, %v2558_v8  ;;  %v2296_v16 = vadd.f32 %v2197_v46, %v1109_v52  ;;  %v4584_v7 = vld [vmem:[%s4715_s7 + $0x1b8] sm:$0xff]  }
 0x1b6   : > { %v2196_v17 = vsel %vm2118_vm3, %v2037_v3, %v2038_v11  ;;  %4435 = vmatmul.mubr.msk.bf16.gmra.mrb[208].mxu1 %vm680_vm2, %v4581_v5  ;;  %4173 = vmatmul.mubr.msk.bf16.gmra.mrb[208].mxu0 %vm680_vm2, %v4581_v5 }
 0x1b7   : > { %3199 = vst.msk [vmem:[%s4930_s16 + $0xc0] sm:$0xf] %vm3150_vm4, %v3750_v15  ;;  %v2431_v18 = vadd.f32 %v5249_v13, %v2296_v16  ;;  %v2297_v19 = vadd.f32 %v2196_v17, %v1114_v2  ;;  %4438 = vmatprep.mubr.msk.bf16.mxu1 %vm4638_vm1, %v4637_v1  ;;  %4176 = vmatprep.mubr.msk.bf16.mxu0 %vm4638_vm1, %v4637_v1 }
 0x1b9   : > { %v2559_v20 = vmax.f32 %v2431_v18, 0.0  ;;  %v2432_v21 = vadd.f32 %v5249_v13, %v2297_v19  ;;  %v1677_v22 = vpop.f32.mrb[104].mxu1  ;;  %v1122_v23 = vpop.f32.mrb[104].mxu0 }
 0x1ba   : > { %v2039_v24 = vrot.slane %v1677_v22, 1  ;;  %v4332_v25 = vpop.f32.mrb[105].mxu1  ;;  %v4070_v27 = vpop.f32.mrb[105].mxu0 }
 0x1bb   : > { %v3751_v28 = vpack.c.bf16 %v2559_v20, %v2559_v20  ;;  %v2560_v29 = vmax.f32 %v2432_v21, 0.0  ;;  %v1680_v30 = vpop.f32.mrb[106].mxu1  ;;  %v1125_v31 = vpop.f32.mrb[106].mxu0 }
 0x1bc   : > { %v2195_v32 = vsel %vm2118_vm3, %v2038_v11, %v2039_v24  ;;  %v2040_v34 = vrot.slane %v1680_v30, 1  ;;  %v4333_v35 = vpop.f32.mrb[107].mxu1  ;;  %v4071_v36 = vpop.f32.mrb[107].mxu0 }
 0x1bd   : > { %3200 = vst.msk [vmem:[%s4930_s16 + $0xc4] sm:$0xf] %vm3150_vm4, %v3751_v28  ;;  %v3752_v37 = vpack.c.bf16 %v2560_v29, %v2560_v29  ;;  %v2298_v38 = vadd.f32 %v2195_v32, %v1117_v10  ;;  %v4585_v28 = vld [vmem:[%s4715_s7 + $0x1c0] sm:$0xff]  }
 0x1be   : > { %v2194_v39 = vsel %vm2118_vm3, %v2039_v24, %v2040_v34  ;;  %4439 = vmatmul.mubr.msk.bf16.gmra.mrb[212].mxu1 %vm680_vm2, %v4582_v26  ;;  %4177 = vmatmul.mubr.msk.bf16.gmra.mrb[212].mxu0 %vm680_vm2, %v4582_v26 }
 0x1bf   : > { %3201 = vst.msk [vmem:[%s4930_s16 + $0xc8] sm:$0xf] %vm3150_vm4, %v3752_v37  ;;  %v2433_v40 = vadd.f32 %v5249_v13, %v2298_v38  ;;  %v2299_v41 = vadd.f32 %v2194_v39, %v1122_v23  ;;  %4442 = vmatprep.mubr.msk.bf16.mxu1 %vm4638_vm1, %v4637_v1  ;;  %4180 = vmatprep.mubr.msk.bf16.mxu0 %vm4638_vm1, %v4637_v1 }
 0x1c1   : > { %v2561_v42 = vmax.f32 %v2433_v40, 0.0  ;;  %v2434_v43 = vadd.f32 %v5249_v13, %v2299_v41  ;;  %v1685_v44 = vpop.f32.mrb[108].mxu1  ;;  %v1130_v45 = vpop.f32.mrb[108].mxu0 }
 0x1c2   : > { %v2041_v47 = vrot.slane %v1685_v44, 1  ;;  %v4336_v48 = vpop.f32.mrb[109].mxu1  ;;  %v4074_v50 = vpop.f32.mrb[109].mxu0 }
 0x1c3   : > { %v3753_v51 = vpack.c.bf16 %v2561_v42, %v2561_v42  ;;  %v2562_v52 = vmax.f32 %v2434_v43, 0.0  ;;  %v1688_v53 = vpop.f32.mrb[110].mxu1  ;;  %v1133_v54 = vpop.f32.mrb[110].mxu0 }
 0x1c4   : > { %v2193_v55 = vsel %vm2118_vm3, %v2040_v34, %v2041_v47  ;;  %v2042_v56 = vrot.slane %v1688_v53, 1  ;;  %v4337_v57 = vpop.f32.mrb[111].mxu1  ;;  %v4075_v58 = vpop.f32.mrb[111].mxu0 }
 0x1c5   : > { %3202 = vst.msk [vmem:[%s4930_s16 + $0xcc] sm:$0xf] %vm3150_vm4, %v3753_v51  ;;  %v3754_v59 = vpack.c.bf16 %v2562_v52, %v2562_v52  ;;  %v2300_v60 = vadd.f32 %v2193_v55, %v1125_v31  ;;  %v4586_v51 = vld [vmem:[%s4715_s7 + $0x1c8] sm:$0xff]  }
 0x1c6   : > { %v2192_v61 = vsel %vm2118_vm3, %v2041_v47, %v2042_v56  ;;  %4443 = vmatmul.mubr.msk.bf16.gmra.mrb[216].mxu1 %vm680_vm2, %v4583_v49  ;;  %4181 = vmatmul.mubr.msk.bf16.gmra.mrb[216].mxu0 %vm680_vm2, %v4583_v49 }
 0x1c7   : > { %3203 = vst.msk [vmem:[%s4930_s16 + $0xd0] sm:$0xf] %vm3150_vm4, %v3754_v59  ;;  %v2435_v62 = vadd.f32 %v5249_v13, %v2300_v60  ;;  %v2301_v63 = vadd.f32 %v2192_v61, %v1130_v45  ;;  %4446 = vmatprep.mubr.msk.bf16.mxu1 %vm4638_vm1, %v4637_v1  ;;  %4184 = vmatprep.mubr.msk.bf16.mxu0 %vm4638_vm1, %v4637_v1 }
 0x1c9   : > { %v2563_v0 = vmax.f32 %v2435_v62, 0.0  ;;  %v2436_v2 = vadd.f32 %v5249_v13, %v2301_v63  ;;  %v1693_v3 = vpop.f32.mrb[112].mxu1  ;;  %v1138_v4 = vpop.f32.mrb[112].mxu0 }
 0x1ca   : > { %v2043_v5 = vrot.slane %v1693_v3, 1  ;;  %v4340_v6 = vpop.f32.mrb[113].mxu1  ;;  %v4078_v8 = vpop.f32.mrb[113].mxu0 }
 0x1cb   : > { %v3755_v9 = vpack.c.bf16 %v2563_v0, %v2563_v0  ;;  %v2564_v10 = vmax.f32 %v2436_v2, 0.0  ;;  %v1696_v46 = vpop.f32.mrb[114].mxu1  ;;  %v1141_v11 = vpop.f32.mrb[114].mxu0 }
 0x1cc   : > { %v2191_v12 = vsel %vm2118_vm3, %v2042_v56, %v2043_v5  ;;  %v2044_v14 = vrot.slane %v1696_v46, 1  ;;  %v4341_v15 = vpop.f32.mrb[115].mxu1  ;;  %v4079_v16 = vpop.f32.mrb[115].mxu0 }
 0x1cd   : > { %3204 = vst.msk [vmem:[%s4930_s16 + $0xd4] sm:$0xf] %vm3150_vm4, %v3755_v9  ;;  %v3756_v17 = vpack.c.bf16 %v2564_v10, %v2564_v10  ;;  %v2302_v18 = vadd.f32 %v2191_v12, %v1133_v54  ;;  %v4587_v9 = vld [vmem:[%s4715_s7 + $0x1d0] sm:$0xff]  }
 0x1ce   : > { %v2190_v19 = vsel %vm2118_vm3, %v2043_v5, %v2044_v14  ;;  %4447 = vmatmul.mubr.msk.bf16.gmra.mrb[220].mxu1 %vm680_vm2, %v4584_v7  ;;  %4185 = vmatmul.mubr.msk.bf16.gmra.mrb[220].mxu0 %vm680_vm2, %v4584_v7 }
 0x1cf   : > { %3205 = vst.msk [vmem:[%s4930_s16 + $0xd8] sm:$0xf] %vm3150_vm4, %v3756_v17  ;;  %v2437_v20 = vadd.f32 %v5249_v13, %v2302_v18  ;;  %v2303_v21 = vadd.f32 %v2190_v19, %v1138_v4  ;;  %4450 = vmatprep.mubr.msk.bf16.mxu1 %vm4638_vm1, %v4637_v1  ;;  %4188 = vmatprep.mubr.msk.bf16.mxu0 %vm4638_vm1, %v4637_v1 }
 0x1d1   : > { %v2565_v22 = vmax.f32 %v2437_v20, 0.0  ;;  %v2438_v23 = vadd.f32 %v5249_v13, %v2303_v21  ;;  %v1701_v24 = vpop.f32.mrb[116].mxu1  ;;  %v1146_v25 = vpop.f32.mrb[116].mxu0 }
 0x1d2   : > { %v2045_v26 = vrot.slane %v1701_v24, 1  ;;  %v4344_v27 = vpop.f32.mrb[117].mxu1  ;;  %v4082_v29 = vpop.f32.mrb[117].mxu0 }
 0x1d3   : > { %v3757_v30 = vpack.c.bf16 %v2565_v22, %v2565_v22  ;;  %v2566_v31 = vmax.f32 %v2438_v23, 0.0  ;;  %v1704_v32 = vpop.f32.mrb[118].mxu1  ;;  %v1149_v34 = vpop.f32.mrb[118].mxu0 }
 0x1d4   : > { %v2189_v35 = vsel %vm2118_vm3, %v2044_v14, %v2045_v26  ;;  %v2046_v36 = vrot.slane %v1704_v32, 1  ;;  %v4345_v37 = vpop.f32.mrb[119].mxu1  ;;  %v4083_v38 = vpop.f32.mrb[119].mxu0 }
 0x1d5   : > { %3206 = vst.msk [vmem:[%s4930_s16 + $0xdc] sm:$0xf] %vm3150_vm4, %v3757_v30  ;;  %v3758_v39 = vpack.c.bf16 %v2566_v31, %v2566_v31  ;;  %v2304_v40 = vadd.f32 %v2189_v35, %v1141_v11  ;;  %v4588_v30 = vld [vmem:[%s4715_s7 + $0x1d8] sm:$0xff]  }
 0x1d6   : > { %v2188_v41 = vsel %vm2118_vm3, %v2045_v26, %v2046_v36  ;;  %4451 = vmatmul.mubr.msk.bf16.gmra.mrb[224].mxu1 %vm680_vm2, %v4585_v28  ;;  %4189 = vmatmul.mubr.msk.bf16.gmra.mrb[224].mxu0 %vm680_vm2, %v4585_v28 }
 0x1d7   : > { %3207 = vst.msk [vmem:[%s4930_s16 + $0xe0] sm:$0xf] %vm3150_vm4, %v3758_v39  ;;  %v2439_v42 = vadd.f32 %v5249_v13, %v2304_v40  ;;  %v2305_v43 = vadd.f32 %v2188_v41, %v1146_v25  ;;  %4454 = vmatprep.mubr.msk.bf16.mxu1 %vm4638_vm1, %v4637_v1  ;;  %4192 = vmatprep.mubr.msk.bf16.mxu0 %vm4638_vm1, %v4637_v1 }
 0x1d9   : > { %v2567_v44 = vmax.f32 %v2439_v42, 0.0  ;;  %v2440_v45 = vadd.f32 %v5249_v13, %v2305_v43  ;;  %v1709_v47 = vpop.f32.mrb[120].mxu1  ;;  %v1154_v48 = vpop.f32.mrb[120].mxu0 }
 0x1da   : > { %v2047_v49 = vrot.slane %v1709_v47, 1  ;;  %v4348_v50 = vpop.f32.mrb[121].mxu1  ;;  %v4086_v52 = vpop.f32.mrb[121].mxu0 }
 0x1db   : > { %v3759_v53 = vpack.c.bf16 %v2567_v44, %v2567_v44  ;;  %v2568_v54 = vmax.f32 %v2440_v45, 0.0  ;;  %v1712_v55 = vpop.f32.mrb[122].mxu1  ;;  %v1157_v56 = vpop.f32.mrb[122].mxu0 }
 0x1dc   : > { %v2187_v57 = vsel %vm2118_vm3, %v2046_v36, %v2047_v49  ;;  %v2048_v58 = vrot.slane %v1712_v55, 1  ;;  %v4349_v59 = vpop.f32.mrb[123].mxu1  ;;  %v4087_v60 = vpop.f32.mrb[123].mxu0 }
 0x1dd   : > { %3208 = vst.msk [vmem:[%s4930_s16 + $0xe4] sm:$0xf] %vm3150_vm4, %v3759_v53  ;;  %v3760_v61 = vpack.c.bf16 %v2568_v54, %v2568_v54  ;;  %v2306_v62 = vadd.f32 %v2187_v57, %v1149_v34  ;;  %v4589_v53 = vld [vmem:[%s4715_s7 + $0x1e0] sm:$0xff]  }
 0x1de   : > { %v2186_v63 = vsel %vm2118_vm3, %v2047_v49, %v2048_v58  ;;  %4455 = vmatmul.mubr.msk.bf16.gmra.mrb[228].mxu1 %vm680_vm2, %v4586_v51  ;;  %4193 = vmatmul.mubr.msk.bf16.gmra.mrb[228].mxu0 %vm680_vm2, %v4586_v51 }
 0x1df   : > { %3209 = vst.msk [vmem:[%s4930_s16 + $0xe8] sm:$0xf] %vm3150_vm4, %v3760_v61  ;;  %v2441_v0 = vadd.f32 %v5249_v13, %v2306_v62  ;;  %v2307_v2 = vadd.f32 %v2186_v63, %v1154_v48  ;;  %4458 = vmatprep.mubr.msk.bf16.mxu1 %vm4638_vm1, %v4637_v1  ;;  %4196 = vmatprep.mubr.msk.bf16.mxu0 %vm4638_vm1, %v4637_v1 }
 0x1e1   : > { %v2569_v3 = vmax.f32 %v2441_v0, 0.0  ;;  %v2442_v4 = vadd.f32 %v5249_v13, %v2307_v2  ;;  %v1717_v5 = vpop.f32.mrb[124].mxu1  ;;  %v1162_v6 = vpop.f32.mrb[124].mxu0 }
 0x1e2   : > { %v2049_v7 = vrot.slane %v1717_v5, 1  ;;  %v4352_v8 = vpop.f32.mrb[125].mxu1  ;;  %v4090_v10 = vpop.f32.mrb[125].mxu0 }
 0x1e3   : > { %v3761_v46 = vpack.c.bf16 %v2569_v3, %v2569_v3  ;;  %v2570_v11 = vmax.f32 %v2442_v4, 0.0  ;;  %v1720_v12 = vpop.f32.mrb[126].mxu1  ;;  %v1165_v14 = vpop.f32.mrb[126].mxu0 }
 0x1e4   : > { %v2185_v15 = vsel %vm2118_vm3, %v2048_v58, %v2049_v7  ;;  %v2050_v16 = vrot.slane %v1720_v12, 1  ;;  %v4353_v17 = vpop.f32.mrb[127].mxu1  ;;  %v4091_v18 = vpop.f32.mrb[127].mxu0 }
 0x1e5   : > { %3210 = vst.msk [vmem:[%s4930_s16 + $0xec] sm:$0xf] %vm3150_vm4, %v3761_v46  ;;  %v3762_v19 = vpack.c.bf16 %v2570_v11, %v2570_v11  ;;  %v2308_v20 = vadd.f32 %v2185_v15, %v1157_v56  ;;  %v4590_v46 = vld [vmem:[%s4715_s7 + $0x1e8] sm:$0xff]  }
 0x1e6   : > { %v2184_v21 = vsel %vm2118_vm3, %v2049_v7, %v2050_v16  ;;  %4459 = vmatmul.mubr.msk.bf16.gmra.mrb[232].mxu1 %vm680_vm2, %v4587_v9  ;;  %4197 = vmatmul.mubr.msk.bf16.gmra.mrb[232].mxu0 %vm680_vm2, %v4587_v9 }
 0x1e7   : > { %3211 = vst.msk [vmem:[%s4930_s16 + $0xf0] sm:$0xf] %vm3150_vm4, %v3762_v19  ;;  %v2443_v22 = vadd.f32 %v5249_v13, %v2308_v20  ;;  %v2309_v23 = vadd.f32 %v2184_v21, %v1162_v6  ;;  %4462 = vmatprep.mubr.msk.bf16.mxu1 %vm4638_vm1, %v4637_v1  ;;  %4200 = vmatprep.mubr.msk.bf16.mxu0 %vm4638_vm1, %v4637_v1 }
 0x1e9   : > { %v2571_v24 = vmax.f32 %v2443_v22, 0.0  ;;  %v2444_v25 = vadd.f32 %v5249_v13, %v2309_v23  ;;  %v1725_v26 = vpop.f32.mrb[128].mxu1  ;;  %v1170_v27 = vpop.f32.mrb[128].mxu0 }
 0x1ea   : > { %v2051_v28 = vrot.slane %v1725_v26, 1  ;;  %v4356_v29 = vpop.f32.mrb[129].mxu1  ;;  %v4094_v31 = vpop.f32.mrb[129].mxu0 }
 0x1eb   : > { %v3763_v32 = vpack.c.bf16 %v2571_v24, %v2571_v24  ;;  %v2572_v34 = vmax.f32 %v2444_v25, 0.0  ;;  %v1728_v35 = vpop.f32.mrb[130].mxu1  ;;  %v1173_v36 = vpop.f32.mrb[130].mxu0 }
 0x1ec   : > { %v2183_v37 = vsel %vm2118_vm3, %v2050_v16, %v2051_v28  ;;  %v2052_v38 = vrot.slane %v1728_v35, 1  ;;  %v4357_v39 = vpop.f32.mrb[131].mxu1  ;;  %v4095_v40 = vpop.f32.mrb[131].mxu0 }
 0x1ed   : > { %3212 = vst.msk [vmem:[%s4930_s16 + $0xf4] sm:$0xf] %vm3150_vm4, %v3763_v32  ;;  %v3764_v41 = vpack.c.bf16 %v2572_v34, %v2572_v34  ;;  %v2310_v42 = vadd.f32 %v2183_v37, %v1165_v14  ;;  %v4591_v32 = vld [vmem:[%s4715_s7 + $0x1f0] sm:$0xff]  }
 0x1ee   : > { %v2182_v43 = vsel %vm2118_vm3, %v2051_v28, %v2052_v38  ;;  %4463 = vmatmul.mubr.msk.bf16.gmra.mrb[236].mxu1 %vm680_vm2, %v4588_v30  ;;  %4201 = vmatmul.mubr.msk.bf16.gmra.mrb[236].mxu0 %vm680_vm2, %v4588_v30 }
 0x1ef   : > { %3213 = vst.msk [vmem:[%s4930_s16 + $0xf8] sm:$0xf] %vm3150_vm4, %v3764_v41  ;;  %v2445_v44 = vadd.f32 %v5249_v13, %v2310_v42  ;;  %v2311_v45 = vadd.f32 %v2182_v43, %v1170_v27  ;;  %4466 = vmatprep.mubr.msk.bf16.mxu1 %vm4638_vm1, %v4637_v1  ;;  %4204 = vmatprep.mubr.msk.bf16.mxu0 %vm4638_vm1, %v4637_v1 }
 0x1f1   : > { %v2573_v47 = vmax.f32 %v2445_v44, 0.0  ;;  %v2446_v48 = vadd.f32 %v5249_v13, %v2311_v45  ;;  %v1733_v49 = vpop.f32.mrb[132].mxu1  ;;  %v1178_v50 = vpop.f32.mrb[132].mxu0 }
 0x1f2   : > { %v2053_v51 = vrot.slane %v1733_v49, 1  ;;  %v4360_v52 = vpop.f32.mrb[133].mxu1  ;;  %v4098_v54 = vpop.f32.mrb[133].mxu0 }
 0x1f3   : > { %v3765_v55 = vpack.c.bf16 %v2573_v47, %v2573_v47  ;;  %v2574_v56 = vmax.f32 %v2446_v48, 0.0  ;;  %v1736_v57 = vpop.f32.mrb[134].mxu1  ;;  %v1181_v58 = vpop.f32.mrb[134].mxu0 }
 0x1f4   : > { %v2181_v59 = vsel %vm2118_vm3, %v2052_v38, %v2053_v51  ;;  %v2054_v60 = vrot.slane %v1736_v57, 1  ;;  %v4361_v61 = vpop.f32.mrb[135].mxu1  ;;  %v4099_v62 = vpop.f32.mrb[135].mxu0 }
 0x1f5   : > { %3214 = vst.msk [vmem:[%s4930_s16 + $0xfc] sm:$0xf] %vm3150_vm4, %v3765_v55  ;;  %v3766_v63 = vpack.c.bf16 %v2574_v56, %v2574_v56  ;;  %v2312_v0 = vadd.f32 %v2181_v59, %v1173_v36  ;;  %v4592_v55 = vld [vmem:[%s4715_s7 + $0x1f8] sm:$0xff]  }
 0x1f6   : > { %v2180_v2 = vsel %vm2118_vm3, %v2053_v51, %v2054_v60  ;;  %4467 = vmatmul.mubr.msk.bf16.gmra.mrb[240].mxu1 %vm680_vm2, %v4589_v53  ;;  %4205 = vmatmul.mubr.msk.bf16.gmra.mrb[240].mxu0 %vm680_vm2, %v4589_v53 }
 0x1f7   : > { %3215 = vst.msk [vmem:[%s4930_s16 + $0x100] sm:$0xf] %vm3150_vm4, %v3766_v63  ;;  %v2447_v3 = vadd.f32 %v5249_v13, %v2312_v0  ;;  %v2313_v4 = vadd.f32 %v2180_v2, %v1178_v50  ;;  %4470 = vmatprep.mubr.msk.bf16.mxu1 %vm4638_vm1, %v4637_v1  ;;  %4208 = vmatprep.mubr.msk.bf16.mxu0 %vm4638_vm1, %v4637_v1 }
 0x1f9   : > { %v2575_v5 = vmax.f32 %v2447_v3, 0.0  ;;  %v2448_v6 = vadd.f32 %v5249_v13, %v2313_v4  ;;  %v1741_v7 = vpop.f32.mrb[136].mxu1  ;;  %v1186_v8 = vpop.f32.mrb[136].mxu0 }
 0x1fa   : > { %v2055_v9 = vrot.slane %v1741_v7, 1  ;;  %v4364_v10 = vpop.f32.mrb[137].mxu1  ;;  %v4102_v11 = vpop.f32.mrb[137].mxu0 }
 0x1fb   : > { %v3767_v12 = vpack.c.bf16 %v2575_v5, %v2575_v5  ;;  %v2576_v14 = vmax.f32 %v2448_v6, 0.0  ;;  %v1744_v15 = vpop.f32.mrb[138].mxu1  ;;  %v1189_v16 = vpop.f32.mrb[138].mxu0 }
 0x1fc   : > { %v2179_v17 = vsel %vm2118_vm3, %v2054_v60, %v2055_v9  ;;  %v2056_v18 = vrot.slane %v1744_v15, 1  ;;  %v4365_v19 = vpop.f32.mrb[139].mxu1  ;;  %v4103_v20 = vpop.f32.mrb[139].mxu0 }
 0x1fd   : > { %3216 = vst.msk [vmem:[%s4930_s16 + $0x104] sm:$0xf] %vm3150_vm4, %v3767_v12  ;;  %v3768_v21 = vpack.c.bf16 %v2576_v14, %v2576_v14  ;;  %v2314_v22 = vadd.f32 %v2179_v17, %v1181_v58  ;;  %v4593_v12 = vld [vmem:[%s4715_s7 + $0x200] ss:$0 sps:$4 sm:$0xff]  }
 0x1fe   : > { %v2178_v23 = vsel %vm2118_vm3, %v2055_v9, %v2056_v18  ;;  %4471 = vmatmul.mubr.msk.bf16.gmra.mrb[244].mxu1 %vm680_vm2, %v4590_v46  ;;  %4209 = vmatmul.mubr.msk.bf16.gmra.mrb[244].mxu0 %vm680_vm2, %v4590_v46 }
 0x1ff   : > { %3217 = vst.msk [vmem:[%s4930_s16 + $0x108] sm:$0xf] %vm3150_vm4, %v3768_v21  ;;  %v2449_v24 = vadd.f32 %v5249_v13, %v2314_v22  ;;  %v2315_v25 = vadd.f32 %v2178_v23, %v1186_v8  ;;  %4474 = vmatprep.mubr.msk.bf16.mxu1 %vm4638_vm1, %v4637_v1  ;;  %4212 = vmatprep.mubr.msk.bf16.mxu0 %vm4638_vm1, %v4637_v1 }
 0x201   : > { %v2577_v26 = vmax.f32 %v2449_v24, 0.0  ;;  %v2450_v27 = vadd.f32 %v5249_v13, %v2315_v25  ;;  %v1749_v28 = vpop.f32.mrb[140].mxu1  ;;  %v1194_v29 = vpop.f32.mrb[140].mxu0 }
 0x202   : > { %v2057_v30 = vrot.slane %v1749_v28, 1  ;;  %v4368_v31 = vpop.f32.mrb[141].mxu1  ;;  %v4106_v34 = vpop.f32.mrb[141].mxu0 }
 0x203   : > { %v3769_v35 = vpack.c.bf16 %v2577_v26, %v2577_v26  ;;  %v2578_v36 = vmax.f32 %v2450_v27, 0.0  ;;  %v1752_v37 = vpop.f32.mrb[142].mxu1  ;;  %v1197_v38 = vpop.f32.mrb[142].mxu0 }
 0x204   : > { %v2177_v39 = vsel %vm2118_vm3, %v2056_v18, %v2057_v30  ;;  %v2058_v40 = vrot.slane %v1752_v37, 1  ;;  %v4369_v41 = vpop.f32.mrb[143].mxu1  ;;  %v4107_v42 = vpop.f32.mrb[143].mxu0 }
 0x205   : > { %3218 = vst.msk [vmem:[%s4930_s16 + $0x10c] sm:$0xf] %vm3150_vm4, %v3769_v35  ;;  %v3770_v43 = vpack.c.bf16 %v2578_v36, %v2578_v36  ;;  %v2316_v44 = vadd.f32 %v2177_v39, %v1189_v16 }
 0x206   : > { %v2176_v45 = vsel %vm2118_vm3, %v2057_v30, %v2058_v40  ;;  %4475 = vmatmul.mubr.msk.bf16.gmra.mrb[248].mxu1 %vm680_vm2, %v4591_v32  ;;  %4213 = vmatmul.mubr.msk.bf16.gmra.mrb[248].mxu0 %vm680_vm2, %v4591_v32 }
 0x207   : > { %3219 = vst.msk [vmem:[%s4930_s16 + $0x110] sm:$0xf] %vm3150_vm4, %v3770_v43  ;;  %v2451_v47 = vadd.f32 %v5249_v13, %v2316_v44  ;;  %v2317_v48 = vadd.f32 %v2176_v45, %v1194_v29  ;;  %4478 = vmatprep.mubr.msk.bf16.mxu1 %vm4638_vm1, %v4637_v1  ;;  %4216 = vmatprep.mubr.msk.bf16.mxu0 %vm4638_vm1, %v4637_v1 }
 0x209   : > { %v2579_v49 = vmax.f32 %v2451_v47, 0.0  ;;  %v2452_v50 = vadd.f32 %v5249_v13, %v2317_v48  ;;  %v1757_v51 = vpop.f32.mrb[144].mxu1  ;;  %v1202_v52 = vpop.f32.mrb[144].mxu0 }
 0x20a   : > { %v2059_v53 = vrot.slane %v1757_v51, 1  ;;  %v4372_v54 = vpop.f32.mrb[145].mxu1  ;;  %v4110_v56 = vpop.f32.mrb[145].mxu0 }
 0x20b   : > { %v3771_v57 = vpack.c.bf16 %v2579_v49, %v2579_v49  ;;  %v2580_v58 = vmax.f32 %v2452_v50, 0.0  ;;  %v1760_v59 = vpop.f32.mrb[146].mxu1  ;;  %v1205_v60 = vpop.f32.mrb[146].mxu0 }
 0x20c   : > { %v2175_v61 = vsel %vm2118_vm3, %v2058_v40, %v2059_v53  ;;  %v2060_v62 = vrot.slane %v1760_v59, 1  ;;  %v4373_v63 = vpop.f32.mrb[147].mxu1  ;;  %v4111_v0 = vpop.f32.mrb[147].mxu0 }
 0x20d   : > { %3220 = vst.msk [vmem:[%s4930_s16 + $0x114] sm:$0xf] %vm3150_vm4, %v3771_v57  ;;  %v3772_v2 = vpack.c.bf16 %v2580_v58, %v2580_v58  ;;  %v2318_v3 = vadd.f32 %v2175_v61, %v1197_v38 }
 0x20e   : > { %v2174_v4 = vsel %vm2118_vm3, %v2059_v53, %v2060_v62  ;;  %4479 = vmatmul.mubr.msk.bf16.gmra.mrb[252].mxu1 %vm680_vm2, %v4592_v55  ;;  %4217 = vmatmul.mubr.msk.bf16.gmra.mrb[252].mxu0 %vm680_vm2, %v4592_v55 }
 0x20f   : > { %3221 = vst.msk [vmem:[%s4930_s16 + $0x118] sm:$0xf] %vm3150_vm4, %v3772_v2  ;;  %v2453_v5 = vadd.f32 %v5249_v13, %v2318_v3  ;;  %v2319_v6 = vadd.f32 %v2174_v4, %v1202_v52  ;;  %4482 = vmatprep.mubr.msk.bf16.mxu1 %vm4638_vm1, %v4637_v1  ;;  %4220 = vmatprep.mubr.msk.bf16.mxu0 %vm4638_vm1, %v4637_v1  ;;  %v5580_v3 = vld [vmem:[%s5851_s3] ss:$0 sm:$0xff] }
 0x211   : > { %v2581_v7 = vmax.f32 %v2453_v5, 0.0  ;;  %v2454_v8 = vadd.f32 %v5249_v13, %v2319_v6  ;;  %v1765_v9 = vpop.f32.mrb[148].mxu1  ;;  %v1210_v10 = vpop.f32.mrb[148].mxu0 }
 0x212   : > { %v2061_v46 = vrot.slane %v1765_v9, 1  ;;  %v4376_v11 = vpop.f32.mrb[149].mxu1  ;;  %v4114_v14 = vpop.f32.mrb[149].mxu0 }
 0x213   : > { %v3773_v15 = vpack.c.bf16 %v2581_v7, %v2581_v7  ;;  %v2582_v16 = vmax.f32 %v2454_v8, 0.0  ;;  %v1768_v17 = vpop.f32.mrb[150].mxu1  ;;  %v1213_v18 = vpop.f32.mrb[150].mxu0 }
 0x214   : > { %v2173_v19 = vsel %vm2118_vm3, %v2060_v62, %v2061_v46  ;;  %v2062_v20 = vrot.slane %v1768_v17, 1  ;;  %v4377_v1 = vpop.f32.mrb[151].mxu1  ;;  %v4115_v21 = vpop.f32.mrb[151].mxu0 }
 0x215   : > { %3222 = vst.msk [vmem:[%s4930_s16 + $0x11c] sm:$0xf] %vm3150_vm4, %v3773_v15  ;;  %v3774_v22 = vpack.c.bf16 %v2582_v16, %v2582_v16  ;;  %v2320_v23 = vadd.f32 %v2173_v19, %v1205_v60 }
 0x216   : > { %v2172_v24 = vsel %vm2118_vm3, %v2061_v46, %v2062_v20  ;;  %4483 = vmatmul.mubr.msk.bf16.gmra.mrb[0].mxu1 %vm680_vm2, %v4593_v12  ;;  %4221 = vmatmul.mubr.msk.bf16.gmra.mrb[0].mxu0 %vm680_vm2, %v4593_v12 }
 0x217   : > { %3223 = vst.msk [vmem:[%s4930_s16 + $0x120] sm:$0xf] %vm3150_vm4, %v3774_v22  ;;  %v2455_v25 = vadd.f32 %v5249_v13, %v2320_v23  ;;  %v2321_v26 = vadd.f32 %v2172_v24, %v1210_v10 }
 0x219   : > { %v2583_v27 = vmax.f32 %v2455_v25, 0.0  ;;  %v2456_v28 = vadd.f32 %v5249_v13, %v2321_v26  ;;  %v1773_v29 = vpop.f32.mrb[152].mxu1  ;;  %v1218_v30 = vpop.f32.mrb[152].mxu0 }
 0x21a   : > { %v2063_v31 = vrot.slane %v1773_v29, 1  ;;  %v4380_v32 = vpop.f32.mrb[153].mxu1  ;;  %v4118_v34 = vpop.f32.mrb[153].mxu0 }
 0x21b   : > { %v3775_v35 = vpack.c.bf16 %v2583_v27, %v2583_v27  ;;  %v2584_v36 = vmax.f32 %v2456_v28, 0.0  ;;  %v1776_v37 = vpop.f32.mrb[154].mxu1  ;;  %v1221_v38 = vpop.f32.mrb[154].mxu0 }
 0x21c   : > { %v2171_v39 = vsel %vm2118_vm3, %v2062_v20, %v2063_v31  ;;  %v2064_v40 = vrot.slane %v1776_v37, 1  ;;  %v4381_v41 = vpop.f32.mrb[155].mxu1  ;;  %v4119_v42 = vpop.f32.mrb[155].mxu0 }
 0x21d   : > { %3224 = vst.msk [vmem:[%s4930_s16 + $0x124] sm:$0xf] %vm3150_vm4, %v3775_v35  ;;  %v3776_v43 = vpack.c.bf16 %v2584_v36, %v2584_v36  ;;  %v2322_v44 = vadd.f32 %v2171_v39, %v1213_v18 }
 0x21e   : > { %v2170_v45 = vsel %vm2118_vm3, %v2063_v31, %v2064_v40 }
 0x21f   : > { %3225 = vst.msk [vmem:[%s4930_s16 + $0x128] sm:$0xf] %vm3150_vm4, %v3776_v43  ;;  %v2457_v47 = vadd.f32 %v5249_v13, %v2322_v44  ;;  %v2323_v48 = vadd.f32 %v2170_v45, %v1218_v30 }
 0x221   : > { %v2585_v49 = vmax.f32 %v2457_v47, 0.0  ;;  %v2458_v50 = vadd.f32 %v5249_v13, %v2323_v48  ;;  %v1781_v51 = vpop.f32.mrb[156].mxu1  ;;  %v1226_v52 = vpop.f32.mrb[156].mxu0 }
 0x222   : > { %v2065_v53 = vrot.slane %v1781_v51, 1  ;;  %v4384_v54 = vpop.f32.mrb[157].mxu1  ;;  %v4122_v55 = vpop.f32.mrb[157].mxu0 }
 0x223   : > { %v3777_v56 = vpack.c.bf16 %v2585_v49, %v2585_v49  ;;  %v2586_v57 = vmax.f32 %v2458_v50, 0.0  ;;  %v1784_v58 = vpop.f32.mrb[158].mxu1  ;;  %v1229_v59 = vpop.f32.mrb[158].mxu0 }
 0x224   : > { %v2169_v60 = vsel %vm2118_vm3, %v2064_v40, %v2065_v53  ;;  %v2066_v61 = vrot.slane %v1784_v58, 1  ;;  %v4385_v62 = vpop.f32.mrb[159].mxu1  ;;  %v4123_v63 = vpop.f32.mrb[159].mxu0 }
 0x225   : > { %3226 = vst.msk [vmem:[%s4930_s16 + $0x12c] sm:$0xf] %vm3150_vm4, %v3777_v56  ;;  %v3778_v0 = vpack.c.bf16 %v2586_v57, %v2586_v57  ;;  %v2324_v13 = vadd.f32 %v2169_v60, %v1221_v38 }
 0x226   : > { %v2168_v2 = vsel %vm2118_vm3, %v2065_v53, %v2066_v61 }
 0x227   : > { %3227 = vst.msk [vmem:[%s4930_s16 + $0x130] sm:$0xf] %vm3150_vm4, %v3778_v0  ;;  %v2459_v4 = vadd.f32 %v5580_v3, %v2324_v13  ;;  %v2325_v5 = vadd.f32 %v2168_v2, %v1226_v52 }
 0x229   : > { %v2587_v6 = vmax.f32 %v2459_v4, 0.0  ;;  %v2460_v7 = vadd.f32 %v5580_v3, %v2325_v5  ;;  %v1789_v8 = vpop.f32.mrb[160].mxu1  ;;  %v1234_v9 = vpop.f32.mrb[160].mxu0 }
 0x22a   : > { %v2067_v10 = vrot.slane %v1789_v8, 1  ;;  %v4388_v46 = vpop.f32.mrb[161].mxu1  ;;  %v4126_v11 = vpop.f32.mrb[161].mxu0 }
 0x22b   : > { %v3779_v12 = vpack.c.bf16 %v2587_v6, %v2587_v6  ;;  %v2588_v14 = vmax.f32 %v2460_v7, 0.0  ;;  %v1792_v15 = vpop.f32.mrb[162].mxu1  ;;  %v1237_v16 = vpop.f32.mrb[162].mxu0 }
 0x22c   : > { %v2167_v17 = vsel %vm2118_vm3, %v2066_v61, %v2067_v10  ;;  %v2068_v18 = vrot.slane %v1792_v15, 1  ;;  %v4389_v19 = vpop.f32.mrb[163].mxu1  ;;  %v4127_v20 = vpop.f32.mrb[163].mxu0 }
 0x22d   : > { %3228 = vst.msk [vmem:[%s4930_s16 + $0x134] sm:$0xf] %vm3150_vm4, %v3779_v12  ;;  %v3780_v1 = vpack.c.bf16 %v2588_v14, %v2588_v14  ;;  %v2326_v21 = vadd.f32 %v2167_v17, %v1229_v59 }
 0x22e   : > { %v2166_v22 = vsel %vm2118_vm3, %v2067_v10, %v2068_v18 }
 0x22f   : > { %3229 = vst.msk [vmem:[%s4930_s16 + $0x138] sm:$0xf] %vm3150_vm4, %v3780_v1  ;;  %v2461_v23 = vadd.f32 %v5580_v3, %v2326_v21  ;;  %v2327_v24 = vadd.f32 %v2166_v22, %v1234_v9 }
 0x231   : > { %v2589_v25 = vmax.f32 %v2461_v23, 0.0  ;;  %v2462_v26 = vadd.f32 %v5580_v3, %v2327_v24  ;;  %v1797_v27 = vpop.f32.mrb[164].mxu1  ;;  %v1242_v28 = vpop.f32.mrb[164].mxu0 }
 0x232   : > { %v2069_v29 = vrot.slane %v1797_v27, 1  ;;  %v4392_v30 = vpop.f32.mrb[165].mxu1  ;;  %v4130_v31 = vpop.f32.mrb[165].mxu0 }
 0x233   : > { %v3781_v32 = vpack.c.bf16 %v2589_v25, %v2589_v25  ;;  %v2590_v34 = vmax.f32 %v2462_v26, 0.0  ;;  %v1800_v35 = vpop.f32.mrb[166].mxu1  ;;  %v1245_v36 = vpop.f32.mrb[166].mxu0 }
 0x234   : > { %v2165_v37 = vsel %vm2118_vm3, %v2068_v18, %v2069_v29  ;;  %v2070_v38 = vrot.slane %v1800_v35, 1  ;;  %v4393_v39 = vpop.f32.mrb[167].mxu1  ;;  %v4131_v40 = vpop.f32.mrb[167].mxu0 }
 0x235   : > { %3230 = vst.msk [vmem:[%s4930_s16 + $0x13c] sm:$0xf] %vm3150_vm4, %v3781_v32  ;;  %v3782_v41 = vpack.c.bf16 %v2590_v34, %v2590_v34  ;;  %v2328_v42 = vadd.f32 %v2165_v37, %v1237_v16 }
 0x236   : > { %v2164_v43 = vsel %vm2118_vm3, %v2069_v29, %v2070_v38 }
 0x237   : > { %3231 = vst.msk [vmem:[%s4930_s16 + $0x140] sm:$0xf] %vm3150_vm4, %v3782_v41  ;;  %v2463_v44 = vadd.f32 %v5580_v3, %v2328_v42  ;;  %v2329_v45 = vadd.f32 %v2164_v43, %v1242_v28 }
 0x239   : > { %v2591_v47 = vmax.f32 %v2463_v44, 0.0  ;;  %v2464_v48 = vadd.f32 %v5580_v3, %v2329_v45  ;;  %v1805_v49 = vpop.f32.mrb[168].mxu1  ;;  %v1250_v50 = vpop.f32.mrb[168].mxu0 }
 0x23a   : > { %v2071_v51 = vrot.slane %v1805_v49, 1  ;;  %v4396_v52 = vpop.f32.mrb[169].mxu1  ;;  %v4134_v53 = vpop.f32.mrb[169].mxu0 }
 0x23b   : > { %v3783_v54 = vpack.c.bf16 %v2591_v47, %v2591_v47  ;;  %v2592_v55 = vmax.f32 %v2464_v48, 0.0  ;;  %v1808_v56 = vpop.f32.mrb[170].mxu1  ;;  %v1253_v57 = vpop.f32.mrb[170].mxu0 }
 0x23c   : > { %v2163_v58 = vsel %vm2118_vm3, %v2070_v38, %v2071_v51  ;;  %v2072_v59 = vrot.slane %v1808_v56, 1  ;;  %v4397_v60 = vpop.f32.mrb[171].mxu1  ;;  %v4135_v61 = vpop.f32.mrb[171].mxu0 }
 0x23d   : > { %3232 = vst.msk [vmem:[%s4930_s16 + $0x144] sm:$0xf] %vm3150_vm4, %v3783_v54  ;;  %v3784_v62 = vpack.c.bf16 %v2592_v55, %v2592_v55  ;;  %v2330_v63 = vadd.f32 %v2163_v58, %v1245_v36 }
 0x23e   : > { %v2162_v0 = vsel %vm2118_vm3, %v2071_v51, %v2072_v59 }
 0x23f   : > { %3233 = vst.msk [vmem:[%s4930_s16 + $0x148] sm:$0xf] %vm3150_vm4, %v3784_v62  ;;  %v2465_v13 = vadd.f32 %v5580_v3, %v2330_v63  ;;  %v2331_v2 = vadd.f32 %v2162_v0, %v1250_v50 }
 0x241   : > { %v2593_v4 = vmax.f32 %v2465_v13, 0.0  ;;  %v2466_v5 = vadd.f32 %v5580_v3, %v2331_v2  ;;  %v1813_v6 = vpop.f32.mrb[172].mxu1  ;;  %v1258_v7 = vpop.f32.mrb[172].mxu0 }
 0x242   : > { %v2073_v8 = vrot.slane %v1813_v6, 1  ;;  %v4400_v9 = vpop.f32.mrb[173].mxu1  ;;  %v4138_v10 = vpop.f32.mrb[173].mxu0 }
 0x243   : > { %v3785_v46 = vpack.c.bf16 %v2593_v4, %v2593_v4  ;;  %v2594_v11 = vmax.f32 %v2466_v5, 0.0  ;;  %v1816_v12 = vpop.f32.mrb[174].mxu1  ;;  %v1261_v14 = vpop.f32.mrb[174].mxu0 }
 0x244   : > { %v2161_v15 = vsel %vm2118_vm3, %v2072_v59, %v2073_v8  ;;  %v2074_v16 = vrot.slane %v1816_v12, 1  ;;  %v4401_v17 = vpop.f32.mrb[175].mxu1  ;;  %v4139_v18 = vpop.f32.mrb[175].mxu0 }
 0x245   : > { %3234 = vst.msk [vmem:[%s4930_s16 + $0x14c] sm:$0xf] %vm3150_vm4, %v3785_v46  ;;  %v3786_v19 = vpack.c.bf16 %v2594_v11, %v2594_v11  ;;  %v2332_v20 = vadd.f32 %v2161_v15, %v1253_v57 }
 0x246   : > { %v2160_v1 = vsel %vm2118_vm3, %v2073_v8, %v2074_v16 }
 0x247   : > { %3235 = vst.msk [vmem:[%s4930_s16 + $0x150] sm:$0xf] %vm3150_vm4, %v3786_v19  ;;  %v2467_v21 = vadd.f32 %v5580_v3, %v2332_v20  ;;  %v2333_v22 = vadd.f32 %v2160_v1, %v1258_v7 }
 0x249   : > { %v2595_v23 = vmax.f32 %v2467_v21, 0.0  ;;  %v2468_v24 = vadd.f32 %v5580_v3, %v2333_v22  ;;  %v1821_v25 = vpop.f32.mrb[176].mxu1  ;;  %v1266_v26 = vpop.f32.mrb[176].mxu0 }
 0x24a   : > { %v2075_v27 = vrot.slane %v1821_v25, 1  ;;  %v4404_v28 = vpop.f32.mrb[177].mxu1  ;;  %v4142_v29 = vpop.f32.mrb[177].mxu0 }
 0x24b   : > { %v3787_v30 = vpack.c.bf16 %v2595_v23, %v2595_v23  ;;  %v2596_v31 = vmax.f32 %v2468_v24, 0.0  ;;  %v1824_v32 = vpop.f32.mrb[178].mxu1  ;;  %v1269_v34 = vpop.f32.mrb[178].mxu0 }
 0x24c   : > { %v2159_v35 = vsel %vm2118_vm3, %v2074_v16, %v2075_v27  ;;  %v2076_v36 = vrot.slane %v1824_v32, 1  ;;  %v4405_v37 = vpop.f32.mrb[179].mxu1  ;;  %v4143_v38 = vpop.f32.mrb[179].mxu0 }
 0x24d   : > { %3236 = vst.msk [vmem:[%s4930_s16 + $0x154] sm:$0xf] %vm3150_vm4, %v3787_v30  ;;  %v3788_v39 = vpack.c.bf16 %v2596_v31, %v2596_v31  ;;  %v2334_v40 = vadd.f32 %v2159_v35, %v1261_v14 }
 0x24e   : > { %v2158_v41 = vsel %vm2118_vm3, %v2075_v27, %v2076_v36 }
 0x24f   : > { %3237 = vst.msk [vmem:[%s4930_s16 + $0x158] sm:$0xf] %vm3150_vm4, %v3788_v39  ;;  %v2469_v42 = vadd.f32 %v5580_v3, %v2334_v40  ;;  %v2335_v43 = vadd.f32 %v2158_v41, %v1266_v26 }
 0x251   : > { %v2597_v44 = vmax.f32 %v2469_v42, 0.0  ;;  %v2470_v45 = vadd.f32 %v5580_v3, %v2335_v43  ;;  %v1829_v47 = vpop.f32.mrb[180].mxu1  ;;  %v1274_v48 = vpop.f32.mrb[180].mxu0 }
 0x252   : > { %v2077_v49 = vrot.slane %v1829_v47, 1  ;;  %v4408_v50 = vpop.f32.mrb[181].mxu1  ;;  %v4146_v51 = vpop.f32.mrb[181].mxu0 }
 0x253   : > { %v3789_v52 = vpack.c.bf16 %v2597_v44, %v2597_v44  ;;  %v2598_v53 = vmax.f32 %v2470_v45, 0.0  ;;  %v1832_v54 = vpop.f32.mrb[182].mxu1  ;;  %v1277_v55 = vpop.f32.mrb[182].mxu0 }
 0x254   : > { %v2157_v56 = vsel %vm2118_vm3, %v2076_v36, %v2077_v49  ;;  %v2078_v57 = vrot.slane %v1832_v54, 1  ;;  %v4409_v58 = vpop.f32.mrb[183].mxu1  ;;  %v4147_v59 = vpop.f32.mrb[183].mxu0 }
 0x255   : > { %3238 = vst.msk [vmem:[%s4930_s16 + $0x15c] sm:$0xf] %vm3150_vm4, %v3789_v52  ;;  %v3790_v60 = vpack.c.bf16 %v2598_v53, %v2598_v53  ;;  %v2336_v61 = vadd.f32 %v2157_v56, %v1269_v34 }
 0x256   : > { %v2156_v62 = vsel %vm2118_vm3, %v2077_v49, %v2078_v57 }
 0x257   : > { %3239 = vst.msk [vmem:[%s4930_s16 + $0x160] sm:$0xf] %vm3150_vm4, %v3790_v60  ;;  %v2471_v63 = vadd.f32 %v5580_v3, %v2336_v61  ;;  %v2337_v0 = vadd.f32 %v2156_v62, %v1274_v48 }
 0x259   : > { %v2599_v13 = vmax.f32 %v2471_v63, 0.0  ;;  %v2472_v2 = vadd.f32 %v5580_v3, %v2337_v0  ;;  %v1837_v4 = vpop.f32.mrb[184].mxu1  ;;  %v1282_v5 = vpop.f32.mrb[184].mxu0 }
 0x25a   : > { %v2079_v6 = vrot.slane %v1837_v4, 1  ;;  %v4412_v7 = vpop.f32.mrb[185].mxu1  ;;  %v4150_v8 = vpop.f32.mrb[185].mxu0 }
 0x25b   : > { %v3791_v9 = vpack.c.bf16 %v2599_v13, %v2599_v13  ;;  %v2600_v10 = vmax.f32 %v2472_v2, 0.0  ;;  %v1840_v46 = vpop.f32.mrb[186].mxu1  ;;  %v1285_v11 = vpop.f32.mrb[186].mxu0 }
 0x25c   : > { %v2155_v12 = vsel %vm2118_vm3, %v2078_v57, %v2079_v6  ;;  %v2080_v14 = vrot.slane %v1840_v46, 1  ;;  %v4413_v15 = vpop.f32.mrb[187].mxu1  ;;  %v4151_v16 = vpop.f32.mrb[187].mxu0 }
 0x25d   : > { %3240 = vst.msk [vmem:[%s4930_s16 + $0x164] sm:$0xf] %vm3150_vm4, %v3791_v9  ;;  %v3792_v17 = vpack.c.bf16 %v2600_v10, %v2600_v10  ;;  %v2338_v18 = vadd.f32 %v2155_v12, %v1277_v55 }
 0x25e   : > { %v2154_v19 = vsel %vm2118_vm3, %v2079_v6, %v2080_v14 }
 0x25f   : > { %3241 = vst.msk [vmem:[%s4930_s16 + $0x168] sm:$0xf] %vm3150_vm4, %v3792_v17  ;;  %v2473_v20 = vadd.f32 %v5580_v3, %v2338_v18  ;;  %v2339_v1 = vadd.f32 %v2154_v19, %v1282_v5 }
 0x261   : > { %v2601_v21 = vmax.f32 %v2473_v20, 0.0  ;;  %v2474_v22 = vadd.f32 %v5580_v3, %v2339_v1  ;;  %v1845_v23 = vpop.f32.mrb[188].mxu1  ;;  %v1290_v24 = vpop.f32.mrb[188].mxu0 }
 0x262   : > { %v2081_v25 = vrot.slane %v1845_v23, 1  ;;  %v4416_v26 = vpop.f32.mrb[189].mxu1  ;;  %v4154_v27 = vpop.f32.mrb[189].mxu0 }
 0x263   : > { %v3793_v28 = vpack.c.bf16 %v2601_v21, %v2601_v21  ;;  %v2602_v29 = vmax.f32 %v2474_v22, 0.0  ;;  %v1848_v30 = vpop.f32.mrb[190].mxu1  ;;  %v1293_v31 = vpop.f32.mrb[190].mxu0 }
 0x264   : > { %v2153_v32 = vsel %vm2118_vm3, %v2080_v14, %v2081_v25  ;;  %v2082_v34 = vrot.slane %v1848_v30, 1  ;;  %v4417_v35 = vpop.f32.mrb[191].mxu1  ;;  %v4155_v36 = vpop.f32.mrb[191].mxu0 }
 0x265   : > { %3242 = vst.msk [vmem:[%s4930_s16 + $0x16c] sm:$0xf] %vm3150_vm4, %v3793_v28  ;;  %v3794_v37 = vpack.c.bf16 %v2602_v29, %v2602_v29  ;;  %v2340_v38 = vadd.f32 %v2153_v32, %v1285_v11 }
 0x266   : > { %v2152_v39 = vsel %vm2118_vm3, %v2081_v25, %v2082_v34 }
 0x267   : > { %3243 = vst.msk [vmem:[%s4930_s16 + $0x170] sm:$0xf] %vm3150_vm4, %v3794_v37  ;;  %v2475_v40 = vadd.f32 %v5580_v3, %v2340_v38  ;;  %v2341_v41 = vadd.f32 %v2152_v39, %v1290_v24 }
 0x269   : > { %v2603_v42 = vmax.f32 %v2475_v40, 0.0  ;;  %v2476_v43 = vadd.f32 %v5580_v3, %v2341_v41  ;;  %v1853_v44 = vpop.f32.mrb[192].mxu1  ;;  %v1298_v45 = vpop.f32.mrb[192].mxu0 }
 0x26a   : > { %v2083_v47 = vrot.slane %v1853_v44, 1  ;;  %v4420_v48 = vpop.f32.mrb[193].mxu1  ;;  %v4158_v49 = vpop.f32.mrb[193].mxu0 }
 0x26b   : > { %v3795_v50 = vpack.c.bf16 %v2603_v42, %v2603_v42  ;;  %v2604_v51 = vmax.f32 %v2476_v43, 0.0  ;;  %v1856_v52 = vpop.f32.mrb[194].mxu1  ;;  %v1301_v53 = vpop.f32.mrb[194].mxu0 }
 0x26c   : > { %v2151_v54 = vsel %vm2118_vm3, %v2082_v34, %v2083_v47  ;;  %v2084_v55 = vrot.slane %v1856_v52, 1  ;;  %v4421_v56 = vpop.f32.mrb[195].mxu1  ;;  %v4159_v57 = vpop.f32.mrb[195].mxu0 }
 0x26d   : > { %3244 = vst.msk [vmem:[%s4930_s16 + $0x174] sm:$0xf] %vm3150_vm4, %v3795_v50  ;;  %v3796_v58 = vpack.c.bf16 %v2604_v51, %v2604_v51  ;;  %v2342_v59 = vadd.f32 %v2151_v54, %v1293_v31 }
 0x26e   : > { %v2150_v60 = vsel %vm2118_vm3, %v2083_v47, %v2084_v55 }
 0x26f   : > { %3245 = vst.msk [vmem:[%s4930_s16 + $0x178] sm:$0xf] %vm3150_vm4, %v3796_v58  ;;  %v2477_v61 = vadd.f32 %v5580_v3, %v2342_v59  ;;  %v2343_v62 = vadd.f32 %v2150_v60, %v1298_v45 }
 0x271   : > { %v2605_v63 = vmax.f32 %v2477_v61, 0.0  ;;  %v2478_v0 = vadd.f32 %v5580_v3, %v2343_v62  ;;  %v1861_v13 = vpop.f32.mrb[196].mxu1  ;;  %v1306_v2 = vpop.f32.mrb[196].mxu0 }
 0x272   : > { %v2085_v4 = vrot.slane %v1861_v13, 1  ;;  %v4424_v5 = vpop.f32.mrb[197].mxu1  ;;  %v4162_v6 = vpop.f32.mrb[197].mxu0 }
 0x273   : > { %v3797_v7 = vpack.c.bf16 %v2605_v63, %v2605_v63  ;;  %v2606_v8 = vmax.f32 %v2478_v0, 0.0  ;;  %v1864_v9 = vpop.f32.mrb[198].mxu1  ;;  %v1309_v10 = vpop.f32.mrb[198].mxu0 }
 0x274   : > { %v2149_v46 = vsel %vm2118_vm3, %v2084_v55, %v2085_v4  ;;  %v2086_v11 = vrot.slane %v1864_v9, 1  ;;  %v4425_v12 = vpop.f32.mrb[199].mxu1  ;;  %v4163_v14 = vpop.f32.mrb[199].mxu0 }
 0x275   : > { %3246 = vst.msk [vmem:[%s4930_s16 + $0x17c] sm:$0xf] %vm3150_vm4, %v3797_v7  ;;  %v3798_v15 = vpack.c.bf16 %v2606_v8, %v2606_v8  ;;  %v2344_v16 = vadd.f32 %v2149_v46, %v1301_v53 }
 0x276   : > { %v2148_v17 = vsel %vm2118_vm3, %v2085_v4, %v2086_v11 }
 0x277   : > { %3247 = vst.msk [vmem:[%s4930_s16 + $0x180] sm:$0xf] %vm3150_vm4, %v3798_v15  ;;  %v2479_v18 = vadd.f32 %v5580_v3, %v2344_v16  ;;  %v2345_v19 = vadd.f32 %v2148_v17, %v1306_v2 }
 0x279   : > { %v2607_v20 = vmax.f32 %v2479_v18, 0.0  ;;  %v2480_v1 = vadd.f32 %v5580_v3, %v2345_v19  ;;  %v1869_v21 = vpop.f32.mrb[200].mxu1  ;;  %v1314_v22 = vpop.f32.mrb[200].mxu0 }
 0x27a   : > { %v2087_v23 = vrot.slane %v1869_v21, 1  ;;  %v4428_v24 = vpop.f32.mrb[201].mxu1  ;;  %v4166_v25 = vpop.f32.mrb[201].mxu0 }
 0x27b   : > { %v3799_v26 = vpack.c.bf16 %v2607_v20, %v2607_v20  ;;  %v2608_v27 = vmax.f32 %v2480_v1, 0.0  ;;  %v1872_v28 = vpop.f32.mrb[202].mxu1  ;;  %v1317_v29 = vpop.f32.mrb[202].mxu0 }
 0x27c   : > { %v2147_v30 = vsel %vm2118_vm3, %v2086_v11, %v2087_v23  ;;  %v2088_v31 = vrot.slane %v1872_v28, 1  ;;  %v4429_v32 = vpop.f32.mrb[203].mxu1  ;;  %v4167_v34 = vpop.f32.mrb[203].mxu0 }
 0x27d   : > { %3248 = vst.msk [vmem:[%s4930_s16 + $0x184] sm:$0xf] %vm3150_vm4, %v3799_v26  ;;  %v3800_v35 = vpack.c.bf16 %v2608_v27, %v2608_v27  ;;  %v2346_v36 = vadd.f32 %v2147_v30, %v1309_v10 }
 0x27e   : > { %v2146_v37 = vsel %vm2118_vm3, %v2087_v23, %v2088_v31 }
 0x27f   : > { %3249 = vst.msk [vmem:[%s4930_s16 + $0x188] sm:$0xf] %vm3150_vm4, %v3800_v35  ;;  %v2481_v38 = vadd.f32 %v5580_v3, %v2346_v36  ;;  %v2347_v39 = vadd.f32 %v2146_v37, %v1314_v22 }
 0x281   : > { %v2609_v40 = vmax.f32 %v2481_v38, 0.0  ;;  %v2482_v41 = vadd.f32 %v5580_v3, %v2347_v39  ;;  %v1877_v42 = vpop.f32.mrb[204].mxu1  ;;  %v1322_v43 = vpop.f32.mrb[204].mxu0 }
 0x282   : > { %v2089_v44 = vrot.slane %v1877_v42, 1  ;;  %v4432_v45 = vpop.f32.mrb[205].mxu1  ;;  %v4170_v47 = vpop.f32.mrb[205].mxu0 }
 0x283   : > { %v3801_v48 = vpack.c.bf16 %v2609_v40, %v2609_v40  ;;  %v2610_v49 = vmax.f32 %v2482_v41, 0.0  ;;  %v1880_v50 = vpop.f32.mrb[206].mxu1  ;;  %v1325_v51 = vpop.f32.mrb[206].mxu0 }
 0x284   : > { %v2145_v52 = vsel %vm2118_vm3, %v2088_v31, %v2089_v44  ;;  %v2090_v53 = vrot.slane %v1880_v50, 1  ;;  %v4433_v54 = vpop.f32.mrb[207].mxu1  ;;  %v4171_v55 = vpop.f32.mrb[207].mxu0 }
 0x285   : > { %3250 = vst.msk [vmem:[%s4930_s16 + $0x18c] sm:$0xf] %vm3150_vm4, %v3801_v48  ;;  %v3802_v56 = vpack.c.bf16 %v2610_v49, %v2610_v49  ;;  %v2348_v57 = vadd.f32 %v2145_v52, %v1317_v29 }
 0x286   : > { %v2144_v58 = vsel %vm2118_vm3, %v2089_v44, %v2090_v53 }
 0x287   : > { %3251 = vst.msk [vmem:[%s4930_s16 + $0x190] sm:$0xf] %vm3150_vm4, %v3802_v56  ;;  %v2483_v59 = vadd.f32 %v5580_v3, %v2348_v57  ;;  %v2349_v60 = vadd.f32 %v2144_v58, %v1322_v43 }
 0x289   : > { %v2611_v61 = vmax.f32 %v2483_v59, 0.0  ;;  %v2484_v62 = vadd.f32 %v5580_v3, %v2349_v60  ;;  %v1885_v63 = vpop.f32.mrb[208].mxu1  ;;  %v1330_v0 = vpop.f32.mrb[208].mxu0 }
 0x28a   : > { %v2091_v13 = vrot.slane %v1885_v63, 1  ;;  %v4436_v2 = vpop.f32.mrb[209].mxu1  ;;  %v4174_v4 = vpop.f32.mrb[209].mxu0 }
 0x28b   : > { %v3803_v5 = vpack.c.bf16 %v2611_v61, %v2611_v61  ;;  %v2612_v6 = vmax.f32 %v2484_v62, 0.0  ;;  %v1888_v7 = vpop.f32.mrb[210].mxu1  ;;  %v1333_v8 = vpop.f32.mrb[210].mxu0 }
 0x28c   : > { %v2143_v9 = vsel %vm2118_vm3, %v2090_v53, %v2091_v13  ;;  %v2092_v10 = vrot.slane %v1888_v7, 1  ;;  %v4437_v46 = vpop.f32.mrb[211].mxu1  ;;  %v4175_v11 = vpop.f32.mrb[211].mxu0 }
 0x28d   : > { %3252 = vst.msk [vmem:[%s4930_s16 + $0x194] sm:$0xf] %vm3150_vm4, %v3803_v5  ;;  %v3804_v12 = vpack.c.bf16 %v2612_v6, %v2612_v6  ;;  %v2350_v14 = vadd.f32 %v2143_v9, %v1325_v51 }
 0x28e   : > { %v2142_v15 = vsel %vm2118_vm3, %v2091_v13, %v2092_v10 }
 0x28f   : > { %3253 = vst.msk [vmem:[%s4930_s16 + $0x198] sm:$0xf] %vm3150_vm4, %v3804_v12  ;;  %v2485_v16 = vadd.f32 %v5580_v3, %v2350_v14  ;;  %v2351_v17 = vadd.f32 %v2142_v15, %v1330_v0 }
 0x291   : > { %v2613_v18 = vmax.f32 %v2485_v16, 0.0  ;;  %v2486_v19 = vadd.f32 %v5580_v3, %v2351_v17  ;;  %v1893_v20 = vpop.f32.mrb[212].mxu1  ;;  %v1338_v1 = vpop.f32.mrb[212].mxu0 }
 0x292   : > { %v2093_v21 = vrot.slane %v1893_v20, 1  ;;  %v4440_v22 = vpop.f32.mrb[213].mxu1  ;;  %v4178_v23 = vpop.f32.mrb[213].mxu0 }
 0x293   : > { %v3805_v24 = vpack.c.bf16 %v2613_v18, %v2613_v18  ;;  %v2614_v25 = vmax.f32 %v2486_v19, 0.0  ;;  %v1896_v26 = vpop.f32.mrb[214].mxu1  ;;  %v1341_v27 = vpop.f32.mrb[214].mxu0 }
 0x294   : > { %v2141_v28 = vsel %vm2118_vm3, %v2092_v10, %v2093_v21  ;;  %v2094_v29 = vrot.slane %v1896_v26, 1  ;;  %v4441_v30 = vpop.f32.mrb[215].mxu1  ;;  %v4179_v31 = vpop.f32.mrb[215].mxu0 }
 0x295   : > { %3254 = vst.msk [vmem:[%s4930_s16 + $0x19c] sm:$0xf] %vm3150_vm4, %v3805_v24  ;;  %v3806_v32 = vpack.c.bf16 %v2614_v25, %v2614_v25  ;;  %v2352_v34 = vadd.f32 %v2141_v28, %v1333_v8 }
 0x296   : > { %v2140_v35 = vsel %vm2118_vm3, %v2093_v21, %v2094_v29 }
 0x297   : > { %3255 = vst.msk [vmem:[%s4930_s16 + $0x1a0] sm:$0xf] %vm3150_vm4, %v3806_v32  ;;  %v2487_v36 = vadd.f32 %v5580_v3, %v2352_v34  ;;  %v2353_v37 = vadd.f32 %v2140_v35, %v1338_v1 }
 0x299   : > { %v2615_v38 = vmax.f32 %v2487_v36, 0.0  ;;  %v2488_v39 = vadd.f32 %v5580_v3, %v2353_v37  ;;  %v1901_v40 = vpop.f32.mrb[216].mxu1  ;;  %v1346_v41 = vpop.f32.mrb[216].mxu0 }
 0x29a   : > { %v2095_v42 = vrot.slane %v1901_v40, 1  ;;  %v4444_v43 = vpop.f32.mrb[217].mxu1  ;;  %v4182_v44 = vpop.f32.mrb[217].mxu0 }
 0x29b   : > { %v3807_v45 = vpack.c.bf16 %v2615_v38, %v2615_v38  ;;  %v2616_v47 = vmax.f32 %v2488_v39, 0.0  ;;  %v1904_v48 = vpop.f32.mrb[218].mxu1  ;;  %v1349_v49 = vpop.f32.mrb[218].mxu0 }
 0x29c   : > { %v2139_v50 = vsel %vm2118_vm3, %v2094_v29, %v2095_v42  ;;  %v2096_v51 = vrot.slane %v1904_v48, 1  ;;  %v4445_v52 = vpop.f32.mrb[219].mxu1  ;;  %v4183_v53 = vpop.f32.mrb[219].mxu0 }
 0x29d   : > { %3256 = vst.msk [vmem:[%s4930_s16 + $0x1a4] sm:$0xf] %vm3150_vm4, %v3807_v45  ;;  %v3808_v54 = vpack.c.bf16 %v2616_v47, %v2616_v47  ;;  %v2354_v55 = vadd.f32 %v2139_v50, %v1341_v27 }
 0x29e   : > { %v2138_v56 = vsel %vm2118_vm3, %v2095_v42, %v2096_v51 }
 0x29f   : > { %3257 = vst.msk [vmem:[%s4930_s16 + $0x1a8] sm:$0xf] %vm3150_vm4, %v3808_v54  ;;  %v2489_v57 = vadd.f32 %v5580_v3, %v2354_v55  ;;  %v2355_v58 = vadd.f32 %v2138_v56, %v1346_v41 }
 0x2a1   : > { %v2617_v59 = vmax.f32 %v2489_v57, 0.0  ;;  %v2490_v60 = vadd.f32 %v5580_v3, %v2355_v58  ;;  %v1909_v61 = vpop.f32.mrb[220].mxu1  ;;  %v1354_v62 = vpop.f32.mrb[220].mxu0 }
 0x2a2   : > { %v2097_v63 = vrot.slane %v1909_v61, 1  ;;  %v4448_v0 = vpop.f32.mrb[221].mxu1  ;;  %v4186_v13 = vpop.f32.mrb[221].mxu0 }
 0x2a3   : > { %v3809_v2 = vpack.c.bf16 %v2617_v59, %v2617_v59  ;;  %v2618_v4 = vmax.f32 %v2490_v60, 0.0  ;;  %v1912_v5 = vpop.f32.mrb[222].mxu1  ;;  %v1357_v6 = vpop.f32.mrb[222].mxu0 }
 0x2a4   : > { %v2137_v7 = vsel %vm2118_vm3, %v2096_v51, %v2097_v63  ;;  %v2098_v8 = vrot.slane %v1912_v5, 1  ;;  %v4449_v9 = vpop.f32.mrb[223].mxu1  ;;  %v4187_v10 = vpop.f32.mrb[223].mxu0 }
 0x2a5   : > { %3258 = vst.msk [vmem:[%s4930_s16 + $0x1ac] sm:$0xf] %vm3150_vm4, %v3809_v2  ;;  %v3810_v46 = vpack.c.bf16 %v2618_v4, %v2618_v4  ;;  %v2356_v11 = vadd.f32 %v2137_v7, %v1349_v49 }
 0x2a6   : > { %v2136_v12 = vsel %vm2118_vm3, %v2097_v63, %v2098_v8 }
 0x2a7   : > { %3259 = vst.msk [vmem:[%s4930_s16 + $0x1b0] sm:$0xf] %vm3150_vm4, %v3810_v46  ;;  %v2491_v14 = vadd.f32 %v5580_v3, %v2356_v11  ;;  %v2357_v15 = vadd.f32 %v2136_v12, %v1354_v62 }
 0x2a9   : > { %v2619_v16 = vmax.f32 %v2491_v14, 0.0  ;;  %v2492_v17 = vadd.f32 %v5580_v3, %v2357_v15  ;;  %v1917_v18 = vpop.f32.mrb[224].mxu1  ;;  %v1362_v19 = vpop.f32.mrb[224].mxu0 }
 0x2aa   : > { %v2099_v20 = vrot.slane %v1917_v18, 1  ;;  %v4452_v1 = vpop.f32.mrb[225].mxu1  ;;  %v4190_v21 = vpop.f32.mrb[225].mxu0 }
 0x2ab   : > { %v3811_v22 = vpack.c.bf16 %v2619_v16, %v2619_v16  ;;  %v2620_v23 = vmax.f32 %v2492_v17, 0.0  ;;  %v1920_v24 = vpop.f32.mrb[226].mxu1  ;;  %v1365_v25 = vpop.f32.mrb[226].mxu0 }
 0x2ac   : > { %v2135_v26 = vsel %vm2118_vm3, %v2098_v8, %v2099_v20  ;;  %v2100_v27 = vrot.slane %v1920_v24, 1  ;;  %v4453_v28 = vpop.f32.mrb[227].mxu1  ;;  %v4191_v29 = vpop.f32.mrb[227].mxu0 }
 0x2ad   : > { %3260 = vst.msk [vmem:[%s4930_s16 + $0x1b4] sm:$0xf] %vm3150_vm4, %v3811_v22  ;;  %v3812_v30 = vpack.c.bf16 %v2620_v23, %v2620_v23  ;;  %v2358_v31 = vadd.f32 %v2135_v26, %v1357_v6 }
 0x2ae   : > { %v2134_v32 = vsel %vm2118_vm3, %v2099_v20, %v2100_v27 }
 0x2af   : > { %3261 = vst.msk [vmem:[%s4930_s16 + $0x1b8] sm:$0xf] %vm3150_vm4, %v3812_v30  ;;  %v2493_v34 = vadd.f32 %v5580_v3, %v2358_v31  ;;  %v2359_v35 = vadd.f32 %v2134_v32, %v1362_v19 }
 0x2b1   : > { %v2621_v36 = vmax.f32 %v2493_v34, 0.0  ;;  %v2494_v37 = vadd.f32 %v5580_v3, %v2359_v35  ;;  %v1925_v38 = vpop.f32.mrb[228].mxu1  ;;  %v1370_v39 = vpop.f32.mrb[228].mxu0 }
 0x2b2   : > { %v2101_v40 = vrot.slane %v1925_v38, 1  ;;  %v4456_v41 = vpop.f32.mrb[229].mxu1  ;;  %v4194_v42 = vpop.f32.mrb[229].mxu0 }
 0x2b3   : > { %v3813_v43 = vpack.c.bf16 %v2621_v36, %v2621_v36  ;;  %v2622_v44 = vmax.f32 %v2494_v37, 0.0  ;;  %v1928_v45 = vpop.f32.mrb[230].mxu1  ;;  %v1373_v47 = vpop.f32.mrb[230].mxu0 }
 0x2b4   : > { %v2133_v48 = vsel %vm2118_vm3, %v2100_v27, %v2101_v40  ;;  %v2102_v49 = vrot.slane %v1928_v45, 1  ;;  %v4457_v50 = vpop.f32.mrb[231].mxu1  ;;  %v4195_v51 = vpop.f32.mrb[231].mxu0 }
 0x2b5   : > { %3262 = vst.msk [vmem:[%s4930_s16 + $0x1bc] sm:$0xf] %vm3150_vm4, %v3813_v43  ;;  %v3814_v52 = vpack.c.bf16 %v2622_v44, %v2622_v44  ;;  %v2360_v53 = vadd.f32 %v2133_v48, %v1365_v25 }
 0x2b6   : > { %v2132_v54 = vsel %vm2118_vm3, %v2101_v40, %v2102_v49 }
 0x2b7   : > { %3263 = vst.msk [vmem:[%s4930_s16 + $0x1c0] sm:$0xf] %vm3150_vm4, %v3814_v52  ;;  %v2495_v55 = vadd.f32 %v5580_v3, %v2360_v53  ;;  %v2361_v56 = vadd.f32 %v2132_v54, %v1370_v39 }
 0x2b9   : > { %v2623_v57 = vmax.f32 %v2495_v55, 0.0  ;;  %v2496_v58 = vadd.f32 %v5580_v3, %v2361_v56  ;;  %v1933_v59 = vpop.f32.mrb[232].mxu1  ;;  %v1378_v60 = vpop.f32.mrb[232].mxu0 }
 0x2ba   : > { %v2103_v61 = vrot.slane %v1933_v59, 1  ;;  %v4460_v62 = vpop.f32.mrb[233].mxu1  ;;  %v4198_v63 = vpop.f32.mrb[233].mxu0 }
 0x2bb   : > { %v3815_v0 = vpack.c.bf16 %v2623_v57, %v2623_v57  ;;  %v2624_v13 = vmax.f32 %v2496_v58, 0.0  ;;  %v1936_v2 = vpop.f32.mrb[234].mxu1  ;;  %v1381_v4 = vpop.f32.mrb[234].mxu0 }
 0x2bc   : > { %v2131_v5 = vsel %vm2118_vm3, %v2102_v49, %v2103_v61  ;;  %v2104_v6 = vrot.slane %v1936_v2, 1  ;;  %v4461_v7 = vpop.f32.mrb[235].mxu1  ;;  %v4199_v8 = vpop.f32.mrb[235].mxu0 }
 0x2bd   : > { %3264 = vst.msk [vmem:[%s4930_s16 + $0x1c4] sm:$0xf] %vm3150_vm4, %v3815_v0  ;;  %v3816_v9 = vpack.c.bf16 %v2624_v13, %v2624_v13  ;;  %v2362_v10 = vadd.f32 %v2131_v5, %v1373_v47 }
 0x2be   : > { %v2130_v46 = vsel %vm2118_vm3, %v2103_v61, %v2104_v6 }
 0x2bf   : > { %3265 = vst.msk [vmem:[%s4930_s16 + $0x1c8] sm:$0xf] %vm3150_vm4, %v3816_v9  ;;  %v2497_v11 = vadd.f32 %v5580_v3, %v2362_v10  ;;  %v2363_v12 = vadd.f32 %v2130_v46, %v1378_v60 }
 0x2c1   : > { %v2625_v14 = vmax.f32 %v2497_v11, 0.0  ;;  %v2498_v15 = vadd.f32 %v5580_v3, %v2363_v12  ;;  %v1941_v16 = vpop.f32.mrb[236].mxu1  ;;  %v1386_v17 = vpop.f32.mrb[236].mxu0 }
 0x2c2   : > { %v2105_v18 = vrot.slane %v1941_v16, 1  ;;  %v4464_v19 = vpop.f32.mrb[237].mxu1  ;;  %v4202_v20 = vpop.f32.mrb[237].mxu0 }
 0x2c3   : > { %v3817_v1 = vpack.c.bf16 %v2625_v14, %v2625_v14  ;;  %v2626_v21 = vmax.f32 %v2498_v15, 0.0  ;;  %v1944_v22 = vpop.f32.mrb[238].mxu1  ;;  %v1389_v23 = vpop.f32.mrb[238].mxu0 }
 0x2c4   : > { %v2129_v24 = vsel %vm2118_vm3, %v2104_v6, %v2105_v18  ;;  %v2106_v25 = vrot.slane %v1944_v22, 1  ;;  %v4465_v26 = vpop.f32.mrb[239].mxu1  ;;  %v4203_v27 = vpop.f32.mrb[239].mxu0 }
 0x2c5   : > { %3266 = vst.msk [vmem:[%s4930_s16 + $0x1cc] sm:$0xf] %vm3150_vm4, %v3817_v1  ;;  %v3818_v28 = vpack.c.bf16 %v2626_v21, %v2626_v21  ;;  %v2364_v29 = vadd.f32 %v2129_v24, %v1381_v4 }
 0x2c6   : > { %v2128_v30 = vsel %vm2118_vm3, %v2105_v18, %v2106_v25 }
 0x2c7   : > { %3267 = vst.msk [vmem:[%s4930_s16 + $0x1d0] sm:$0xf] %vm3150_vm4, %v3818_v28  ;;  %v2499_v31 = vadd.f32 %v5580_v3, %v2364_v29  ;;  %v2365_v32 = vadd.f32 %v2128_v30, %v1386_v17 }
 0x2c9   : > { %v2627_v34 = vmax.f32 %v2499_v31, 0.0  ;;  %v2500_v35 = vadd.f32 %v5580_v3, %v2365_v32  ;;  %v1949_v36 = vpop.f32.mrb[240].mxu1  ;;  %v1394_v37 = vpop.f32.mrb[240].mxu0 }
 0x2ca   : > { %v2107_v38 = vrot.slane %v1949_v36, 1  ;;  %v4468_v39 = vpop.f32.mrb[241].mxu1  ;;  %v4206_v40 = vpop.f32.mrb[241].mxu0 }
 0x2cb   : > { %v3819_v41 = vpack.c.bf16 %v2627_v34, %v2627_v34  ;;  %v2628_v42 = vmax.f32 %v2500_v35, 0.0  ;;  %v1952_v43 = vpop.f32.mrb[242].mxu1  ;;  %v1397_v44 = vpop.f32.mrb[242].mxu0 }
 0x2cc   : > { %v2127_v45 = vsel %vm2118_vm3, %v2106_v25, %v2107_v38  ;;  %v2108_v47 = vrot.slane %v1952_v43, 1  ;;  %v4469_v48 = vpop.f32.mrb[243].mxu1  ;;  %v4207_v49 = vpop.f32.mrb[243].mxu0 }
 0x2cd   : > { %3268 = vst.msk [vmem:[%s4930_s16 + $0x1d4] sm:$0xf] %vm3150_vm4, %v3819_v41  ;;  %v3820_v50 = vpack.c.bf16 %v2628_v42, %v2628_v42  ;;  %v2366_v51 = vadd.f32 %v2127_v45, %v1389_v23 }
 0x2ce   : > { %v2126_v52 = vsel %vm2118_vm3, %v2107_v38, %v2108_v47 }
 0x2cf   : > { %3269 = vst.msk [vmem:[%s4930_s16 + $0x1d8] sm:$0xf] %vm3150_vm4, %v3820_v50  ;;  %v2501_v53 = vadd.f32 %v5580_v3, %v2366_v51  ;;  %v2367_v54 = vadd.f32 %v2126_v52, %v1394_v37  ;;  %v4596_v50 = vld [vmem:[%s5851_s3] ss:$0 sm:$0xff] }
 0x2d1   : > { %v2629_v55 = vmax.f32 %v2501_v53, 0.0  ;;  %v2502_v56 = vadd.f32 %v5580_v3, %v2367_v54  ;;  %v1957_v57 = vpop.f32.mrb[244].mxu1  ;;  %v1402_v58 = vpop.f32.mrb[244].mxu0 }
 0x2d2   : > { %v2109_v59 = vrot.slane %v1957_v57, 1  ;;  %v4472_v60 = vpop.f32.mrb[245].mxu1  ;;  %v4210_v61 = vpop.f32.mrb[245].mxu0 }
 0x2d3   : > { %v3821_v62 = vpack.c.bf16 %v2629_v55, %v2629_v55  ;;  %v2630_v63 = vmax.f32 %v2502_v56, 0.0  ;;  %v1960_v0 = vpop.f32.mrb[246].mxu1  ;;  %v1405_v13 = vpop.f32.mrb[246].mxu0 }
 0x2d4   : > { %v2125_v2 = vsel %vm2118_vm3, %v2108_v47, %v2109_v59  ;;  %v2110_v4 = vrot.slane %v1960_v0, 1  ;;  %v4473_v5 = vpop.f32.mrb[247].mxu1  ;;  %v4211_v6 = vpop.f32.mrb[247].mxu0 }
 0x2d5   : > { %3270 = vst.msk [vmem:[%s4930_s16 + $0x1dc] sm:$0xf] %vm3150_vm4, %v3821_v62  ;;  %v3822_v7 = vpack.c.bf16 %v2630_v63, %v2630_v63  ;;  %v2368_v8 = vadd.f32 %v2125_v2, %v1397_v44 }
 0x2d6   : > { %v2124_v9 = vsel %vm2118_vm3, %v2109_v59, %v2110_v4 }
 0x2d7   : > { %3271 = vst.msk [vmem:[%s4930_s16 + $0x1e0] sm:$0xf] %vm3150_vm4, %v3822_v7  ;;  %v2503_v10 = vadd.f32 %v5580_v3, %v2368_v8  ;;  %v2369_v46 = vadd.f32 %v2124_v9, %v1402_v58 }
 0x2d9   : > { %v2631_v11 = vmax.f32 %v2503_v10, 0.0  ;;  %v2504_v12 = vadd.f32 %v5580_v3, %v2369_v46  ;;  %v1965_v14 = vpop.f32.mrb[248].mxu1  ;;  %v1410_v15 = vpop.f32.mrb[248].mxu0 }
 0x2da   : > { %v2111_v16 = vrot.slane %v1965_v14, 1  ;;  %v4476_v17 = vpop.f32.mrb[249].mxu1  ;;  %v4214_v18 = vpop.f32.mrb[249].mxu0 }
 0x2db   : > { %v3823_v19 = vpack.c.bf16 %v2631_v11, %v2631_v11  ;;  %v2632_v20 = vmax.f32 %v2504_v12, 0.0  ;;  %v1968_v1 = vpop.f32.mrb[250].mxu1  ;;  %v1413_v21 = vpop.f32.mrb[250].mxu0 }
 0x2dc   : > { %v2123_v22 = vsel %vm2118_vm3, %v2110_v4, %v2111_v16  ;;  %v2112_v23 = vrot.slane %v1968_v1, 1  ;;  %v4477_v24 = vpop.f32.mrb[251].mxu1  ;;  %v4215_v25 = vpop.f32.mrb[251].mxu0 }
 0x2dd   : > { %3272 = vst.msk [vmem:[%s4930_s16 + $0x1e4] sm:$0xf] %vm3150_vm4, %v3823_v19  ;;  %v3824_v26 = vpack.c.bf16 %v2632_v20, %v2632_v20  ;;  %v2370_v27 = vadd.f32 %v2123_v22, %v1405_v13 }
 0x2de   : > { %v2122_v28 = vsel %vm2118_vm3, %v2111_v16, %v2112_v23 }
 0x2df   : > { %3273 = vst.msk [vmem:[%s4930_s16 + $0x1e8] sm:$0xf] %vm3150_vm4, %v3824_v26  ;;  %v2505_v29 = vadd.f32 %v5580_v3, %v2370_v27  ;;  %v2371_v30 = vadd.f32 %v2122_v28, %v1410_v15 }
 0x2e1   : > { %v2633_v31 = vmax.f32 %v2505_v29, 0.0  ;;  %v2506_v32 = vadd.f32 %v5580_v3, %v2371_v30  ;;  %v1973_v34 = vpop.f32.mrb[252].mxu1  ;;  %v1418_v35 = vpop.f32.mrb[252].mxu0 }
 0x2e2   : > { %v2113_v36 = vrot.slane %v1973_v34, 1  ;;  %v4480_v37 = vpop.f32.mrb[253].mxu1  ;;  %v4218_v38 = vpop.f32.mrb[253].mxu0 }
 0x2e3   : > { %v3825_v39 = vpack.c.bf16 %v2633_v31, %v2633_v31  ;;  %v2634_v40 = vmax.f32 %v2506_v32, 0.0  ;;  %v1976_v41 = vpop.f32.mrb[254].mxu1  ;;  %v1421_v42 = vpop.f32.mrb[254].mxu0 }
 0x2e4   : > { %v2121_v43 = vsel %vm2118_vm3, %v2112_v23, %v2113_v36  ;;  %v2114_v44 = vrot.slane %v1976_v41, 1  ;;  %v4481_v45 = vpop.f32.mrb[255].mxu1  ;;  %v4219_v47 = vpop.f32.mrb[255].mxu0 }
 0x2e5   : > { %3274 = vst.msk [vmem:[%s4930_s16 + $0x1ec] sm:$0xf] %vm3150_vm4, %v3825_v39  ;;  %v3826_v48 = vpack.c.bf16 %v2634_v40, %v2634_v40  ;;  %v2372_v3 = vadd.f32 %v2121_v43, %v1413_v21 }
 0x2e6   : > { %v2120_v49 = vsel %vm2118_vm3, %v2113_v36, %v2114_v44 }
 0x2e7   : > { %3275 = vst.msk [vmem:[%s4930_s16 + $0x1f0] sm:$0xf] %vm3150_vm4, %v3826_v48  ;;  %v2507_v51 = vadd.f32 %v4596_v50, %v2372_v3  ;;  %v2373_v52 = vadd.f32 %v2120_v49, %v1418_v35 }
 0x2e9   : > { %v2635_v53 = vmax.f32 %v2507_v51, 0.0  ;;  %v2508_v54 = vadd.f32 %v4596_v50, %v2373_v52  ;;  %v1981_v55 = vpop.f32.mrb[0].mxu1  ;;  %v1426_v56 = vpop.f32.mrb[0].mxu0 }
 0x2ea   : > { %v2115_v57 = vrot.slane %v1981_v55, 1  ;;  %v4484_v58 = vpop.f32.mrb[1].mxu1  ;;  %v4222_v59 = vpop.f32.mrb[1].mxu0 }
 0x2eb   : > { %v3827_v60 = vpack.c.bf16 %v2635_v53, %v2635_v53  ;;  %v2636_v61 = vmax.f32 %v2508_v54, 0.0  ;;  %v1984_v62 = vpop.f32.mrb[2].mxu1  ;;  %v1428_v63 = vpop.f32.mrb[2].mxu0 }
 0x2ec   : > { %v2119_v0 = vsel %vm2118_vm3, %v2114_v44, %v2115_v57  ;;  %v4485_v13 = vpop.f32.mrb[3].mxu1  ;;  %v4223_v2 = vpop.f32.mrb[3].mxu0 }
 0x2ed   : > { %3276 = vst.msk [vmem:[%s4930_s16 + $0x1f4] sm:$0xf] %vm3150_vm4, %v3827_v60  ;;  %v3828_v4 = vpack.c.bf16 %v2636_v61, %v2636_v61  ;;  %v2374_v5 = vadd.f32 %v2119_v0, %v1421_v42 }
 0x2ef   : > { %3277 = vst.msk [vmem:[%s4930_s16 + $0x1f8] sm:$0xf] %vm3150_vm4, %v3828_v4  ;;  %v2509_v6 = vadd.f32 %v4596_v50, %v2374_v5 }
 0x2f1   : > { %v2637_v7 = vmax.f32 %v2509_v6, 0.0 }
 0x2f3   : > { %v3829_v8 = vpack.c.bf16 %v2637_v7, %v2637_v7 }
 0x2f5   : > { %3278 = vst.msk [vmem:[%s4930_s16 + $0x1fc] sm:$0xf] %vm3150_vm4, %v3829_v8 }
 0x2f6 PF: > { %s14_s19 = sadd.s32 1, %s4635_s19   ;;  %s5853_s15 = smov %s4627_s17 }
 0x2f7   : > { %p11_p7 = scmp.ge.s32.totalorder %s14_s19, 18   ;;  %s5854_s16 = smov %s4631_s18 }
 0x2f8   : > { %s5855_s17 = smov %s5858_s20  ;;  %s5856_s18 = smov %s5862_s21 }
 0x2f9   :  { %13 = sbr.rel (!%p11_p7) target bundleno = 3 (0x3), region = 67 }

// kernel: encoder_forward.7
= control target key start
LH: loop header
LB: loop body
LE: loop exit
PB: predicated region body
PF: predicated region fallthrough
CT: control target
= control target key end

     0   :  { %s2651_s15 = smov 0   ;;  %s2653_s16 = smov 0   ;;  %s3294_s0 = inlined_call_operand.vmem [shape: bf16[2,2056,32], index: 0, kind: input, shape index: {}]   ;;  %s3295_s1 = inlined_call_operand.vmem [shape: bf16[32,16], index: 1, kind: input, shape index: {}]   ;;  %s3296_s2 = inlined_call_operand.vmem [shape: bf16[32,16], index: 2, kind: input, shape index: {}]   ;;  %s3297_s3 = inlined_call_operand.vmem [shape: f32[1,16], index: 3, kind: input, shape index: {}]   ;;  %s3298_s4 = inlined_call_operand.vmem [shape: bf16[2,2048,16], index: 4, kind: output, shape index: {}]  }
   0x1   :  { %s2655_s17 = smov 0   ;;  %s2657_s18 = smov 0  }
   0x2   :  { %s2659_s19 = smov 0  }
   0x3 LB: > { %s23_s20 = sadd.s32 1, %s2614_s17  ;;  %s26_s21 = sadd.s32 1, %s2618_s18  ;;  %s2622_s19 = sphi %s2659_s19, %s14_s19   ;;  %s2618_s18 = sphi %s2657_s18, %s3302_s18   ;;  %s2614_s17 = sphi %s2655_s17, %s3301_s17   ;;  %s2610_s16 = sphi %s2653_s16, %s3300_s16   ;;  %s2606_s15 = sphi %s2651_s15, %s3299_s15  }
   0x4   : > { %p24_p0 = scmp.ge.s32.totalorder %s23_s20, 4  ;;  %p1920_p1 = scmp.ge.s32.totalorder %s2622_s19, 1 }
   0x5   : > { %p176_p2 = scmp.lt.s32.totalorder %s2622_s19, 9 }
   0x6   : > { %s3304_s20 = smov (%p24_p0, %s23_s20), 0  ;;  %s3306_s21 = smov (!%p24_p0, %s26_s21), %s2618_s18 }
   0x7   : > { %p177_p3 = pnand %p1920_p1, %p176_p2  ;;  %p28_p4 = scmp.ge.s32.totalorder %s3306_s21, 2 }
   0x8   : > { %v2546_v0 = vld [vmem:[%s3296_s2] sm:$0xff] (!%p177_p3)   ;;  %v2624_v1 = vmov (!%p177_p3), 0.0   ;;  %v2547_v2 = vld [vmem:[%s3296_s2 + $0x8] sm:$0xff] (!%p177_p3)   ;;  %vm2625_vm0 = vmmov (!%p177_p3), 0   ;;  %p206_p5 = scmp.lt.s32.totalorder (!%p177_p3), %s2610_s16, 1  ;;  %s1925_s28 = sshll.u32 (!%p177_p3), %s2606_s15, 9  ;;  %v1243_v32 = vlaneseq (!%p177_p3) }
   0x9   : > { %s3308_s21 = smov (%p28_p4, %s3306_s21), 0  ;;  %180 = sbr.rel (%p177_p3) target bundleno = 502 (0x1f6), region = 36 }
   0xa   : > { %2367 = vmatprep.subr.bf16.mxu1 (!%p177_p3), %v2624_v1  ;;  %2231 = vmatprep.subr.bf16.mxu0 (!%p177_p3), %v2624_v1  ;;  %v2548_v3 = vld [vmem:[%s3295_s1] sm:$0xff] (!%p177_p3)   ;;  %v2550_v4 = vld [vmem:[%s3295_s1 + $0x8] sm:$0xff] (!%p177_p3)   ;;  %s223_s5 = sshra.s32 (!%p177_p3), %s1925_s28, 3  ;;  %vm471_vm1 = vcmask (!%p177_p3), 261120   ;;  %s1922_s12 = sshll.u32 (!%p177_p3), %s2606_s15, 6  ;;  %v2900_v33 = vshrl.u32 (!%p177_p3), %v1243_v32, 7 }
   0xb   : > { %2368 = vmatpush3.bf16.msra.mxu1 (!%p177_p3), %v2546_v0  ;;  %2371 = vmatprep.mubr.msk.bf16.mxu1 (!%p177_p3), %vm2625_vm0, %v2624_v1  ;;  %s1926_s7 = sshll.u32 (!%p177_p3), %s223_s5, 2  ;;  %p214_p6 = scmp.lt.s32.totalorder (!%p177_p3), %s1922_s12, 255  ;;  %v2912_v46 = vld [vmem:[%s3297_s3] ss:$0 sm:$0xff] (!%p177_p3)  ;;  %vm1765_vm3 = vcmask (!%p177_p3), 125952  }
   0xc   : > { %2369 = vmatprep.subr.bf16.mxu1 (!%p177_p3), %v2624_v1  ;;  %2235 = vmatprep.mubr.msk.bf16.mxu0 (!%p177_p3), %vm2625_vm0, %v2624_v1  ;;  %vm1245_vm2 = vcmp.lt.s32.totalorder (!%p177_p3), %v2900_v33, 7 }
   0xd   : > { %2232 = vmatpush3.bf16.msra.mxu0 (!%p177_p3), %v2548_v3 }
   0xe   : > { %2233 = vmatprep.subr.bf16.mxu0 (!%p177_p3), %v2624_v1 }
   0xf   : > { %2370 = vmatpush3.bf16.msra.mxu1 (!%p177_p3), %v2547_v2 }
  0x10   : > { %s3310_s16 = smov (!%p206_p5, %s2610_s16), 1  ;;  %s3312_s12 = smov (!%p214_p6, %s1922_s12), 255 }
  0x11   : > { %s2503_s6 = smul.u32 1028, %s3310_s16  ;;  %2234 = vmatpush3.bf16.msra.mxu0 %v2550_v4  ;;  %s1923_s13 = sshll.u32 %s3310_s16, 8 }
  0x12   : > { %s217_s14 = sadd.s32 %s1923_s13, %s3312_s12 }
  0x13   : > { %s210_s10 = scalar_lea.vmem %s3294_s0, %s2503_s6  ;;  %s1924_s16 = sshll.u32 %s217_s14, 2 }
  0x14   : > { %s2710_s11 = scalar_lea.vmem %s210_s10, %s1926_s7  ;;  %s2925_s25 = scalar_lea.vmem %s3298_s4, %s1924_s16 }
  0x15   : > { %v2549_v5 = vld [vmem:[%s2710_s11] sm:$0xff]   ;;  %v2551_v6 = vld [vmem:[%s2710_s11 + $0x8] sm:$0xff]   ;;  %v2552_v7 = vld [vmem:[%s2710_s11 + $0x10] sm:$0xff]  }
  0x16   : > { %2372 = vmatmul.mubr.msk.bf16.vlgmr.msra.gmra.mrb[0].mxu1 %vm471_vm1, %v2549_v5  ;;  %2236 = vmatmul.mubr.msk.bf16.vlgmr.msra.gmra.mrb[0].mxu0 %vm471_vm1, %v2549_v5  ;;  %v2553_v8 = vld [vmem:[%s2710_s11 + $0x18] sm:$0xff]   ;;  %v2554_v9 = vld [vmem:[%s2710_s11 + $0x20] sm:$0xff]   ;;  %v2555_v10 = vld [vmem:[%s2710_s11 + $0x28] sm:$0xff]  }
  0x17   : > { %2375 = vmatprep.mubr.msk.bf16.mxu1 %vm2625_vm0, %v2624_v1  ;;  %2239 = vmatprep.mubr.msk.bf16.mxu0 %vm2625_vm0, %v2624_v1  ;;  %v2556_v11 = vld [vmem:[%s2710_s11 + $0x30] sm:$0xff]   ;;  %v2557_v12 = vld [vmem:[%s2710_s11 + $0x38] sm:$0xff]   ;;  %v2558_v13 = vld [vmem:[%s2710_s11 + $0x40] sm:$0xff]  }
  0x18   : > { %v2559_v14 = vld [vmem:[%s2710_s11 + $0x48] sm:$0xff]   ;;  %v2560_v15 = vld [vmem:[%s2710_s11 + $0x50] sm:$0xff]   ;;  %v2561_v16 = vld [vmem:[%s2710_s11 + $0x58] sm:$0xff]  }
  0x19   : > { %v2562_v17 = vld [vmem:[%s2710_s11 + $0x60] sm:$0xff]   ;;  %v2563_v18 = vld [vmem:[%s2710_s11 + $0x68] sm:$0xff]   ;;  %v2564_v19 = vld [vmem:[%s2710_s11 + $0x70] sm:$0xff]  }
  0x1a   : > { %v2565_v20 = vld [vmem:[%s2710_s11 + $0x78] sm:$0xff]   ;;  %v2566_v21 = vld [vmem:[%s2710_s11 + $0x80] sm:$0xff]   ;;  %v2567_v22 = vld [vmem:[%s2710_s11 + $0x88] sm:$0xff]  }
  0x1b   : > { %v2568_v23 = vld [vmem:[%s2710_s11 + $0x90] sm:$0xff]   ;;  %v2569_v24 = vld [vmem:[%s2710_s11 + $0x98] sm:$0xff]   ;;  %v2570_v25 = vld [vmem:[%s2710_s11 + $0xa0] sm:$0xff]  }
  0x1c   : > { %v2571_v26 = vld [vmem:[%s2710_s11 + $0xa8] sm:$0xff]   ;;  %v2572_v27 = vld [vmem:[%s2710_s11 + $0xb0] sm:$0xff]   ;;  %v2573_v28 = vld [vmem:[%s2710_s11 + $0xb8] sm:$0xff]  }
  0x1d   : > { %v2574_v29 = vld [vmem:[%s2710_s11 + $0xc0] sm:$0xff]   ;;  %v2575_v30 = vld [vmem:[%s2710_s11 + $0xc8] sm:$0xff]   ;;  %v2576_v31 = vld [vmem:[%s2710_s11 + $0xd0] sm:$0xff]  }
  0x1e   : > { %2376 = vmatmul.mubr.msk.bf16.gmra.mrb[4].mxu1 %vm471_vm1, %v2551_v6  ;;  %2240 = vmatmul.mubr.msk.bf16.gmra.mrb[4].mxu0 %vm471_vm1, %v2551_v6  ;;  %v2577_v37 = vld [vmem:[%s2710_s11 + $0xd8] sm:$0xff]   ;;  %v2578_v53 = vld [vmem:[%s2710_s11 + $0xe0] sm:$0xff]  }
  0x1f   : > { %2379 = vmatprep.mubr.msk.bf16.mxu1 %vm2625_vm0, %v2624_v1  ;;  %2243 = vmatprep.mubr.msk.bf16.mxu0 %vm2625_vm0, %v2624_v1 }
  0x26   : > { %2380 = vmatmul.mubr.msk.bf16.gmra.mrb[8].mxu1 %vm471_vm1, %v2552_v7  ;;  %2244 = vmatmul.mubr.msk.bf16.gmra.mrb[8].mxu0 %vm471_vm1, %v2552_v7 }
  0x27   : > { %2383 = vmatprep.mubr.msk.bf16.mxu1 %vm2625_vm0, %v2624_v1  ;;  %2247 = vmatprep.mubr.msk.bf16.mxu0 %vm2625_vm0, %v2624_v1 }
  0x2e   : > { %2384 = vmatmul.mubr.msk.bf16.gmra.mrb[12].mxu1 %vm471_vm1, %v2553_v8  ;;  %2248 = vmatmul.mubr.msk.bf16.gmra.mrb[12].mxu0 %vm471_vm1, %v2553_v8 }
  0x2f   : > { %2387 = vmatprep.mubr.msk.bf16.mxu1 %vm2625_vm0, %v2624_v1  ;;  %2251 = vmatprep.mubr.msk.bf16.mxu0 %vm2625_vm0, %v2624_v1 }
  0x36   : > { %2388 = vmatmul.mubr.msk.bf16.gmra.mrb[16].mxu1 %vm471_vm1, %v2554_v9  ;;  %2252 = vmatmul.mubr.msk.bf16.gmra.mrb[16].mxu0 %vm471_vm1, %v2554_v9 }
  0x37   : > { %2391 = vmatprep.mubr.msk.bf16.mxu1 %vm2625_vm0, %v2624_v1  ;;  %2255 = vmatprep.mubr.msk.bf16.mxu0 %vm2625_vm0, %v2624_v1 }
  0x3e   : > { %2392 = vmatmul.mubr.msk.bf16.gmra.mrb[20].mxu1 %vm471_vm1, %v2555_v10  ;;  %2256 = vmatmul.mubr.msk.bf16.gmra.mrb[20].mxu0 %vm471_vm1, %v2555_v10  ;;  %v2579_v10 = vld [vmem:[%s2710_s11 + $0xe8] sm:$0xff]  }
  0x3f   : > { %2395 = vmatprep.mubr.msk.bf16.mxu1 %vm2625_vm0, %v2624_v1  ;;  %2259 = vmatprep.mubr.msk.bf16.mxu0 %vm2625_vm0, %v2624_v1 }
  0x46   : > { %2396 = vmatmul.mubr.msk.bf16.gmra.mrb[24].mxu1 %vm471_vm1, %v2556_v11  ;;  %2260 = vmatmul.mubr.msk.bf16.gmra.mrb[24].mxu0 %vm471_vm1, %v2556_v11 }
  0x47   : > { %2399 = vmatprep.mubr.msk.bf16.mxu1 %vm2625_vm0, %v2624_v1  ;;  %2263 = vmatprep.mubr.msk.bf16.mxu0 %vm2625_vm0, %v2624_v1 }
  0x4e   : > { %2400 = vmatmul.mubr.msk.bf16.gmra.mrb[28].mxu1 %vm471_vm1, %v2557_v12  ;;  %2264 = vmatmul.mubr.msk.bf16.gmra.mrb[28].mxu0 %vm471_vm1, %v2557_v12 }
  0x4f   : > { %2403 = vmatprep.mubr.msk.bf16.mxu1 %vm2625_vm0, %v2624_v1  ;;  %2267 = vmatprep.mubr.msk.bf16.mxu0 %vm2625_vm0, %v2624_v1 }
  0x56   : > { %2404 = vmatmul.mubr.msk.bf16.gmra.mrb[32].mxu1 %vm471_vm1, %v2558_v13  ;;  %2268 = vmatmul.mubr.msk.bf16.gmra.mrb[32].mxu0 %vm471_vm1, %v2558_v13 }
  0x57   : > { %2407 = vmatprep.mubr.msk.bf16.mxu1 %vm2625_vm0, %v2624_v1  ;;  %2271 = vmatprep.mubr.msk.bf16.mxu0 %vm2625_vm0, %v2624_v1 }
  0x5e   : > { %2408 = vmatmul.mubr.msk.bf16.gmra.mrb[36].mxu1 %vm471_vm1, %v2559_v14  ;;  %2272 = vmatmul.mubr.msk.bf16.gmra.mrb[36].mxu0 %vm471_vm1, %v2559_v14 }
  0x5f   : > { %2411 = vmatprep.mubr.msk.bf16.mxu1 %vm2625_vm0, %v2624_v1  ;;  %2275 = vmatprep.mubr.msk.bf16.mxu0 %vm2625_vm0, %v2624_v1 }
  0x66   : > { %2412 = vmatmul.mubr.msk.bf16.gmra.mrb[40].mxu1 %vm471_vm1, %v2560_v15  ;;  %2276 = vmatmul.mubr.msk.bf16.gmra.mrb[40].mxu0 %vm471_vm1, %v2560_v15 }
  0x67   : > { %2415 = vmatprep.mubr.msk.bf16.mxu1 %vm2625_vm0, %v2624_v1  ;;  %2279 = vmatprep.mubr.msk.bf16.mxu0 %vm2625_vm0, %v2624_v1 }
  0x6e   : > { %2416 = vmatmul.mubr.msk.bf16.gmra.mrb[44].mxu1 %vm471_vm1, %v2561_v16  ;;  %2280 = vmatmul.mubr.msk.bf16.gmra.mrb[44].mxu0 %vm471_vm1, %v2561_v16 }
  0x6f   : > { %2419 = vmatprep.mubr.msk.bf16.mxu1 %vm2625_vm0, %v2624_v1  ;;  %2283 = vmatprep.mubr.msk.bf16.mxu0 %vm2625_vm0, %v2624_v1 }
  0x76   : > { %2420 = vmatmul.mubr.msk.bf16.gmra.mrb[48].mxu1 %vm471_vm1, %v2562_v17  ;;  %2284 = vmatmul.mubr.msk.bf16.gmra.mrb[48].mxu0 %vm471_vm1, %v2562_v17 }
  0x77   : > { %2423 = vmatprep.mubr.msk.bf16.mxu1 %vm2625_vm0, %v2624_v1  ;;  %2287 = vmatprep.mubr.msk.bf16.mxu0 %vm2625_vm0, %v2624_v1 }
  0x7e   : > { %2424 = vmatmul.mubr.msk.bf16.gmra.mrb[52].mxu1 %vm471_vm1, %v2563_v18  ;;  %2288 = vmatmul.mubr.msk.bf16.gmra.mrb[52].mxu0 %vm471_vm1, %v2563_v18 }
  0x7f   : > { %2427 = vmatprep.mubr.msk.bf16.mxu1 %vm2625_vm0, %v2624_v1  ;;  %2291 = vmatprep.mubr.msk.bf16.mxu0 %vm2625_vm0, %v2624_v1 }
  0x86   : > { %2428 = vmatmul.mubr.msk.bf16.gmra.mrb[56].mxu1 %vm471_vm1, %v2564_v19  ;;  %2292 = vmatmul.mubr.msk.bf16.gmra.mrb[56].mxu0 %vm471_vm1, %v2564_v19 }
  0x87   : > { %2431 = vmatprep.mubr.msk.bf16.mxu1 %vm2625_vm0, %v2624_v1  ;;  %2295 = vmatprep.mubr.msk.bf16.mxu0 %vm2625_vm0, %v2624_v1 }
  0x8e   : > { %2432 = vmatmul.mubr.msk.bf16.gmra.mrb[60].mxu1 %vm471_vm1, %v2565_v20  ;;  %2296 = vmatmul.mubr.msk.bf16.gmra.mrb[60].mxu0 %vm471_vm1, %v2565_v20 }
  0x8f   : > { %2435 = vmatprep.mubr.msk.bf16.mxu1 %vm2625_vm0, %v2624_v1  ;;  %2299 = vmatprep.mubr.msk.bf16.mxu0 %vm2625_vm0, %v2624_v1 }
  0x96   : > { %2436 = vmatmul.mubr.msk.bf16.gmra.mrb[64].mxu1 %vm471_vm1, %v2566_v21  ;;  %2300 = vmatmul.mubr.msk.bf16.gmra.mrb[64].mxu0 %vm471_vm1, %v2566_v21 }
  0x97   : > { %2439 = vmatprep.mubr.msk.bf16.mxu1 %vm2625_vm0, %v2624_v1  ;;  %2303 = vmatprep.mubr.msk.bf16.mxu0 %vm2625_vm0, %v2624_v1 }
  0x9e   : > { %2440 = vmatmul.mubr.msk.bf16.gmra.mrb[68].mxu1 %vm471_vm1, %v2567_v22  ;;  %2304 = vmatmul.mubr.msk.bf16.gmra.mrb[68].mxu0 %vm471_vm1, %v2567_v22 }
  0x9f   : > { %2443 = vmatprep.mubr.msk.bf16.mxu1 %vm2625_vm0, %v2624_v1  ;;  %2307 = vmatprep.mubr.msk.bf16.mxu0 %vm2625_vm0, %v2624_v1 }
  0xa6   : > { %2444 = vmatmul.mubr.msk.bf16.gmra.mrb[72].mxu1 %vm471_vm1, %v2568_v23  ;;  %2308 = vmatmul.mubr.msk.bf16.gmra.mrb[72].mxu0 %vm471_vm1, %v2568_v23 }
  0xa7   : > { %2447 = vmatprep.mubr.msk.bf16.mxu1 %vm2625_vm0, %v2624_v1  ;;  %2311 = vmatprep.mubr.msk.bf16.mxu0 %vm2625_vm0, %v2624_v1 }
  0xae   : > { %2448 = vmatmul.mubr.msk.bf16.gmra.mrb[76].mxu1 %vm471_vm1, %v2569_v24  ;;  %2312 = vmatmul.mubr.msk.bf16.gmra.mrb[76].mxu0 %vm471_vm1, %v2569_v24 }
  0xaf   : > { %2451 = vmatprep.mubr.msk.bf16.mxu1 %vm2625_vm0, %v2624_v1  ;;  %2315 = vmatprep.mubr.msk.bf16.mxu0 %vm2625_vm0, %v2624_v1 }
  0xb6   : > { %2452 = vmatmul.mubr.msk.bf16.gmra.mrb[80].mxu1 %vm471_vm1, %v2570_v25  ;;  %2316 = vmatmul.mubr.msk.bf16.gmra.mrb[80].mxu0 %vm471_vm1, %v2570_v25 }
  0xb7   : > { %2455 = vmatprep.mubr.msk.bf16.mxu1 %vm2625_vm0, %v2624_v1  ;;  %2319 = vmatprep.mubr.msk.bf16.mxu0 %vm2625_vm0, %v2624_v1 }
  0xbe   : > { %2456 = vmatmul.mubr.msk.bf16.gmra.mrb[84].mxu1 %vm471_vm1, %v2571_v26  ;;  %2320 = vmatmul.mubr.msk.bf16.gmra.mrb[84].mxu0 %vm471_vm1, %v2571_v26 }
  0xbf   : > { %2459 = vmatprep.mubr.msk.bf16.mxu1 %vm2625_vm0, %v2624_v1  ;;  %2323 = vmatprep.mubr.msk.bf16.mxu0 %vm2625_vm0, %v2624_v1 }
  0xc6   : > { %2460 = vmatmul.mubr.msk.bf16.gmra.mrb[88].mxu1 %vm471_vm1, %v2572_v27  ;;  %2324 = vmatmul.mubr.msk.bf16.gmra.mrb[88].mxu0 %vm471_vm1, %v2572_v27 }
  0xc7   : > { %2463 = vmatprep.mubr.msk.bf16.mxu1 %vm2625_vm0, %v2624_v1  ;;  %2327 = vmatprep.mubr.msk.bf16.mxu0 %vm2625_vm0, %v2624_v1 }
  0xce   : > { %2464 = vmatmul.mubr.msk.bf16.gmra.mrb[92].mxu1 %vm471_vm1, %v2573_v28  ;;  %2328 = vmatmul.mubr.msk.bf16.gmra.mrb[92].mxu0 %vm471_vm1, %v2573_v28 }
  0xcf   : > { %2467 = vmatprep.mubr.msk.bf16.mxu1 %vm2625_vm0, %v2624_v1  ;;  %2331 = vmatprep.mubr.msk.bf16.mxu0 %vm2625_vm0, %v2624_v1 }
  0xd6   : > { %2468 = vmatmul.mubr.msk.bf16.gmra.mrb[96].mxu1 %vm471_vm1, %v2574_v29  ;;  %2332 = vmatmul.mubr.msk.bf16.gmra.mrb[96].mxu0 %vm471_vm1, %v2574_v29 }
  0xd7   : > { %2471 = vmatprep.mubr.msk.bf16.mxu1 %vm2625_vm0, %v2624_v1  ;;  %2335 = vmatprep.mubr.msk.bf16.mxu0 %vm2625_vm0, %v2624_v1 }
  0xde   : > { %2472 = vmatmul.mubr.msk.bf16.gmra.mrb[100].mxu1 %vm471_vm1, %v2575_v30  ;;  %2336 = vmatmul.mubr.msk.bf16.gmra.mrb[100].mxu0 %vm471_vm1, %v2575_v30 }
  0xdf   : > { %2475 = vmatprep.mubr.msk.bf16.mxu1 %vm2625_vm0, %v2624_v1  ;;  %2339 = vmatprep.mubr.msk.bf16.mxu0 %vm2625_vm0, %v2624_v1 }
  0xe6   : > { %2476 = vmatmul.mubr.msk.bf16.gmra.mrb[104].mxu1 %vm471_vm1, %v2576_v31  ;;  %2340 = vmatmul.mubr.msk.bf16.gmra.mrb[104].mxu0 %vm471_vm1, %v2576_v31  ;;  %v2580_v31 = vld [vmem:[%s2710_s11 + $0xf0] sm:$0xff]  }
  0xe7   : > { %2479 = vmatprep.mubr.msk.bf16.mxu1 %vm2625_vm0, %v2624_v1  ;;  %2343 = vmatprep.mubr.msk.bf16.mxu0 %vm2625_vm0, %v2624_v1 }
  0xe9   : > { %v916_v34 = vpop.f32.mrb[0].mxu1  ;;  %v605_v35 = vpop.f32.mrb[0].mxu0 }
  0xea   : > { %v2373_v36 = vpop.f32.mrb[1].mxu1  ;;  %v2237_v38 = vpop.f32.mrb[1].mxu0  ;;  %v1178_v41 = vrot.slane %v916_v34, 1 }
  0xeb   : > { %v919_v39 = vpop.f32.mrb[2].mxu1  ;;  %v608_v40 = vpop.f32.mrb[2].mxu0 }
  0xec   : > { %v1179_v42 = vrot.slane %v919_v39, 1  ;;  %v2374_v43 = vpop.f32.mrb[3].mxu1  ;;  %v2238_v44 = vpop.f32.mrb[3].mxu0 }
  0xee   : > { %v1309_v45 = vsel %vm1245_vm2, %v1178_v41, %v1179_v42  ;;  %2480 = vmatmul.mubr.msk.bf16.gmra.mrb[108].mxu1 %vm471_vm1, %v2577_v37  ;;  %2344 = vmatmul.mubr.msk.bf16.gmra.mrb[108].mxu0 %vm471_vm1, %v2577_v37 }
  0xef   : > { %v1310_v47 = vadd.f32 %v1309_v45, %v605_v35  ;;  %2483 = vmatprep.mubr.msk.bf16.mxu1 %vm2625_vm0, %v2624_v1  ;;  %2347 = vmatprep.mubr.msk.bf16.mxu0 %vm2625_vm0, %v2624_v1 }
  0xf1   : > { %v1381_v48 = vadd.f32 %v2912_v46, %v1310_v47  ;;  %v924_v49 = vpop.f32.mrb[4].mxu1  ;;  %v613_v50 = vpop.f32.mrb[4].mxu0 }
  0xf2   : > { %v1180_v51 = vrot.slane %v924_v49, 1  ;;  %v2377_v52 = vpop.f32.mrb[5].mxu1  ;;  %v2241_v54 = vpop.f32.mrb[5].mxu0 }
  0xf3   : > { %v1445_v55 = vmax.f32 %v1381_v48, 0.0  ;;  %v927_v56 = vpop.f32.mrb[6].mxu1  ;;  %v616_v57 = vpop.f32.mrb[6].mxu0  ;;  %v2581_v54 = vld [vmem:[%s2710_s11 + $0xf8] sm:$0xff]  }
  0xf4   : > { %v1308_v58 = vsel %vm1245_vm2, %v1179_v42, %v1180_v51  ;;  %v1181_v59 = vrot.slane %v927_v56, 1  ;;  %v2378_v60 = vpop.f32.mrb[7].mxu1  ;;  %v2242_v61 = vpop.f32.mrb[7].mxu0 }
  0xf5   : > { %v2097_v62 = vpack.c.bf16 %v1445_v55, %v1445_v55  ;;  %v1311_v63 = vadd.f32 %v1308_v58, %v608_v40 }
  0xf6   : > { %v1307_v0 = vsel %vm1245_vm2, %v1180_v51, %v1181_v59  ;;  %2484 = vmatmul.mubr.msk.bf16.gmra.mrb[112].mxu1 %vm471_vm1, %v2578_v53  ;;  %2348 = vmatmul.mubr.msk.bf16.gmra.mrb[112].mxu0 %vm471_vm1, %v2578_v53 }
  0xf7   : > { %1766 = vst.msk [vmem:[%s2925_s25] sm:$0xf] %vm1765_vm3, %v2097_v62  ;;  %v1382_v2 = vadd.f32 %v2912_v46, %v1311_v63  ;;  %v1312_v3 = vadd.f32 %v1307_v0, %v613_v50  ;;  %2487 = vmatprep.mubr.msk.bf16.mxu1 %vm2625_vm0, %v2624_v1  ;;  %2351 = vmatprep.mubr.msk.bf16.mxu0 %vm2625_vm0, %v2624_v1 }
  0xf9   : > { %v1446_v4 = vmax.f32 %v1382_v2, 0.0  ;;  %v1383_v5 = vadd.f32 %v2912_v46, %v1312_v3  ;;  %v932_v6 = vpop.f32.mrb[8].mxu1  ;;  %v621_v7 = vpop.f32.mrb[8].mxu0 }
  0xfa   : > { %v1182_v8 = vrot.slane %v932_v6, 1  ;;  %v2381_v9 = vpop.f32.mrb[9].mxu1  ;;  %v2245_v11 = vpop.f32.mrb[9].mxu0 }
  0xfb   : > { %v2098_v12 = vpack.c.bf16 %v1446_v4, %v1446_v4  ;;  %v1447_v13 = vmax.f32 %v1383_v5, 0.0  ;;  %v935_v14 = vpop.f32.mrb[10].mxu1  ;;  %v624_v15 = vpop.f32.mrb[10].mxu0 }
  0xfc   : > { %v1306_v16 = vsel %vm1245_vm2, %v1181_v59, %v1182_v8  ;;  %v1183_v17 = vrot.slane %v935_v14, 1  ;;  %v2382_v18 = vpop.f32.mrb[11].mxu1  ;;  %v2246_v19 = vpop.f32.mrb[11].mxu0 }
  0xfd   : > { %1767 = vst.msk [vmem:[%s2925_s25 + $0x4] sm:$0xf] %vm1765_vm3, %v2098_v12  ;;  %v2099_v20 = vpack.c.bf16 %v1447_v13, %v1447_v13  ;;  %v1313_v21 = vadd.f32 %v1306_v16, %v616_v57  ;;  %v2582_v12 = vld [vmem:[%s2710_s11 + $0x100] ss:$0 sps:$4 sm:$0xff]  }
  0xfe   : > { %v1305_v22 = vsel %vm1245_vm2, %v1182_v8, %v1183_v17  ;;  %2488 = vmatmul.mubr.msk.bf16.gmra.mrb[116].mxu1 %vm471_vm1, %v2579_v10  ;;  %2352 = vmatmul.mubr.msk.bf16.gmra.mrb[116].mxu0 %vm471_vm1, %v2579_v10 }
  0xff   : > { %1768 = vst.msk [vmem:[%s2925_s25 + $0x8] sm:$0xf] %vm1765_vm3, %v2099_v20  ;;  %v1384_v23 = vadd.f32 %v2912_v46, %v1313_v21  ;;  %v1314_v24 = vadd.f32 %v1305_v22, %v621_v7  ;;  %2491 = vmatprep.mubr.msk.bf16.mxu1 %vm2625_vm0, %v2624_v1  ;;  %2355 = vmatprep.mubr.msk.bf16.mxu0 %vm2625_vm0, %v2624_v1 }
 0x101   : > { %v1448_v25 = vmax.f32 %v1384_v23, 0.0  ;;  %v1385_v26 = vadd.f32 %v2912_v46, %v1314_v24  ;;  %v940_v27 = vpop.f32.mrb[12].mxu1  ;;  %v629_v28 = vpop.f32.mrb[12].mxu0 }
 0x102   : > { %v1184_v29 = vrot.slane %v940_v27, 1  ;;  %v2385_v30 = vpop.f32.mrb[13].mxu1  ;;  %v2249_v32 = vpop.f32.mrb[13].mxu0 }
 0x103   : > { %v2100_v34 = vpack.c.bf16 %v1448_v25, %v1448_v25  ;;  %v1449_v35 = vmax.f32 %v1385_v26, 0.0  ;;  %v943_v36 = vpop.f32.mrb[14].mxu1  ;;  %v632_v37 = vpop.f32.mrb[14].mxu0 }
 0x104   : > { %v1304_v38 = vsel %vm1245_vm2, %v1183_v17, %v1184_v29  ;;  %v1185_v39 = vrot.slane %v943_v36, 1  ;;  %v2386_v40 = vpop.f32.mrb[15].mxu1  ;;  %v2250_v41 = vpop.f32.mrb[15].mxu0 }
 0x105   : > { %1769 = vst.msk [vmem:[%s2925_s25 + $0xc] sm:$0xf] %vm1765_vm3, %v2100_v34  ;;  %v2101_v42 = vpack.c.bf16 %v1449_v35, %v1449_v35  ;;  %v1315_v43 = vadd.f32 %v1304_v38, %v624_v15 }
 0x106   : > { %v1303_v44 = vsel %vm1245_vm2, %v1184_v29, %v1185_v39  ;;  %2492 = vmatmul.mubr.msk.bf16.gmra.mrb[120].mxu1 %vm471_vm1, %v2580_v31  ;;  %2356 = vmatmul.mubr.msk.bf16.gmra.mrb[120].mxu0 %vm471_vm1, %v2580_v31 }
 0x107   : > { %1770 = vst.msk [vmem:[%s2925_s25 + $0x10] sm:$0xf] %vm1765_vm3, %v2101_v42  ;;  %v1386_v45 = vadd.f32 %v2912_v46, %v1315_v43  ;;  %v1316_v47 = vadd.f32 %v1303_v44, %v629_v28  ;;  %2495 = vmatprep.mubr.msk.bf16.mxu1 %vm2625_vm0, %v2624_v1  ;;  %2359 = vmatprep.mubr.msk.bf16.mxu0 %vm2625_vm0, %v2624_v1 }
 0x109   : > { %v1450_v48 = vmax.f32 %v1386_v45, 0.0  ;;  %v1387_v49 = vadd.f32 %v2912_v46, %v1316_v47  ;;  %v948_v50 = vpop.f32.mrb[16].mxu1  ;;  %v637_v51 = vpop.f32.mrb[16].mxu0 }
 0x10a   : > { %v1186_v52 = vrot.slane %v948_v50, 1  ;;  %v2389_v53 = vpop.f32.mrb[17].mxu1  ;;  %v2253_v55 = vpop.f32.mrb[17].mxu0 }
 0x10b   : > { %v2102_v56 = vpack.c.bf16 %v1450_v48, %v1450_v48  ;;  %v1451_v57 = vmax.f32 %v1387_v49, 0.0  ;;  %v951_v58 = vpop.f32.mrb[18].mxu1  ;;  %v640_v59 = vpop.f32.mrb[18].mxu0 }
 0x10c   : > { %v1302_v60 = vsel %vm1245_vm2, %v1185_v39, %v1186_v52  ;;  %v1187_v61 = vrot.slane %v951_v58, 1  ;;  %v2390_v62 = vpop.f32.mrb[19].mxu1  ;;  %v2254_v63 = vpop.f32.mrb[19].mxu0 }
 0x10d   : > { %1771 = vst.msk [vmem:[%s2925_s25 + $0x14] sm:$0xf] %vm1765_vm3, %v2102_v56  ;;  %v2103_v0 = vpack.c.bf16 %v1451_v57, %v1451_v57  ;;  %v1317_v2 = vadd.f32 %v1302_v60, %v632_v37 }
 0x10e   : > { %v1301_v3 = vsel %vm1245_vm2, %v1186_v52, %v1187_v61  ;;  %2496 = vmatmul.mubr.msk.bf16.gmra.mrb[124].mxu1 %vm471_vm1, %v2581_v54  ;;  %2360 = vmatmul.mubr.msk.bf16.gmra.mrb[124].mxu0 %vm471_vm1, %v2581_v54 }
 0x10f   : > { %1772 = vst.msk [vmem:[%s2925_s25 + $0x18] sm:$0xf] %vm1765_vm3, %v2103_v0  ;;  %v1388_v4 = vadd.f32 %v2912_v46, %v1317_v2  ;;  %v1318_v5 = vadd.f32 %v1301_v3, %v637_v51  ;;  %2499 = vmatprep.mubr.msk.bf16.mxu1 %vm2625_vm0, %v2624_v1  ;;  %2363 = vmatprep.mubr.msk.bf16.mxu0 %vm2625_vm0, %v2624_v1 }
 0x111   : > { %v1452_v6 = vmax.f32 %v1388_v4, 0.0  ;;  %v1389_v7 = vadd.f32 %v2912_v46, %v1318_v5  ;;  %v956_v8 = vpop.f32.mrb[20].mxu1  ;;  %v645_v9 = vpop.f32.mrb[20].mxu0 }
 0x112   : > { %v1188_v10 = vrot.slane %v956_v8, 1  ;;  %v2393_v11 = vpop.f32.mrb[21].mxu1  ;;  %v2257_v13 = vpop.f32.mrb[21].mxu0 }
 0x113   : > { %v2104_v14 = vpack.c.bf16 %v1452_v6, %v1452_v6  ;;  %v1453_v15 = vmax.f32 %v1389_v7, 0.0  ;;  %v959_v16 = vpop.f32.mrb[22].mxu1  ;;  %v648_v17 = vpop.f32.mrb[22].mxu0 }
 0x114   : > { %v1300_v18 = vsel %vm1245_vm2, %v1187_v61, %v1188_v10  ;;  %v1189_v19 = vrot.slane %v959_v16, 1  ;;  %v2394_v1 = vpop.f32.mrb[23].mxu1  ;;  %v2258_v20 = vpop.f32.mrb[23].mxu0 }
 0x115   : > { %1773 = vst.msk [vmem:[%s2925_s25 + $0x1c] sm:$0xf] %vm1765_vm3, %v2104_v14  ;;  %v2105_v21 = vpack.c.bf16 %v1453_v15, %v1453_v15  ;;  %v1319_v22 = vadd.f32 %v1300_v18, %v640_v59 }
 0x116   : > { %v1299_v23 = vsel %vm1245_vm2, %v1188_v10, %v1189_v19  ;;  %2500 = vmatmul.mubr.msk.bf16.gmra.mrb[128].mxu1 %vm471_vm1, %v2582_v12  ;;  %2364 = vmatmul.mubr.msk.bf16.gmra.mrb[128].mxu0 %vm471_vm1, %v2582_v12 }
 0x117   : > { %1774 = vst.msk [vmem:[%s2925_s25 + $0x20] sm:$0xf] %vm1765_vm3, %v2105_v21  ;;  %v1390_v24 = vadd.f32 %v2912_v46, %v1319_v22  ;;  %v1320_v25 = vadd.f32 %v1299_v23, %v645_v9 }
 0x119   : > { %v1454_v26 = vmax.f32 %v1390_v24, 0.0  ;;  %v1391_v27 = vadd.f32 %v2912_v46, %v1320_v25  ;;  %v964_v28 = vpop.f32.mrb[24].mxu1  ;;  %v653_v29 = vpop.f32.mrb[24].mxu0 }
 0x11a   : > { %v1190_v30 = vrot.slane %v964_v28, 1  ;;  %v2397_v31 = vpop.f32.mrb[25].mxu1  ;;  %v2261_v32 = vpop.f32.mrb[25].mxu0 }
 0x11b   : > { %v2106_v34 = vpack.c.bf16 %v1454_v26, %v1454_v26  ;;  %v1455_v35 = vmax.f32 %v1391_v27, 0.0  ;;  %v967_v36 = vpop.f32.mrb[26].mxu1  ;;  %v656_v37 = vpop.f32.mrb[26].mxu0 }
 0x11c   : > { %v1298_v38 = vsel %vm1245_vm2, %v1189_v19, %v1190_v30  ;;  %v1191_v39 = vrot.slane %v967_v36, 1  ;;  %v2398_v40 = vpop.f32.mrb[27].mxu1  ;;  %v2262_v41 = vpop.f32.mrb[27].mxu0 }
 0x11d   : > { %1775 = vst.msk [vmem:[%s2925_s25 + $0x24] sm:$0xf] %vm1765_vm3, %v2106_v34  ;;  %v2107_v42 = vpack.c.bf16 %v1455_v35, %v1455_v35  ;;  %v1321_v43 = vadd.f32 %v1298_v38, %v648_v17 }
 0x11e   : > { %v1297_v44 = vsel %vm1245_vm2, %v1190_v30, %v1191_v39 }
 0x11f   : > { %1776 = vst.msk [vmem:[%s2925_s25 + $0x28] sm:$0xf] %vm1765_vm3, %v2107_v42  ;;  %v1392_v45 = vadd.f32 %v2912_v46, %v1321_v43  ;;  %v1322_v47 = vadd.f32 %v1297_v44, %v653_v29 }
 0x121   : > { %v1456_v48 = vmax.f32 %v1392_v45, 0.0  ;;  %v1393_v49 = vadd.f32 %v2912_v46, %v1322_v47  ;;  %v972_v50 = vpop.f32.mrb[28].mxu1  ;;  %v661_v51 = vpop.f32.mrb[28].mxu0 }
 0x122   : > { %v1192_v52 = vrot.slane %v972_v50, 1  ;;  %v2401_v53 = vpop.f32.mrb[29].mxu1  ;;  %v2265_v54 = vpop.f32.mrb[29].mxu0 }
 0x123   : > { %v2108_v55 = vpack.c.bf16 %v1456_v48, %v1456_v48  ;;  %v1457_v56 = vmax.f32 %v1393_v49, 0.0  ;;  %v975_v57 = vpop.f32.mrb[30].mxu1  ;;  %v664_v58 = vpop.f32.mrb[30].mxu0 }
 0x124   : > { %v1296_v59 = vsel %vm1245_vm2, %v1191_v39, %v1192_v52  ;;  %v1193_v60 = vrot.slane %v975_v57, 1  ;;  %v2402_v61 = vpop.f32.mrb[31].mxu1  ;;  %v2266_v62 = vpop.f32.mrb[31].mxu0 }
 0x125   : > { %1777 = vst.msk [vmem:[%s2925_s25 + $0x2c] sm:$0xf] %vm1765_vm3, %v2108_v55  ;;  %v2109_v63 = vpack.c.bf16 %v1457_v56, %v1457_v56  ;;  %v1323_v0 = vadd.f32 %v1296_v59, %v656_v37 }
 0x126   : > { %v1295_v2 = vsel %vm1245_vm2, %v1192_v52, %v1193_v60 }
 0x127   : > { %1778 = vst.msk [vmem:[%s2925_s25 + $0x30] sm:$0xf] %vm1765_vm3, %v2109_v63  ;;  %v1394_v3 = vadd.f32 %v2912_v46, %v1323_v0  ;;  %v1324_v4 = vadd.f32 %v1295_v2, %v661_v51 }
 0x129   : > { %v1458_v5 = vmax.f32 %v1394_v3, 0.0  ;;  %v1395_v6 = vadd.f32 %v2912_v46, %v1324_v4  ;;  %v980_v7 = vpop.f32.mrb[32].mxu1  ;;  %v669_v8 = vpop.f32.mrb[32].mxu0 }
 0x12a   : > { %v1194_v9 = vrot.slane %v980_v7, 1  ;;  %v2405_v10 = vpop.f32.mrb[33].mxu1  ;;  %v2269_v11 = vpop.f32.mrb[33].mxu0 }
 0x12b   : > { %v2110_v12 = vpack.c.bf16 %v1458_v5, %v1458_v5  ;;  %v1459_v13 = vmax.f32 %v1395_v6, 0.0  ;;  %v983_v14 = vpop.f32.mrb[34].mxu1  ;;  %v672_v15 = vpop.f32.mrb[34].mxu0 }
 0x12c   : > { %v1294_v16 = vsel %vm1245_vm2, %v1193_v60, %v1194_v9  ;;  %v1195_v17 = vrot.slane %v983_v14, 1  ;;  %v2406_v18 = vpop.f32.mrb[35].mxu1  ;;  %v2270_v19 = vpop.f32.mrb[35].mxu0 }
 0x12d   : > { %1779 = vst.msk [vmem:[%s2925_s25 + $0x34] sm:$0xf] %vm1765_vm3, %v2110_v12  ;;  %v2111_v1 = vpack.c.bf16 %v1459_v13, %v1459_v13  ;;  %v1325_v20 = vadd.f32 %v1294_v16, %v664_v58 }
 0x12e   : > { %v1293_v21 = vsel %vm1245_vm2, %v1194_v9, %v1195_v17 }
 0x12f   : > { %1780 = vst.msk [vmem:[%s2925_s25 + $0x38] sm:$0xf] %vm1765_vm3, %v2111_v1  ;;  %v1396_v22 = vadd.f32 %v2912_v46, %v1325_v20  ;;  %v1326_v23 = vadd.f32 %v1293_v21, %v669_v8 }
 0x131   : > { %v1460_v24 = vmax.f32 %v1396_v22, 0.0  ;;  %v1397_v25 = vadd.f32 %v2912_v46, %v1326_v23  ;;  %v988_v26 = vpop.f32.mrb[36].mxu1  ;;  %v677_v27 = vpop.f32.mrb[36].mxu0 }
 0x132   : > { %v1196_v28 = vrot.slane %v988_v26, 1  ;;  %v2409_v29 = vpop.f32.mrb[37].mxu1  ;;  %v2273_v30 = vpop.f32.mrb[37].mxu0 }
 0x133   : > { %v2112_v31 = vpack.c.bf16 %v1460_v24, %v1460_v24  ;;  %v1461_v32 = vmax.f32 %v1397_v25, 0.0  ;;  %v991_v34 = vpop.f32.mrb[38].mxu1  ;;  %v680_v35 = vpop.f32.mrb[38].mxu0 }
 0x134   : > { %v1292_v36 = vsel %vm1245_vm2, %v1195_v17, %v1196_v28  ;;  %v1197_v37 = vrot.slane %v991_v34, 1  ;;  %v2410_v38 = vpop.f32.mrb[39].mxu1  ;;  %v2274_v39 = vpop.f32.mrb[39].mxu0 }
 0x135   : > { %1781 = vst.msk [vmem:[%s2925_s25 + $0x3c] sm:$0xf] %vm1765_vm3, %v2112_v31  ;;  %v2113_v40 = vpack.c.bf16 %v1461_v32, %v1461_v32  ;;  %v1327_v41 = vadd.f32 %v1292_v36, %v672_v15 }
 0x136   : > { %v1291_v42 = vsel %vm1245_vm2, %v1196_v28, %v1197_v37 }
 0x137   : > { %1782 = vst.msk [vmem:[%s2925_s25 + $0x40] sm:$0xf] %vm1765_vm3, %v2113_v40  ;;  %v1398_v43 = vadd.f32 %v2912_v46, %v1327_v41  ;;  %v1328_v44 = vadd.f32 %v1291_v42, %v677_v27 }
 0x139   : > { %v1462_v45 = vmax.f32 %v1398_v43, 0.0  ;;  %v1399_v47 = vadd.f32 %v2912_v46, %v1328_v44  ;;  %v996_v48 = vpop.f32.mrb[40].mxu1  ;;  %v685_v49 = vpop.f32.mrb[40].mxu0 }
 0x13a   : > { %v1198_v50 = vrot.slane %v996_v48, 1  ;;  %v2413_v51 = vpop.f32.mrb[41].mxu1  ;;  %v2277_v52 = vpop.f32.mrb[41].mxu0 }
 0x13b   : > { %v2114_v53 = vpack.c.bf16 %v1462_v45, %v1462_v45  ;;  %v1463_v54 = vmax.f32 %v1399_v47, 0.0  ;;  %v999_v55 = vpop.f32.mrb[42].mxu1  ;;  %v688_v56 = vpop.f32.mrb[42].mxu0 }
 0x13c   : > { %v1290_v57 = vsel %vm1245_vm2, %v1197_v37, %v1198_v50  ;;  %v1199_v58 = vrot.slane %v999_v55, 1  ;;  %v2414_v59 = vpop.f32.mrb[43].mxu1  ;;  %v2278_v60 = vpop.f32.mrb[43].mxu0 }
 0x13d   : > { %1783 = vst.msk [vmem:[%s2925_s25 + $0x44] sm:$0xf] %vm1765_vm3, %v2114_v53  ;;  %v2115_v61 = vpack.c.bf16 %v1463_v54, %v1463_v54  ;;  %v1329_v62 = vadd.f32 %v1290_v57, %v680_v35 }
 0x13e   : > { %v1289_v63 = vsel %vm1245_vm2, %v1198_v50, %v1199_v58 }
 0x13f   : > { %1784 = vst.msk [vmem:[%s2925_s25 + $0x48] sm:$0xf] %vm1765_vm3, %v2115_v61  ;;  %v1400_v0 = vadd.f32 %v2912_v46, %v1329_v62  ;;  %v1330_v2 = vadd.f32 %v1289_v63, %v685_v49 }
 0x141   : > { %v1464_v3 = vmax.f32 %v1400_v0, 0.0  ;;  %v1401_v4 = vadd.f32 %v2912_v46, %v1330_v2  ;;  %v1004_v5 = vpop.f32.mrb[44].mxu1  ;;  %v693_v6 = vpop.f32.mrb[44].mxu0 }
 0x142   : > { %v1200_v7 = vrot.slane %v1004_v5, 1  ;;  %v2417_v8 = vpop.f32.mrb[45].mxu1  ;;  %v2281_v9 = vpop.f32.mrb[45].mxu0 }
 0x143   : > { %v2116_v10 = vpack.c.bf16 %v1464_v3, %v1464_v3  ;;  %v1465_v11 = vmax.f32 %v1401_v4, 0.0  ;;  %v1007_v12 = vpop.f32.mrb[46].mxu1  ;;  %v696_v13 = vpop.f32.mrb[46].mxu0 }
 0x144   : > { %v1288_v14 = vsel %vm1245_vm2, %v1199_v58, %v1200_v7  ;;  %v1201_v15 = vrot.slane %v1007_v12, 1  ;;  %v2418_v16 = vpop.f32.mrb[47].mxu1  ;;  %v2282_v17 = vpop.f32.mrb[47].mxu0 }
 0x145   : > { %1785 = vst.msk [vmem:[%s2925_s25 + $0x4c] sm:$0xf] %vm1765_vm3, %v2116_v10  ;;  %v2117_v18 = vpack.c.bf16 %v1465_v11, %v1465_v11  ;;  %v1331_v19 = vadd.f32 %v1288_v14, %v688_v56 }
 0x146   : > { %v1287_v1 = vsel %vm1245_vm2, %v1200_v7, %v1201_v15 }
 0x147   : > { %1786 = vst.msk [vmem:[%s2925_s25 + $0x50] sm:$0xf] %vm1765_vm3, %v2117_v18  ;;  %v1402_v20 = vadd.f32 %v2912_v46, %v1331_v19  ;;  %v1332_v21 = vadd.f32 %v1287_v1, %v693_v6 }
 0x149   : > { %v1466_v22 = vmax.f32 %v1402_v20, 0.0  ;;  %v1403_v23 = vadd.f32 %v2912_v46, %v1332_v21  ;;  %v1012_v24 = vpop.f32.mrb[48].mxu1  ;;  %v701_v25 = vpop.f32.mrb[48].mxu0 }
 0x14a   : > { %v1202_v26 = vrot.slane %v1012_v24, 1  ;;  %v2421_v27 = vpop.f32.mrb[49].mxu1  ;;  %v2285_v28 = vpop.f32.mrb[49].mxu0 }
 0x14b   : > { %v2118_v29 = vpack.c.bf16 %v1466_v22, %v1466_v22  ;;  %v1467_v30 = vmax.f32 %v1403_v23, 0.0  ;;  %v1015_v31 = vpop.f32.mrb[50].mxu1  ;;  %v704_v32 = vpop.f32.mrb[50].mxu0 }
 0x14c   : > { %v1286_v34 = vsel %vm1245_vm2, %v1201_v15, %v1202_v26  ;;  %v1203_v35 = vrot.slane %v1015_v31, 1  ;;  %v2422_v36 = vpop.f32.mrb[51].mxu1  ;;  %v2286_v37 = vpop.f32.mrb[51].mxu0 }
 0x14d   : > { %1787 = vst.msk [vmem:[%s2925_s25 + $0x54] sm:$0xf] %vm1765_vm3, %v2118_v29  ;;  %v2119_v38 = vpack.c.bf16 %v1467_v30, %v1467_v30  ;;  %v1333_v39 = vadd.f32 %v1286_v34, %v696_v13 }
 0x14e   : > { %v1285_v40 = vsel %vm1245_vm2, %v1202_v26, %v1203_v35 }
 0x14f   : > { %1788 = vst.msk [vmem:[%s2925_s25 + $0x58] sm:$0xf] %vm1765_vm3, %v2119_v38  ;;  %v1404_v41 = vadd.f32 %v2912_v46, %v1333_v39  ;;  %v1334_v42 = vadd.f32 %v1285_v40, %v701_v25 }
 0x151   : > { %v1468_v43 = vmax.f32 %v1404_v41, 0.0  ;;  %v1405_v44 = vadd.f32 %v2912_v46, %v1334_v42  ;;  %v1020_v45 = vpop.f32.mrb[52].mxu1  ;;  %v709_v47 = vpop.f32.mrb[52].mxu0 }
 0x152   : > { %v1204_v48 = vrot.slane %v1020_v45, 1  ;;  %v2425_v49 = vpop.f32.mrb[53].mxu1  ;;  %v2289_v50 = vpop.f32.mrb[53].mxu0 }
 0x153   : > { %v2120_v51 = vpack.c.bf16 %v1468_v43, %v1468_v43  ;;  %v1469_v52 = vmax.f32 %v1405_v44, 0.0  ;;  %v1023_v53 = vpop.f32.mrb[54].mxu1  ;;  %v712_v54 = vpop.f32.mrb[54].mxu0 }
 0x154   : > { %v1284_v55 = vsel %vm1245_vm2, %v1203_v35, %v1204_v48  ;;  %v1205_v56 = vrot.slane %v1023_v53, 1  ;;  %v2426_v57 = vpop.f32.mrb[55].mxu1  ;;  %v2290_v58 = vpop.f32.mrb[55].mxu0 }
 0x155   : > { %1789 = vst.msk [vmem:[%s2925_s25 + $0x5c] sm:$0xf] %vm1765_vm3, %v2120_v51  ;;  %v2121_v59 = vpack.c.bf16 %v1469_v52, %v1469_v52  ;;  %v1335_v60 = vadd.f32 %v1284_v55, %v704_v32 }
 0x156   : > { %v1283_v61 = vsel %vm1245_vm2, %v1204_v48, %v1205_v56 }
 0x157   : > { %1790 = vst.msk [vmem:[%s2925_s25 + $0x60] sm:$0xf] %vm1765_vm3, %v2121_v59  ;;  %v1406_v62 = vadd.f32 %v2912_v46, %v1335_v60  ;;  %v1336_v63 = vadd.f32 %v1283_v61, %v709_v47 }
 0x159   : > { %v1470_v0 = vmax.f32 %v1406_v62, 0.0  ;;  %v1407_v2 = vadd.f32 %v2912_v46, %v1336_v63  ;;  %v1028_v3 = vpop.f32.mrb[56].mxu1  ;;  %v717_v4 = vpop.f32.mrb[56].mxu0 }
 0x15a   : > { %v1206_v5 = vrot.slane %v1028_v3, 1  ;;  %v2429_v6 = vpop.f32.mrb[57].mxu1  ;;  %v2293_v7 = vpop.f32.mrb[57].mxu0 }
 0x15b   : > { %v2122_v8 = vpack.c.bf16 %v1470_v0, %v1470_v0  ;;  %v1471_v9 = vmax.f32 %v1407_v2, 0.0  ;;  %v1031_v10 = vpop.f32.mrb[58].mxu1  ;;  %v720_v11 = vpop.f32.mrb[58].mxu0 }
 0x15c   : > { %v1282_v12 = vsel %vm1245_vm2, %v1205_v56, %v1206_v5  ;;  %v1207_v13 = vrot.slane %v1031_v10, 1  ;;  %v2430_v14 = vpop.f32.mrb[59].mxu1  ;;  %v2294_v15 = vpop.f32.mrb[59].mxu0 }
 0x15d   : > { %1791 = vst.msk [vmem:[%s2925_s25 + $0x64] sm:$0xf] %vm1765_vm3, %v2122_v8  ;;  %v2123_v16 = vpack.c.bf16 %v1471_v9, %v1471_v9  ;;  %v1337_v17 = vadd.f32 %v1282_v12, %v712_v54 }
 0x15e   : > { %v1281_v18 = vsel %vm1245_vm2, %v1206_v5, %v1207_v13 }
 0x15f   : > { %1792 = vst.msk [vmem:[%s2925_s25 + $0x68] sm:$0xf] %vm1765_vm3, %v2123_v16  ;;  %v1408_v19 = vadd.f32 %v2912_v46, %v1337_v17  ;;  %v1338_v1 = vadd.f32 %v1281_v18, %v717_v4 }
 0x161   : > { %v1472_v20 = vmax.f32 %v1408_v19, 0.0  ;;  %v1409_v21 = vadd.f32 %v2912_v46, %v1338_v1  ;;  %v1036_v22 = vpop.f32.mrb[60].mxu1  ;;  %v725_v23 = vpop.f32.mrb[60].mxu0 }
 0x162   : > { %v1208_v24 = vrot.slane %v1036_v22, 1  ;;  %v2433_v25 = vpop.f32.mrb[61].mxu1  ;;  %v2297_v26 = vpop.f32.mrb[61].mxu0 }
 0x163   : > { %v2124_v27 = vpack.c.bf16 %v1472_v20, %v1472_v20  ;;  %v1473_v28 = vmax.f32 %v1409_v21, 0.0  ;;  %v1039_v29 = vpop.f32.mrb[62].mxu1  ;;  %v728_v30 = vpop.f32.mrb[62].mxu0 }
 0x164   : > { %v1280_v31 = vsel %vm1245_vm2, %v1207_v13, %v1208_v24  ;;  %v1209_v32 = vrot.slane %v1039_v29, 1  ;;  %v2434_v34 = vpop.f32.mrb[63].mxu1  ;;  %v2298_v35 = vpop.f32.mrb[63].mxu0 }
 0x165   : > { %1793 = vst.msk [vmem:[%s2925_s25 + $0x6c] sm:$0xf] %vm1765_vm3, %v2124_v27  ;;  %v2125_v36 = vpack.c.bf16 %v1473_v28, %v1473_v28  ;;  %v1339_v37 = vadd.f32 %v1280_v31, %v720_v11 }
 0x166   : > { %v1279_v38 = vsel %vm1245_vm2, %v1208_v24, %v1209_v32 }
 0x167   : > { %1794 = vst.msk [vmem:[%s2925_s25 + $0x70] sm:$0xf] %vm1765_vm3, %v2125_v36  ;;  %v1410_v39 = vadd.f32 %v2912_v46, %v1339_v37  ;;  %v1340_v40 = vadd.f32 %v1279_v38, %v725_v23 }
 0x169   : > { %v1474_v41 = vmax.f32 %v1410_v39, 0.0  ;;  %v1411_v42 = vadd.f32 %v2912_v46, %v1340_v40  ;;  %v1044_v43 = vpop.f32.mrb[64].mxu1  ;;  %v733_v44 = vpop.f32.mrb[64].mxu0 }
 0x16a   : > { %v1210_v45 = vrot.slane %v1044_v43, 1  ;;  %v2437_v47 = vpop.f32.mrb[65].mxu1  ;;  %v2301_v48 = vpop.f32.mrb[65].mxu0 }
 0x16b   : > { %v2126_v49 = vpack.c.bf16 %v1474_v41, %v1474_v41  ;;  %v1475_v50 = vmax.f32 %v1411_v42, 0.0  ;;  %v1047_v51 = vpop.f32.mrb[66].mxu1  ;;  %v736_v52 = vpop.f32.mrb[66].mxu0 }
 0x16c   : > { %v1278_v53 = vsel %vm1245_vm2, %v1209_v32, %v1210_v45  ;;  %v1211_v54 = vrot.slane %v1047_v51, 1  ;;  %v2438_v55 = vpop.f32.mrb[67].mxu1  ;;  %v2302_v56 = vpop.f32.mrb[67].mxu0 }
 0x16d   : > { %1795 = vst.msk [vmem:[%s2925_s25 + $0x74] sm:$0xf] %vm1765_vm3, %v2126_v49  ;;  %v2127_v57 = vpack.c.bf16 %v1475_v50, %v1475_v50  ;;  %v1341_v58 = vadd.f32 %v1278_v53, %v728_v30 }
 0x16e   : > { %v1277_v59 = vsel %vm1245_vm2, %v1210_v45, %v1211_v54 }
 0x16f   : > { %1796 = vst.msk [vmem:[%s2925_s25 + $0x78] sm:$0xf] %vm1765_vm3, %v2127_v57  ;;  %v1412_v60 = vadd.f32 %v2912_v46, %v1341_v58  ;;  %v1342_v61 = vadd.f32 %v1277_v59, %v733_v44 }
 0x171   : > { %v1476_v62 = vmax.f32 %v1412_v60, 0.0  ;;  %v1413_v63 = vadd.f32 %v2912_v46, %v1342_v61  ;;  %v1052_v0 = vpop.f32.mrb[68].mxu1  ;;  %v741_v2 = vpop.f32.mrb[68].mxu0 }
 0x172   : > { %v1212_v3 = vrot.slane %v1052_v0, 1  ;;  %v2441_v4 = vpop.f32.mrb[69].mxu1  ;;  %v2305_v5 = vpop.f32.mrb[69].mxu0 }
 0x173   : > { %v2128_v6 = vpack.c.bf16 %v1476_v62, %v1476_v62  ;;  %v1477_v7 = vmax.f32 %v1413_v63, 0.0  ;;  %v1055_v8 = vpop.f32.mrb[70].mxu1  ;;  %v744_v9 = vpop.f32.mrb[70].mxu0 }
 0x174   : > { %v1276_v10 = vsel %vm1245_vm2, %v1211_v54, %v1212_v3  ;;  %v1213_v11 = vrot.slane %v1055_v8, 1  ;;  %v2442_v12 = vpop.f32.mrb[71].mxu1  ;;  %v2306_v13 = vpop.f32.mrb[71].mxu0 }
 0x175   : > { %1797 = vst.msk [vmem:[%s2925_s25 + $0x7c] sm:$0xf] %vm1765_vm3, %v2128_v6  ;;  %v2129_v14 = vpack.c.bf16 %v1477_v7, %v1477_v7  ;;  %v1343_v15 = vadd.f32 %v1276_v10, %v736_v52 }
 0x176   : > { %v1275_v16 = vsel %vm1245_vm2, %v1212_v3, %v1213_v11 }
 0x177   : > { %1798 = vst.msk [vmem:[%s2925_s25 + $0x80] sm:$0xf] %vm1765_vm3, %v2129_v14  ;;  %v1414_v17 = vadd.f32 %v2912_v46, %v1343_v15  ;;  %v1344_v18 = vadd.f32 %v1275_v16, %v741_v2 }
 0x179   : > { %v1478_v19 = vmax.f32 %v1414_v17, 0.0  ;;  %v1415_v1 = vadd.f32 %v2912_v46, %v1344_v18  ;;  %v1060_v20 = vpop.f32.mrb[72].mxu1  ;;  %v749_v21 = vpop.f32.mrb[72].mxu0 }
 0x17a   : > { %v1214_v22 = vrot.slane %v1060_v20, 1  ;;  %v2445_v23 = vpop.f32.mrb[73].mxu1  ;;  %v2309_v24 = vpop.f32.mrb[73].mxu0 }
 0x17b   : > { %v2130_v25 = vpack.c.bf16 %v1478_v19, %v1478_v19  ;;  %v1479_v26 = vmax.f32 %v1415_v1, 0.0  ;;  %v1063_v27 = vpop.f32.mrb[74].mxu1  ;;  %v752_v28 = vpop.f32.mrb[74].mxu0 }
 0x17c   : > { %v1274_v29 = vsel %vm1245_vm2, %v1213_v11, %v1214_v22  ;;  %v1215_v30 = vrot.slane %v1063_v27, 1  ;;  %v2446_v31 = vpop.f32.mrb[75].mxu1  ;;  %v2310_v32 = vpop.f32.mrb[75].mxu0 }
 0x17d   : > { %1799 = vst.msk [vmem:[%s2925_s25 + $0x84] sm:$0xf] %vm1765_vm3, %v2130_v25  ;;  %v2131_v34 = vpack.c.bf16 %v1479_v26, %v1479_v26  ;;  %v1345_v35 = vadd.f32 %v1274_v29, %v744_v9 }
 0x17e   : > { %v1273_v36 = vsel %vm1245_vm2, %v1214_v22, %v1215_v30 }
 0x17f   : > { %1800 = vst.msk [vmem:[%s2925_s25 + $0x88] sm:$0xf] %vm1765_vm3, %v2131_v34  ;;  %v1416_v37 = vadd.f32 %v2912_v46, %v1345_v35  ;;  %v1346_v38 = vadd.f32 %v1273_v36, %v749_v21 }
 0x181   : > { %v1480_v39 = vmax.f32 %v1416_v37, 0.0  ;;  %v1417_v40 = vadd.f32 %v2912_v46, %v1346_v38  ;;  %v1068_v41 = vpop.f32.mrb[76].mxu1  ;;  %v757_v42 = vpop.f32.mrb[76].mxu0 }
 0x182   : > { %v1216_v43 = vrot.slane %v1068_v41, 1  ;;  %v2449_v44 = vpop.f32.mrb[77].mxu1  ;;  %v2313_v45 = vpop.f32.mrb[77].mxu0 }
 0x183   : > { %v2132_v47 = vpack.c.bf16 %v1480_v39, %v1480_v39  ;;  %v1481_v48 = vmax.f32 %v1417_v40, 0.0  ;;  %v1071_v49 = vpop.f32.mrb[78].mxu1  ;;  %v760_v50 = vpop.f32.mrb[78].mxu0 }
 0x184   : > { %v1272_v51 = vsel %vm1245_vm2, %v1215_v30, %v1216_v43  ;;  %v1217_v52 = vrot.slane %v1071_v49, 1  ;;  %v2450_v53 = vpop.f32.mrb[79].mxu1  ;;  %v2314_v54 = vpop.f32.mrb[79].mxu0 }
 0x185   : > { %1801 = vst.msk [vmem:[%s2925_s25 + $0x8c] sm:$0xf] %vm1765_vm3, %v2132_v47  ;;  %v2133_v55 = vpack.c.bf16 %v1481_v48, %v1481_v48  ;;  %v1347_v56 = vadd.f32 %v1272_v51, %v752_v28 }
 0x186   : > { %v1271_v57 = vsel %vm1245_vm2, %v1216_v43, %v1217_v52 }
 0x187   : > { %1802 = vst.msk [vmem:[%s2925_s25 + $0x90] sm:$0xf] %vm1765_vm3, %v2133_v55  ;;  %v1418_v58 = vadd.f32 %v2912_v46, %v1347_v56  ;;  %v1348_v59 = vadd.f32 %v1271_v57, %v757_v42 }
 0x189   : > { %v1482_v60 = vmax.f32 %v1418_v58, 0.0  ;;  %v1419_v61 = vadd.f32 %v2912_v46, %v1348_v59  ;;  %v1076_v62 = vpop.f32.mrb[80].mxu1  ;;  %v765_v63 = vpop.f32.mrb[80].mxu0  ;;  %v3177_v59 = vld [vmem:[%s3297_s3] ss:$0 sm:$0xff] }
 0x18a   : > { %v1218_v0 = vrot.slane %v1076_v62, 1  ;;  %v2453_v2 = vpop.f32.mrb[81].mxu1  ;;  %v2317_v3 = vpop.f32.mrb[81].mxu0 }
 0x18b   : > { %v2134_v4 = vpack.c.bf16 %v1482_v60, %v1482_v60  ;;  %v1483_v5 = vmax.f32 %v1419_v61, 0.0  ;;  %v1079_v6 = vpop.f32.mrb[82].mxu1  ;;  %v768_v7 = vpop.f32.mrb[82].mxu0 }
 0x18c   : > { %v1270_v8 = vsel %vm1245_vm2, %v1217_v52, %v1218_v0  ;;  %v1219_v9 = vrot.slane %v1079_v6, 1  ;;  %v2454_v10 = vpop.f32.mrb[83].mxu1  ;;  %v2318_v11 = vpop.f32.mrb[83].mxu0 }
 0x18d   : > { %1803 = vst.msk [vmem:[%s2925_s25 + $0x94] sm:$0xf] %vm1765_vm3, %v2134_v4  ;;  %v2135_v12 = vpack.c.bf16 %v1483_v5, %v1483_v5  ;;  %v1349_v13 = vadd.f32 %v1270_v8, %v760_v50 }
 0x18e   : > { %v1269_v14 = vsel %vm1245_vm2, %v1218_v0, %v1219_v9 }
 0x18f   : > { %1804 = vst.msk [vmem:[%s2925_s25 + $0x98] sm:$0xf] %vm1765_vm3, %v2135_v12  ;;  %v1420_v15 = vadd.f32 %v2912_v46, %v1349_v13  ;;  %v1350_v16 = vadd.f32 %v1269_v14, %v765_v63 }
 0x191   : > { %v1484_v17 = vmax.f32 %v1420_v15, 0.0  ;;  %v1421_v18 = vadd.f32 %v2912_v46, %v1350_v16  ;;  %v1084_v19 = vpop.f32.mrb[84].mxu1  ;;  %v773_v1 = vpop.f32.mrb[84].mxu0 }
 0x192   : > { %v1220_v20 = vrot.slane %v1084_v19, 1  ;;  %v2457_v21 = vpop.f32.mrb[85].mxu1  ;;  %v2321_v22 = vpop.f32.mrb[85].mxu0 }
 0x193   : > { %v2136_v23 = vpack.c.bf16 %v1484_v17, %v1484_v17  ;;  %v1485_v24 = vmax.f32 %v1421_v18, 0.0  ;;  %v1087_v25 = vpop.f32.mrb[86].mxu1  ;;  %v776_v26 = vpop.f32.mrb[86].mxu0 }
 0x194   : > { %v1268_v27 = vsel %vm1245_vm2, %v1219_v9, %v1220_v20  ;;  %v1221_v28 = vrot.slane %v1087_v25, 1  ;;  %v2458_v29 = vpop.f32.mrb[87].mxu1  ;;  %v2322_v30 = vpop.f32.mrb[87].mxu0 }
 0x195   : > { %1805 = vst.msk [vmem:[%s2925_s25 + $0x9c] sm:$0xf] %vm1765_vm3, %v2136_v23  ;;  %v2137_v31 = vpack.c.bf16 %v1485_v24, %v1485_v24  ;;  %v1351_v32 = vadd.f32 %v1268_v27, %v768_v7 }
 0x196   : > { %v1267_v34 = vsel %vm1245_vm2, %v1220_v20, %v1221_v28 }
 0x197   : > { %1806 = vst.msk [vmem:[%s2925_s25 + $0xa0] sm:$0xf] %vm1765_vm3, %v2137_v31  ;;  %v1422_v35 = vadd.f32 %v2912_v46, %v1351_v32  ;;  %v1352_v36 = vadd.f32 %v1267_v34, %v773_v1 }
 0x199   : > { %v1486_v37 = vmax.f32 %v1422_v35, 0.0  ;;  %v1423_v38 = vadd.f32 %v2912_v46, %v1352_v36  ;;  %v1092_v39 = vpop.f32.mrb[88].mxu1  ;;  %v781_v40 = vpop.f32.mrb[88].mxu0 }
 0x19a   : > { %v1222_v41 = vrot.slane %v1092_v39, 1  ;;  %v2461_v42 = vpop.f32.mrb[89].mxu1  ;;  %v2325_v43 = vpop.f32.mrb[89].mxu0 }
 0x19b   : > { %v2138_v44 = vpack.c.bf16 %v1486_v37, %v1486_v37  ;;  %v1487_v45 = vmax.f32 %v1423_v38, 0.0  ;;  %v1095_v47 = vpop.f32.mrb[90].mxu1  ;;  %v784_v48 = vpop.f32.mrb[90].mxu0 }
 0x19c   : > { %v1266_v49 = vsel %vm1245_vm2, %v1221_v28, %v1222_v41  ;;  %v1223_v50 = vrot.slane %v1095_v47, 1  ;;  %v2462_v51 = vpop.f32.mrb[91].mxu1  ;;  %v2326_v52 = vpop.f32.mrb[91].mxu0 }
 0x19d   : > { %1807 = vst.msk [vmem:[%s2925_s25 + $0xa4] sm:$0xf] %vm1765_vm3, %v2138_v44  ;;  %v2139_v53 = vpack.c.bf16 %v1487_v45, %v1487_v45  ;;  %v1353_v54 = vadd.f32 %v1266_v49, %v776_v26 }
 0x19e   : > { %v1265_v55 = vsel %vm1245_vm2, %v1222_v41, %v1223_v50 }
 0x19f   : > { %1808 = vst.msk [vmem:[%s2925_s25 + $0xa8] sm:$0xf] %vm1765_vm3, %v2139_v53  ;;  %v1424_v56 = vadd.f32 %v2912_v46, %v1353_v54  ;;  %v1354_v57 = vadd.f32 %v1265_v55, %v781_v40 }
 0x1a1   : > { %v1488_v58 = vmax.f32 %v1424_v56, 0.0  ;;  %v1425_v60 = vadd.f32 %v3177_v59, %v1354_v57  ;;  %v1100_v61 = vpop.f32.mrb[92].mxu1  ;;  %v789_v62 = vpop.f32.mrb[92].mxu0 }
 0x1a2   : > { %v1224_v63 = vrot.slane %v1100_v61, 1  ;;  %v2465_v0 = vpop.f32.mrb[93].mxu1  ;;  %v2329_v2 = vpop.f32.mrb[93].mxu0 }
 0x1a3   : > { %v2140_v3 = vpack.c.bf16 %v1488_v58, %v1488_v58  ;;  %v1489_v4 = vmax.f32 %v1425_v60, 0.0  ;;  %v1103_v5 = vpop.f32.mrb[94].mxu1  ;;  %v792_v46 = vpop.f32.mrb[94].mxu0 }
 0x1a4   : > { %v1264_v6 = vsel %vm1245_vm2, %v1223_v50, %v1224_v63  ;;  %v1225_v7 = vrot.slane %v1103_v5, 1  ;;  %v2466_v8 = vpop.f32.mrb[95].mxu1  ;;  %v2330_v9 = vpop.f32.mrb[95].mxu0 }
 0x1a5   : > { %1809 = vst.msk [vmem:[%s2925_s25 + $0xac] sm:$0xf] %vm1765_vm3, %v2140_v3  ;;  %v2141_v10 = vpack.c.bf16 %v1489_v4, %v1489_v4  ;;  %v1355_v11 = vadd.f32 %v1264_v6, %v784_v48 }
 0x1a6   : > { %v1263_v12 = vsel %vm1245_vm2, %v1224_v63, %v1225_v7 }
 0x1a7   : > { %1810 = vst.msk [vmem:[%s2925_s25 + $0xb0] sm:$0xf] %vm1765_vm3, %v2141_v10  ;;  %v1426_v13 = vadd.f32 %v3177_v59, %v1355_v11  ;;  %v1356_v14 = vadd.f32 %v1263_v12, %v789_v62 }
 0x1a9   : > { %v1490_v15 = vmax.f32 %v1426_v13, 0.0  ;;  %v1427_v16 = vadd.f32 %v3177_v59, %v1356_v14  ;;  %v1108_v17 = vpop.f32.mrb[96].mxu1  ;;  %v797_v18 = vpop.f32.mrb[96].mxu0 }
 0x1aa   : > { %v1226_v19 = vrot.slane %v1108_v17, 1  ;;  %v2469_v1 = vpop.f32.mrb[97].mxu1  ;;  %v2333_v20 = vpop.f32.mrb[97].mxu0 }
 0x1ab   : > { %v2142_v21 = vpack.c.bf16 %v1490_v15, %v1490_v15  ;;  %v1491_v22 = vmax.f32 %v1427_v16, 0.0  ;;  %v1111_v23 = vpop.f32.mrb[98].mxu1  ;;  %v800_v24 = vpop.f32.mrb[98].mxu0 }
 0x1ac   : > { %v1262_v25 = vsel %vm1245_vm2, %v1225_v7, %v1226_v19  ;;  %v1227_v26 = vrot.slane %v1111_v23, 1  ;;  %v2470_v27 = vpop.f32.mrb[99].mxu1  ;;  %v2334_v28 = vpop.f32.mrb[99].mxu0 }
 0x1ad   : > { %1811 = vst.msk [vmem:[%s2925_s25 + $0xb4] sm:$0xf] %vm1765_vm3, %v2142_v21  ;;  %v2143_v29 = vpack.c.bf16 %v1491_v22, %v1491_v22  ;;  %v1357_v30 = vadd.f32 %v1262_v25, %v792_v46 }
 0x1ae   : > { %v1261_v31 = vsel %vm1245_vm2, %v1226_v19, %v1227_v26 }
 0x1af   : > { %1812 = vst.msk [vmem:[%s2925_s25 + $0xb8] sm:$0xf] %vm1765_vm3, %v2143_v29  ;;  %v1428_v32 = vadd.f32 %v3177_v59, %v1357_v30  ;;  %v1358_v34 = vadd.f32 %v1261_v31, %v797_v18 }
 0x1b1   : > { %v1492_v35 = vmax.f32 %v1428_v32, 0.0  ;;  %v1429_v36 = vadd.f32 %v3177_v59, %v1358_v34  ;;  %v1116_v37 = vpop.f32.mrb[100].mxu1  ;;  %v805_v38 = vpop.f32.mrb[100].mxu0 }
 0x1b2   : > { %v1228_v39 = vrot.slane %v1116_v37, 1  ;;  %v2473_v40 = vpop.f32.mrb[101].mxu1  ;;  %v2337_v41 = vpop.f32.mrb[101].mxu0 }
 0x1b3   : > { %v2144_v42 = vpack.c.bf16 %v1492_v35, %v1492_v35  ;;  %v1493_v43 = vmax.f32 %v1429_v36, 0.0  ;;  %v1119_v44 = vpop.f32.mrb[102].mxu1  ;;  %v808_v45 = vpop.f32.mrb[102].mxu0 }
 0x1b4   : > { %v1260_v47 = vsel %vm1245_vm2, %v1227_v26, %v1228_v39  ;;  %v1229_v48 = vrot.slane %v1119_v44, 1  ;;  %v2474_v49 = vpop.f32.mrb[103].mxu1  ;;  %v2338_v50 = vpop.f32.mrb[103].mxu0 }
 0x1b5   : > { %1813 = vst.msk [vmem:[%s2925_s25 + $0xbc] sm:$0xf] %vm1765_vm3, %v2144_v42  ;;  %v2145_v51 = vpack.c.bf16 %v1493_v43, %v1493_v43  ;;  %v1359_v52 = vadd.f32 %v1260_v47, %v800_v24 }
 0x1b6   : > { %v1259_v53 = vsel %vm1245_vm2, %v1228_v39, %v1229_v48 }
 0x1b7   : > { %1814 = vst.msk [vmem:[%s2925_s25 + $0xc0] sm:$0xf] %vm1765_vm3, %v2145_v51  ;;  %v1430_v54 = vadd.f32 %v3177_v59, %v1359_v52  ;;  %v1360_v55 = vadd.f32 %v1259_v53, %v805_v38 }
 0x1b9   : > { %v1494_v56 = vmax.f32 %v1430_v54, 0.0  ;;  %v1431_v57 = vadd.f32 %v3177_v59, %v1360_v55  ;;  %v1124_v58 = vpop.f32.mrb[104].mxu1  ;;  %v813_v60 = vpop.f32.mrb[104].mxu0 }
 0x1ba   : > { %v1230_v61 = vrot.slane %v1124_v58, 1  ;;  %v2477_v62 = vpop.f32.mrb[105].mxu1  ;;  %v2341_v63 = vpop.f32.mrb[105].mxu0 }
 0x1bb   : > { %v2146_v0 = vpack.c.bf16 %v1494_v56, %v1494_v56  ;;  %v1495_v2 = vmax.f32 %v1431_v57, 0.0  ;;  %v1127_v3 = vpop.f32.mrb[106].mxu1  ;;  %v816_v4 = vpop.f32.mrb[106].mxu0 }
 0x1bc   : > { %v1258_v5 = vsel %vm1245_vm2, %v1229_v48, %v1230_v61  ;;  %v1231_v46 = vrot.slane %v1127_v3, 1  ;;  %v2478_v6 = vpop.f32.mrb[107].mxu1  ;;  %v2342_v7 = vpop.f32.mrb[107].mxu0 }
 0x1bd   : > { %1815 = vst.msk [vmem:[%s2925_s25 + $0xc4] sm:$0xf] %vm1765_vm3, %v2146_v0  ;;  %v2147_v8 = vpack.c.bf16 %v1495_v2, %v1495_v2  ;;  %v1361_v9 = vadd.f32 %v1258_v5, %v808_v45 }
 0x1be   : > { %v1257_v10 = vsel %vm1245_vm2, %v1230_v61, %v1231_v46 }
 0x1bf   : > { %1816 = vst.msk [vmem:[%s2925_s25 + $0xc8] sm:$0xf] %vm1765_vm3, %v2147_v8  ;;  %v1432_v11 = vadd.f32 %v3177_v59, %v1361_v9  ;;  %v1362_v12 = vadd.f32 %v1257_v10, %v813_v60 }
 0x1c1   : > { %v1496_v13 = vmax.f32 %v1432_v11, 0.0  ;;  %v1433_v14 = vadd.f32 %v3177_v59, %v1362_v12  ;;  %v1132_v15 = vpop.f32.mrb[108].mxu1  ;;  %v821_v16 = vpop.f32.mrb[108].mxu0 }
 0x1c2   : > { %v1232_v17 = vrot.slane %v1132_v15, 1  ;;  %v2481_v18 = vpop.f32.mrb[109].mxu1  ;;  %v2345_v19 = vpop.f32.mrb[109].mxu0 }
 0x1c3   : > { %v2148_v1 = vpack.c.bf16 %v1496_v13, %v1496_v13  ;;  %v1497_v20 = vmax.f32 %v1433_v14, 0.0  ;;  %v1135_v21 = vpop.f32.mrb[110].mxu1  ;;  %v824_v22 = vpop.f32.mrb[110].mxu0 }
 0x1c4   : > { %v1256_v23 = vsel %vm1245_vm2, %v1231_v46, %v1232_v17  ;;  %v1233_v24 = vrot.slane %v1135_v21, 1  ;;  %v2482_v25 = vpop.f32.mrb[111].mxu1  ;;  %v2346_v26 = vpop.f32.mrb[111].mxu0 }
 0x1c5   : > { %1817 = vst.msk [vmem:[%s2925_s25 + $0xcc] sm:$0xf] %vm1765_vm3, %v2148_v1  ;;  %v2149_v27 = vpack.c.bf16 %v1497_v20, %v1497_v20  ;;  %v1363_v28 = vadd.f32 %v1256_v23, %v816_v4 }
 0x1c6   : > { %v1255_v29 = vsel %vm1245_vm2, %v1232_v17, %v1233_v24 }
 0x1c7   : > { %1818 = vst.msk [vmem:[%s2925_s25 + $0xd0] sm:$0xf] %vm1765_vm3, %v2149_v27  ;;  %v1434_v30 = vadd.f32 %v3177_v59, %v1363_v28  ;;  %v1364_v31 = vadd.f32 %v1255_v29, %v821_v16 }
 0x1c9   : > { %v1498_v32 = vmax.f32 %v1434_v30, 0.0  ;;  %v1435_v34 = vadd.f32 %v3177_v59, %v1364_v31  ;;  %v1140_v35 = vpop.f32.mrb[112].mxu1  ;;  %v829_v36 = vpop.f32.mrb[112].mxu0 }
 0x1ca   : > { %v1234_v37 = vrot.slane %v1140_v35, 1  ;;  %v2485_v38 = vpop.f32.mrb[113].mxu1  ;;  %v2349_v39 = vpop.f32.mrb[113].mxu0 }
 0x1cb   : > { %v2150_v40 = vpack.c.bf16 %v1498_v32, %v1498_v32  ;;  %v1499_v41 = vmax.f32 %v1435_v34, 0.0  ;;  %v1143_v42 = vpop.f32.mrb[114].mxu1  ;;  %v832_v43 = vpop.f32.mrb[114].mxu0 }
 0x1cc   : > { %v1254_v44 = vsel %vm1245_vm2, %v1233_v24, %v1234_v37  ;;  %v1235_v45 = vrot.slane %v1143_v42, 1  ;;  %v2486_v47 = vpop.f32.mrb[115].mxu1  ;;  %v2350_v48 = vpop.f32.mrb[115].mxu0 }
 0x1cd   : > { %1819 = vst.msk [vmem:[%s2925_s25 + $0xd4] sm:$0xf] %vm1765_vm3, %v2150_v40  ;;  %v2151_v49 = vpack.c.bf16 %v1499_v41, %v1499_v41  ;;  %v1365_v50 = vadd.f32 %v1254_v44, %v824_v22 }
 0x1ce   : > { %v1253_v51 = vsel %vm1245_vm2, %v1234_v37, %v1235_v45 }
 0x1cf   : > { %1820 = vst.msk [vmem:[%s2925_s25 + $0xd8] sm:$0xf] %vm1765_vm3, %v2151_v49  ;;  %v1436_v52 = vadd.f32 %v3177_v59, %v1365_v50  ;;  %v1366_v53 = vadd.f32 %v1253_v51, %v829_v36 }
 0x1d1   : > { %v1500_v54 = vmax.f32 %v1436_v52, 0.0  ;;  %v1437_v55 = vadd.f32 %v3177_v59, %v1366_v53  ;;  %v1148_v56 = vpop.f32.mrb[116].mxu1  ;;  %v837_v57 = vpop.f32.mrb[116].mxu0 }
 0x1d2   : > { %v1236_v58 = vrot.slane %v1148_v56, 1  ;;  %v2489_v60 = vpop.f32.mrb[117].mxu1  ;;  %v2353_v61 = vpop.f32.mrb[117].mxu0 }
 0x1d3   : > { %v2152_v62 = vpack.c.bf16 %v1500_v54, %v1500_v54  ;;  %v1501_v63 = vmax.f32 %v1437_v55, 0.0  ;;  %v1151_v0 = vpop.f32.mrb[118].mxu1  ;;  %v840_v2 = vpop.f32.mrb[118].mxu0 }
 0x1d4   : > { %v1252_v3 = vsel %vm1245_vm2, %v1235_v45, %v1236_v58  ;;  %v1237_v4 = vrot.slane %v1151_v0, 1  ;;  %v2490_v5 = vpop.f32.mrb[119].mxu1  ;;  %v2354_v46 = vpop.f32.mrb[119].mxu0 }
 0x1d5   : > { %1821 = vst.msk [vmem:[%s2925_s25 + $0xdc] sm:$0xf] %vm1765_vm3, %v2152_v62  ;;  %v2153_v6 = vpack.c.bf16 %v1501_v63, %v1501_v63  ;;  %v1367_v7 = vadd.f32 %v1252_v3, %v832_v43 }
 0x1d6   : > { %v1251_v8 = vsel %vm1245_vm2, %v1236_v58, %v1237_v4 }
 0x1d7   : > { %1822 = vst.msk [vmem:[%s2925_s25 + $0xe0] sm:$0xf] %vm1765_vm3, %v2153_v6  ;;  %v1438_v9 = vadd.f32 %v3177_v59, %v1367_v7  ;;  %v1368_v10 = vadd.f32 %v1251_v8, %v837_v57 }
 0x1d9   : > { %v1502_v11 = vmax.f32 %v1438_v9, 0.0  ;;  %v1439_v12 = vadd.f32 %v3177_v59, %v1368_v10  ;;  %v1156_v13 = vpop.f32.mrb[120].mxu1  ;;  %v845_v14 = vpop.f32.mrb[120].mxu0 }
 0x1da   : > { %v1238_v15 = vrot.slane %v1156_v13, 1  ;;  %v2493_v16 = vpop.f32.mrb[121].mxu1  ;;  %v2357_v17 = vpop.f32.mrb[121].mxu0 }
 0x1db   : > { %v2154_v18 = vpack.c.bf16 %v1502_v11, %v1502_v11  ;;  %v1503_v19 = vmax.f32 %v1439_v12, 0.0  ;;  %v1159_v1 = vpop.f32.mrb[122].mxu1  ;;  %v848_v20 = vpop.f32.mrb[122].mxu0 }
 0x1dc   : > { %v1250_v21 = vsel %vm1245_vm2, %v1237_v4, %v1238_v15  ;;  %v1239_v22 = vrot.slane %v1159_v1, 1  ;;  %v2494_v23 = vpop.f32.mrb[123].mxu1  ;;  %v2358_v24 = vpop.f32.mrb[123].mxu0 }
 0x1dd   : > { %1823 = vst.msk [vmem:[%s2925_s25 + $0xe4] sm:$0xf] %vm1765_vm3, %v2154_v18  ;;  %v2155_v25 = vpack.c.bf16 %v1503_v19, %v1503_v19  ;;  %v1369_v26 = vadd.f32 %v1250_v21, %v840_v2 }
 0x1de   : > { %v1249_v27 = vsel %vm1245_vm2, %v1238_v15, %v1239_v22 }
 0x1df   : > { %1824 = vst.msk [vmem:[%s2925_s25 + $0xe8] sm:$0xf] %vm1765_vm3, %v2155_v25  ;;  %v1440_v28 = vadd.f32 %v3177_v59, %v1369_v26  ;;  %v1370_v29 = vadd.f32 %v1249_v27, %v845_v14 }
 0x1e1   : > { %v1504_v30 = vmax.f32 %v1440_v28, 0.0  ;;  %v1441_v31 = vadd.f32 %v3177_v59, %v1370_v29  ;;  %v1164_v32 = vpop.f32.mrb[124].mxu1  ;;  %v853_v34 = vpop.f32.mrb[124].mxu0 }
 0x1e2   : > { %v1240_v35 = vrot.slane %v1164_v32, 1  ;;  %v2497_v36 = vpop.f32.mrb[125].mxu1  ;;  %v2361_v37 = vpop.f32.mrb[125].mxu0 }
 0x1e3   : > { %v2156_v38 = vpack.c.bf16 %v1504_v30, %v1504_v30  ;;  %v1505_v39 = vmax.f32 %v1441_v31, 0.0  ;;  %v1167_v40 = vpop.f32.mrb[126].mxu1  ;;  %v856_v41 = vpop.f32.mrb[126].mxu0 }
 0x1e4   : > { %v1248_v42 = vsel %vm1245_vm2, %v1239_v22, %v1240_v35  ;;  %v1241_v43 = vrot.slane %v1167_v40, 1  ;;  %v2498_v44 = vpop.f32.mrb[127].mxu1  ;;  %v2362_v45 = vpop.f32.mrb[127].mxu0 }
 0x1e5   : > { %1825 = vst.msk [vmem:[%s2925_s25 + $0xec] sm:$0xf] %vm1765_vm3, %v2156_v38  ;;  %v2157_v47 = vpack.c.bf16 %v1505_v39, %v1505_v39  ;;  %v1371_v48 = vadd.f32 %v1248_v42, %v848_v20 }
 0x1e6   : > { %v1247_v49 = vsel %vm1245_vm2, %v1240_v35, %v1241_v43 }
 0x1e7   : > { %1826 = vst.msk [vmem:[%s2925_s25 + $0xf0] sm:$0xf] %vm1765_vm3, %v2157_v47  ;;  %v1442_v50 = vadd.f32 %v3177_v59, %v1371_v48  ;;  %v1372_v51 = vadd.f32 %v1247_v49, %v853_v34 }
 0x1e9   : > { %v1506_v52 = vmax.f32 %v1442_v50, 0.0  ;;  %v1443_v53 = vadd.f32 %v3177_v59, %v1372_v51  ;;  %v1172_v54 = vpop.f32.mrb[128].mxu1  ;;  %v861_v55 = vpop.f32.mrb[128].mxu0 }
 0x1ea   : > { %v1242_v56 = vrot.slane %v1172_v54, 1  ;;  %v2501_v57 = vpop.f32.mrb[129].mxu1  ;;  %v2365_v58 = vpop.f32.mrb[129].mxu0 }
 0x1eb   : > { %v2158_v60 = vpack.c.bf16 %v1506_v52, %v1506_v52  ;;  %v1507_v61 = vmax.f32 %v1443_v53, 0.0  ;;  %v1175_v62 = vpop.f32.mrb[130].mxu1  ;;  %v863_v63 = vpop.f32.mrb[130].mxu0 }
 0x1ec   : > { %v1246_v0 = vsel %vm1245_vm2, %v1241_v43, %v1242_v56  ;;  %v2502_v2 = vpop.f32.mrb[131].mxu1  ;;  %v2366_v3 = vpop.f32.mrb[131].mxu0 }
 0x1ed   : > { %1827 = vst.msk [vmem:[%s2925_s25 + $0xf4] sm:$0xf] %vm1765_vm3, %v2158_v60  ;;  %v2159_v4 = vpack.c.bf16 %v1507_v61, %v1507_v61  ;;  %v1373_v5 = vadd.f32 %v1246_v0, %v856_v41 }
 0x1ef   : > { %1828 = vst.msk [vmem:[%s2925_s25 + $0xf8] sm:$0xf] %vm1765_vm3, %v2159_v4  ;;  %v1444_v46 = vadd.f32 %v3177_v59, %v1373_v5 }
 0x1f1   : > { %v1508_v6 = vmax.f32 %v1444_v46, 0.0 }
 0x1f3   : > { %v2160_v7 = vpack.c.bf16 %v1508_v6, %v1508_v6 }
 0x1f5   : > { %1829 = vst.msk [vmem:[%s2925_s25 + $0xfc] sm:$0xf] %vm1765_vm3, %v2160_v7 }
 0x1f6 PF: > { %s14_s19 = sadd.s32 1, %s2622_s19   ;;  %s3299_s15 = smov %s2614_s17 }
 0x1f7   : > { %p11_p7 = scmp.ge.s32.totalorder %s14_s19, 10   ;;  %s3300_s16 = smov %s2618_s18 }
 0x1f8   : > { %s3301_s17 = smov %s3304_s20  ;;  %s3302_s18 = smov %s3308_s21 }
 0x1f9   :  { %13 = sbr.rel (!%p11_p7) target bundleno = 3 (0x3), region = 67 }

// kernel: encoder_forward.8
= control target key start
LH: loop header
LB: loop body
LE: loop exit
PB: predicated region body
PF: predicated region fallthrough
CT: control target
= control target key end

     0   :  { %s1166_s15 = smov 0   ;;  %s1168_s16 = smov 0   ;;  %s1416_s0 = inlined_call_operand.vmem [shape: bf16[2,520,64], index: 0, kind: input, shape index: {}]   ;;  %s1417_s1 = inlined_call_operand.vmem [shape: bf16[64,32], index: 1, kind: input, shape index: {}]   ;;  %s1418_s2 = inlined_call_operand.vmem [shape: bf16[64,32], index: 2, kind: input, shape index: {}]   ;;  %s1419_s3 = inlined_call_operand.vmem [shape: f32[1,32], index: 3, kind: input, shape index: {}]   ;;  %s1420_s4 = inlined_call_operand.vmem [shape: bf16[2,512,32], index: 4, kind: output, shape index: {}]  }
   0x1   :  { %s1170_s17 = smov 0   ;;  %s1172_s18 = smov 0  }
   0x2   :  { %s1174_s19 = smov 0  }
   0x3 LB: > { %s23_s20 = sadd.s32 1, %s1129_s17  ;;  %s26_s21 = sadd.s32 1, %s1133_s18  ;;  %s1137_s19 = sphi %s1174_s19, %s14_s19   ;;  %s1133_s18 = sphi %s1172_s18, %s1424_s18   ;;  %s1129_s17 = sphi %s1170_s17, %s1423_s17   ;;  %s1125_s16 = sphi %s1168_s16, %s1422_s16   ;;  %s1121_s15 = sphi %s1166_s15, %s1421_s15  }
   0x4   : > { %p24_p0 = scmp.ge.s32.totalorder %s23_s20, 4  ;;  %p848_p1 = scmp.ge.s32.totalorder %s1137_s19, 1 }
   0x5   : > { %p176_p2 = scmp.lt.s32.totalorder %s1137_s19, 9 }
   0x6   : > { %s1426_s20 = smov (%p24_p0, %s23_s20), 0  ;;  %s1428_s21 = smov (!%p24_p0, %s26_s21), %s1133_s18 }
   0x7   : > { %p177_p3 = pnand %p848_p1, %p176_p2  ;;  %p28_p4 = scmp.ge.s32.totalorder %s1428_s21, 2 }
   0x8   : > { %v1082_v0 = vld [vmem:[%s1418_s2] sm:$0xff] (!%p177_p3)   ;;  %v1139_v1 = vmov (!%p177_p3), 0.0   ;;  %v1083_v2 = vld [vmem:[%s1418_s2 + $0x8] sm:$0xff] (!%p177_p3)   ;;  %vm1140_vm0 = vmmov (!%p177_p3), 0   ;;  %p206_p5 = scmp.lt.s32.totalorder (!%p177_p3), %s1125_s16, 1  ;;  %s853_s28 = sshll.u32 (!%p177_p3), %s1121_s15, 7  ;;  %v603_v18 = vlaneseq (!%p177_p3) }
   0x9   : > { %s1430_s21 = smov (%p28_p4, %s1428_s21), 0  ;;  %180 = sbr.rel (%p177_p3) target bundleno = 314 (0x13a), region = 36 }
   0xa   : > { %995 = vmatprep.subr.bf16.mxu1 (!%p177_p3), %v1139_v1  ;;  %951 = vmatprep.subr.bf16.mxu0 (!%p177_p3), %v1139_v1  ;;  %v1084_v3 = vld [vmem:[%s1417_s1] sm:$0xff] (!%p177_p3)   ;;  %v1086_v4 = vld [vmem:[%s1417_s1 + $0x8] sm:$0xff] (!%p177_p3)   ;;  %s223_s5 = sshra.s32 (!%p177_p3), %s853_s28, 3  ;;  %v1085_v5 = vld [vmem:[%s1418_s2 + $0x10] sm:$0xff] (!%p177_p3)   ;;  %vm319_vm1 = vcmask (!%p177_p3), 523264   ;;  %s850_s27 = sshll.u32 (!%p177_p3), %s1121_s15, 4 }
   0xb   : > { %996 = vmatpush3.bf16.msra.mxu1 (!%p177_p3), %v1082_v0  ;;  %1003 = vmatprep.mubr.msk.bf16.mxu1 (!%p177_p3), %vm1140_vm0, %v1139_v1  ;;  %s854_s9 = sshll.u32 (!%p177_p3), %s223_s5, 2  ;;  %v1088_v6 = vld [vmem:[%s1417_s1 + $0x10] sm:$0xff] (!%p177_p3)   ;;  %v1087_v7 = vld [vmem:[%s1418_s2 + $0x18] sm:$0xff] (!%p177_p3)   ;;  %p214_p6 = scmp.lt.s32.totalorder (!%p177_p3), %s850_s27, 63  ;;  %v1307_v19 = vshrl.u32 (!%p177_p3), %v603_v18, 7  ;;  %vm741_vm3 = vcmask (!%p177_p3), 257024  }
   0xc   : > { %997 = vmatprep.subr.bf16.mxu1 (!%p177_p3), %v1139_v1  ;;  %959 = vmatprep.mubr.msk.bf16.mxu0 (!%p177_p3), %vm1140_vm0, %v1139_v1  ;;  %v1090_v8 = vld [vmem:[%s1417_s1 + $0x18] sm:$0xff] (!%p177_p3)   ;;  %v1316_v30 = vld [vmem:[%s1419_s3] ss:$0 sm:$0xff] (!%p177_p3) }
   0xd   : > { %952 = vmatpush3.bf16.msra.mxu0 (!%p177_p3), %v1084_v3  ;;  %vm605_vm2 = vcmp.lt.s32.totalorder (!%p177_p3), %v1307_v19, 7 }
   0xe   : > { %953 = vmatprep.subr.bf16.mxu0 (!%p177_p3), %v1139_v1 }
   0xf   : > { %998 = vmatpush3.bf16.msra.mxu1 (!%p177_p3), %v1083_v2 }
  0x10   : > { %s1432_s16 = smov (!%p206_p5, %s1125_s16), 1  ;;  %999 = vmatprep.subr.bf16.mxu1 %v1139_v1  ;;  %s1434_s27 = smov (!%p214_p6, %s850_s27), 63 }
  0x11   : > { %s1039_s8 = smul.u32 260, %s1432_s16  ;;  %954 = vmatpush3.bf16.msra.mxu0 %v1086_v4  ;;  %s851_s28 = sshll.u32 %s1432_s16, 6 }
  0x12   : > { %955 = vmatprep.subr.bf16.mxu0 %v1139_v1  ;;  %s217_s29 = sadd.s32 %s851_s28, %s1434_s27 }
  0x13   : > { %s210_s14 = scalar_lea.vmem %s1416_s0, %s1039_s8  ;;  %1000 = vmatpush3.bf16.msra.mxu1 %v1085_v5  ;;  %s852_s16 = sshll.u32 %s217_s29, 2 }
  0x14   : > { %s1237_s22 = scalar_lea.vmem %s210_s14, %s854_s9  ;;  %1001 = vmatprep.subr.bf16.mxu1 %v1139_v1  ;;  %s1322_s7 = scalar_lea.vmem %s1420_s4, %s852_s16 }
  0x15   : > { %956 = vmatpush3.bf16.msra.mxu0 %v1088_v6  ;;  %v1089_v9 = vld [vmem:[%s1237_s22] sm:$0xff]   ;;  %v1091_v10 = vld [vmem:[%s1237_s22 + $0x8] sm:$0xff]   ;;  %v1092_v11 = vld [vmem:[%s1237_s22 + $0x10] sm:$0xff]  }
  0x16   : > { %957 = vmatprep.subr.bf16.mxu0 %v1139_v1  ;;  %v1093_v12 = vld [vmem:[%s1237_s22 + $0x18] sm:$0xff]   ;;  %v1094_v13 = vld [vmem:[%s1237_s22 + $0x20] sm:$0xff]   ;;  %v1095_v14 = vld [vmem:[%s1237_s22 + $0x28] sm:$0xff]  }
  0x17   : > { %1002 = vmatpush3.bf16.msra.mxu1 %v1087_v7  ;;  %v1096_v15 = vld [vmem:[%s1237_s22 + $0x30] sm:$0xff]   ;;  %v1097_v16 = vld [vmem:[%s1237_s22 + $0x38] sm:$0xff]   ;;  %v1098_v17 = vld [vmem:[%s1237_s22 + $0x40] ss:$0 sps:$4 sm:$0xff]  }
  0x19   : > { %958 = vmatpush3.bf16.msra.mxu0 %v1090_v8 }
  0x1a   : > { %1004 = vmatmul.mubr.msk.bf16.vlgmr.msra.gmra.mrb[0].mxu1 %vm319_vm1, %v1089_v9 }
  0x1b   : > { %1007 = vmatprep.mubr.msk.bf16.mxu1 %vm1140_vm0, %v1139_v1 }
  0x1c   : > { %960 = vmatmul.mubr.msk.bf16.vlgmr.msra.gmra.mrb[0].mxu0 %vm319_vm1, %v1089_v9 }
  0x1d   : > { %963 = vmatprep.mubr.msk.bf16.mxu0 %vm1140_vm0, %v1139_v1 }
  0x22   : > { %1008 = vmatmul.mubr.msk.bf16.gmra.mrb[4].mxu1 %vm319_vm1, %v1091_v10 }
  0x23   : > { %1011 = vmatprep.mubr.msk.bf16.mxu1 %vm1140_vm0, %v1139_v1 }
  0x24   : > { %964 = vmatmul.mubr.msk.bf16.gmra.mrb[4].mxu0 %vm319_vm1, %v1091_v10 }
  0x25   : > { %967 = vmatprep.mubr.msk.bf16.mxu0 %vm1140_vm0, %v1139_v1 }
  0x2a   : > { %1012 = vmatmul.mubr.msk.bf16.gmra.mrb[8].mxu1 %vm319_vm1, %v1092_v11 }
  0x2b   : > { %1015 = vmatprep.mubr.msk.bf16.mxu1 %vm1140_vm0, %v1139_v1 }
  0x2c   : > { %968 = vmatmul.mubr.msk.bf16.gmra.mrb[8].mxu0 %vm319_vm1, %v1092_v11 }
  0x2d   : > { %971 = vmatprep.mubr.msk.bf16.mxu0 %vm1140_vm0, %v1139_v1 }
  0x32   : > { %1016 = vmatmul.mubr.msk.bf16.gmra.mrb[12].mxu1 %vm319_vm1, %v1093_v12 }
  0x33   : > { %1019 = vmatprep.mubr.msk.bf16.mxu1 %vm1140_vm0, %v1139_v1 }
  0x34   : > { %972 = vmatmul.mubr.msk.bf16.gmra.mrb[12].mxu0 %vm319_vm1, %v1093_v12 }
  0x35   : > { %975 = vmatprep.mubr.msk.bf16.mxu0 %vm1140_vm0, %v1139_v1 }
  0x3a   : > { %1020 = vmatmul.mubr.msk.bf16.gmra.mrb[16].mxu1 %vm319_vm1, %v1094_v13 }
  0x3b   : > { %1023 = vmatprep.mubr.msk.bf16.mxu1 %vm1140_vm0, %v1139_v1 }
  0x3c   : > { %976 = vmatmul.mubr.msk.bf16.gmra.mrb[16].mxu0 %vm319_vm1, %v1094_v13 }
  0x3d   : > { %979 = vmatprep.mubr.msk.bf16.mxu0 %vm1140_vm0, %v1139_v1 }
  0x42   : > { %1024 = vmatmul.mubr.msk.bf16.gmra.mrb[20].mxu1 %vm319_vm1, %v1095_v14 }
  0x43   : > { %1027 = vmatprep.mubr.msk.bf16.mxu1 %vm1140_vm0, %v1139_v1 }
  0x44   : > { %980 = vmatmul.mubr.msk.bf16.gmra.mrb[20].mxu0 %vm319_vm1, %v1095_v14 }
  0x45   : > { %983 = vmatprep.mubr.msk.bf16.mxu0 %vm1140_vm0, %v1139_v1 }
  0x4a   : > { %1028 = vmatmul.mubr.msk.bf16.gmra.mrb[24].mxu1 %vm319_vm1, %v1096_v15 }
  0x4b   : > { %1031 = vmatprep.mubr.msk.bf16.mxu1 %vm1140_vm0, %v1139_v1 }
  0x4c   : > { %984 = vmatmul.mubr.msk.bf16.gmra.mrb[24].mxu0 %vm319_vm1, %v1096_v15 }
  0x4d   : > { %987 = vmatprep.mubr.msk.bf16.mxu0 %vm1140_vm0, %v1139_v1 }
  0x52   : > { %1032 = vmatmul.mubr.msk.bf16.gmra.mrb[28].mxu1 %vm319_vm1, %v1097_v16 }
  0x53   : > { %1035 = vmatprep.mubr.msk.bf16.mxu1 %vm1140_vm0, %v1139_v1 }
  0x54   : > { %988 = vmatmul.mubr.msk.bf16.gmra.mrb[28].mxu0 %vm319_vm1, %v1097_v16 }
  0x55   : > { %991 = vmatprep.mubr.msk.bf16.mxu0 %vm1140_vm0, %v1139_v1 }
  0x5a   : > { %1036 = vmatmul.mubr.msk.bf16.gmra.mrb[32].mxu1 %vm319_vm1, %v1098_v17 }
  0x5c   : > { %992 = vmatmul.mubr.msk.bf16.gmra.mrb[32].mxu0 %vm319_vm1, %v1098_v17 }
  0xed   : > { %v516_v20 = vpop.f32.mrb[0].mxu1 }
  0xee   : > { %v1005_v21 = vpop.f32.mrb[1].mxu1  ;;  %v586_v24 = vrot.slane %v516_v20, 1 }
  0xef   : > { %v519_v22 = vpop.f32.mrb[2].mxu1  ;;  %v381_v23 = vpop.f32.mrb[0].mxu0 }
  0xf0   : > { %v587_v25 = vrot.slane %v519_v22, 1  ;;  %v1006_v26 = vpop.f32.mrb[3].mxu1  ;;  %v961_v27 = vpop.f32.mrb[1].mxu0 }
  0xf1   : > { %v384_v28 = vpop.f32.mrb[2].mxu0 }
  0xf2   : > { %v621_v29 = vsel %vm605_vm2, %v586_v24, %v587_v25  ;;  %v962_v31 = vpop.f32.mrb[3].mxu0 }
  0xf3   : > { %v622_v32 = vadd.f32 %v621_v29, %v381_v23 }
  0xf5   : > { %v645_v33 = vadd.f32 %v1316_v30, %v622_v32  ;;  %v524_v34 = vpop.f32.mrb[4].mxu1 }
  0xf6   : > { %v588_v35 = vrot.slane %v524_v34, 1  ;;  %v1009_v36 = vpop.f32.mrb[5].mxu1 }
  0xf7   : > { %v661_v37 = vmax.f32 %v645_v33, 0.0  ;;  %v527_v38 = vpop.f32.mrb[6].mxu1  ;;  %v389_v39 = vpop.f32.mrb[4].mxu0 }
  0xf8   : > { %v620_v40 = vsel %vm605_vm2, %v587_v25, %v588_v35  ;;  %v589_v41 = vrot.slane %v527_v38, 1  ;;  %v1010_v42 = vpop.f32.mrb[7].mxu1  ;;  %v965_v43 = vpop.f32.mrb[5].mxu0 }
  0xf9   : > { %v909_v44 = vpack.c.bf16 %v661_v37, %v661_v37  ;;  %v623_v45 = vadd.f32 %v620_v40, %v384_v28  ;;  %v392_v46 = vpop.f32.mrb[6].mxu0 }
  0xfa   : > { %v619_v47 = vsel %vm605_vm2, %v588_v35, %v589_v41  ;;  %v966_v48 = vpop.f32.mrb[7].mxu0 }
  0xfb   : > { %742 = vst.msk [vmem:[%s1322_s7] sm:$0xf] %vm741_vm3, %v909_v44  ;;  %v646_v49 = vadd.f32 %v1316_v30, %v623_v45  ;;  %v624_v50 = vadd.f32 %v619_v47, %v389_v39 }
  0xfd   : > { %v662_v51 = vmax.f32 %v646_v49, 0.0  ;;  %v647_v52 = vadd.f32 %v1316_v30, %v624_v50  ;;  %v532_v53 = vpop.f32.mrb[8].mxu1 }
  0xfe   : > { %v590_v54 = vrot.slane %v532_v53, 1  ;;  %v1013_v55 = vpop.f32.mrb[9].mxu1 }
  0xff   : > { %v910_v56 = vpack.c.bf16 %v662_v51, %v662_v51  ;;  %v663_v57 = vmax.f32 %v647_v52, 0.0  ;;  %v535_v58 = vpop.f32.mrb[10].mxu1  ;;  %v397_v59 = vpop.f32.mrb[8].mxu0 }
 0x100   : > { %v618_v60 = vsel %vm605_vm2, %v589_v41, %v590_v54  ;;  %v591_v61 = vrot.slane %v535_v58, 1  ;;  %v1014_v62 = vpop.f32.mrb[11].mxu1  ;;  %v969_v63 = vpop.f32.mrb[9].mxu0 }
 0x101   : > { %743 = vst.msk [vmem:[%s1322_s7 + $0x4] sm:$0xf] %vm741_vm3, %v910_v56  ;;  %v911_v0 = vpack.c.bf16 %v663_v57, %v663_v57  ;;  %v625_v1 = vadd.f32 %v618_v60, %v392_v46  ;;  %v400_v2 = vpop.f32.mrb[10].mxu0 }
 0x102   : > { %v617_v3 = vsel %vm605_vm2, %v590_v54, %v591_v61  ;;  %v970_v4 = vpop.f32.mrb[11].mxu0 }
 0x103   : > { %744 = vst.msk [vmem:[%s1322_s7 + $0x8] sm:$0xf] %vm741_vm3, %v911_v0  ;;  %v648_v5 = vadd.f32 %v1316_v30, %v625_v1  ;;  %v626_v6 = vadd.f32 %v617_v3, %v397_v59 }
 0x105   : > { %v664_v7 = vmax.f32 %v648_v5, 0.0  ;;  %v649_v8 = vadd.f32 %v1316_v30, %v626_v6  ;;  %v540_v9 = vpop.f32.mrb[12].mxu1 }
 0x106   : > { %v592_v10 = vrot.slane %v540_v9, 1  ;;  %v1017_v11 = vpop.f32.mrb[13].mxu1 }
 0x107   : > { %v912_v12 = vpack.c.bf16 %v664_v7, %v664_v7  ;;  %v665_v13 = vmax.f32 %v649_v8, 0.0  ;;  %v543_v14 = vpop.f32.mrb[14].mxu1  ;;  %v405_v15 = vpop.f32.mrb[12].mxu0 }
 0x108   : > { %v616_v16 = vsel %vm605_vm2, %v591_v61, %v592_v10  ;;  %v593_v17 = vrot.slane %v543_v14, 1  ;;  %v1018_v18 = vpop.f32.mrb[15].mxu1  ;;  %v973_v20 = vpop.f32.mrb[13].mxu0 }
 0x109   : > { %745 = vst.msk [vmem:[%s1322_s7 + $0xc] sm:$0xf] %vm741_vm3, %v912_v12  ;;  %v913_v21 = vpack.c.bf16 %v665_v13, %v665_v13  ;;  %v627_v22 = vadd.f32 %v616_v16, %v400_v2  ;;  %v408_v23 = vpop.f32.mrb[14].mxu0 }
 0x10a   : > { %v615_v24 = vsel %vm605_vm2, %v592_v10, %v593_v17  ;;  %v974_v25 = vpop.f32.mrb[15].mxu0 }
 0x10b   : > { %746 = vst.msk [vmem:[%s1322_s7 + $0x10] sm:$0xf] %vm741_vm3, %v913_v21  ;;  %v650_v26 = vadd.f32 %v1316_v30, %v627_v22  ;;  %v628_v27 = vadd.f32 %v615_v24, %v405_v15 }
 0x10d   : > { %v666_v28 = vmax.f32 %v650_v26, 0.0  ;;  %v651_v29 = vadd.f32 %v1316_v30, %v628_v27  ;;  %v548_v31 = vpop.f32.mrb[16].mxu1 }
 0x10e   : > { %v594_v32 = vrot.slane %v548_v31, 1  ;;  %v1021_v33 = vpop.f32.mrb[17].mxu1 }
 0x10f   : > { %v914_v34 = vpack.c.bf16 %v666_v28, %v666_v28  ;;  %v667_v35 = vmax.f32 %v651_v29, 0.0  ;;  %v551_v36 = vpop.f32.mrb[18].mxu1  ;;  %v413_v37 = vpop.f32.mrb[16].mxu0 }
 0x110   : > { %v614_v38 = vsel %vm605_vm2, %v593_v17, %v594_v32  ;;  %v595_v39 = vrot.slane %v551_v36, 1  ;;  %v1022_v40 = vpop.f32.mrb[19].mxu1  ;;  %v977_v41 = vpop.f32.mrb[17].mxu0 }
 0x111   : > { %747 = vst.msk [vmem:[%s1322_s7 + $0x14] sm:$0xf] %vm741_vm3, %v914_v34  ;;  %v915_v42 = vpack.c.bf16 %v667_v35, %v667_v35  ;;  %v629_v43 = vadd.f32 %v614_v38, %v408_v23  ;;  %v416_v44 = vpop.f32.mrb[18].mxu0 }
 0x112   : > { %v613_v45 = vsel %vm605_vm2, %v594_v32, %v595_v39  ;;  %v978_v46 = vpop.f32.mrb[19].mxu0 }
 0x113   : > { %748 = vst.msk [vmem:[%s1322_s7 + $0x18] sm:$0xf] %vm741_vm3, %v915_v42  ;;  %v652_v47 = vadd.f32 %v1316_v30, %v629_v43  ;;  %v630_v48 = vadd.f32 %v613_v45, %v413_v37 }
 0x115   : > { %v668_v49 = vmax.f32 %v652_v47, 0.0  ;;  %v653_v50 = vadd.f32 %v1316_v30, %v630_v48  ;;  %v556_v51 = vpop.f32.mrb[20].mxu1 }
 0x116   : > { %v596_v52 = vrot.slane %v556_v51, 1  ;;  %v1025_v53 = vpop.f32.mrb[21].mxu1 }
 0x117   : > { %v916_v54 = vpack.c.bf16 %v668_v49, %v668_v49  ;;  %v669_v55 = vmax.f32 %v653_v50, 0.0  ;;  %v559_v56 = vpop.f32.mrb[22].mxu1  ;;  %v421_v57 = vpop.f32.mrb[20].mxu0 }
 0x118   : > { %v612_v58 = vsel %vm605_vm2, %v595_v39, %v596_v52  ;;  %v597_v59 = vrot.slane %v559_v56, 1  ;;  %v1026_v60 = vpop.f32.mrb[23].mxu1  ;;  %v981_v61 = vpop.f32.mrb[21].mxu0 }
 0x119   : > { %749 = vst.msk [vmem:[%s1322_s7 + $0x1c] sm:$0xf] %vm741_vm3, %v916_v54  ;;  %v917_v62 = vpack.c.bf16 %v669_v55, %v669_v55  ;;  %v631_v63 = vadd.f32 %v612_v58, %v416_v44  ;;  %v424_v0 = vpop.f32.mrb[22].mxu0 }
 0x11a   : > { %v611_v1 = vsel %vm605_vm2, %v596_v52, %v597_v59  ;;  %v982_v2 = vpop.f32.mrb[23].mxu0 }
 0x11b   : > { %750 = vst.msk [vmem:[%s1322_s7 + $0x20] sm:$0xf] %vm741_vm3, %v917_v62  ;;  %v654_v3 = vadd.f32 %v1316_v30, %v631_v63  ;;  %v632_v4 = vadd.f32 %v611_v1, %v421_v57 }
 0x11d   : > { %v670_v5 = vmax.f32 %v654_v3, 0.0  ;;  %v655_v6 = vadd.f32 %v1316_v30, %v632_v4  ;;  %v564_v7 = vpop.f32.mrb[24].mxu1 }
 0x11e   : > { %v598_v8 = vrot.slane %v564_v7, 1  ;;  %v1029_v9 = vpop.f32.mrb[25].mxu1 }
 0x11f   : > { %v918_v10 = vpack.c.bf16 %v670_v5, %v670_v5  ;;  %v671_v11 = vmax.f32 %v655_v6, 0.0  ;;  %v567_v12 = vpop.f32.mrb[26].mxu1  ;;  %v429_v13 = vpop.f32.mrb[24].mxu0 }
 0x120   : > { %v610_v14 = vsel %vm605_vm2, %v597_v59, %v598_v8  ;;  %v599_v15 = vrot.slane %v567_v12, 1  ;;  %v1030_v16 = vpop.f32.mrb[27].mxu1  ;;  %v985_v17 = vpop.f32.mrb[25].mxu0 }
 0x121   : > { %751 = vst.msk [vmem:[%s1322_s7 + $0x24] sm:$0xf] %vm741_vm3, %v918_v10  ;;  %v919_v18 = vpack.c.bf16 %v671_v11, %v671_v11  ;;  %v633_v20 = vadd.f32 %v610_v14, %v424_v0  ;;  %v432_v21 = vpop.f32.mrb[26].mxu0 }
 0x122   : > { %v609_v22 = vsel %vm605_vm2, %v598_v8, %v599_v15  ;;  %v986_v23 = vpop.f32.mrb[27].mxu0 }
 0x123   : > { %752 = vst.msk [vmem:[%s1322_s7 + $0x28] sm:$0xf] %vm741_vm3, %v919_v18  ;;  %v656_v24 = vadd.f32 %v1316_v30, %v633_v20  ;;  %v634_v25 = vadd.f32 %v609_v22, %v429_v13 }
 0x125   : > { %v672_v26 = vmax.f32 %v656_v24, 0.0  ;;  %v657_v27 = vadd.f32 %v1316_v30, %v634_v25  ;;  %v572_v28 = vpop.f32.mrb[28].mxu1 }
 0x126   : > { %v600_v29 = vrot.slane %v572_v28, 1  ;;  %v1033_v31 = vpop.f32.mrb[29].mxu1 }
 0x127   : > { %v920_v32 = vpack.c.bf16 %v672_v26, %v672_v26  ;;  %v673_v33 = vmax.f32 %v657_v27, 0.0  ;;  %v575_v34 = vpop.f32.mrb[30].mxu1  ;;  %v437_v35 = vpop.f32.mrb[28].mxu0 }
 0x128   : > { %v608_v36 = vsel %vm605_vm2, %v599_v15, %v600_v29  ;;  %v601_v37 = vrot.slane %v575_v34, 1  ;;  %v1034_v38 = vpop.f32.mrb[31].mxu1  ;;  %v989_v39 = vpop.f32.mrb[29].mxu0 }
 0x129   : > { %753 = vst.msk [vmem:[%s1322_s7 + $0x2c] sm:$0xf] %vm741_vm3, %v920_v32  ;;  %v921_v40 = vpack.c.bf16 %v673_v33, %v673_v33  ;;  %v635_v41 = vadd.f32 %v608_v36, %v432_v21  ;;  %v440_v42 = vpop.f32.mrb[30].mxu0 }
 0x12a   : > { %v607_v43 = vsel %vm605_vm2, %v600_v29, %v601_v37  ;;  %v990_v44 = vpop.f32.mrb[31].mxu0 }
 0x12b   : > { %754 = vst.msk [vmem:[%s1322_s7 + $0x30] sm:$0xf] %vm741_vm3, %v921_v40  ;;  %v658_v45 = vadd.f32 %v1316_v30, %v635_v41  ;;  %v636_v46 = vadd.f32 %v607_v43, %v437_v35 }
 0x12d   : > { %v674_v47 = vmax.f32 %v658_v45, 0.0  ;;  %v659_v48 = vadd.f32 %v1316_v30, %v636_v46  ;;  %v580_v49 = vpop.f32.mrb[32].mxu1 }
 0x12e   : > { %v602_v50 = vrot.slane %v580_v49, 1  ;;  %v1037_v51 = vpop.f32.mrb[33].mxu1 }
 0x12f   : > { %v922_v52 = vpack.c.bf16 %v674_v47, %v674_v47  ;;  %v675_v53 = vmax.f32 %v659_v48, 0.0  ;;  %v583_v54 = vpop.f32.mrb[34].mxu1  ;;  %v445_v55 = vpop.f32.mrb[32].mxu0 }
 0x130   : > { %v606_v56 = vsel %vm605_vm2, %v601_v37, %v602_v50  ;;  %v1038_v57 = vpop.f32.mrb[35].mxu1  ;;  %v993_v58 = vpop.f32.mrb[33].mxu0 }
 0x131   : > { %755 = vst.msk [vmem:[%s1322_s7 + $0x34] sm:$0xf] %vm741_vm3, %v922_v52  ;;  %v923_v59 = vpack.c.bf16 %v675_v53, %v675_v53  ;;  %v637_v60 = vadd.f32 %v606_v56, %v440_v42  ;;  %v447_v61 = vpop.f32.mrb[34].mxu0 }
 0x132   : > { %v994_v62 = vpop.f32.mrb[35].mxu0 }
 0x133   : > { %756 = vst.msk [vmem:[%s1322_s7 + $0x38] sm:$0xf] %vm741_vm3, %v923_v59  ;;  %v660_v63 = vadd.f32 %v1316_v30, %v637_v60 }
 0x135   : > { %v676_v0 = vmax.f32 %v660_v63, 0.0 }
 0x137   : > { %v924_v1 = vpack.c.bf16 %v676_v0, %v676_v0 }
 0x139   : > { %757 = vst.msk [vmem:[%s1322_s7 + $0x3c] sm:$0xf] %vm741_vm3, %v924_v1 }
 0x13a PF: > { %s14_s19 = sadd.s32 1, %s1137_s19   ;;  %s1421_s15 = smov %s1129_s17 }
 0x13b   : > { %p11_p7 = scmp.ge.s32.totalorder %s14_s19, 10   ;;  %s1422_s16 = smov %s1133_s18 }
 0x13c   : > { %s1423_s17 = smov %s1426_s20  ;;  %s1424_s18 = smov %s1430_s21 }
 0x13d   :  { %13 = sbr.rel (!%p11_p7) target bundleno = 3 (0x3), region = 67 }

// kernel: encoder_forward.9
= control target key start
LH: loop header
LB: loop body
LE: loop exit
PB: predicated region body
PF: predicated region fallthrough
CT: control target
= control target key end

     0   :  { %s1196_s15 = smov 0   ;;  %s1198_s16 = smov 0   ;;  %s1434_s0 = inlined_call_operand.vmem [shape: bf16[2,136,128], index: 0, kind: input, shape index: {}]   ;;  %s1435_s1 = inlined_call_operand.vmem [shape: bf16[128,64], index: 1, kind: input, shape index: {}]   ;;  %s1436_s2 = inlined_call_operand.vmem [shape: bf16[128,64], index: 2, kind: input, shape index: {}]   ;;  %s1437_s3 = inlined_call_operand.vmem [shape: f32[1,64], index: 3, kind: input, shape index: {}]   ;;  %s1438_s4 = inlined_call_operand.vmem [shape: bf16[2,128,64], index: 4, kind: output, shape index: {}]  }
   0x1   :  { %s1200_s17 = smov 0  }
   0x2 LB: > { %s26_s18 = sadd.s32 1, %s1163_s16  ;;  %p890_p0 = scmp.ge.s32.totalorder %s1167_s17, 1  ;;  %s1167_s17 = sphi %s1200_s17, %s14_s17   ;;  %s1163_s16 = sphi %s1198_s16, %s1440_s16   ;;  %s1159_s15 = sphi %s1196_s15, %s1439_s15  }
   0x3   : > { %p28_p1 = scmp.ge.s32.totalorder %s26_s18, 2  ;;  %p176_p2 = scmp.lt.s32.totalorder %s1167_s17, 3 }
   0x5   : > { %s1442_s18 = smov (%p28_p1, %s26_s18), 0  ;;  %p177_p3 = pnand %p890_p0, %p176_p2 }
   0x6   : > { %v1120_v0 = vld [vmem:[%s1436_s2] sm:$0xff] (!%p177_p3)   ;;  %v1169_v1 = vmov (!%p177_p3), 0.0   ;;  %v1121_v2 = vld [vmem:[%s1436_s2 + $0x8] sm:$0xff] (!%p177_p3)   ;;  %vm1170_vm0 = vmmov (!%p177_p3), 0   ;;  %p206_p4 = scmp.lt.s32.totalorder (!%p177_p3), %s1159_s15, 1  ;;  %v1123_v5 = vld [vmem:[%s1436_s2 + $0x10] sm:$0xff] (!%p177_p3)   ;;  %v648_v26 = vlaneseq (!%p177_p3) }
   0x7   : > { %180 = sbr.rel (%p177_p3) target bundleno = 327 (0x147), region = 36  ;;  %1041 = vmatprep.subr.bf16.mxu1 (!%p177_p3), %v1169_v1  ;;  %989 = vmatprep.subr.bf16.mxu0 (!%p177_p3), %v1169_v1  ;;  %v1122_v3 = vld [vmem:[%s1435_s1] sm:$0xff] (!%p177_p3)   ;;  %v1124_v4 = vld [vmem:[%s1435_s1 + $0x8] sm:$0xff] (!%p177_p3)   ;;  %v1126_v6 = vld [vmem:[%s1435_s1 + $0x10] sm:$0xff] (!%p177_p3)   ;;  %vm786_vm2 = vcmask (!%p177_p3), 519168  }
   0x8   : > { %1042 = vmatpush3.bf16.msra.mxu1 (!%p177_p3), %v1120_v0  ;;  %1057 = vmatprep.mubr.msk.bf16.mxu1 (!%p177_p3), %vm1170_vm0, %v1169_v1  ;;  %v1125_v7 = vld [vmem:[%s1436_s2 + $0x18] sm:$0xff] (!%p177_p3)   ;;  %v1127_v9 = vld [vmem:[%s1436_s2 + $0x20] sm:$0xff] (!%p177_p3)   ;;  %v1129_v11 = vld [vmem:[%s1436_s2 + $0x28] sm:$0xff] (!%p177_p3)   ;;  %v1331_v27 = vshrl.u32 (!%p177_p3), %v648_v26, 7 }
   0x9   : > { %1043 = vmatprep.subr.bf16.mxu1 (!%p177_p3), %v1169_v1  ;;  %1005 = vmatprep.mubr.msk.bf16.mxu0 (!%p177_p3), %vm1170_vm0, %v1169_v1  ;;  %v1128_v8 = vld [vmem:[%s1435_s1 + $0x18] sm:$0xff] (!%p177_p3)   ;;  %v1130_v10 = vld [vmem:[%s1435_s1 + $0x20] sm:$0xff] (!%p177_p3)   ;;  %v1132_v12 = vld [vmem:[%s1435_s1 + $0x28] sm:$0xff] (!%p177_p3)  }
   0xa   : > { %990 = vmatpush3.bf16.msra.mxu0 (!%p177_p3), %v1122_v3  ;;  %v1131_v13 = vld [vmem:[%s1436_s2 + $0x30] sm:$0xff] (!%p177_p3)   ;;  %v1133_v15 = vld [vmem:[%s1436_s2 + $0x38] sm:$0xff] (!%p177_p3)   ;;  %vm650_vm1 = vcmp.lt.s32.totalorder (!%p177_p3), %v1331_v27, 7  ;;  %v1339_v38 = vld [vmem:[%s1437_s3] ss:$0 sm:$0xff] (!%p177_p3) }
   0xb   : > { %991 = vmatprep.subr.bf16.mxu0 (!%p177_p3), %v1169_v1  ;;  %v1134_v14 = vld [vmem:[%s1435_s1 + $0x30] sm:$0xff] (!%p177_p3)   ;;  %v1136_v16 = vld [vmem:[%s1435_s1 + $0x38] sm:$0xff] (!%p177_p3)  }
   0xc   : > { %1044 = vmatpush3.bf16.msra.mxu1 (!%p177_p3), %v1121_v2 }
   0xd   : > { %1045 = vmatprep.subr.bf16.mxu1 (!%p177_p3), %v1169_v1 }
   0xe   : > { %s1444_s15 = smov (!%p206_p4, %s1159_s15), 1  ;;  %992 = vmatpush3.bf16.msra.mxu0 %v1124_v4 }
   0xf   : > { %993 = vmatprep.subr.bf16.mxu0 %v1169_v1  ;;  %s1093_s7 = smul.u32 68, %s1444_s15  ;;  %s938_s9 = sshll.u32 %s1444_s15, 6 }
  0x10   : > { %1046 = vmatpush3.bf16.msra.mxu1 %v1123_v5  ;;  %s1346_s12 = scalar_lea.vmem %s1438_s4, %s938_s9 }
  0x11   : > { %1047 = vmatprep.subr.bf16.mxu1 %v1169_v1  ;;  %s1259_s14 = scalar_lea.vmem %s1434_s0, %s1093_s7 }
  0x12   : > { %994 = vmatpush3.bf16.msra.mxu0 %v1126_v6  ;;  %v1135_v17 = vld [vmem:[%s1259_s14] sm:$0xff]   ;;  %v1137_v18 = vld [vmem:[%s1259_s14 + $0x8] sm:$0xff]   ;;  %v1138_v19 = vld [vmem:[%s1259_s14 + $0x10] sm:$0xff]  }
  0x13   : > { %995 = vmatprep.subr.bf16.mxu0 %v1169_v1  ;;  %v1139_v20 = vld [vmem:[%s1259_s14 + $0x18] sm:$0xff]   ;;  %v1140_v21 = vld [vmem:[%s1259_s14 + $0x20] sm:$0xff]   ;;  %v1141_v22 = vld [vmem:[%s1259_s14 + $0x28] sm:$0xff]  }
  0x14   : > { %1048 = vmatpush3.bf16.msra.mxu1 %v1125_v7  ;;  %v1142_v23 = vld [vmem:[%s1259_s14 + $0x30] sm:$0xff]   ;;  %v1143_v24 = vld [vmem:[%s1259_s14 + $0x38] sm:$0xff]   ;;  %v1144_v25 = vld [vmem:[%s1259_s14 + $0x40] ss:$0 sps:$4 sm:$0xff]  }
  0x15   : > { %1049 = vmatprep.subr.bf16.mxu1 %v1169_v1 }
  0x16   : > { %996 = vmatpush3.bf16.msra.mxu0 %v1128_v8 }
  0x17   : > { %997 = vmatprep.subr.bf16.mxu0 %v1169_v1 }
  0x18   : > { %1050 = vmatpush3.bf16.msra.mxu1 %v1127_v9 }
  0x19   : > { %1051 = vmatprep.subr.bf16.mxu1 %v1169_v1 }
  0x1a   : > { %998 = vmatpush3.bf16.msra.mxu0 %v1130_v10 }
  0x1b   : > { %999 = vmatprep.subr.bf16.mxu0 %v1169_v1 }
  0x1c   : > { %1052 = vmatpush3.bf16.msra.mxu1 %v1129_v11 }
  0x1d   : > { %1053 = vmatprep.subr.bf16.mxu1 %v1169_v1 }
  0x1e   : > { %1000 = vmatpush3.bf16.msra.mxu0 %v1132_v12 }
  0x1f   : > { %1001 = vmatprep.subr.bf16.mxu0 %v1169_v1 }
  0x20   : > { %1054 = vmatpush3.bf16.msra.mxu1 %v1131_v13 }
  0x21   : > { %1055 = vmatprep.subr.bf16.mxu1 %v1169_v1 }
  0x22   : > { %1002 = vmatpush3.bf16.msra.mxu0 %v1134_v14 }
  0x23   : > { %1003 = vmatprep.subr.bf16.mxu0 %v1169_v1 }
  0x24   : > { %1056 = vmatpush3.bf16.msra.mxu1 %v1133_v15 }
  0x26   : > { %1004 = vmatpush3.bf16.msra.mxu0 %v1136_v16 }
  0x27   : > { %1058 = vmatmul.mubr.bf16.vlgmr.msra.gmra.mrb[0].mxu1 %v1135_v17 }
  0x28   : > { %1061 = vmatprep.mubr.msk.bf16.mxu1 %vm1170_vm0, %v1169_v1 }
  0x29   : > { %1006 = vmatmul.mubr.bf16.vlgmr.msra.gmra.mrb[0].mxu0 %v1135_v17 }
  0x2a   : > { %1009 = vmatprep.mubr.msk.bf16.mxu0 %vm1170_vm0, %v1169_v1 }
  0x2f   : > { %1062 = vmatmul.mubr.bf16.gmra.mrb[4].mxu1 %v1137_v18 }
  0x30   : > { %1065 = vmatprep.mubr.msk.bf16.mxu1 %vm1170_vm0, %v1169_v1 }
  0x31   : > { %1010 = vmatmul.mubr.bf16.gmra.mrb[4].mxu0 %v1137_v18 }
  0x32   : > { %1013 = vmatprep.mubr.msk.bf16.mxu0 %vm1170_vm0, %v1169_v1 }
  0x37   : > { %1066 = vmatmul.mubr.bf16.gmra.mrb[8].mxu1 %v1138_v19 }
  0x38   : > { %1069 = vmatprep.mubr.msk.bf16.mxu1 %vm1170_vm0, %v1169_v1 }
  0x39   : > { %1014 = vmatmul.mubr.bf16.gmra.mrb[8].mxu0 %v1138_v19 }
  0x3a   : > { %1017 = vmatprep.mubr.msk.bf16.mxu0 %vm1170_vm0, %v1169_v1 }
  0x3f   : > { %1070 = vmatmul.mubr.bf16.gmra.mrb[12].mxu1 %v1139_v20 }
  0x40   : > { %1073 = vmatprep.mubr.msk.bf16.mxu1 %vm1170_vm0, %v1169_v1 }
  0x41   : > { %1018 = vmatmul.mubr.bf16.gmra.mrb[12].mxu0 %v1139_v20 }
  0x42   : > { %1021 = vmatprep.mubr.msk.bf16.mxu0 %vm1170_vm0, %v1169_v1 }
  0x47   : > { %1074 = vmatmul.mubr.bf16.gmra.mrb[16].mxu1 %v1140_v21 }
  0x48   : > { %1077 = vmatprep.mubr.msk.bf16.mxu1 %vm1170_vm0, %v1169_v1 }
  0x49   : > { %1022 = vmatmul.mubr.bf16.gmra.mrb[16].mxu0 %v1140_v21 }
  0x4a   : > { %1025 = vmatprep.mubr.msk.bf16.mxu0 %vm1170_vm0, %v1169_v1 }
  0x4f   : > { %1078 = vmatmul.mubr.bf16.gmra.mrb[20].mxu1 %v1141_v22 }
  0x50   : > { %1081 = vmatprep.mubr.msk.bf16.mxu1 %vm1170_vm0, %v1169_v1 }
  0x51   : > { %1026 = vmatmul.mubr.bf16.gmra.mrb[20].mxu0 %v1141_v22 }
  0x52   : > { %1029 = vmatprep.mubr.msk.bf16.mxu0 %vm1170_vm0, %v1169_v1 }
  0x57   : > { %1082 = vmatmul.mubr.bf16.gmra.mrb[24].mxu1 %v1142_v23 }
  0x58   : > { %1085 = vmatprep.mubr.msk.bf16.mxu1 %vm1170_vm0, %v1169_v1 }
  0x59   : > { %1030 = vmatmul.mubr.bf16.gmra.mrb[24].mxu0 %v1142_v23 }
  0x5a   : > { %1033 = vmatprep.mubr.msk.bf16.mxu0 %vm1170_vm0, %v1169_v1 }
  0x5f   : > { %1086 = vmatmul.mubr.bf16.gmra.mrb[28].mxu1 %v1143_v24 }
  0x60   : > { %1089 = vmatprep.mubr.msk.bf16.mxu1 %vm1170_vm0, %v1169_v1 }
  0x61   : > { %1034 = vmatmul.mubr.bf16.gmra.mrb[28].mxu0 %v1143_v24 }
  0x62   : > { %1037 = vmatprep.mubr.msk.bf16.mxu0 %vm1170_vm0, %v1169_v1 }
  0x67   : > { %1090 = vmatmul.mubr.bf16.gmra.mrb[32].mxu1 %v1144_v25 }
  0x69   : > { %1038 = vmatmul.mubr.bf16.gmra.mrb[32].mxu0 %v1144_v25 }
  0xfa   : > { %v561_v28 = vpop.f32.mrb[0].mxu1 }
  0xfb   : > { %v1059_v29 = vpop.f32.mrb[1].mxu1  ;;  %v631_v32 = vrot.slane %v561_v28, 1 }
  0xfc   : > { %v564_v30 = vpop.f32.mrb[2].mxu1  ;;  %v394_v31 = vpop.f32.mrb[0].mxu0 }
  0xfd   : > { %v632_v33 = vrot.slane %v564_v30, 1  ;;  %v1060_v34 = vpop.f32.mrb[3].mxu1  ;;  %v1007_v35 = vpop.f32.mrb[1].mxu0 }
  0xfe   : > { %v397_v36 = vpop.f32.mrb[2].mxu0 }
  0xff   : > { %v666_v37 = vsel %vm650_vm1, %v631_v32, %v632_v33  ;;  %v1008_v39 = vpop.f32.mrb[3].mxu0 }
 0x100   : > { %v667_v40 = vadd.f32 %v666_v37, %v394_v31 }
 0x102   : > { %v690_v41 = vadd.f32 %v1339_v38, %v667_v40  ;;  %v569_v42 = vpop.f32.mrb[4].mxu1 }
 0x103   : > { %v633_v43 = vrot.slane %v569_v42, 1  ;;  %v1063_v44 = vpop.f32.mrb[5].mxu1 }
 0x104   : > { %v706_v45 = vmax.f32 %v690_v41, 0.0  ;;  %v572_v46 = vpop.f32.mrb[6].mxu1  ;;  %v402_v47 = vpop.f32.mrb[4].mxu0 }
 0x105   : > { %v665_v48 = vsel %vm650_vm1, %v632_v33, %v633_v43  ;;  %v634_v49 = vrot.slane %v572_v46, 1  ;;  %v1064_v50 = vpop.f32.mrb[7].mxu1  ;;  %v1011_v51 = vpop.f32.mrb[5].mxu0 }
 0x106   : > { %v939_v52 = vpack.c.bf16 %v706_v45, %v706_v45  ;;  %v668_v53 = vadd.f32 %v665_v48, %v397_v36  ;;  %v405_v54 = vpop.f32.mrb[6].mxu0 }
 0x107   : > { %v664_v55 = vsel %vm650_vm1, %v633_v43, %v634_v49  ;;  %v1012_v56 = vpop.f32.mrb[7].mxu0 }
 0x108   : > { %787 = vst.msk [vmem:[%s1346_s12] sm:$0xf] %vm786_vm2, %v939_v52  ;;  %v691_v57 = vadd.f32 %v1339_v38, %v668_v53  ;;  %v669_v58 = vadd.f32 %v664_v55, %v402_v47 }
 0x10a   : > { %v707_v59 = vmax.f32 %v691_v57, 0.0  ;;  %v692_v60 = vadd.f32 %v1339_v38, %v669_v58  ;;  %v577_v61 = vpop.f32.mrb[8].mxu1 }
 0x10b   : > { %v635_v62 = vrot.slane %v577_v61, 1  ;;  %v1067_v63 = vpop.f32.mrb[9].mxu1 }
 0x10c   : > { %v940_v0 = vpack.c.bf16 %v707_v59, %v707_v59  ;;  %v708_v1 = vmax.f32 %v692_v60, 0.0  ;;  %v580_v2 = vpop.f32.mrb[10].mxu1  ;;  %v410_v3 = vpop.f32.mrb[8].mxu0 }
 0x10d   : > { %v663_v4 = vsel %vm650_vm1, %v634_v49, %v635_v62  ;;  %v636_v5 = vrot.slane %v580_v2, 1  ;;  %v1068_v6 = vpop.f32.mrb[11].mxu1  ;;  %v1015_v7 = vpop.f32.mrb[9].mxu0 }
 0x10e   : > { %788 = vst.msk [vmem:[%s1346_s12 + $0x4] sm:$0xf] %vm786_vm2, %v940_v0  ;;  %v941_v8 = vpack.c.bf16 %v708_v1, %v708_v1  ;;  %v670_v9 = vadd.f32 %v663_v4, %v405_v54  ;;  %v413_v10 = vpop.f32.mrb[10].mxu0 }
 0x10f   : > { %v662_v11 = vsel %vm650_vm1, %v635_v62, %v636_v5  ;;  %v1016_v12 = vpop.f32.mrb[11].mxu0 }
 0x110   : > { %789 = vst.msk [vmem:[%s1346_s12 + $0x8] sm:$0xf] %vm786_vm2, %v941_v8  ;;  %v693_v13 = vadd.f32 %v1339_v38, %v670_v9  ;;  %v671_v14 = vadd.f32 %v662_v11, %v410_v3 }
 0x112   : > { %v709_v15 = vmax.f32 %v693_v13, 0.0  ;;  %v694_v16 = vadd.f32 %v1339_v38, %v671_v14  ;;  %v585_v17 = vpop.f32.mrb[12].mxu1 }
 0x113   : > { %v637_v18 = vrot.slane %v585_v17, 1  ;;  %v1071_v19 = vpop.f32.mrb[13].mxu1 }
 0x114   : > { %v942_v20 = vpack.c.bf16 %v709_v15, %v709_v15  ;;  %v710_v21 = vmax.f32 %v694_v16, 0.0  ;;  %v588_v22 = vpop.f32.mrb[14].mxu1  ;;  %v418_v23 = vpop.f32.mrb[12].mxu0 }
 0x115   : > { %v661_v24 = vsel %vm650_vm1, %v636_v5, %v637_v18  ;;  %v638_v25 = vrot.slane %v588_v22, 1  ;;  %v1072_v26 = vpop.f32.mrb[15].mxu1  ;;  %v1019_v28 = vpop.f32.mrb[13].mxu0 }
 0x116   : > { %790 = vst.msk [vmem:[%s1346_s12 + $0xc] sm:$0xf] %vm786_vm2, %v942_v20  ;;  %v943_v29 = vpack.c.bf16 %v710_v21, %v710_v21  ;;  %v672_v30 = vadd.f32 %v661_v24, %v413_v10  ;;  %v421_v31 = vpop.f32.mrb[14].mxu0 }
 0x117   : > { %v660_v32 = vsel %vm650_vm1, %v637_v18, %v638_v25  ;;  %v1020_v33 = vpop.f32.mrb[15].mxu0 }
 0x118   : > { %791 = vst.msk [vmem:[%s1346_s12 + $0x10] sm:$0xf] %vm786_vm2, %v943_v29  ;;  %v695_v34 = vadd.f32 %v1339_v38, %v672_v30  ;;  %v673_v35 = vadd.f32 %v660_v32, %v418_v23 }
 0x11a   : > { %v711_v36 = vmax.f32 %v695_v34, 0.0  ;;  %v696_v37 = vadd.f32 %v1339_v38, %v673_v35  ;;  %v593_v39 = vpop.f32.mrb[16].mxu1 }
 0x11b   : > { %v639_v40 = vrot.slane %v593_v39, 1  ;;  %v1075_v41 = vpop.f32.mrb[17].mxu1 }
 0x11c   : > { %v944_v42 = vpack.c.bf16 %v711_v36, %v711_v36  ;;  %v712_v43 = vmax.f32 %v696_v37, 0.0  ;;  %v596_v44 = vpop.f32.mrb[18].mxu1  ;;  %v426_v45 = vpop.f32.mrb[16].mxu0 }
 0x11d   : > { %v659_v46 = vsel %vm650_vm1, %v638_v25, %v639_v40  ;;  %v640_v47 = vrot.slane %v596_v44, 1  ;;  %v1076_v48 = vpop.f32.mrb[19].mxu1  ;;  %v1023_v49 = vpop.f32.mrb[17].mxu0 }
 0x11e   : > { %792 = vst.msk [vmem:[%s1346_s12 + $0x14] sm:$0xf] %vm786_vm2, %v944_v42  ;;  %v945_v50 = vpack.c.bf16 %v712_v43, %v712_v43  ;;  %v674_v51 = vadd.f32 %v659_v46, %v421_v31  ;;  %v429_v52 = vpop.f32.mrb[18].mxu0 }
 0x11f   : > { %v658_v53 = vsel %vm650_vm1, %v639_v40, %v640_v47  ;;  %v1024_v54 = vpop.f32.mrb[19].mxu0 }
 0x120   : > { %793 = vst.msk [vmem:[%s1346_s12 + $0x18] sm:$0xf] %vm786_vm2, %v945_v50  ;;  %v697_v55 = vadd.f32 %v1339_v38, %v674_v51  ;;  %v675_v56 = vadd.f32 %v658_v53, %v426_v45 }
 0x122   : > { %v713_v57 = vmax.f32 %v697_v55, 0.0  ;;  %v698_v58 = vadd.f32 %v1339_v38, %v675_v56  ;;  %v601_v59 = vpop.f32.mrb[20].mxu1 }
 0x123   : > { %v641_v60 = vrot.slane %v601_v59, 1  ;;  %v1079_v61 = vpop.f32.mrb[21].mxu1 }
 0x124   : > { %v946_v62 = vpack.c.bf16 %v713_v57, %v713_v57  ;;  %v714_v63 = vmax.f32 %v698_v58, 0.0  ;;  %v604_v0 = vpop.f32.mrb[22].mxu1  ;;  %v434_v1 = vpop.f32.mrb[20].mxu0 }
 0x125   : > { %v657_v2 = vsel %vm650_vm1, %v640_v47, %v641_v60  ;;  %v642_v3 = vrot.slane %v604_v0, 1  ;;  %v1080_v4 = vpop.f32.mrb[23].mxu1  ;;  %v1027_v5 = vpop.f32.mrb[21].mxu0 }
 0x126   : > { %794 = vst.msk [vmem:[%s1346_s12 + $0x1c] sm:$0xf] %vm786_vm2, %v946_v62  ;;  %v947_v6 = vpack.c.bf16 %v714_v63, %v714_v63  ;;  %v676_v7 = vadd.f32 %v657_v2, %v429_v52  ;;  %v437_v8 = vpop.f32.mrb[22].mxu0 }
 0x127   : > { %v656_v9 = vsel %vm650_vm1, %v641_v60, %v642_v3  ;;  %v1028_v10 = vpop.f32.mrb[23].mxu0 }
 0x128   : > { %795 = vst.msk [vmem:[%s1346_s12 + $0x20] sm:$0xf] %vm786_vm2, %v947_v6  ;;  %v699_v11 = vadd.f32 %v1339_v38, %v676_v7  ;;  %v677_v12 = vadd.f32 %v656_v9, %v434_v1 }
 0x12a   : > { %v715_v13 = vmax.f32 %v699_v11, 0.0  ;;  %v700_v14 = vadd.f32 %v1339_v38, %v677_v12  ;;  %v609_v15 = vpop.f32.mrb[24].mxu1 }
 0x12b   : > { %v643_v16 = vrot.slane %v609_v15, 1  ;;  %v1083_v17 = vpop.f32.mrb[25].mxu1 }
 0x12c   : > { %v948_v18 = vpack.c.bf16 %v715_v13, %v715_v13  ;;  %v716_v19 = vmax.f32 %v700_v14, 0.0  ;;  %v612_v20 = vpop.f32.mrb[26].mxu1  ;;  %v442_v21 = vpop.f32.mrb[24].mxu0 }
 0x12d   : > { %v655_v22 = vsel %vm650_vm1, %v642_v3, %v643_v16  ;;  %v644_v23 = vrot.slane %v612_v20, 1  ;;  %v1084_v24 = vpop.f32.mrb[27].mxu1  ;;  %v1031_v25 = vpop.f32.mrb[25].mxu0 }
 0x12e   : > { %796 = vst.msk [vmem:[%s1346_s12 + $0x24] sm:$0xf] %vm786_vm2, %v948_v18  ;;  %v949_v26 = vpack.c.bf16 %v716_v19, %v716_v19  ;;  %v678_v28 = vadd.f32 %v655_v22, %v437_v8  ;;  %v445_v29 = vpop.f32.mrb[26].mxu0 }
 0x12f   : > { %v654_v30 = vsel %vm650_vm1, %v643_v16, %v644_v23  ;;  %v1032_v31 = vpop.f32.mrb[27].mxu0 }
 0x130   : > { %797 = vst.msk [vmem:[%s1346_s12 + $0x28] sm:$0xf] %vm786_vm2, %v949_v26  ;;  %v701_v32 = vadd.f32 %v1339_v38, %v678_v28  ;;  %v679_v33 = vadd.f32 %v654_v30, %v442_v21 }
 0x132   : > { %v717_v34 = vmax.f32 %v701_v32, 0.0  ;;  %v702_v35 = vadd.f32 %v1339_v38, %v679_v33  ;;  %v617_v36 = vpop.f32.mrb[28].mxu1 }
 0x133   : > { %v645_v37 = vrot.slane %v617_v36, 1  ;;  %v1087_v39 = vpop.f32.mrb[29].mxu1 }
 0x134   : > { %v950_v40 = vpack.c.bf16 %v717_v34, %v717_v34  ;;  %v718_v41 = vmax.f32 %v702_v35, 0.0  ;;  %v620_v42 = vpop.f32.mrb[30].mxu1  ;;  %v450_v43 = vpop.f32.mrb[28].mxu0 }
 0x135   : > { %v653_v44 = vsel %vm650_vm1, %v644_v23, %v645_v37  ;;  %v646_v45 = vrot.slane %v620_v42, 1  ;;  %v1088_v46 = vpop.f32.mrb[31].mxu1  ;;  %v1035_v47 = vpop.f32.mrb[29].mxu0 }
 0x136   : > { %798 = vst.msk [vmem:[%s1346_s12 + $0x2c] sm:$0xf] %vm786_vm2, %v950_v40  ;;  %v951_v48 = vpack.c.bf16 %v718_v41, %v718_v41  ;;  %v680_v49 = vadd.f32 %v653_v44, %v445_v29  ;;  %v453_v50 = vpop.f32.mrb[30].mxu0 }
 0x137   : > { %v652_v51 = vsel %vm650_vm1, %v645_v37, %v646_v45  ;;  %v1036_v52 = vpop.f32.mrb[31].mxu0 }
 0x138   : > { %799 = vst.msk [vmem:[%s1346_s12 + $0x30] sm:$0xf] %vm786_vm2, %v951_v48  ;;  %v703_v53 = vadd.f32 %v1339_v38, %v680_v49  ;;  %v681_v54 = vadd.f32 %v652_v51, %v450_v43 }
 0x13a   : > { %v719_v55 = vmax.f32 %v703_v53, 0.0  ;;  %v704_v56 = vadd.f32 %v1339_v38, %v681_v54  ;;  %v625_v57 = vpop.f32.mrb[32].mxu1 }
 0x13b   : > { %v647_v58 = vrot.slane %v625_v57, 1  ;;  %v1091_v59 = vpop.f32.mrb[33].mxu1 }
 0x13c   : > { %v952_v60 = vpack.c.bf16 %v719_v55, %v719_v55  ;;  %v720_v61 = vmax.f32 %v704_v56, 0.0  ;;  %v628_v62 = vpop.f32.mrb[34].mxu1  ;;  %v458_v63 = vpop.f32.mrb[32].mxu0 }
 0x13d   : > { %v651_v0 = vsel %vm650_vm1, %v646_v45, %v647_v58  ;;  %v1092_v1 = vpop.f32.mrb[35].mxu1  ;;  %v1039_v2 = vpop.f32.mrb[33].mxu0 }
 0x13e   : > { %800 = vst.msk [vmem:[%s1346_s12 + $0x34] sm:$0xf] %vm786_vm2, %v952_v60  ;;  %v953_v3 = vpack.c.bf16 %v720_v61, %v720_v61  ;;  %v682_v4 = vadd.f32 %v651_v0, %v453_v50  ;;  %v460_v5 = vpop.f32.mrb[34].mxu0 }
 0x13f   : > { %v1040_v6 = vpop.f32.mrb[35].mxu0 }
 0x140   : > { %801 = vst.msk [vmem:[%s1346_s12 + $0x38] sm:$0xf] %vm786_vm2, %v953_v3  ;;  %v705_v7 = vadd.f32 %v1339_v38, %v682_v4 }
 0x142   : > { %v721_v8 = vmax.f32 %v705_v7, 0.0 }
 0x144   : > { %v954_v9 = vpack.c.bf16 %v721_v8, %v721_v8 }
 0x146   : > { %802 = vst.msk [vmem:[%s1346_s12 + $0x3c] sm:$0xf] %vm786_vm2, %v954_v9 }
 0x147 PF: > { %s14_s17 = sadd.s32 1, %s1167_s17   ;;  %s1439_s15 = smov %s1163_s16 }
 0x148   : > { %p11_p5 = scmp.ge.s32.totalorder %s14_s17, 4   ;;  %s1440_s16 = smov %s1442_s18 }
 0x14a   :  { %13 = sbr.rel (!%p11_p5) target bundleno = 2 (0x2), region = 67 }

// kernel: encoder_forward.10
= control target key start
LH: loop header
LB: loop body
LE: loop exit
PB: predicated region body
PF: predicated region fallthrough
CT: control target
= control target key end

     0   :  { %s1012_s15 = smov 0   ;;  %s1014_s16 = smov 0   ;;  %s1156_s0 = inlined_call_operand.vmem [shape: bf16[2,40,256], index: 0, kind: input, shape index: {}]   ;;  %s1157_s1 = inlined_call_operand.vmem [shape: bf16[256,128], index: 1, kind: input, shape index: {}]   ;;  %s1158_s2 = inlined_call_operand.vmem [shape: bf16[256,128], index: 2, kind: input, shape index: {}]   ;;  %s1159_s3 = inlined_call_operand.vmem [shape: f32[1,128], index: 3, kind: input, shape index: {}]   ;;  %s1160_s4 = inlined_call_operand.vmem [shape: bf16[2,32,128], index: 4, kind: output, shape index: {}]  }
   0x1   :  { %s1016_s17 = smov 0  }
   0x2 LB: > { %s26_s18 = sadd.s32 1, %s981_s16  ;;  %p765_p0 = scmp.ge.s32.totalorder %s985_s17, 1  ;;  %s985_s17 = sphi %s1016_s17, %s14_s17   ;;  %s981_s16 = sphi %s1014_s16, %s1162_s16   ;;  %s977_s15 = sphi %s1012_s15, %s1161_s15  }
   0x3   : > { %p28_p1 = scmp.ge.s32.totalorder %s26_s18, 2  ;;  %p176_p2 = scmp.lt.s32.totalorder %s985_s17, 3 }
   0x5   : > { %s1164_s18 = smov (%p28_p1, %s26_s18), 0  ;;  %p177_p3 = pnand %p765_p0, %p176_p2 }
   0x6   : > { %v923_v0 = vld [vmem:[%s1158_s2 + $0x40] sm:$0xff] (!%p177_p3)   ;;  %v925_v2 = vld [vmem:[%s1158_s2 + $0x48] sm:$0xff] (!%p177_p3)   ;;  %v929_v6 = vld [vmem:[%s1158_s2 + $0x50] sm:$0xff] (!%p177_p3)   ;;  %p206_p4 = scmp.lt.s32.totalorder (!%p177_p3), %s977_s15, 1  ;;  %v632_v39 = vlaneseq (!%p177_p3) }
   0x7   : > { %180 = sbr.rel (%p177_p3) target bundleno = 282 (0x11a), region = 36  ;;  %v924_v1 = vld [vmem:[%s1158_s2] sm:$0xff] (!%p177_p3)   ;;  %864 = vmatprep.subr.bf16.mxu1 (!%p177_p3), %v923_v0  ;;  %v927_v4 = vld [vmem:[%s1158_s2 + $0x8] sm:$0xff] (!%p177_p3)   ;;  %v931_v8 = vld [vmem:[%s1158_s2 + $0x10] sm:$0xff] (!%p177_p3)  }
   0x8   : > { %865 = vmatpush3.bf16.msra.mxu1 (!%p177_p3), %v924_v1  ;;  %v926_v3 = vld [vmem:[%s1157_s1 + $0x40] sm:$0xff] (!%p177_p3)   ;;  %v930_v7 = vld [vmem:[%s1157_s1 + $0x48] sm:$0xff] (!%p177_p3)   ;;  %v933_v10 = vld [vmem:[%s1158_s2 + $0x58] sm:$0xff] (!%p177_p3)   ;;  %v633_v42 = vshrl.u32 (!%p177_p3), %v632_v39, 7 }
   0x9   : > { %866 = vmatprep.subr.bf16.mxu1 (!%p177_p3), %v925_v2  ;;  %830 = vmatprep.subr.bf16.mxu0 (!%p177_p3), %v926_v3  ;;  %v928_v5 = vld [vmem:[%s1157_s1] sm:$0xff] (!%p177_p3)   ;;  %v932_v9 = vld [vmem:[%s1157_s1 + $0x8] sm:$0xff] (!%p177_p3)   ;;  %v934_v11 = vld [vmem:[%s1157_s1 + $0x50] sm:$0xff] (!%p177_p3)  }
   0xa   : > { %831 = vmatpush3.bf16.msra.mxu0 (!%p177_p3), %v928_v5  ;;  %v935_v12 = vld [vmem:[%s1158_s2 + $0x18] sm:$0xff] (!%p177_p3)   ;;  %v936_v13 = vld [vmem:[%s1157_s1 + $0x10] sm:$0xff] (!%p177_p3)   ;;  %v937_v14 = vld [vmem:[%s1158_s2 + $0x60] sm:$0xff] (!%p177_p3)   ;;  %vm634_vm0 = vcmp.lt.s32.totalorder (!%p177_p3), %v633_v42, 7 }
   0xb   : > { %832 = vmatprep.subr.bf16.mxu0 (!%p177_p3), %v930_v7  ;;  %v938_v15 = vld [vmem:[%s1157_s1 + $0x58] sm:$0xff] (!%p177_p3)   ;;  %v939_v16 = vld [vmem:[%s1158_s2 + $0x20] sm:$0xff] (!%p177_p3)   ;;  %v941_v18 = vld [vmem:[%s1158_s2 + $0x68] sm:$0xff] (!%p177_p3)  }
   0xc   : > { %867 = vmatpush3.bf16.msra.mxu1 (!%p177_p3), %v927_v4  ;;  %v940_v17 = vld [vmem:[%s1157_s1 + $0x18] sm:$0xff] (!%p177_p3)   ;;  %v942_v19 = vld [vmem:[%s1157_s1 + $0x60] sm:$0xff] (!%p177_p3)   ;;  %v943_v20 = vld [vmem:[%s1158_s2 + $0x28] sm:$0xff] (!%p177_p3)  }
   0xd   : > { %868 = vmatprep.subr.bf16.mxu1 (!%p177_p3), %v929_v6  ;;  %v944_v21 = vld [vmem:[%s1157_s1 + $0x20] sm:$0xff] (!%p177_p3)   ;;  %v945_v22 = vld [vmem:[%s1158_s2 + $0x70] sm:$0xff] (!%p177_p3)   ;;  %v946_v23 = vld [vmem:[%s1157_s1 + $0x68] sm:$0xff] (!%p177_p3)  }
   0xe   : > { %833 = vmatpush3.bf16.msra.mxu0 %v932_v9  ;;  %s1166_s15 = smov (!%p206_p4, %s977_s15), 1  ;;  %v947_v24 = vld [vmem:[%s1158_s2 + $0x30] sm:$0xff]   ;;  %v948_v25 = vld [vmem:[%s1157_s1 + $0x28] sm:$0xff]   ;;  %v949_v26 = vld [vmem:[%s1158_s2 + $0x78] sm:$0xff]  }
   0xf   : > { %834 = vmatprep.subr.bf16.mxu0 %v934_v11  ;;  %s898_s23 = smul.u32 40, %s1166_s15  ;;  %v950_v27 = vld [vmem:[%s1157_s1 + $0x70] sm:$0xff]   ;;  %v951_v28 = vld [vmem:[%s1158_s2 + $0x38] sm:$0xff]   ;;  %v807_v62 = vld [vmem:[%s1159_s3] ss:$0 sm:$0xff] }
  0x10   : > { %869 = vmatpush3.bf16.msra.mxu1 %v931_v8  ;;  %v952_v29 = vld [vmem:[%s1157_s1 + $0x30] sm:$0xff]   ;;  %v956_v32 = vld [vmem:[%s1157_s1 + $0x78] sm:$0xff]  }
  0x11   : > { %870 = vmatprep.subr.bf16.mxu1 %v933_v10  ;;  %s210_s8 = scalar_lea.vmem %s1156_s0, %s898_s23  ;;  %v957_v33 = vld [vmem:[%s1157_s1 + $0x38] sm:$0xff]   ;;  %s814_s23 = sshll.u32 %s1166_s15, 4 }
  0x12   : > { %835 = vmatpush3.bf16.msra.mxu0 %v936_v13  ;;  %v953_v30 = vld [vmem:[%s210_s8] ss:$8 sps:$4 sm:$0xff]   ;;  %v955_v31 = vld [vmem:[%s210_s8 + $0x4] ss:$8 sps:$4 sm:$0xff]   ;;  %v958_v34 = vld [vmem:[%s210_s8 + $0x14] ss:$8 sps:$4 sm:$0xff]   ;;  %s219_s26 = scalar_lea.vmem %s1160_s4, %s814_s23 }
  0x13   : > { %836 = vmatprep.subr.bf16.mxu0 %v938_v15  ;;  %603 = vmatprep.mubr.bf16.mxu1 %v955_v31  ;;  %v232_v35 = vld [vmem:[%s210_s8 + $0x20] sm:$0xff]  ;;  %v960_v36 = vld [vmem:[%s210_s8 + $0x10] ss:$8 sps:$4 sm:$0xff]  }
  0x14   : > { %871 = vmatpush3.bf16.msra.mxu1 %v935_v12  ;;  %420 = vmatprep.mubr.bf16.mxu0 %v955_v31  ;;  %v774_v37 = vcombine.high %v232_v35, %v232_v35  ;;  %v773_v38 = vcombine.low %v232_v35, %v232_v35 }
  0x15   : > { %872 = vmatprep.subr.bf16.mxu1 %v937_v14 }
  0x16   : > { %837 = vmatpush3.bf16.msra.mxu0 %v940_v17 }
  0x17   : > { %838 = vmatprep.subr.bf16.mxu0 %v942_v19 }
  0x18   : > { %873 = vmatpush3.bf16.msra.mxu1 %v939_v16 }
  0x19   : > { %874 = vmatprep.subr.bf16.mxu1 %v941_v18 }
  0x1a   : > { %839 = vmatpush3.bf16.msra.mxu0 %v944_v21 }
  0x1b   : > { %840 = vmatprep.subr.bf16.mxu0 %v946_v23 }
  0x1c   : > { %875 = vmatpush3.bf16.msra.mxu1 %v943_v20 }
  0x1d   : > { %876 = vmatprep.subr.bf16.mxu1 %v945_v22 }
  0x1e   : > { %841 = vmatpush3.bf16.msra.mxu0 %v948_v25 }
  0x1f   : > { %842 = vmatprep.subr.bf16.mxu0 %v950_v27 }
  0x20   : > { %877 = vmatpush3.bf16.msra.mxu1 %v947_v24 }
  0x21   : > { %878 = vmatprep.subr.bf16.mxu1 %v949_v26 }
  0x22   : > { %843 = vmatpush3.bf16.msra.mxu0 %v952_v29 }
  0x23   : > { %844 = vmatprep.subr.bf16.mxu0 %v956_v32 }
  0x24   : > { %879 = vmatpush3.bf16.msra.mxu1 %v951_v28 }
  0x26   : > { %845 = vmatpush3.bf16.msra.mxu0 %v957_v33 }
  0x27   : > { %604 = vmatmul.mubr.bf16.vlgmr.msra.gmra.mrb[0].mxu1 %v953_v30 }
  0x28   : > { %611 = vmatprep.mubr.bf16.mxu1 %v958_v34 }
  0x29   : > { %421 = vmatmul.mubr.bf16.vlgmr.msra.gmra.mrb[0].mxu0 %v953_v30 }
  0x2a   : > { %428 = vmatprep.mubr.bf16.mxu0 %v958_v34 }
  0x2f   : > { %612 = vmatmul.mubr.bf16.gmra.mrb[4].mxu1 %v960_v36 }
  0x30   : > { %619 = vmatprep.mubr.bf16.mxu1 %v774_v37 }
  0x31   : > { %429 = vmatmul.mubr.bf16.gmra.mrb[4].mxu0 %v960_v36 }
  0x32   : > { %436 = vmatprep.mubr.bf16.mxu0 %v774_v37 }
  0x37   : > { %620 = vmatmul.mubr.bf16.gmra.mrb[8].mxu1 %v773_v38 }
  0x39   : > { %437 = vmatmul.mubr.bf16.gmra.mrb[8].mxu0 %v773_v38 }
  0xfa   : > { %v880_v40 = vpop.f32.mrb[0].mxu1 }
  0xfb   : > { %v881_v41 = vpop.f32.mrb[1].mxu1 }
  0xfc   : > { %v882_v43 = vadd.f32 %v881_v41, %v880_v40  ;;  %v883_v44 = vpop.f32.mrb[2].mxu1  ;;  %v846_v47 = vpop.f32.mrb[0].mxu0 }
  0xfd   : > { %v884_v45 = vpop.f32.mrb[3].mxu1  ;;  %v847_v48 = vpop.f32.mrb[1].mxu0 }
  0xfe   : > { %v885_v46 = vadd.f32 %v884_v45, %v883_v44  ;;  %v627_v49 = vrot.slane %v882_v43, 1  ;;  %v848_v51 = vadd.f32 %v847_v48, %v846_v47  ;;  %v849_v52 = vpop.f32.mrb[2].mxu0 }
  0xff   : > { %v850_v53 = vpop.f32.mrb[3].mxu0 }
 0x100   : > { %v628_v50 = vrot.slane %v885_v46, 1  ;;  %v851_v56 = vadd.f32 %v850_v53, %v849_v52 }
 0x102   : > { %v638_v54 = vsel %vm634_vm0, %v627_v49, %v628_v50  ;;  %v886_v55 = vpop.f32.mrb[4].mxu1 }
 0x103   : > { %v639_v57 = vadd.f32 %v848_v51, %v638_v54  ;;  %v887_v58 = vpop.f32.mrb[5].mxu1 }
 0x104   : > { %v888_v59 = vadd.f32 %v887_v58, %v886_v55  ;;  %v889_v60 = vpop.f32.mrb[6].mxu1  ;;  %v852_v1 = vpop.f32.mrb[4].mxu0 }
 0x105   : > { %v890_v61 = vpop.f32.mrb[7].mxu1  ;;  %v853_v2 = vpop.f32.mrb[5].mxu0  ;;  %v650_v7 = vadd.f32 %v807_v62, %v639_v57 }
 0x106   : > { %v629_v63 = vrot.slane %v888_v59, 1  ;;  %v891_v0 = vadd.f32 %v890_v61, %v889_v60  ;;  %v854_v5 = vadd.f32 %v853_v2, %v852_v1  ;;  %v855_v6 = vpop.f32.mrb[6].mxu0 }
 0x107   : > { %v856_v9 = vpop.f32.mrb[7].mxu0  ;;  %v654_v18 = vmax.f32 %v650_v7, 0.0 }
 0x108   : > { %v637_v3 = vsel %vm634_vm0, %v628_v50, %v629_v63  ;;  %v630_v4 = vrot.slane %v891_v0, 1  ;;  %v857_v12 = vadd.f32 %v856_v9, %v855_v6 }
 0x109   : > { %v640_v8 = vadd.f32 %v851_v56, %v637_v3 }
 0x10a   : > { %v636_v10 = vsel %vm634_vm0, %v629_v63, %v630_v4  ;;  %v892_v11 = vpop.f32.mrb[8].mxu1 }
 0x10b   : > { %v651_v13 = vadd.f32 %v807_v62, %v640_v8  ;;  %v641_v14 = vadd.f32 %v854_v5, %v636_v10  ;;  %v893_v15 = vpop.f32.mrb[9].mxu1 }
 0x10c   : > { %v894_v16 = vadd.f32 %v893_v15, %v892_v11  ;;  %v895_v17 = vpop.f32.mrb[10].mxu1  ;;  %v858_v22 = vpop.f32.mrb[8].mxu0 }
 0x10d   : > { %v655_v19 = vmax.f32 %v651_v13, 0.0  ;;  %v896_v20 = vpop.f32.mrb[11].mxu1  ;;  %v859_v24 = vpop.f32.mrb[9].mxu0  ;;  %v652_v27 = vadd.f32 %v807_v62, %v641_v14 }
 0x10e   : > { %v631_v21 = vrot.slane %v894_v16, 1  ;;  %v861_v26 = vpop.f32.mrb[10].mxu0 }
 0x10f   : > { %v822_v23 = vpack.c.bf16 %v655_v19, %v654_v18  ;;  %v862_v29 = vpop.f32.mrb[11].mxu0  ;;  %v656_v31 = vmax.f32 %v652_v27, 0.0 }
 0x110   : > { %v635_v25 = vsel %vm634_vm0, %v630_v4, %v631_v21 }
 0x111   : > { %823 = vst [vmem:[%s219_s26] sm:$0xff] %v822_v23   ;;  %v642_v28 = vadd.f32 %v857_v12, %v635_v25 }
 0x113   : > { %v653_v30 = vadd.f32 %v807_v62, %v642_v28 }
 0x115   : > { %v657_v32 = vmax.f32 %v653_v30, 0.0 }
 0x117   : > { %v827_v33 = vpack.c.bf16 %v657_v32, %v656_v31 }
 0x119   : > { %829 = vst [vmem:[%s219_s26 + $0x8] sm:$0xff] %v827_v33  }
 0x11a PF: > { %s14_s17 = sadd.s32 1, %s985_s17   ;;  %s1161_s15 = smov %s981_s16 }
 0x11b   : > { %p11_p5 = scmp.ge.s32.totalorder %s14_s17, 4   ;;  %s1162_s16 = smov %s1164_s18 }
 0x11d   :  { %13 = sbr.rel (!%p11_p5) target bundleno = 2 (0x2), region = 67 }

// kernel: encoder_forward.11
= control target key start
LH: loop header
LB: loop body
LE: loop exit
PB: predicated region body
PF: predicated region fallthrough
CT: control target
= control target key end

     0   :  { %v547_v28 = vlaneseq  ;;  %v3858_v36 = vmov 1966171168   ;;  %s4721_s0 = inlined_call_operand.vmem [shape: bf16[2,4096], index: 0, kind: input, shape index: {}]   ;;  %s4722_s1 = inlined_call_operand.vmem [shape: bf16[4096,8], index: 1, kind: input, shape index: {}]   ;;  %s4723_s2 = inlined_call_operand.vmem [shape: f32[1,8], index: 2, kind: input, shape index: {}]   ;;  %s4724_s3 = inlined_call_operand.hbm [shape: f32[2,8], index: 3, kind: output, shape index: {}]  }
   0x1   :  { %v3574_v0 = vld [vmem:[%s4722_s1 + $0x40] sm:$0xff]   ;;  %v3578_v4 = vld [vmem:[%s4722_s1 + $0x48] sm:$0xff]   ;;  %v3582_v8 = vld [vmem:[%s4722_s1 + $0x50] sm:$0xff]   ;;  %v545_v37 = vunpack.c.l.s4 %v3858_v36 }
   0x2   :  { %v3575_v1 = vld [vmem:[%s4722_s1 + $0xc0] sm:$0xff]   ;;  %3220 = vmatprep.subr.bf16.mxu0 %v3574_v0  ;;  %v3579_v5 = vld [vmem:[%s4722_s1 + $0xc8] sm:$0xff]   ;;  %v3583_v9 = vld [vmem:[%s4722_s1 + $0xd0] sm:$0xff]   ;;  %v548_v33 = vshrl.u32 %v547_v28, 7 }
   0x3   :  { %v3576_v2 = vld [vmem:[%s4722_s1] sm:$0xff]   ;;  %3242 = vmatprep.subr.bf16.mxu1 %v3575_v1  ;;  %v3580_v6 = vld [vmem:[%s4722_s1 + $0x8] sm:$0xff]   ;;  %v3584_v10 = vld [vmem:[%s4722_s1 + $0x10] sm:$0xff]   ;;  %v546_v40 = vunpack.c.0.s8 %v545_v37 }
   0x4   :  { %v3577_v3 = vld [vmem:[%s4722_s1 + $0x80] sm:$0xff]   ;;  %3221 = vmatpush3.bf16.msra.mxu0 %v3576_v2  ;;  %v3581_v7 = vld [vmem:[%s4722_s1 + $0x88] sm:$0xff]   ;;  %v3585_v11 = vld [vmem:[%s4722_s1 + $0x90] sm:$0xff]  }
   0x5   :  { %3243 = vmatpush3.bf16.msra.mxu1 %v3577_v3  ;;  %3222 = vmatprep.subr.bf16.mxu0 %v3578_v4  ;;  %v3586_v12 = vld [vmem:[%s4722_s1 + $0x58] sm:$0xff]   ;;  %v3590_v16 = vld [vmem:[%s4722_s1 + $0x60] sm:$0xff]   ;;  %v3594_v20 = vld [vmem:[%s4722_s1 + $0x68] sm:$0xff]   ;;  %v3985_v41 = vsub.s32 %v546_v40, %v548_v33 }
   0x6   :  { %3244 = vmatprep.subr.bf16.mxu1 %v3579_v5  ;;  %v3587_v13 = vld [vmem:[%s4722_s1 + $0xd8] sm:$0xff]   ;;  %v3591_v17 = vld [vmem:[%s4722_s1 + $0xe0] sm:$0xff]   ;;  %v3595_v21 = vld [vmem:[%s4722_s1 + $0xe8] sm:$0xff]  }
   0x7   :  { %v3588_v14 = vld [vmem:[%s4722_s1 + $0x18] sm:$0xff]   ;;  %v3592_v18 = vld [vmem:[%s4722_s1 + $0x20] sm:$0xff]   ;;  %v3596_v22 = vld [vmem:[%s4722_s1 + $0x28] sm:$0xff]  }
   0x8   :  { %3223 = vmatpush3.bf16.msra.mxu0 %v3580_v6  ;;  %v3589_v15 = vld [vmem:[%s4722_s1 + $0x98] sm:$0xff]   ;;  %v3593_v19 = vld [vmem:[%s4722_s1 + $0xa0] sm:$0xff]   ;;  %v3597_v23 = vld [vmem:[%s4722_s1 + $0xa8] sm:$0xff]  }
   0x9   :  { %3245 = vmatpush3.bf16.msra.mxu1 %v3581_v7  ;;  %3224 = vmatprep.subr.bf16.mxu0 %v3582_v8  ;;  %v3598_v24 = vld [vmem:[%s4722_s1 + $0x70] sm:$0xff]   ;;  %v3602_v29 = vld [vmem:[%s4722_s1 + $0x78] sm:$0xff]   ;;  %v16_v34 = vld [vmem:[%s4721_s0] sm:$0xff] }
   0xa   :  { %3246 = vmatprep.subr.bf16.mxu1 %v3583_v9  ;;  %v3599_v25 = vld [vmem:[%s4722_s1 + $0xf0] sm:$0xff]   ;;  %v3603_v30 = vld [vmem:[%s4722_s1 + $0xf8] sm:$0xff]   ;;  %v3607_v35 = vld [vmem:[%s4722_s1 + $0x140] sm:$0xff]   ;;  %v543_v39 = vcombine.high %v16_v34, %v16_v34  ;;  %v550_v42 = vrot.slane %v16_v34, %v3985_v41 }
   0xb   :  { %v3600_v26 = vld [vmem:[%s4722_s1 + $0x30] sm:$0xff]   ;;  %v3604_v31 = vld [vmem:[%s4722_s1 + $0x38] sm:$0xff]   ;;  %v3608_v38 = vld [vmem:[%s4722_s1 + $0x1c0] sm:$0xff]  }
   0xc   :  { %3225 = vmatpush3.bf16.msra.mxu0 %v3584_v10  ;;  %v3601_v27 = vld [vmem:[%s4722_s1 + $0xb0] sm:$0xff]   ;;  %v3605_v32 = vld [vmem:[%s4722_s1 + $0xb8] sm:$0xff]   ;;  %v3989_v43 = vrot.slane %v543_v39, %v3985_v41  ;;  %v558_v44 = vcombine.high %v550_v42, %v550_v42  ;;  %v566_v45 = vrot.slane %v550_v42, %v3985_v41  ;;  %v3609_v47 = vld [vmem:[%s4722_s1 + $0x100] sm:$0xff]  }
   0xd   :  { %3247 = vmatpush3.bf16.msra.mxu1 %v3585_v11  ;;  %3226 = vmatprep.subr.bf16.mxu0 %v3586_v12  ;;  %v3610_v49 = vld [vmem:[%s4722_s1 + $0x180] sm:$0xff]   ;;  %v3611_v52 = vld [vmem:[%s4722_s1 + $0x148] sm:$0xff]   ;;  %v3615_v58 = vld [vmem:[%s4722_s1 + $0x150] sm:$0xff]  }
   0xe   :  { %3248 = vmatprep.subr.bf16.mxu1 %v3587_v13  ;;  %v559_v46 = vcombine.high %v3989_v43, %v3989_v43  ;;  %v580_v48 = vrot.slane %v558_v44, %v3985_v41  ;;  %v588_v51 = vcombine.high %v566_v45, %v566_v45  ;;  %v3612_v54 = vld [vmem:[%s4722_s1 + $0x1c8] sm:$0xff]   ;;  %v3616_v59 = vld [vmem:[%s4722_s1 + $0x1d0] sm:$0xff]   ;;  %v3619_v62 = vld [vmem:[%s4722_s1 + $0x158] sm:$0xff]  }
   0xf   :  { %v3613_v55 = vld [vmem:[%s4722_s1 + $0x108] sm:$0xff]   ;;  %v3617_v60 = vld [vmem:[%s4722_s1 + $0x110] sm:$0xff]   ;;  %v3620_v63 = vld [vmem:[%s4722_s1 + $0x1d8] sm:$0xff]  }
  0x10   :  { %3227 = vmatpush3.bf16.msra.mxu0 %v3588_v14  ;;  %v587_v50 = vrot.slane %v559_v46, %v3985_v41  ;;  %2339 = vmatprep.mubr.bf16.mxu0 %v580_v48  ;;  %v590_v53 = vcombine.high %v580_v48, %v580_v48  ;;  %v3614_v57 = vld [vmem:[%s4722_s1 + $0x188] sm:$0xff]   ;;  %v3618_v61 = vld [vmem:[%s4722_s1 + $0x190] sm:$0xff]   ;;  %v3621_v0 = vld [vmem:[%s4722_s1 + $0x118] sm:$0xff]  }
  0x11   :  { %3249 = vmatpush3.bf16.msra.mxu1 %v3589_v15  ;;  %3228 = vmatprep.subr.bf16.mxu0 %v3590_v16  ;;  %v3622_v1 = vld [vmem:[%s4722_s1 + $0x198] sm:$0xff]   ;;  %v3623_v2 = vld [vmem:[%s4722_s1 + $0x160] sm:$0xff]   ;;  %v3627_v6 = vld [vmem:[%s4722_s1 + $0x168] sm:$0xff]  }
  0x12   :  { %3250 = vmatprep.subr.bf16.mxu1 %v3591_v17  ;;  %v591_v56 = vcombine.high %v587_v50, %v587_v50  ;;  %2379 = vmatprep.mubr.bf16.mxu1 %v590_v53  ;;  %v3624_v3 = vld [vmem:[%s4722_s1 + $0x1e0] sm:$0xff]   ;;  %v3628_v7 = vld [vmem:[%s4722_s1 + $0x1e8] sm:$0xff]   ;;  %v3631_v10 = vld [vmem:[%s4722_s1 + $0x170] sm:$0xff]  }
  0x13   :  { %v3625_v4 = vld [vmem:[%s4722_s1 + $0x120] sm:$0xff]   ;;  %v3629_v8 = vld [vmem:[%s4722_s1 + $0x128] sm:$0xff]   ;;  %v3632_v11 = vld [vmem:[%s4722_s1 + $0x1f0] sm:$0xff]  }
  0x14   :  { %3229 = vmatpush3.bf16.msra.mxu0 %v3592_v18  ;;  %v3626_v5 = vld [vmem:[%s4722_s1 + $0x1a0] sm:$0xff]   ;;  %v3630_v9 = vld [vmem:[%s4722_s1 + $0x1a8] sm:$0xff]   ;;  %v3633_v12 = vld [vmem:[%s4722_s1 + $0x130] sm:$0xff]   ;;  %v573_v18 = vrot.slane %v3989_v43, %v3985_v41 }
  0x15   :  { %3251 = vmatpush3.bf16.msra.mxu1 %v3593_v19  ;;  %3230 = vmatprep.subr.bf16.mxu0 %v3594_v20  ;;  %v3634_v13 = vld [vmem:[%s4722_s1 + $0x1b0] sm:$0xff]   ;;  %v3635_v14 = vld [vmem:[%s4722_s1 + $0x178] sm:$0xff]   ;;  %v3639_v19 = vld [vmem:[%s4722_s1 + $0x240] sm:$0xff]  }
  0x16   :  { %3252 = vmatprep.subr.bf16.mxu1 %v3595_v21  ;;  %v3636_v15 = vld [vmem:[%s4722_s1 + $0x1f8] sm:$0xff]   ;;  %v3640_v20 = vld [vmem:[%s4722_s1 + $0x2c0] sm:$0xff]   ;;  %v3647_v28 = vld [vmem:[%s4722_s1 + $0x250] sm:$0xff]  }
  0x17   :  { %v3637_v16 = vld [vmem:[%s4722_s1 + $0x138] sm:$0xff]   ;;  %v3641_v21 = vld [vmem:[%s4722_s1 + $0x200] sm:$0xff]   ;;  %v3659_v40 = vld [vmem:[%s4722_s1 + $0x268] sm:$0xff]  }
  0x18   :  { %3231 = vmatpush3.bf16.msra.mxu0 %v3596_v22  ;;  %v3638_v17 = vld [vmem:[%s4722_s1 + $0x1b8] sm:$0xff]   ;;  %v3642_v22 = vld [vmem:[%s4722_s1 + $0x280] sm:$0xff]   ;;  %v3660_v42 = vld [vmem:[%s4722_s1 + $0x2e8] sm:$0xff]  }
  0x19   :  { %3253 = vmatpush3.bf16.msra.mxu1 %v3597_v23  ;;  %3232 = vmatprep.subr.bf16.mxu0 %v3598_v24  ;;  %v589_v23 = vcombine.high %v573_v18, %v573_v18  ;;  %v3643_v24 = vld [vmem:[%s4722_s1 + $0x248] sm:$0xff]   ;;  %v3652_v33 = vld [vmem:[%s4722_s1 + $0x2d8] sm:$0xff]   ;;  %v3655_v36 = vld [vmem:[%s4722_s1 + $0x260] sm:$0xff]  }
  0x1a   :  { %3254 = vmatprep.subr.bf16.mxu1 %v3599_v25  ;;  %v3644_v25 = vld [vmem:[%s4722_s1 + $0x2c8] sm:$0xff]   ;;  %v3653_v34 = vld [vmem:[%s4722_s1 + $0x218] sm:$0xff]   ;;  %v3656_v37 = vld [vmem:[%s4722_s1 + $0x2e0] sm:$0xff]  }
  0x1b   :  { %v3658_v39 = vld [vmem:[%s4722_s1 + $0x2a0] sm:$0xff]   ;;  %v3661_v43 = vld [vmem:[%s4722_s1 + $0x228] sm:$0xff]  }
  0x1c   :  { %3233 = vmatpush3.bf16.msra.mxu0 %v3600_v26  ;;  %v3645_v26 = vld [vmem:[%s4722_s1 + $0x208] sm:$0xff]  }
  0x1d   :  { %3255 = vmatpush3.bf16.msra.mxu1 %v3601_v27  ;;  %3234 = vmatprep.subr.bf16.mxu0 %v3602_v29  ;;  %v3646_v27 = vld [vmem:[%s4722_s1 + $0x288] sm:$0xff]   ;;  %v3648_v29 = vld [vmem:[%s4722_s1 + $0x2d0] sm:$0xff]  }
  0x1e   :  { %3256 = vmatprep.subr.bf16.mxu1 %v3603_v30  ;;  %v3649_v30 = vld [vmem:[%s4722_s1 + $0x210] sm:$0xff]   ;;  %v3662_v44 = vld [vmem:[%s4722_s1 + $0x2a8] sm:$0xff]  }
  0x1f   :  { %v17_v46 = vld [vmem:[%s4721_s0 + $0x8] sm:$0xff] }
  0x20   :  { %3235 = vmatpush3.bf16.msra.mxu0 %v3604_v31  ;;  %v3650_v31 = vld [vmem:[%s4722_s1 + $0x290] sm:$0xff]   ;;  %v599_v48 = vrot.slane %v17_v46, %v3985_v41 }
  0x21   :  { %3257 = vmatpush3.bf16.msra.mxu1 %v3605_v32  ;;  %3264 = vmatprep.subr.bf16.mxu0 %v3607_v35  ;;  %v3651_v32 = vld [vmem:[%s4722_s1 + $0x258] sm:$0xff]  }
  0x22   :  { %3286 = vmatprep.subr.bf16.mxu1 %v3608_v38  ;;  %v3654_v35 = vld [vmem:[%s4722_s1 + $0x298] sm:$0xff]   ;;  %v3657_v38 = vld [vmem:[%s4722_s1 + $0x220] sm:$0xff]  }
  0x23   :  { %2340 = vmatmul.mubr.bf16.vlgmr.msra.gmra.mrb[0].mxu0 %v566_v45  ;;  %v3663_v45 = vld [vmem:[%s4722_s1 + $0x270] sm:$0xff]  }
  0x24   :  { %3265 = vmatpush3.bf16.msra.mxu0 %v3609_v47  ;;  %2380 = vmatmul.mubr.bf16.vlgmr.msra.gmra.mrb[0].mxu1 %v588_v51  ;;  %v3664_v47 = vld [vmem:[%s4722_s1 + $0x2f0] sm:$0xff]  }
  0x25   :  { %3266 = vmatprep.subr.bf16.mxu0 %v3611_v52  ;;  %3287 = vmatpush3.bf16.msra.mxu1 %v3610_v49  ;;  %v592_v49 = vcombine.high %v17_v46, %v17_v46  ;;  %v3666_v51 = vld [vmem:[%s4722_s1 + $0x2b0] sm:$0xff]   ;;  %v607_v52 = vcombine.high %v599_v48, %v599_v48 }
  0x26   :  { %2419 = vmatprep.mubr.bf16.mxu0 %v587_v50  ;;  %3288 = vmatprep.subr.bf16.mxu1 %v3612_v54  ;;  %v3665_v50 = vld [vmem:[%s4722_s1 + $0x230] sm:$0xff]   ;;  %v3667_v54 = vld [vmem:[%s4722_s1 + $0x278] sm:$0xff]  }
  0x27   :  { %2459 = vmatprep.mubr.bf16.mxu1 %v591_v56  ;;  %v4177_v53 = vrot.slane %v592_v49, %v3985_v41  ;;  %v629_v56 = vrot.slane %v607_v52, %v3985_v41  ;;  %v3714_v46 = vld [vmem:[%s4722_s1 + $0x410] sm:$0xff]   ;;  %v3717_v49 = vld [vmem:[%s4722_s1 + $0x4d8] sm:$0xff]   ;;  %v3720_v52 = vld [vmem:[%s4722_s1 + $0x460] sm:$0xff]  }
  0x28   :  { %3267 = vmatpush3.bf16.msra.mxu0 %v3613_v55  ;;  %v3668_v55 = vld [vmem:[%s4722_s1 + $0x2f8] sm:$0xff]  }
  0x29   :  { %3268 = vmatprep.subr.bf16.mxu0 %v3615_v58  ;;  %3289 = vmatpush3.bf16.msra.mxu1 %v3614_v57  ;;  %v608_v57 = vcombine.high %v4177_v53, %v4177_v53  ;;  %v3669_v58 = vld [vmem:[%s4722_s1 + $0x238] sm:$0xff]  }
  0x2a   :  { %3290 = vmatprep.subr.bf16.mxu1 %v3616_v59  ;;  %v3670_v59 = vld [vmem:[%s4722_s1 + $0x2b8] sm:$0xff]  }
  0x2c   :  { %3269 = vmatpush3.bf16.msra.mxu0 %v3617_v60  ;;  %v639_v60 = vcombine.high %v629_v56, %v629_v56 }
  0x2d   :  { %3270 = vmatprep.subr.bf16.mxu0 %v3619_v62  ;;  %3291 = vmatpush3.bf16.msra.mxu1 %v3618_v61  ;;  %v615_v61 = vrot.slane %v599_v48, %v3985_v41  ;;  %v3671_v62 = vld [vmem:[%s4722_s1 + $0x340] sm:$0xff]   ;;  %v3716_v48 = vld [vmem:[%s4722_s1 + $0x458] sm:$0xff]  }
  0x2e   :  { %3292 = vmatprep.subr.bf16.mxu1 %v3620_v63  ;;  %v3672_v63 = vld [vmem:[%s4722_s1 + $0x3c0] sm:$0xff]  }
  0x30   :  { %3271 = vmatpush3.bf16.msra.mxu0 %v3621_v0  ;;  %v636_v0 = vrot.slane %v608_v57, %v3985_v41  ;;  %v3725_v57 = vld [vmem:[%s4722_s1 + $0x4e8] sm:$0xff]  }
  0x31   :  { %3272 = vmatprep.subr.bf16.mxu0 %v3623_v2  ;;  %3293 = vmatpush3.bf16.msra.mxu1 %v3622_v1  ;;  %v3673_v1 = vld [vmem:[%s4722_s1 + $0x300] sm:$0xff]  }
  0x32   :  { %3294 = vmatprep.subr.bf16.mxu1 %v3624_v3  ;;  %v3674_v2 = vld [vmem:[%s4722_s1 + $0x380] sm:$0xff]   ;;  %v637_v3 = vcombine.high %v615_v61, %v615_v61 }
  0x34   :  { %3273 = vmatpush3.bf16.msra.mxu0 %v3625_v4  ;;  %v3675_v4 = vld [vmem:[%s4722_s1 + $0x348] sm:$0xff]  }
  0x35   :  { %3274 = vmatprep.subr.bf16.mxu0 %v3627_v6  ;;  %3295 = vmatpush3.bf16.msra.mxu1 %v3626_v5  ;;  %v3676_v5 = vld [vmem:[%s4722_s1 + $0x3c8] sm:$0xff]   ;;  %v640_v6 = vcombine.high %v636_v0, %v636_v0 }
  0x36   :  { %3296 = vmatprep.subr.bf16.mxu1 %v3628_v7  ;;  %v3677_v7 = vld [vmem:[%s4722_s1 + $0x308] sm:$0xff]  }
  0x38   :  { %3275 = vmatpush3.bf16.msra.mxu0 %v3629_v8  ;;  %v3678_v8 = vld [vmem:[%s4722_s1 + $0x388] sm:$0xff]  }
  0x39   :  { %3276 = vmatprep.subr.bf16.mxu0 %v3631_v10  ;;  %3297 = vmatpush3.bf16.msra.mxu1 %v3630_v9  ;;  %v3679_v9 = vld [vmem:[%s4722_s1 + $0x350] sm:$0xff]  }
  0x3a   :  { %3298 = vmatprep.subr.bf16.mxu1 %v3632_v11  ;;  %v3680_v10 = vld [vmem:[%s4722_s1 + $0x3d0] sm:$0xff]  }
  0x3b   :  { %v3681_v11 = vld [vmem:[%s4722_s1 + $0x310] sm:$0xff]  }
  0x3c   :  { %3277 = vmatpush3.bf16.msra.mxu0 %v3633_v12  ;;  %v3682_v12 = vld [vmem:[%s4722_s1 + $0x390] sm:$0xff]  }
  0x3d   :  { %3278 = vmatprep.subr.bf16.mxu0 %v3635_v14  ;;  %3299 = vmatpush3.bf16.msra.mxu1 %v3634_v13  ;;  %v3683_v13 = vld [vmem:[%s4722_s1 + $0x358] sm:$0xff]  }
  0x3e   :  { %3300 = vmatprep.subr.bf16.mxu1 %v3636_v15  ;;  %v3684_v14 = vld [vmem:[%s4722_s1 + $0x3d8] sm:$0xff]  }
  0x3f   :  { %v3685_v15 = vld [vmem:[%s4722_s1 + $0x318] sm:$0xff]  }
  0x40   :  { %3279 = vmatpush3.bf16.msra.mxu0 %v3637_v16  ;;  %v3686_v16 = vld [vmem:[%s4722_s1 + $0x398] sm:$0xff]  }
  0x41   :  { %3308 = vmatprep.subr.bf16.mxu0 %v3639_v19  ;;  %3301 = vmatpush3.bf16.msra.mxu1 %v3638_v17  ;;  %v3687_v17 = vld [vmem:[%s4722_s1 + $0x360] sm:$0xff]  }
  0x42   :  { %3330 = vmatprep.subr.bf16.mxu1 %v3640_v20  ;;  %v3689_v19 = vld [vmem:[%s4722_s1 + $0x320] sm:$0xff]  }
  0x43   :  { %2420 = vmatmul.mubr.bf16.vlgmr.msra.gmra.mrb[4].mxu0 %v573_v18  ;;  %v3688_v18 = vld [vmem:[%s4722_s1 + $0x3e0] sm:$0xff]  }
  0x44   :  { %3309 = vmatpush3.bf16.msra.mxu0 %v3641_v21  ;;  %2460 = vmatmul.mubr.bf16.vlgmr.msra.gmra.mrb[4].mxu1 %v589_v23  ;;  %v3690_v20 = vld [vmem:[%s4722_s1 + $0x3a0] sm:$0xff]   ;;  %v3691_v21 = vld [vmem:[%s4722_s1 + $0x368] sm:$0xff]  }
  0x45   :  { %3310 = vmatprep.subr.bf16.mxu0 %v3643_v24  ;;  %3331 = vmatpush3.bf16.msra.mxu1 %v3642_v22  ;;  %v3692_v22 = vld [vmem:[%s4722_s1 + $0x3e8] sm:$0xff]  }
  0x46   :  { %3332 = vmatprep.subr.bf16.mxu1 %v3644_v25  ;;  %2499 = vmatprep.mubr.bf16.mxu0 %v629_v56  ;;  %v3693_v23 = vld [vmem:[%s4722_s1 + $0x328] sm:$0xff]   ;;  %v3695_v25 = vld [vmem:[%s4722_s1 + $0x370] sm:$0xff]  }
  0x47   :  { %2539 = vmatprep.mubr.bf16.mxu1 %v639_v60  ;;  %v3694_v24 = vld [vmem:[%s4722_s1 + $0x3a8] sm:$0xff]   ;;  %v3728_v60 = vld [vmem:[%s4722_s1 + $0x470] sm:$0xff]  }
  0x48   :  { %3311 = vmatpush3.bf16.msra.mxu0 %v3645_v26  ;;  %v3696_v26 = vld [vmem:[%s4722_s1 + $0x3f0] sm:$0xff]   ;;  %v3724_v56 = vld [vmem:[%s4722_s1 + $0x468] sm:$0xff]  }
  0x49   :  { %3312 = vmatprep.subr.bf16.mxu0 %v3647_v28  ;;  %3333 = vmatpush3.bf16.msra.mxu1 %v3646_v27  ;;  %v3697_v27 = vld [vmem:[%s4722_s1 + $0x330] sm:$0xff]  }
  0x4a   :  { %3334 = vmatprep.subr.bf16.mxu1 %v3648_v29  ;;  %v3698_v28 = vld [vmem:[%s4722_s1 + $0x3b0] sm:$0xff]   ;;  %v3699_v29 = vld [vmem:[%s4722_s1 + $0x378] sm:$0xff]  }
  0x4c   :  { %3313 = vmatpush3.bf16.msra.mxu0 %v3649_v30  ;;  %v3700_v30 = vld [vmem:[%s4722_s1 + $0x3f8] sm:$0xff]  }
  0x4d   :  { %3314 = vmatprep.subr.bf16.mxu0 %v3651_v32  ;;  %3335 = vmatpush3.bf16.msra.mxu1 %v3650_v31  ;;  %v3701_v31 = vld [vmem:[%s4722_s1 + $0x338] sm:$0xff]  }
  0x4e   :  { %3336 = vmatprep.subr.bf16.mxu1 %v3652_v33  ;;  %v3702_v32 = vld [vmem:[%s4722_s1 + $0x3b8] sm:$0xff]   ;;  %v622_v33 = vrot.slane %v4177_v53, %v3985_v41  ;;  %v3721_v53 = vld [vmem:[%s4722_s1 + $0x4e0] sm:$0xff]  }
  0x50   :  { %3315 = vmatpush3.bf16.msra.mxu0 %v3653_v34  ;;  %v3704_v34 = vld [vmem:[%s4722_s1 + $0x440] sm:$0xff]  }
  0x51   :  { %3316 = vmatprep.subr.bf16.mxu0 %v3655_v36  ;;  %3337 = vmatpush3.bf16.msra.mxu1 %v3654_v35  ;;  %v3705_v35 = vld [vmem:[%s4722_s1 + $0x4c0] sm:$0xff]  }
  0x52   :  { %3338 = vmatprep.subr.bf16.mxu1 %v3656_v37  ;;  %v3706_v36 = vld [vmem:[%s4722_s1 + $0x400] sm:$0xff]  }
  0x53   :  { %v3707_v37 = vld [vmem:[%s4722_s1 + $0x480] sm:$0xff]  }
  0x54   :  { %3317 = vmatpush3.bf16.msra.mxu0 %v3657_v38  ;;  %v638_v38 = vcombine.high %v622_v33, %v622_v33 }
  0x55   :  { %3318 = vmatprep.subr.bf16.mxu0 %v3659_v40  ;;  %3339 = vmatpush3.bf16.msra.mxu1 %v3658_v39  ;;  %v3708_v39 = vld [vmem:[%s4722_s1 + $0x448] sm:$0xff]  }
  0x56   :  { %3340 = vmatprep.subr.bf16.mxu1 %v3660_v42  ;;  %v3709_v40 = vld [vmem:[%s4722_s1 + $0x4c8] sm:$0xff]  }
  0x57   :  { %v3710_v42 = vld [vmem:[%s4722_s1 + $0x408] sm:$0xff]  }
  0x58   :  { %3319 = vmatpush3.bf16.msra.mxu0 %v3661_v43  ;;  %v3711_v43 = vld [vmem:[%s4722_s1 + $0x488] sm:$0xff]  }
  0x59   :  { %3320 = vmatprep.subr.bf16.mxu0 %v3663_v45  ;;  %3341 = vmatpush3.bf16.msra.mxu1 %v3662_v44  ;;  %v3712_v44 = vld [vmem:[%s4722_s1 + $0x450] sm:$0xff]  }
  0x5a   :  { %3342 = vmatprep.subr.bf16.mxu1 %v3664_v47  ;;  %v3713_v45 = vld [vmem:[%s4722_s1 + $0x4d0] sm:$0xff]  }
  0x5b   :  { %v3715_v47 = vld [vmem:[%s4722_s1 + $0x490] sm:$0xff]  }
  0x5c   :  { %3321 = vmatpush3.bf16.msra.mxu0 %v3665_v50  ;;  %v3718_v50 = vld [vmem:[%s4722_s1 + $0x418] sm:$0xff]  }
  0x5d   :  { %3322 = vmatprep.subr.bf16.mxu0 %v3667_v54  ;;  %3343 = vmatpush3.bf16.msra.mxu1 %v3666_v51  ;;  %v3719_v51 = vld [vmem:[%s4722_s1 + $0x498] sm:$0xff]   ;;  %v3722_v54 = vld [vmem:[%s4722_s1 + $0x420] sm:$0xff]  }
  0x5e   :  { %3344 = vmatprep.subr.bf16.mxu1 %v3668_v55  ;;  %v3723_v55 = vld [vmem:[%s4722_s1 + $0x4a0] sm:$0xff]  }
  0x60   :  { %3323 = vmatpush3.bf16.msra.mxu0 %v3669_v58  ;;  %v3726_v58 = vld [vmem:[%s4722_s1 + $0x428] sm:$0xff]  }
  0x61   :  { %3352 = vmatprep.subr.bf16.mxu0 %v3671_v62  ;;  %3345 = vmatpush3.bf16.msra.mxu1 %v3670_v59  ;;  %v3727_v59 = vld [vmem:[%s4722_s1 + $0x4a8] sm:$0xff]   ;;  %v3729_v62 = vld [vmem:[%s4722_s1 + $0x4f0] sm:$0xff]  }
  0x62   :  { %3374 = vmatprep.subr.bf16.mxu1 %v3672_v63 }
  0x63   :  { %2500 = vmatmul.mubr.bf16.vlgmr.msra.gmra.mrb[8].mxu0 %v615_v61  ;;  %v18_v61 = vld [vmem:[%s4721_s0 + $0x10] sm:$0xff] }
  0x64   :  { %3353 = vmatpush3.bf16.msra.mxu0 %v3673_v1  ;;  %2579 = vmatprep.mubr.bf16.mxu0 %v636_v0  ;;  %v648_v63 = vrot.slane %v18_v61, %v3985_v41  ;;  %v641_v0 = vcombine.high %v18_v61, %v18_v61  ;;  %v3730_v1 = vld [vmem:[%s4722_s1 + $0x430] sm:$0xff]  }
  0x65   :  { %2540 = vmatmul.mubr.bf16.vlgmr.msra.gmra.mrb[8].mxu1 %v637_v3  ;;  %3354 = vmatprep.subr.bf16.mxu0 %v3675_v4  ;;  %v3779_v61 = vld [vmem:[%s4722_s1 + $0x610] sm:$0xff]  }
  0x66   :  { %3375 = vmatpush3.bf16.msra.mxu1 %v3674_v2  ;;  %2619 = vmatprep.mubr.bf16.mxu1 %v640_v6  ;;  %v3731_v2 = vld [vmem:[%s4722_s1 + $0x4b0] sm:$0xff]   ;;  %v656_v3 = vcombine.high %v648_v63, %v648_v63  ;;  %v4383_v4 = vrot.slane %v641_v0, %v3985_v41  ;;  %v3733_v6 = vld [vmem:[%s4722_s1 + $0x4f8] sm:$0xff]  }
  0x67   :  { %3376 = vmatprep.subr.bf16.mxu1 %v3676_v5  ;;  %v3732_v5 = vld [vmem:[%s4722_s1 + $0x478] sm:$0xff]  }
  0x68   :  { %3355 = vmatpush3.bf16.msra.mxu0 %v3677_v7  ;;  %v678_v7 = vrot.slane %v656_v3, %v3985_v41  ;;  %v3782_v0 = vld [vmem:[%s4722_s1 + $0x6d8] sm:$0xff]   ;;  %v3785_v3 = vld [vmem:[%s4722_s1 + $0x660] sm:$0xff]  }
  0x69   :  { %3356 = vmatprep.subr.bf16.mxu0 %v3679_v9  ;;  %v3734_v9 = vld [vmem:[%s4722_s1 + $0x438] sm:$0xff]  }
  0x6a   :  { %3377 = vmatpush3.bf16.msra.mxu1 %v3678_v8  ;;  %v657_v8 = vcombine.high %v4383_v4, %v4383_v4 }
  0x6b   :  { %3378 = vmatprep.subr.bf16.mxu1 %v3680_v10  ;;  %v3735_v10 = vld [vmem:[%s4722_s1 + $0x4b8] sm:$0xff]  }
  0x6c   :  { %3357 = vmatpush3.bf16.msra.mxu0 %v3681_v11  ;;  %v688_v11 = vcombine.high %v678_v7, %v678_v7 }
  0x6d   :  { %3358 = vmatprep.subr.bf16.mxu0 %v3683_v13  ;;  %v3736_v13 = vld [vmem:[%s4722_s1 + $0x540] sm:$0xff]  }
  0x6e   :  { %3379 = vmatpush3.bf16.msra.mxu1 %v3682_v12  ;;  %v664_v12 = vrot.slane %v648_v63, %v3985_v41  ;;  %v3781_v63 = vld [vmem:[%s4722_s1 + $0x658] sm:$0xff]  }
  0x6f   :  { %3380 = vmatprep.subr.bf16.mxu1 %v3684_v14  ;;  %v3737_v14 = vld [vmem:[%s4722_s1 + $0x5c0] sm:$0xff]  }
  0x70   :  { %3359 = vmatpush3.bf16.msra.mxu0 %v3685_v15  ;;  %v685_v15 = vrot.slane %v657_v8, %v3985_v41  ;;  %v3790_v8 = vld [vmem:[%s4722_s1 + $0x6e8] sm:$0xff]  }
  0x71   :  { %3360 = vmatprep.subr.bf16.mxu0 %v3687_v17  ;;  %v3739_v17 = vld [vmem:[%s4722_s1 + $0x580] sm:$0xff]  }
  0x72   :  { %3381 = vmatpush3.bf16.msra.mxu1 %v3686_v16  ;;  %v3738_v16 = vld [vmem:[%s4722_s1 + $0x500] sm:$0xff]  }
  0x73   :  { %3382 = vmatprep.subr.bf16.mxu1 %v3688_v18  ;;  %v686_v18 = vcombine.high %v664_v12, %v664_v12 }
  0x74   :  { %3361 = vmatpush3.bf16.msra.mxu0 %v3689_v19  ;;  %v3740_v19 = vld [vmem:[%s4722_s1 + $0x548] sm:$0xff]  }
  0x75   :  { %3362 = vmatprep.subr.bf16.mxu0 %v3691_v21  ;;  %v689_v21 = vcombine.high %v685_v15, %v685_v15 }
  0x76   :  { %3383 = vmatpush3.bf16.msra.mxu1 %v3690_v20  ;;  %v3741_v20 = vld [vmem:[%s4722_s1 + $0x5c8] sm:$0xff]  }
  0x77   :  { %3384 = vmatprep.subr.bf16.mxu1 %v3692_v22  ;;  %v3742_v22 = vld [vmem:[%s4722_s1 + $0x508] sm:$0xff]  }
  0x78   :  { %3363 = vmatpush3.bf16.msra.mxu0 %v3693_v23  ;;  %v3743_v23 = vld [vmem:[%s4722_s1 + $0x588] sm:$0xff]  }
  0x79   :  { %3364 = vmatprep.subr.bf16.mxu0 %v3695_v25  ;;  %v3745_v25 = vld [vmem:[%s4722_s1 + $0x5d0] sm:$0xff]  }
  0x7a   :  { %3385 = vmatpush3.bf16.msra.mxu1 %v3694_v24  ;;  %v3744_v24 = vld [vmem:[%s4722_s1 + $0x550] sm:$0xff]  }
  0x7b   :  { %3386 = vmatprep.subr.bf16.mxu1 %v3696_v26  ;;  %v3746_v26 = vld [vmem:[%s4722_s1 + $0x510] sm:$0xff]  }
  0x7c   :  { %3365 = vmatpush3.bf16.msra.mxu0 %v3697_v27  ;;  %v3747_v27 = vld [vmem:[%s4722_s1 + $0x590] sm:$0xff]  }
  0x7d   :  { %3366 = vmatprep.subr.bf16.mxu0 %v3699_v29  ;;  %v3749_v29 = vld [vmem:[%s4722_s1 + $0x5d8] sm:$0xff]  }
  0x7e   :  { %3387 = vmatpush3.bf16.msra.mxu1 %v3698_v28  ;;  %v3748_v28 = vld [vmem:[%s4722_s1 + $0x558] sm:$0xff]  }
  0x7f   :  { %3388 = vmatprep.subr.bf16.mxu1 %v3700_v30  ;;  %v3750_v30 = vld [vmem:[%s4722_s1 + $0x518] sm:$0xff]  }
  0x80   :  { %3367 = vmatpush3.bf16.msra.mxu0 %v3701_v31  ;;  %v3751_v31 = vld [vmem:[%s4722_s1 + $0x598] sm:$0xff]  }
  0x81   :  { %3396 = vmatprep.subr.bf16.mxu0 %v3704_v34  ;;  %v3754_v34 = vld [vmem:[%s4722_s1 + $0x520] sm:$0xff]  }
  0x82   :  { %3389 = vmatpush3.bf16.msra.mxu1 %v3702_v32  ;;  %v3752_v32 = vld [vmem:[%s4722_s1 + $0x560] sm:$0xff]  }
  0x83   :  { %2580 = vmatmul.mubr.bf16.vlgmr.msra.gmra.mrb[12].mxu0 %v622_v33  ;;  %3418 = vmatprep.subr.bf16.mxu1 %v3705_v35  ;;  %v3753_v33 = vld [vmem:[%s4722_s1 + $0x5e0] sm:$0xff]  }
  0x84   :  { %3397 = vmatpush3.bf16.msra.mxu0 %v3706_v36  ;;  %2659 = vmatprep.mubr.bf16.mxu0 %v678_v7  ;;  %v3755_v35 = vld [vmem:[%s4722_s1 + $0x5a0] sm:$0xff]   ;;  %v3756_v36 = vld [vmem:[%s4722_s1 + $0x568] sm:$0xff]  }
  0x85   :  { %2620 = vmatmul.mubr.bf16.vlgmr.msra.gmra.mrb[12].mxu1 %v638_v38  ;;  %3398 = vmatprep.subr.bf16.mxu0 %v3708_v39  ;;  %v3758_v38 = vld [vmem:[%s4722_s1 + $0x528] sm:$0xff]  }
  0x86   :  { %3419 = vmatpush3.bf16.msra.mxu1 %v3707_v37  ;;  %2699 = vmatprep.mubr.bf16.mxu1 %v688_v11  ;;  %v3757_v37 = vld [vmem:[%s4722_s1 + $0x5e8] sm:$0xff]   ;;  %v3793_v11 = vld [vmem:[%s4722_s1 + $0x670] sm:$0xff]  }
  0x87   :  { %3420 = vmatprep.subr.bf16.mxu1 %v3709_v40  ;;  %v3759_v39 = vld [vmem:[%s4722_s1 + $0x5a8] sm:$0xff]   ;;  %v3760_v40 = vld [vmem:[%s4722_s1 + $0x570] sm:$0xff]  }
  0x88   :  { %3399 = vmatpush3.bf16.msra.mxu0 %v3710_v42  ;;  %v3761_v42 = vld [vmem:[%s4722_s1 + $0x5f0] sm:$0xff]   ;;  %v3789_v7 = vld [vmem:[%s4722_s1 + $0x668] sm:$0xff]  }
  0x89   :  { %3400 = vmatprep.subr.bf16.mxu0 %v3712_v44  ;;  %v3763_v44 = vld [vmem:[%s4722_s1 + $0x5b0] sm:$0xff]  }
  0x8a   :  { %3421 = vmatpush3.bf16.msra.mxu1 %v3711_v43  ;;  %v3762_v43 = vld [vmem:[%s4722_s1 + $0x530] sm:$0xff]  }
  0x8b   :  { %3422 = vmatprep.subr.bf16.mxu1 %v3713_v45  ;;  %v3764_v45 = vld [vmem:[%s4722_s1 + $0x578] sm:$0xff]  }
  0x8c   :  { %3401 = vmatpush3.bf16.msra.mxu0 %v3714_v46  ;;  %v3765_v46 = vld [vmem:[%s4722_s1 + $0x5f8] sm:$0xff]  }
  0x8d   :  { %3402 = vmatprep.subr.bf16.mxu0 %v3716_v48  ;;  %v3767_v48 = vld [vmem:[%s4722_s1 + $0x5b8] sm:$0xff]  }
  0x8e   :  { %3423 = vmatpush3.bf16.msra.mxu1 %v3715_v47  ;;  %v3766_v47 = vld [vmem:[%s4722_s1 + $0x538] sm:$0xff]  }
  0x8f   :  { %3424 = vmatprep.subr.bf16.mxu1 %v3717_v49  ;;  %v671_v49 = vrot.slane %v4383_v4, %v3985_v41  ;;  %v3786_v4 = vld [vmem:[%s4722_s1 + $0x6e0] sm:$0xff]  }
  0x90   :  { %3403 = vmatpush3.bf16.msra.mxu0 %v3718_v50  ;;  %v3769_v50 = vld [vmem:[%s4722_s1 + $0x640] sm:$0xff]  }
  0x91   :  { %3404 = vmatprep.subr.bf16.mxu0 %v3720_v52  ;;  %v3771_v52 = vld [vmem:[%s4722_s1 + $0x600] sm:$0xff]  }
  0x92   :  { %3425 = vmatpush3.bf16.msra.mxu1 %v3719_v51  ;;  %v3770_v51 = vld [vmem:[%s4722_s1 + $0x6c0] sm:$0xff]  }
  0x93   :  { %3426 = vmatprep.subr.bf16.mxu1 %v3721_v53  ;;  %v3772_v53 = vld [vmem:[%s4722_s1 + $0x680] sm:$0xff]  }
  0x94   :  { %3405 = vmatpush3.bf16.msra.mxu0 %v3722_v54  ;;  %v687_v54 = vcombine.high %v671_v49, %v671_v49 }
  0x95   :  { %3406 = vmatprep.subr.bf16.mxu0 %v3724_v56  ;;  %v3774_v56 = vld [vmem:[%s4722_s1 + $0x6c8] sm:$0xff]  }
  0x96   :  { %3427 = vmatpush3.bf16.msra.mxu1 %v3723_v55  ;;  %v3773_v55 = vld [vmem:[%s4722_s1 + $0x648] sm:$0xff]  }
  0x97   :  { %3428 = vmatprep.subr.bf16.mxu1 %v3725_v57  ;;  %v3775_v57 = vld [vmem:[%s4722_s1 + $0x608] sm:$0xff]  }
  0x98   :  { %3407 = vmatpush3.bf16.msra.mxu0 %v3726_v58  ;;  %v3776_v58 = vld [vmem:[%s4722_s1 + $0x688] sm:$0xff]  }
  0x99   :  { %3408 = vmatprep.subr.bf16.mxu0 %v3728_v60  ;;  %v3778_v60 = vld [vmem:[%s4722_s1 + $0x6d0] sm:$0xff]  }
  0x9a   :  { %3429 = vmatpush3.bf16.msra.mxu1 %v3727_v59  ;;  %v3777_v59 = vld [vmem:[%s4722_s1 + $0x650] sm:$0xff]  }
  0x9b   :  { %3430 = vmatprep.subr.bf16.mxu1 %v3729_v62  ;;  %v3780_v62 = vld [vmem:[%s4722_s1 + $0x690] sm:$0xff]  }
  0x9c   :  { %3409 = vmatpush3.bf16.msra.mxu0 %v3730_v1  ;;  %v3783_v1 = vld [vmem:[%s4722_s1 + $0x618] sm:$0xff]  }
  0x9d   :  { %3410 = vmatprep.subr.bf16.mxu0 %v3732_v5  ;;  %v3787_v5 = vld [vmem:[%s4722_s1 + $0x620] sm:$0xff]  }
  0x9e   :  { %3431 = vmatpush3.bf16.msra.mxu1 %v3731_v2  ;;  %v3784_v2 = vld [vmem:[%s4722_s1 + $0x698] sm:$0xff]  }
  0x9f   :  { %3432 = vmatprep.subr.bf16.mxu1 %v3733_v6  ;;  %v3788_v6 = vld [vmem:[%s4722_s1 + $0x6a0] sm:$0xff]  }
  0xa0   :  { %3411 = vmatpush3.bf16.msra.mxu0 %v3734_v9  ;;  %v3791_v9 = vld [vmem:[%s4722_s1 + $0x628] sm:$0xff]  }
  0xa1   :  { %3440 = vmatprep.subr.bf16.mxu0 %v3736_v13  ;;  %v3794_v13 = vld [vmem:[%s4722_s1 + $0x6f0] sm:$0xff]  }
  0xa2   :  { %3433 = vmatpush3.bf16.msra.mxu1 %v3735_v10  ;;  %v3792_v10 = vld [vmem:[%s4722_s1 + $0x6a8] sm:$0xff]  }
  0xa3   :  { %2660 = vmatmul.mubr.bf16.vlgmr.msra.gmra.mrb[16].mxu0 %v664_v12  ;;  %3462 = vmatprep.subr.bf16.mxu1 %v3737_v14  ;;  %v19_v12 = vld [vmem:[%s4721_s0 + $0x18] sm:$0xff] }
  0xa4   :  { %3441 = vmatpush3.bf16.msra.mxu0 %v3738_v16  ;;  %2739 = vmatprep.mubr.bf16.mxu0 %v685_v15  ;;  %v697_v14 = vrot.slane %v19_v12, %v3985_v41  ;;  %v690_v15 = vcombine.high %v19_v12, %v19_v12  ;;  %v3795_v16 = vld [vmem:[%s4722_s1 + $0x630] sm:$0xff]  }
  0xa5   :  { %2700 = vmatmul.mubr.bf16.vlgmr.msra.gmra.mrb[16].mxu1 %v686_v18  ;;  %3442 = vmatprep.subr.bf16.mxu0 %v3740_v19 }
  0xa6   :  { %3463 = vmatpush3.bf16.msra.mxu1 %v3739_v17  ;;  %2779 = vmatprep.mubr.bf16.mxu1 %v689_v21  ;;  %v3797_v17 = vld [vmem:[%s4722_s1 + $0x678] sm:$0xff]   ;;  %v705_v18 = vcombine.high %v697_v14, %v697_v14  ;;  %v4589_v19 = vrot.slane %v690_v15, %v3985_v41 }
  0xa7   :  { %3464 = vmatprep.subr.bf16.mxu1 %v3741_v20  ;;  %v3796_v20 = vld [vmem:[%s4722_s1 + $0x6b0] sm:$0xff]   ;;  %v3798_v21 = vld [vmem:[%s4722_s1 + $0x6f8] sm:$0xff]  }
  0xa8   :  { %3443 = vmatpush3.bf16.msra.mxu0 %v3742_v22  ;;  %v727_v22 = vrot.slane %v705_v18, %v3985_v41 }
  0xa9   :  { %3444 = vmatprep.subr.bf16.mxu0 %v3744_v24  ;;  %v3799_v24 = vld [vmem:[%s4722_s1 + $0x638] sm:$0xff]  }
  0xaa   :  { %3465 = vmatpush3.bf16.msra.mxu1 %v3743_v23  ;;  %v706_v23 = vcombine.high %v4589_v19, %v4589_v19 }
  0xab   :  { %3466 = vmatprep.subr.bf16.mxu1 %v3745_v25  ;;  %v737_v25 = vcombine.high %v727_v22, %v727_v22 }
  0xac   :  { %3445 = vmatpush3.bf16.msra.mxu0 %v3746_v26  ;;  %v713_v26 = vrot.slane %v697_v14, %v3985_v41 }
  0xad   :  { %3446 = vmatprep.subr.bf16.mxu0 %v3748_v28  ;;  %v3800_v28 = vld [vmem:[%s4722_s1 + $0x6b8] sm:$0xff]  }
  0xae   :  { %3467 = vmatpush3.bf16.msra.mxu1 %v3747_v27  ;;  %v3801_v27 = vld [vmem:[%s4722_s1 + $0x740] sm:$0xff]  }
  0xaf   :  { %3468 = vmatprep.subr.bf16.mxu1 %v3749_v29  ;;  %v734_v29 = vrot.slane %v706_v23, %v3985_v41 }
  0xb0   :  { %3447 = vmatpush3.bf16.msra.mxu0 %v3750_v30  ;;  %v3802_v30 = vld [vmem:[%s4722_s1 + $0x7c0] sm:$0xff]  }
  0xb1   :  { %3448 = vmatprep.subr.bf16.mxu0 %v3752_v32  ;;  %v735_v32 = vcombine.high %v713_v26, %v713_v26 }
  0xb2   :  { %3469 = vmatpush3.bf16.msra.mxu1 %v3751_v31  ;;  %v3803_v31 = vld [vmem:[%s4722_s1 + $0x700] sm:$0xff]  }
  0xb3   :  { %3470 = vmatprep.subr.bf16.mxu1 %v3753_v33  ;;  %v3805_v33 = vld [vmem:[%s4722_s1 + $0x748] sm:$0xff]  }
  0xb4   :  { %3449 = vmatpush3.bf16.msra.mxu0 %v3754_v34  ;;  %v3804_v34 = vld [vmem:[%s4722_s1 + $0x780] sm:$0xff]  }
  0xb5   :  { %3450 = vmatprep.subr.bf16.mxu0 %v3756_v36  ;;  %v3806_v36 = vld [vmem:[%s4722_s1 + $0x7c8] sm:$0xff]  }
  0xb6   :  { %3471 = vmatpush3.bf16.msra.mxu1 %v3755_v35  ;;  %v738_v35 = vcombine.high %v734_v29, %v734_v29 }
  0xb7   :  { %3472 = vmatprep.subr.bf16.mxu1 %v3757_v37  ;;  %v3807_v37 = vld [vmem:[%s4722_s1 + $0x708] sm:$0xff]  }
  0xb8   :  { %3451 = vmatpush3.bf16.msra.mxu0 %v3758_v38  ;;  %v3809_v38 = vld [vmem:[%s4722_s1 + $0x750] sm:$0xff]  }
  0xb9   :  { %3452 = vmatprep.subr.bf16.mxu0 %v3760_v40  ;;  %v3810_v40 = vld [vmem:[%s4722_s1 + $0x7d0] sm:$0xff]  }
  0xba   :  { %3473 = vmatpush3.bf16.msra.mxu1 %v3759_v39  ;;  %v3808_v39 = vld [vmem:[%s4722_s1 + $0x788] sm:$0xff]  }
  0xbb   :  { %3474 = vmatprep.subr.bf16.mxu1 %v3761_v42  ;;  %v3811_v42 = vld [vmem:[%s4722_s1 + $0x710] sm:$0xff]  }
  0xbc   :  { %3453 = vmatpush3.bf16.msra.mxu0 %v3762_v43  ;;  %v3813_v43 = vld [vmem:[%s4722_s1 + $0x758] sm:$0xff]  }
  0xbd   :  { %3454 = vmatprep.subr.bf16.mxu0 %v3764_v45  ;;  %v3814_v45 = vld [vmem:[%s4722_s1 + $0x7d8] sm:$0xff]  }
  0xbe   :  { %3475 = vmatpush3.bf16.msra.mxu1 %v3763_v44  ;;  %v3812_v44 = vld [vmem:[%s4722_s1 + $0x790] sm:$0xff]  }
  0xbf   :  { %3476 = vmatprep.subr.bf16.mxu1 %v3765_v46  ;;  %v3815_v46 = vld [vmem:[%s4722_s1 + $0x718] sm:$0xff]  }
  0xc0   :  { %3455 = vmatpush3.bf16.msra.mxu0 %v3766_v47  ;;  %v3817_v47 = vld [vmem:[%s4722_s1 + $0x760] sm:$0xff]  }
  0xc1   :  { %3484 = vmatprep.subr.bf16.mxu0 %v3769_v50  ;;  %v3819_v50 = vld [vmem:[%s4722_s1 + $0x720] sm:$0xff]  }
  0xc2   :  { %3477 = vmatpush3.bf16.msra.mxu1 %v3767_v48  ;;  %v3816_v48 = vld [vmem:[%s4722_s1 + $0x798] sm:$0xff]  }
  0xc3   :  { %2740 = vmatmul.mubr.bf16.vlgmr.msra.gmra.mrb[20].mxu0 %v671_v49  ;;  %3506 = vmatprep.subr.bf16.mxu1 %v3770_v51  ;;  %v3818_v49 = vld [vmem:[%s4722_s1 + $0x7e0] sm:$0xff]   ;;  %v3821_v51 = vld [vmem:[%s4722_s1 + $0x768] sm:$0xff]  }
  0xc4   :  { %3485 = vmatpush3.bf16.msra.mxu0 %v3771_v52  ;;  %2819 = vmatprep.mubr.bf16.mxu0 %v727_v22  ;;  %v3820_v52 = vld [vmem:[%s4722_s1 + $0x7a0] sm:$0xff]  }
  0xc5   :  { %2780 = vmatmul.mubr.bf16.vlgmr.msra.gmra.mrb[20].mxu1 %v687_v54  ;;  %3486 = vmatprep.subr.bf16.mxu0 %v3773_v55  ;;  %v3823_v54 = vld [vmem:[%s4722_s1 + $0x728] sm:$0xff]   ;;  %v3825_v55 = vld [vmem:[%s4722_s1 + $0x770] sm:$0xff]  }
  0xc6   :  { %3507 = vmatpush3.bf16.msra.mxu1 %v3772_v53  ;;  %2859 = vmatprep.mubr.bf16.mxu1 %v737_v25  ;;  %v3822_v53 = vld [vmem:[%s4722_s1 + $0x7e8] sm:$0xff]  }
  0xc7   :  { %3508 = vmatprep.subr.bf16.mxu1 %v3774_v56 }
  0xc8   :  { %3487 = vmatpush3.bf16.msra.mxu0 %v3775_v57  ;;  %v3824_v57 = vld [vmem:[%s4722_s1 + $0x7a8] sm:$0xff]  }
  0xc9   :  { %3488 = vmatprep.subr.bf16.mxu0 %v3777_v59 }
  0xca   :  { %3509 = vmatpush3.bf16.msra.mxu1 %v3776_v58 }
  0xcb   :  { %3510 = vmatprep.subr.bf16.mxu1 %v3778_v60 }
  0xcc   :  { %3489 = vmatpush3.bf16.msra.mxu0 %v3779_v61 }
  0xcd   :  { %3490 = vmatprep.subr.bf16.mxu0 %v3781_v63 }
  0xce   :  { %3511 = vmatpush3.bf16.msra.mxu1 %v3780_v62 }
  0xcf   :  { %3512 = vmatprep.subr.bf16.mxu1 %v3782_v0 }
  0xd0   :  { %3491 = vmatpush3.bf16.msra.mxu0 %v3783_v1 }
  0xd1   :  { %3492 = vmatprep.subr.bf16.mxu0 %v3785_v3 }
  0xd2   :  { %3513 = vmatpush3.bf16.msra.mxu1 %v3784_v2 }
  0xd3   :  { %3514 = vmatprep.subr.bf16.mxu1 %v3786_v4 }
  0xd4   :  { %3493 = vmatpush3.bf16.msra.mxu0 %v3787_v5 }
  0xd5   :  { %3494 = vmatprep.subr.bf16.mxu0 %v3789_v7 }
  0xd6   :  { %3515 = vmatpush3.bf16.msra.mxu1 %v3788_v6 }
  0xd7   :  { %3516 = vmatprep.subr.bf16.mxu1 %v3790_v8 }
  0xd8   :  { %3495 = vmatpush3.bf16.msra.mxu0 %v3791_v9 }
  0xd9   :  { %3496 = vmatprep.subr.bf16.mxu0 %v3793_v11 }
  0xda   :  { %3517 = vmatpush3.bf16.msra.mxu1 %v3792_v10 }
  0xdb   :  { %3518 = vmatprep.subr.bf16.mxu1 %v3794_v13 }
  0xdc   :  { %3497 = vmatpush3.bf16.msra.mxu0 %v3795_v16 }
  0xdd   :  { %3498 = vmatprep.subr.bf16.mxu0 %v3797_v17 }
  0xde   :  { %3519 = vmatpush3.bf16.msra.mxu1 %v3796_v20 }
  0xdf   :  { %3520 = vmatprep.subr.bf16.mxu1 %v3798_v21 }
  0xe0   :  { %3499 = vmatpush3.bf16.msra.mxu0 %v3799_v24 }
  0xe1   :  { %3528 = vmatprep.subr.bf16.mxu0 %v3801_v27 }
  0xe2   :  { %3521 = vmatpush3.bf16.msra.mxu1 %v3800_v28 }
  0xe3   :  { %2820 = vmatmul.mubr.bf16.vlgmr.msra.gmra.mrb[24].mxu0 %v713_v26  ;;  %3550 = vmatprep.subr.bf16.mxu1 %v3802_v30 }
  0xe4   :  { %3529 = vmatpush3.bf16.msra.mxu0 %v3803_v31  ;;  %2899 = vmatprep.mubr.bf16.mxu0 %v734_v29 }
  0xe5   :  { %2860 = vmatmul.mubr.bf16.vlgmr.msra.gmra.mrb[24].mxu1 %v735_v32  ;;  %3530 = vmatprep.subr.bf16.mxu0 %v3805_v33 }
  0xe6   :  { %3551 = vmatpush3.bf16.msra.mxu1 %v3804_v34  ;;  %2939 = vmatprep.mubr.bf16.mxu1 %v738_v35 }
  0xe7   :  { %3552 = vmatprep.subr.bf16.mxu1 %v3806_v36 }
  0xe8   :  { %3531 = vmatpush3.bf16.msra.mxu0 %v3807_v37 }
  0xe9   :  { %3532 = vmatprep.subr.bf16.mxu0 %v3809_v38 }
  0xea   :  { %3553 = vmatpush3.bf16.msra.mxu1 %v3808_v39 }
  0xeb   :  { %3554 = vmatprep.subr.bf16.mxu1 %v3810_v40 }
  0xec   :  { %3533 = vmatpush3.bf16.msra.mxu0 %v3811_v42 }
  0xed   :  { %3534 = vmatprep.subr.bf16.mxu0 %v3813_v43 }
  0xee   :  { %3555 = vmatpush3.bf16.msra.mxu1 %v3812_v44 }
  0xef   :  { %3556 = vmatprep.subr.bf16.mxu1 %v3814_v45 }
  0xf0   :  { %3535 = vmatpush3.bf16.msra.mxu0 %v3815_v46 }
  0xf1   :  { %3536 = vmatprep.subr.bf16.mxu0 %v3817_v47 }
  0xf2   :  { %3557 = vmatpush3.bf16.msra.mxu1 %v3816_v48 }
  0xf3   :  { %3558 = vmatprep.subr.bf16.mxu1 %v3818_v49 }
  0xf4   :  { %3537 = vmatpush3.bf16.msra.mxu0 %v3819_v50 }
  0xf5   :  { %3538 = vmatprep.subr.bf16.mxu0 %v3821_v51 }
  0xf6   :  { %3559 = vmatpush3.bf16.msra.mxu1 %v3820_v52  ;;  %v3236_v56 = vpop.f32.mrb[0].mxu0 }
  0xf7   :  { %8 = vsyncpa [#allocation3], 0  ;;  %v2963_v58 = vld [vmem:[%s4723_s2] ss:$0 sm:$0xff]  ;;  %v3237_v59 = vpop.f32.mrb[1].mxu0  ;;  %3560 = vmatprep.subr.bf16.mxu1 %v3822_v53  ;;  %v3826_v60 = vld [vmem:[%s4722_s1 + $0x7f0] sm:$0xff]   ;;  %v720_v12 = vrot.slane %v4589_v19, %v3985_v41 }
  0xf8   :  { %v3258_v61 = vpop.f32.mrb[0].mxu1  ;;  %v3238_v62 = vadd.f32 %v3237_v59, %v3236_v56  ;;  %v3239_v63 = vpop.f32.mrb[2].mxu0  ;;  %3539 = vmatpush3.bf16.msra.mxu0 %v3823_v54  ;;  %v3827_v0 = vld [vmem:[%s4722_s1 + $0x730] sm:$0xff]   ;;  %v3829_v3 = vld [vmem:[%s4722_s1 + $0x778] sm:$0xff]   ;;  %vm2947_vm0 = vcmask 58368  }
  0xf9   :  { %v3259_v1 = vpop.f32.mrb[1].mxu1  ;;  %v3240_v2 = vpop.f32.mrb[3].mxu0  ;;  %3540 = vmatprep.subr.bf16.mxu0 %v3825_v55  ;;  %v3828_v7 = vld [vmem:[%s4722_s1 + $0x7b0] sm:$0xff]   ;;  %v3830_v9 = vld [vmem:[%s4722_s1 + $0x7f8] sm:$0xff]   ;;  %v736_v14 = vcombine.high %v720_v12, %v720_v12 }
  0xfa   :  { %v2342_v4 = vadd.f32 %v3238_v62, %v2963_v58  ;;  %v3260_v5 = vadd.f32 %v3259_v1, %v3258_v61  ;;  %v3261_v6 = vpop.f32.mrb[2].mxu1  ;;  %3561 = vmatpush3.bf16.msra.mxu1 %v3824_v57  ;;  %v3831_v11 = vld [vmem:[%s4722_s1 + $0x738] sm:$0xff]  }
  0xfb   :  { %v3262_v8 = vpop.f32.mrb[3].mxu1  ;;  %3562 = vmatprep.subr.bf16.mxu1 %v3826_v60  ;;  %v3832_v13 = vld [vmem:[%s4722_s1 + $0x7b8] sm:$0xff]   ;;  %s3859_s1 = smov [#allocation2]  }
  0xfc   :  { %v2382_v10 = vadd.f32 %v3260_v5, %v2342_v4  ;;  %3541 = vmatpush3.bf16.msra.mxu0 %v3827_v0  ;;  %s2955_s17 = sshll.u32 %s3859_s1, 4  ;;  %s2956_s17 = int_to_ptr.vmem [resolvable:$true] %s2955_s17 }
  0xfd   :  { %3542 = vmatprep.subr.bf16.mxu0 %v3829_v3  ;;  %s3834_s18 = scalar_lea.vmem %s2956_s17, 32  ;;  %p3839_p1 = scmp.lt.s32.totalorder %s2956_s17, %s2956_s17 }
  0xfe   :  { %3563 = vmatpush3.bf16.msra.mxu1 %v3828_v7  ;;  %p3835_p0 = scmp.ne.s32.totalorder %s2956_s17, %s3834_s18  ;;  %p3840_p2 = scmp.lt.s32.totalorder %s3834_s18, %s3834_s18 }
  0xff   :  { %3564 = vmatprep.subr.bf16.mxu1 %v3830_v9 }
 0x100   :  { %3543 = vmatpush3.bf16.msra.mxu0 %v3831_v11  ;;  %p3841_p3 = por %p3840_p2, %p3839_p1 }
 0x102   :  { %3565 = vmatpush3.bf16.msra.mxu1 %v3832_v13  ;;  %p3842_p4 = pnand %p3841_p3, %p3835_p0 }
 0x103   :  { %2900 = vmatmul.mubr.bf16.vlgmr.msra.gmra.mrb[28].mxu0 %v720_v12 }
 0x105   :  { %2940 = vmatmul.mubr.bf16.vlgmr.msra.gmra.mrb[28].mxu1 %v736_v14 }
 0x116   :  { %v3280_v15 = vpop.f32.mrb[4].mxu0 }
 0x117   :  { %v3281_v16 = vpop.f32.mrb[5].mxu0  ;;  %v3302_v17 = vpop.f32.mrb[4].mxu1 }
 0x118   :  { %v3282_v18 = vadd.f32 %v3281_v16, %v3280_v15  ;;  %v3283_v20 = vpop.f32.mrb[6].mxu0  ;;  %v3303_v21 = vpop.f32.mrb[5].mxu1 }
 0x119   :  { %v3284_v22 = vpop.f32.mrb[7].mxu0  ;;  %v3304_v41 = vadd.f32 %v3303_v21, %v3302_v17  ;;  %v3305_v19 = vpop.f32.mrb[6].mxu1 }
 0x11a   :  { %v2422_v23 = vadd.f32 %v3282_v18, %v2382_v10  ;;  %v3306_v24 = vpop.f32.mrb[7].mxu1 }
 0x11c   :  { %v2462_v25 = vadd.f32 %v3304_v41, %v2422_v23 }
 0x136   :  { %v3324_v26 = vpop.f32.mrb[8].mxu0 }
 0x137   :  { %v3325_v27 = vpop.f32.mrb[9].mxu0 }
 0x138   :  { %v3346_v28 = vpop.f32.mrb[8].mxu1  ;;  %v3326_v29 = vadd.f32 %v3325_v27, %v3324_v26  ;;  %v3327_v30 = vpop.f32.mrb[10].mxu0 }
 0x139   :  { %v3347_v31 = vpop.f32.mrb[9].mxu1  ;;  %v3328_v32 = vpop.f32.mrb[11].mxu0 }
 0x13a   :  { %v2502_v33 = vadd.f32 %v3326_v29, %v2462_v25  ;;  %v3348_v34 = vadd.f32 %v3347_v31, %v3346_v28  ;;  %v3349_v35 = vpop.f32.mrb[10].mxu1 }
 0x13b   :  { %v3350_v36 = vpop.f32.mrb[11].mxu1 }
 0x13c   :  { %v2542_v37 = vadd.f32 %v3348_v34, %v2502_v33 }
 0x156   :  { %v3368_v38 = vpop.f32.mrb[12].mxu0 }
 0x157   :  { %v3369_v39 = vpop.f32.mrb[13].mxu0 }
 0x158   :  { %v3390_v40 = vpop.f32.mrb[12].mxu1  ;;  %v3370_v42 = vadd.f32 %v3369_v39, %v3368_v38  ;;  %v3371_v43 = vpop.f32.mrb[14].mxu0 }
 0x159   :  { %v3391_v44 = vpop.f32.mrb[13].mxu1  ;;  %v3372_v45 = vpop.f32.mrb[15].mxu0 }
 0x15a   :  { %v2582_v46 = vadd.f32 %v3370_v42, %v2542_v37  ;;  %v3392_v47 = vadd.f32 %v3391_v44, %v3390_v40  ;;  %v3393_v48 = vpop.f32.mrb[14].mxu1 }
 0x15b   :  { %v3394_v49 = vpop.f32.mrb[15].mxu1 }
 0x15c   :  { %v2622_v50 = vadd.f32 %v3392_v47, %v2582_v46 }
 0x176   :  { %v3412_v51 = vpop.f32.mrb[16].mxu0 }
 0x177   :  { %v3413_v52 = vpop.f32.mrb[17].mxu0 }
 0x178   :  { %v3434_v53 = vpop.f32.mrb[16].mxu1  ;;  %v3414_v54 = vadd.f32 %v3413_v52, %v3412_v51  ;;  %v3415_v55 = vpop.f32.mrb[18].mxu0 }
 0x179   :  { %v3435_v56 = vpop.f32.mrb[17].mxu1  ;;  %v3416_v57 = vpop.f32.mrb[19].mxu0 }
 0x17a   :  { %v2662_v58 = vadd.f32 %v3414_v54, %v2622_v50  ;;  %v3436_v59 = vadd.f32 %v3435_v56, %v3434_v53  ;;  %v3437_v60 = vpop.f32.mrb[18].mxu1 }
 0x17b   :  { %v3438_v61 = vpop.f32.mrb[19].mxu1 }
 0x17c   :  { %v2702_v62 = vadd.f32 %v3436_v59, %v2662_v58 }
 0x196   :  { %v3456_v63 = vpop.f32.mrb[20].mxu0 }
 0x197   :  { %v3457_v0 = vpop.f32.mrb[21].mxu0 }
 0x198   :  { %v3478_v1 = vpop.f32.mrb[20].mxu1  ;;  %v3458_v2 = vadd.f32 %v3457_v0, %v3456_v63  ;;  %v3459_v3 = vpop.f32.mrb[22].mxu0 }
 0x199   :  { %v3479_v4 = vpop.f32.mrb[21].mxu1  ;;  %v3460_v5 = vpop.f32.mrb[23].mxu0 }
 0x19a   :  { %v2742_v6 = vadd.f32 %v3458_v2, %v2702_v62  ;;  %v3480_v7 = vadd.f32 %v3479_v4, %v3478_v1  ;;  %v3481_v8 = vpop.f32.mrb[22].mxu1 }
 0x19b   :  { %v3482_v9 = vpop.f32.mrb[23].mxu1 }
 0x19c   :  { %v2782_v10 = vadd.f32 %v3480_v7, %v2742_v6 }
 0x1b6   :  { %v3500_v11 = vpop.f32.mrb[24].mxu0 }
 0x1b7   :  { %v3501_v12 = vpop.f32.mrb[25].mxu0 }
 0x1b8   :  { %v3522_v13 = vpop.f32.mrb[24].mxu1  ;;  %v3502_v14 = vadd.f32 %v3501_v12, %v3500_v11  ;;  %v3503_v15 = vpop.f32.mrb[26].mxu0 }
 0x1b9   :  { %v3523_v16 = vpop.f32.mrb[25].mxu1  ;;  %v3504_v17 = vpop.f32.mrb[27].mxu0 }
 0x1ba   :  { %v2822_v18 = vadd.f32 %v3502_v14, %v2782_v10  ;;  %v3524_v20 = vadd.f32 %v3523_v16, %v3522_v13  ;;  %v3525_v21 = vpop.f32.mrb[26].mxu1 }
 0x1bb   :  { %v3526_v22 = vpop.f32.mrb[27].mxu1 }
 0x1bc   :  { %v2862_v23 = vadd.f32 %v3524_v20, %v2822_v18 }
 0x1d6   :  { %v3544_v41 = vpop.f32.mrb[28].mxu0 }
 0x1d7   :  { %v3545_v19 = vpop.f32.mrb[29].mxu0 }
 0x1d8   :  { %v3566_v24 = vpop.f32.mrb[28].mxu1  ;;  %v3546_v25 = vadd.f32 %v3545_v19, %v3544_v41  ;;  %v3547_v26 = vpop.f32.mrb[30].mxu0 }
 0x1d9   :  { %v3567_v27 = vpop.f32.mrb[29].mxu1  ;;  %v3548_v28 = vpop.f32.mrb[31].mxu0 }
 0x1da   :  { %v2902_v29 = vadd.f32 %v3546_v25, %v2862_v23  ;;  %v3568_v30 = vadd.f32 %v3567_v27, %v3566_v24  ;;  %v3569_v31 = vpop.f32.mrb[30].mxu1 }
 0x1db   :  { %v3570_v32 = vpop.f32.mrb[31].mxu1 }
 0x1dc   :  { %v2942_v33 = vadd.f32 %v3568_v30, %v2902_v29 }
 0x1de   :  { %2948 = vst.msk [vmem:[#allocation2] sm:$0x3] %vm2947_vm0, %v2942_v33 }
 0x1df   :  { %3845 = shalt.err (!%p3842_p4)
}
 0x1e0   :  { %s3846_s21 = scalar_lea.hbm %s4724_s3, 32 }
 0x1e1   :  { %p3847_p5 = scmp.ne.s32.totalorder %s4724_s3, %s3846_s21  ;;  %p3850_p6 = scmp.lt.u32.totalorder %s3846_s21, %s4724_s3 }
 0x1e3   :  { %p3852_p7 = pnand %p3850_p6, %p3847_p5 }
 0x1e5   :  { %3855 = shalt.err (!%p3852_p7)
}
 0x1e6   :  { %2958 = dma.vmem_to_hbm [thread:$0]  %s2956_s17, 32, %s4724_s3, [#allocation3]  }
 0x1e7   :  { %3856 = dma.done.wait [#allocation3], 32  }
 0x1e8   :  { %3857 = vsyncadd [#allocation3], 4294967264 }
 0x1e9   :  { %2962 = vsyncpa [#allocation3], 1 }

</bundles_post_ra>
